<compile_context>
chip_gen: v5e
topology: v5e:2x2
jax: 0.10.0
libtpu: 0.0.40
codegen_flags: <defaults>
</compile_context>

<pallas_src>
import jax
import jax.numpy as jnp
from jax.experimental import pallas as pl
from jax.experimental.pallas import tpu as pltpu


def vfe_kernel(x_ref, mask_ref, w_ref, p_ref, out_ref):
    # x_ref    : (tile_v, T, Cin)  bf16 voxel tile
    # mask_ref : (tile_v, T)       f32 point-validity mask (0/1)
    # w_ref    : (Cin, C)          bf16 Linear weight, transposed to (in, out)
    # p_ref    : (8, C)            f32 packed params: row0=bias, row1=BN scale, row2=BN shift
    # out_ref  : (tile_v, T, 2C)   bf16 pointwise features ++ voxel-aggregated max
    blk_v, T, cin = x_ref.shape
    c = w_ref.shape[1]

    # --- fcn: one big 2-D MXU matmul over every point in the tile (hot path) ---
    x2 = x_ref[...].reshape(blk_v * T, cin)        # layout-free leading-dim collapse
    h = jnp.dot(x2, w_ref[...], preferred_element_type=jnp.float32)

    bias = p_ref[0:1, :]                           # static row slices of the packed params
    scale = p_ref[1:2, :]
    shift = p_ref[2:3, :]
    h = jnp.maximum(h + bias, 0.0)                 # Linear bias + ReLU   (f32 epilogue)
    h = h * scale + shift                          # folded eval-mode BatchNorm1d

    # --- per-voxel max over the points axis, then concat pointwise ++ aggregated ---
    h3 = h.reshape(blk_v, T, c)                    # layout-free leading-dim split (T % 8 == 0)
    agg = jnp.max(h3, axis=1, keepdims=True)       # (tile_v, 1, C)  (includes padded points,
    rep = jnp.broadcast_to(agg, (blk_v, T, c))     #  exactly like the PyTorch module)
    out = jnp.concatenate([h3, rep], axis=2)       # (tile_v, T, 2C); 2C == 128 lanes here

    # --- mask invalid points (applied after concat, as in the module) ---
    m = mask_ref[...][:, :, None]                  # (tile_v, T) -> (tile_v, T, 1)
    out_ref[...] = (out * m).astype(out_ref.dtype) # single unmasked 128-lane dense store


def _pick_tile_v(V, requested=None):
    """Choose a voxel tile: multiple of 8 dividing V, preferring >= 8 grid steps."""
    cands = [c for c in range(8, V + 1, 8) if V % c == 0]
    if not cands:
        raise ValueError("V must be a multiple of 8 (pad voxels in the caller)")
    if requested is not None and requested in cands:
        return requested
    good = [c for c in cands if V // c >= 8 and c <= 512]   # >= 4 steps per v7x core
    if good:
        return max(good)
    small = [c for c in cands if c <= 512]
    return max(small) if small else min(cands)


def _vmem_estimate_bytes(tile_v, T, Cin, C):
    """Double-buffered VMEM footprint of one grid step (padded to (8,128) tiles)."""
    pad = lambda n, m: ((n + m - 1) // m) * m
    x_tile = tile_v * pad(T, 8) * pad(Cin, 128) * 2        # bf16
    out_tile = tile_v * pad(T, 8) * pad(2 * C, 128) * 2    # bf16
    mask_tile = pad(tile_v, 8) * pad(T, 128) * 4            # f32
    w_tile = pad(Cin, 8) * pad(C, 128) * 2                  # bf16
    p_tile = 8 * pad(C, 128) * 4                            # f32
    dbuf = 2 * (x_tile + out_tile + mask_tile + w_tile + p_tile)
    # in-kernel f32 intermediates (h, pre-cast output), conservative
    interm = 2 * tile_v * pad(T, 8) * pad(2 * C, 128) * 4
    return dbuf + interm


def vfe_layer(x, mask, weight_t, bias, gamma, beta, running_mean, running_var,
              *, tile_v=None, eps=1e-5, out_dtype=jnp.bfloat16):
    """VoxelNet VFELayer forward pass.

    x        : (V, T, Cin) float (cast to bf16 for the MXU matmul)
    mask     : (V, T) or (V, T, 1), bool or float
    weight_t : (Cin, C)   nn.Linear weight transposed (C = cout // 2)
    bias     : (C,)
    gamma, beta, running_mean, running_var : (C,)   BatchNorm1d parameters / stats
    returns  : (V, T, 2C) in `out_dtype` (bf16 by default: halves the dominant HBM stream)
    """
    V, T, Cin = x.shape
    C = weight_t.shape[1]
    assert T % 8 == 0, "points-per-voxel must be a multiple of 8 (pad in the caller)"
    tile_v = _pick_tile_v(V, tile_v)

    # Fold eval-mode BatchNorm1d (running stats) into one scale & shift, and pack
    # bias/scale/shift into a single (8, C) parameter block (one resident DMA stream).
    inv_std = jax.lax.rsqrt(running_var.astype(jnp.float32) + eps)
    scale = (gamma * inv_std).astype(jnp.float32)
    shift = (beta - running_mean * gamma * inv_std).astype(jnp.float32)
    params = jnp.zeros((8, C), jnp.float32)
    params = params.at[0].set(bias.astype(jnp.float32))
    params = params.at[1].set(scale)
    params = params.at[2].set(shift)

    x_bf16 = x.astype(jnp.bfloat16)
    w_bf16 = weight_t.astype(jnp.bfloat16)
    mask2 = mask.reshape(V, T).astype(jnp.float32)   # drop trailing size-1 dim

    # VMEM limit: real footprint + headroom, never the full physical VMEM (v7x: 64 MiB).
    est = _vmem_estimate_bytes(tile_v, T, Cin, C)
    vmem_limit = int(min(max(2 * est, 16 * 1024 * 1024), 40 * 1024 * 1024))

    # NOTE: if xprof ever shows exposed DMA gaps between grid steps, add
    # pipeline_mode=pl.Buffered(3) to the x / out BlockSpecs (skip on v7x if it
    # pushes the footprint past ~half of the 64 MiB VMEM).
    return pl.pallas_call(
        vfe_kernel,
        out_shape=jax.ShapeDtypeStruct((V, T, 2 * C), out_dtype),
        grid=(V // tile_v,),
        in_specs=[
            pl.BlockSpec((tile_v, T, Cin), lambda i: (i, 0, 0)),    # x tile (bf16)
            pl.BlockSpec((tile_v, T), lambda i: (i, 0)),            # mask tile (f32)
            pl.BlockSpec((Cin, C), lambda i: (0, 0)),               # W (resident, bf16)
            pl.BlockSpec((8, C), lambda i: (0, 0)),                 # packed bias/scale/shift
        ],
        out_specs=pl.BlockSpec((tile_v, T, 2 * C), lambda i: (i, 0, 0)),
        compiler_params=pltpu.CompilerParams(
            dimension_semantics=("parallel",),
            vmem_limit_bytes=vmem_limit,
        ),
    )(x_bf16, mask2, w_bf16, params)


def vfe_reference(x, mask, weight_t, bias, gamma, beta, running_mean, running_var,
                  eps=1e-5):
    """Plain-JAX reference mirroring the PyTorch forward (eval-mode BN).

    Matmul operands are rounded to bf16 (matching the kernel's MXU precision); the
    epilogue is f32.
    """
    xb = x.astype(jnp.bfloat16).astype(jnp.float32)
    wb = weight_t.astype(jnp.bfloat16).astype(jnp.float32)
    h = jnp.einsum("vtc,cd->vtd", xb, wb,
                   precision=jax.lax.Precision.HIGHEST) + bias
    h = jnp.maximum(h, 0.0)                                              # fcn
    h = (h - running_mean) * jax.lax.rsqrt(running_var + eps) * gamma + beta  # bn
    agg = jnp.max(h, axis=1, keepdims=True)
    concat = jnp.concatenate([h, jnp.broadcast_to(agg, h.shape)], axis=2)
    V, T, _ = x.shape
    return concat * mask.reshape(V, T, 1).astype(jnp.float32)


if __name__ == "__main__":
    # Canonical VoxelNet second VFE layer: cin=32, cout=128 (local_agg_features = 64),
    # T = cfg.OBJECT.POINTS_PER_VOXEL (32 here), V voxels (small demo size).
    V, T, CIN, COUT = 512, 32, 32, 128
    C = COUT // 2

    key = jax.random.PRNGKey(0)
    kx, km, kw, kb, kg, kbt, krm, krv = jax.random.split(key, 8)

    x = jax.random.normal(kx, (V, T, CIN), dtype=jnp.float32)
    mask = jax.random.uniform(km, (V, T, 1)) > 0.3          # bool point-validity mask

    bound = 1.0 / (CIN ** 0.5)
    weight_t = jax.random.uniform(kw, (CIN, C), minval=-bound, maxval=bound,
                                  dtype=jnp.float32)         # Linear weight (transposed)
    bias = jax.random.uniform(kb, (C,), minval=-bound, maxval=bound, dtype=jnp.float32)
    gamma = jax.random.uniform(kg, (C,), minval=0.5, maxval=1.5, dtype=jnp.float32)
    beta = 0.1 * jax.random.normal(kbt, (C,), dtype=jnp.float32)
    running_mean = 0.1 * jax.random.normal(krm, (C,), dtype=jnp.float32)
    running_var = jax.random.uniform(krv, (C,), minval=0.5, maxval=1.5, dtype=jnp.float32)

    out = vfe_layer(x, mask, weight_t, bias, gamma, beta, running_mean, running_var)
    out = jax.block_until_ready(out)

    ref = vfe_reference(x, mask, weight_t, bias, gamma, beta, running_mean, running_var)
    assert out.shape == (V, T, COUT)
    assert out.dtype == jnp.bfloat16
    err = float(jnp.max(jnp.abs(out.astype(jnp.float32) - ref)))
    # bf16 output quantization (~2^-8 relative) + MXU accumulation-order differences.
    assert jnp.allclose(out.astype(jnp.float32), ref, atol=3e-2, rtol=3e-2), (
        f"mismatch vs reference: max abs err = {err}")

    print("KERNEL_OK")
</pallas_src>

<mosaic_0001>
module attributes {stable_mosaic.version = 11 : i64} {
  func.func @vfe_kernel(%arg0: i32, %arg1: memref<64x32x32xbf16, #tpu.memory_space<vmem>>, %arg2: memref<64x32xf32, #tpu.memory_space<vmem>>, %arg3: memref<32x64xbf16, #tpu.memory_space<vmem>>, %arg4: memref<8x64xf32, #tpu.memory_space<vmem>>, %arg5: memref<64x32x128xbf16, #tpu.memory_space<vmem>>) attributes {dimension_semantics = [#tpu.dimension_semantics<parallel>], iteration_bounds = array<i64: 8>, scalar_prefetch = 0 : i64, scratch_operands = 0 : i64, tpu.core_type = #tpu.core_type<tc>, window_params = [{transform_indices = @transform_0, window_bounds = array<i64: 64, 32, 32>}, {transform_indices = @transform_1, window_bounds = array<i64: 64, 32>}, {pipeline_mode = #tpu.pipeline_mode<synchronous>, transform_indices = @transform_2, window_bounds = array<i64: 32, 64>}, {pipeline_mode = #tpu.pipeline_mode<synchronous>, transform_indices = @transform_3, window_bounds = array<i64: 8, 64>}, {transform_indices = @transform_4, window_bounds = array<i64: 64, 32, 128>}]} {
    %c0 = arith.constant 0 : index
    %c0_0 = arith.constant 0 : index
    %c0_1 = arith.constant 0 : index
    %0 = vector.load %arg1[%c0, %c0_0, %c0_1] : memref<64x32x32xbf16, #tpu.memory_space<vmem>>, vector<64x32x32xbf16>
    %1 = vector.shape_cast %0 : vector<64x32x32xbf16> to vector<2048x32xbf16>
    %c0_2 = arith.constant 0 : index
    %c0_3 = arith.constant 0 : index
    %2 = vector.load %arg3[%c0_2, %c0_3] : memref<32x64xbf16, #tpu.memory_space<vmem>>, vector<32x64xbf16>
    %cst = arith.constant dense<0.000000e+00> : vector<2048x64xf32>
    %3 = tpu.matmul %1, %2, %cst {dimension_numbers = #tpu.dot_dimension_numbers<[1], [0], [0], [1], [0, 0, 1, 1], [], []>} : vector<2048x32xbf16>, vector<32x64xbf16>, vector<2048x64xf32> -> vector<2048x64xf32>
    %c0_4 = arith.constant 0 : index
    %c0_5 = arith.constant 0 : index
    %4 = vector.load %arg4[%c0_4, %c0_5] : memref<8x64xf32, #tpu.memory_space<vmem>>, vector<1x64xf32>
    %c1 = arith.constant 1 : index
    %c0_6 = arith.constant 0 : index
    %5 = vector.load %arg4[%c1, %c0_6] : memref<8x64xf32, #tpu.memory_space<vmem>>, vector<1x64xf32>
    %c2 = arith.constant 2 : index
    %c0_7 = arith.constant 0 : index
    %6 = vector.load %arg4[%c2, %c0_7] : memref<8x64xf32, #tpu.memory_space<vmem>>, vector<1x64xf32>
    %7 = vector.broadcast %4 : vector<1x64xf32> to vector<2048x64xf32>
    %8 = arith.addf %3, %7 : vector<2048x64xf32>
    %cst_8 = arith.constant 0.000000e+00 : f32
    %9 = vector.broadcast %cst_8 : f32 to vector<2048x64xf32>
    %10 = arith.maximumf %8, %9 : vector<2048x64xf32>
    %11 = vector.broadcast %5 : vector<1x64xf32> to vector<2048x64xf32>
    %12 = arith.mulf %10, %11 : vector<2048x64xf32>
    %13 = vector.broadcast %6 : vector<1x64xf32> to vector<2048x64xf32>
    %14 = arith.addf %12, %13 : vector<2048x64xf32>
    %15 = vector.shape_cast %14 : vector<2048x64xf32> to vector<64x32x64xf32>
    %cst_9 = arith.constant dense<0xFF800000> : vector<64x64xf32>
    %16 = vector.multi_reduction <maximumf>, %15, %cst_9 [1] : vector<64x32x64xf32> to vector<64x64xf32>
    %17 = vector.shape_cast %16 : vector<64x64xf32> to vector<64x1x64xf32>
    %18 = vector.shape_cast %17 : vector<64x1x64xf32> to vector<64x1x64xf32>
    %19 = vector.broadcast %18 : vector<64x1x64xf32> to vector<64x32x64xf32>
    %20 = tpu.concatenate %15, %19 in 2 : vector<64x32x64xf32>, vector<64x32x64xf32> -> vector<64x32x128xf32>
    %c0_10 = arith.constant 0 : index
    %c0_11 = arith.constant 0 : index
    %21 = vector.load %arg2[%c0_10, %c0_11] : memref<64x32xf32, #tpu.memory_space<vmem>>, vector<64x32xf32>
    %22 = vector.shape_cast %21 : vector<64x32xf32> to vector<64x32x1xf32>
    %23 = vector.broadcast %22 : vector<64x32x1xf32> to vector<64x32x128xf32>
    %24 = arith.mulf %20, %23 : vector<64x32x128xf32>
    %25 = arith.truncf %24 : vector<64x32x128xf32> to vector<64x32x128xbf16>
    %c0_12 = arith.constant 0 : index
    %c0_13 = arith.constant 0 : index
    %c0_14 = arith.constant 0 : index
    %26 = vector.load %arg5[%c0_12, %c0_13, %c0_14] : memref<64x32x128xbf16, #tpu.memory_space<vmem>>, vector<64x32x128xbf16>
    tpu.vector_store %arg5[%c0_12, %c0_13, %c0_14], %25 {strides = array<i32>} : memref<64x32x128xbf16, #tpu.memory_space<vmem>>, vector<64x32x128xbf16>,
    return
  }
  func.func @transform_0(%arg0: i32) -> (i32, i32, i32) {
    %c0_i32 = arith.constant 0 : i32
    %c0_i32_0 = arith.constant 0 : i32
    %c0_i32_1 = arith.constant 0 : i32
    return %arg0, %c0_i32, %c0_i32_0 : i32, i32, i32
  }
  func.func @transform_1(%arg0: i32) -> (i32, i32) {
    %c0_i32 = arith.constant 0 : i32
    %c0_i32_0 = arith.constant 0 : i32
    return %arg0, %c0_i32 : i32, i32
  }
  func.func @transform_2(%arg0: i32) -> (i32, i32) {
    %c0_i32 = arith.constant 0 : i32
    %c0_i32_0 = arith.constant 0 : i32
    %c0_i32_1 = arith.constant 0 : i32
    return %c0_i32, %c0_i32_0 : i32, i32
  }
  func.func @transform_3(%arg0: i32) -> (i32, i32) {
    %c0_i32 = arith.constant 0 : i32
    %c0_i32_0 = arith.constant 0 : i32
    %c0_i32_1 = arith.constant 0 : i32
    return %c0_i32, %c0_i32_0 : i32, i32
  }
  func.func @transform_4(%arg0: i32) -> (i32, i32, i32) {
    %c0_i32 = arith.constant 0 : i32
    %c0_i32_0 = arith.constant 0 : i32
    %c0_i32_1 = arith.constant 0 : i32
    return %arg0, %c0_i32, %c0_i32_0 : i32, i32, i32
  }
}

</mosaic_0001>

<bundles_post_ra>
// kernel: tpu_custom_call.1
= control target key start
LH: loop header
LB: loop body
LE: loop exit
PB: predicated region body
PF: predicated region fallthrough
CT: control target
= control target key end

     0   :  { %9 = vsyncpa [#allocation3], 0  ;;  %s13485_s0 = inlined_call_operand.vmem [shape: bf16[512,32,32], index: 0, kind: input, shape index: {}]   ;;  %s13486_s1 = inlined_call_operand.vmem [shape: f32[512,32], index: 1, kind: input, shape index: {}]   ;;  %s13487_s2 = inlined_call_operand.vmem [shape: bf16[32,64], index: 2, kind: input, shape index: {}]   ;;  %s13488_s3 = inlined_call_operand.vmem [shape: f32[8,64], index: 3, kind: input, shape index: {}]   ;;  %s13489_s4 = inlined_call_operand.hbm [shape: bf16[512,32,128], index: 4, kind: output, shape index: {}]  }
   0x1   :  { %11 = vsyncpa [#allocation3 + $0x1], 0  ;;  %s8702_s15 = smov 0   ;;  %s8704_s16 = smov 0  }
   0x2   :  { %s8706_s17 = smov 0   ;;  %s8708_s18 = smov 0  }
   0x3 LB: > { %s8723_s19 = sadd.s32 4294967295, %s8673_s18   ;;  %s6757_s20 = sadd.s32 4294967294, %s8673_s18   ;;  %s8673_s18 = sphi %s8708_s18, %s14642_s18   ;;  %s8669_s17 = sphi %s8706_s17, %s14641_s17   ;;  %s8665_s16 = sphi %s8704_s16, %s14640_s16   ;;  %s8661_s15 = sphi %s8702_s15, %s14639_s15  }
   0x4   : > { %s8727_s21 = sadd.s32 1, %s8673_s18   ;;  %s118_s22 = sadd.s32 1, %s8669_s17 }
   0x5   : > { %s115_s23 = ssub.s32 %s8673_s18, %s8727_s21  ;;  %p128_p0 = scmp.ne.s32.totalorder %s8669_s17, %s8665_s16 }
   0x6   : > { %p116_p1 = scmp.eq.s32.totalorder %s115_s23, 0  ;;  %p129_p2 = scmp.eq.s32.totalorder %s8723_s19, 7 }
   0x7   : > { %p134_p3 = scmp.ne.s32.totalorder %s8665_s16, %s8661_s15  ;;  %p135_p4 = scmp.eq.s32.totalorder %s6757_s20, 7 }
   0x8   : > { %s8738_s24 = scalar_select %p116_p1, %s8669_s17, %s118_s22  }
   0x9   : > { %p8740_p5 = por %p129_p2, %p128_p0  ;;  %p8744_p6 = por %p135_p4, %p134_p3 }
   0xa   : > { %p6760_p7 = scmp.ge.s32.totalorder %s8673_s18, 1  ;;  %p178_p8 = scmp.lt.s32.totalorder %s8673_s18, 9 }
   0xc   : > { %p179_p9 = pnand %p6760_p7, %p178_p8 }
   0xe   : > { %182 = sbr.rel (%p179_p9) target bundleno = 1841 (0x731), region = 36 }
  0x13   : > { %v7551_v0 = vld [vmem:[%s13487_s2 + $0x8] sm:$0xff]  ;;  %v4299_v1 = vlaneseq  ;;  %s6762_s29 = sshll.u32 %s8723_s19, 6  ;;  %s6765_s30 = sshll.u32 %s8723_s19, 3  ;;  %v7550_v3 = vld [vmem:[%s13487_s2] sm:$0xff]  ;;  %vm1141_vm0 = vcmask 261120   ;;  %vm2945_vm1 = vcmask 523264  }
  0x14   : > { %p211_p10 = scmp.lt.s32.totalorder %s6762_s29, 511  ;;  %p218_p11 = scmp.lt.s32.totalorder %s6765_s30, 63  ;;  %1532 = vmatpush.bf16.msra.mxu0 %v7551_v0  ;;  %8323 = vmatpush.bf16.msra.mxu3 %v7551_v0  ;;  %v8891_v48 = vld [vmem:[%s13488_s3] ss:$0 sm:$0xff]  ;;  %v8913_v58 = vld [vmem:[%s13488_s3 + $0x1] ss:$0 sm:$0xff] }
  0x15   : > { %v8755_v2 = vshrl.u32 %v4299_v1, 7  ;;  %8321 = vmatpush.bf16.msra.mxu1 %v7551_v0  ;;  %8322 = vmatpush.bf16.msra.mxu2 %v7551_v0  ;;  %v8923_v63 = vld [vmem:[%s13488_s3 + $0x2] ss:$0 sm:$0xff]  ;;  %s207_s5 = sand.u32 1, %s8665_s16   ;;  %s8631_s23 = scalar_lea.hbm %s13489_s4, 8192 }
  0x16   : > { %s14644_s29 = smov (!%p211_p10, %s6762_s29), 511  ;;  %s14646_s30 = smov (!%p218_p11, %s6765_s30), 63 }
  0x17   : > { %8368 = vset.pattern.permute.xlu1 %v8755_v2  ;;  %v8762_v4 = vadd.s32 8, %v8755_v2  ;;  %s7421_s7 = sshll.u32 %s14644_s29, 4  ;;  %s6766_s11 = sshll.u32 %s14646_s30, 3  ;;  %v8791_v10 = vadd.s32 24, %v8755_v2  ;;  %v8810_v17 = vadd.s32 16, %v8755_v2 }
  0x18   : > { %1533 = vmatpush.bf16.msra.mxu0 %v7550_v3  ;;  %s8768_s10 = scalar_lea.vmem %s13485_s0, %s7421_s7  ;;  %s8774_s14 = scalar_lea.vmem %s13486_s1, %s6766_s11  ;;  %8326 = vmatpush.bf16.msra.mxu3 %v7550_v3 }
  0x19   : > { %8369 = vset.pattern.permute.xlu2 %v8762_v4  ;;  %v7422_v5 = vld [vmem:[%s8768_s10] sm:$0xff]  ;;  %8324 = vmatpush.bf16.msra.mxu1 %v7550_v3  ;;  %v7423_v12 = vld [vmem:[%s8768_s10 + $0x8] sm:$0xff]  ;;  %v7424_v18 = vld [vmem:[%s8768_s10 + $0x10] sm:$0xff]  ;;  %s8675_s30 = smov 64   ;;  %s9327_s6 = sshll.u32 %s207_s5, 10 }
  0x1a   : > { %v7518_v6 = vld [vmem:[%s8768_s10 + $0x300] sm:$0xff]  ;;  %8325 = vmatpush.bf16.msra.mxu2 %v7550_v3  ;;  %8382 = vset.pattern.permute.xlu0 %v8762_v4  ;;  %v7519_v13 = vld [vmem:[%s8768_s10 + $0x308] sm:$0xff]  ;;  %v7456_v19 = vld [vmem:[%s8768_s10 + $0x110] sm:$0xff]  ;;  %s9366_s7 = scalar_lea.vmem [#allocation2], %s9327_s6 }
  0x1b   : > { %v8778_v7 = vld [vmem:[%s8774_s14] sm:$0xff]  ;;  %7287 = vmatmul.msk.bf16.vlgmr.msra.gmra.mxu0 %vm1141_vm0, %v7422_v5  ;;  %7383 = vmatmul.msk.bf16.vlgmr.msra.gmra.mxu3 %vm1141_vm0, %v7518_v6  ;;  %v7455_v14 = vld [vmem:[%s8768_s10 + $0x108] sm:$0xff]  ;;  %v7488_v20 = vld [vmem:[%s8768_s10 + $0x210] sm:$0xff]  ;;  %s6680_s11 = sshll.u32 %s9366_s7, 4  ;;  %s6681_s11 = int_to_ptr.vmem [resolvable:$true] %s6680_s11 }
  0x1c   : > { %v7454_v8 = vld [vmem:[%s8768_s10 + $0x100] sm:$0xff]  ;;  %v8784_v9 = vperm.slane %v8778_v7, 0  ;;  %v8802_v15 = vperm.slane %v8778_v7, 1  ;;  %v7487_v16 = vld [vmem:[%s8768_s10 + $0x208] sm:$0xff]  ;;  %v7425_v21 = vld [vmem:[%s8768_s10 + $0x18] sm:$0xff]  ;;  %v4348_v23 = vperm.slane %v8778_v7, 2 }
  0x1d   : > { %7319 = vmatmul.msk.bf16.vlgmr.msra.gmra.mxu1 %vm1141_vm0, %v7454_v8  ;;  %v7486_v11 = vld [vmem:[%s8768_s10 + $0x200] sm:$0xff]  ;;  %v7457_v22 = vld [vmem:[%s8768_s10 + $0x118] sm:$0xff]  ;;  %v7520_v27 = vld [vmem:[%s8768_s10 + $0x310] sm:$0xff]  ;;  %v4398_v28 = vperm.slane %v8778_v7, 4  ;;  %v8848_v32 = vperm.slane %v8778_v7, 3  ;;  %v8886_v47 = vperm.slane %v8778_v7, 5 }
  0x1e   : > { %13769 = vst [vmem:[#allocation5_spill] sm:$0xff] %v8784_v9  ;;  %7351 = vmatmul.msk.bf16.vlgmr.msra.gmra.mxu2 %vm1141_vm0, %v7486_v11  ;;  %v7489_v24 = vld [vmem:[%s8768_s10 + $0x218] sm:$0xff]  ;;  %v7426_v25 = vld [vmem:[%s8768_s10 + $0x20] sm:$0xff]  ;;  %v7427_v30 = vld [vmem:[%s8768_s10 + $0x28] sm:$0xff] }
  0x1f   : > { %4303 = vperm.xlu1 %8368, %v8784_v9   ;;  %13770 = vst [vmem:[#allocation6_spill] sm:$0xff] %v8802_v15  ;;  %v7458_v26 = vld [vmem:[%s8768_s10 + $0x120] sm:$0xff]  ;;  %v7459_v31 = vld [vmem:[%s8768_s10 + $0x128] sm:$0xff]  ;;  %v7521_v33 = vld [vmem:[%s8768_s10 + $0x318] sm:$0xff] }
  0x20   : > { %v7490_v29 = vld [vmem:[%s8768_s10 + $0x220] sm:$0xff]  ;;  %13771 = vst [vmem:[#allocation7_spill] sm:$0xff] %v8848_v32  ;;  %v7491_v34 = vld [vmem:[%s8768_s10 + $0x228] sm:$0xff]  ;;  %v7428_v35 = vld [vmem:[%s8768_s10 + $0x30] sm:$0xff] }
  0x21   : > { %4309 = vperm.xlu2 %8369, %v8784_v9   ;;  %v7460_v36 = vld [vmem:[%s8768_s10 + $0x130] sm:$0xff]  ;;  %v7522_v37 = vld [vmem:[%s8768_s10 + $0x320] sm:$0xff]  ;;  %v7429_v39 = vld [vmem:[%s8768_s10 + $0x38] sm:$0xff]  ;;  %13772 = vst [vmem:[#allocation8_spill] sm:$0xff] %v8886_v47 }
  0x22   : > { %4409 = vperm.xlu0 %8382, %v4398_v28   ;;  %v7492_v38 = vld [vmem:[%s8768_s10 + $0x230] sm:$0xff]  ;;  %v7461_v40 = vld [vmem:[%s8768_s10 + $0x138] sm:$0xff]  ;;  %v7523_v41 = vld [vmem:[%s8768_s10 + $0x328] sm:$0xff] }
  0x23   : > { %v7493_v42 = vld [vmem:[%s8768_s10 + $0x238] sm:$0xff]  ;;  %v7430_v43 = vld [vmem:[%s8768_s10 + $0x40] sm:$0xff]  ;;  %v7524_v49 = vld [vmem:[%s8768_s10 + $0x330] sm:$0xff] }
  0x24   : > { %v7462_v45 = vld [vmem:[%s8768_s10 + $0x140] sm:$0xff]  ;;  %v8898_v50 = vld [vmem:[%s8774_s14 + $0x8] sm:$0xff] }
  0x25   : > { %v8902_v51 = vperm.slane %v8898_v50, 1  ;;  %v7494_v60 = vld [vmem:[%s8768_s10 + $0x240] sm:$0xff]  ;;  %v7431_v1 = vld [vmem:[%s8768_s10 + $0x48] sm:$0xff] }
  0x26   : > { %v7463_v8 = vld [vmem:[%s8768_s10 + $0x148] sm:$0xff] }
  0x27   : > { %8370 = vset.pattern.permute.xlu1 %v8791_v10 }
  0x29   : > { %8371 = vset.pattern.permute.xlu2 %v8755_v2 }
  0x2a   : > { %4534 = vperm.xlu0 %8382, %v8902_v51  }
  0x2b   : > { %7288 = vmatmul.msk.bf16.gmra.mxu0 %vm1141_vm0, %v7423_v12  ;;  %7384 = vmatmul.msk.bf16.gmra.mxu3 %vm1141_vm0, %v7519_v13 }
  0x2d   : > { %7320 = vmatmul.msk.bf16.gmra.mxu1 %vm1141_vm0, %v7455_v14 }
  0x2e   : > { %7352 = vmatmul.msk.bf16.gmra.mxu2 %vm1141_vm0, %v7487_v16 }
  0x2f   : > { %4321 = vperm.xlu1 %8370, %v8784_v9  }
  0x31   : > { %4328 = vperm.xlu2 %8371, %v8802_v15  }
  0x37   : > { %8372 = vset.pattern.permute.xlu1 %v8762_v4 }
  0x39   : > { %8373 = vset.pattern.permute.xlu2 %v8810_v17 }
  0x3b   : > { %7289 = vmatmul.msk.bf16.gmra.mxu0 %vm1141_vm0, %v7424_v18  ;;  %7385 = vmatmul.msk.bf16.gmra.mxu3 %vm1141_vm0, %v7520_v27 }
  0x3d   : > { %7321 = vmatmul.msk.bf16.gmra.mxu1 %vm1141_vm0, %v7456_v19 }
  0x3e   : > { %7353 = vmatmul.msk.bf16.gmra.mxu2 %vm1141_vm0, %v7488_v20 }
  0x3f   : > { %4334 = vperm.xlu1 %8372, %v8802_v15  }
  0x41   : > { %4340 = vperm.xlu2 %8373, %v8802_v15  }
  0x47   : > { %8374 = vset.pattern.permute.xlu1 %v8755_v2 }
  0x49   : > { %8375 = vset.pattern.permute.xlu2 %v8762_v4 }
  0x4b   : > { %7290 = vmatmul.msk.bf16.gmra.mxu0 %vm1141_vm0, %v7425_v21  ;;  %7386 = vmatmul.msk.bf16.gmra.mxu3 %vm1141_vm0, %v7521_v33  ;;  %v7525_v21 = vld [vmem:[%s8768_s10 + $0x338] sm:$0xff] }
  0x4d   : > { %7322 = vmatmul.msk.bf16.gmra.mxu1 %vm1141_vm0, %v7457_v22  ;;  %v8944_v22 = vperm.slane %v8778_v7, 6 }
  0x4e   : > { %7354 = vmatmul.msk.bf16.gmra.mxu2 %vm1141_vm0, %v7489_v24 }
  0x4f   : > { %4353 = vperm.xlu1 %8374, %v4348_v23   ;;  %13773 = vst [vmem:[#allocation9_spill] sm:$0xff] %v8944_v22 }
  0x51   : > { %4359 = vperm.xlu2 %8375, %v4348_v23  }
  0x57   : > { %8376 = vset.pattern.permute.xlu1 %v8810_v17 }
  0x59   : > { %8377 = vset.pattern.permute.xlu2 %v8791_v10 }
  0x5b   : > { %7291 = vmatmul.msk.bf16.gmra.mxu0 %vm1141_vm0, %v7426_v25  ;;  %7387 = vmatmul.msk.bf16.gmra.mxu3 %vm1141_vm0, %v7522_v37 }
  0x5d   : > { %7323 = vmatmul.msk.bf16.gmra.mxu1 %vm1141_vm0, %v7458_v26 }
  0x5e   : > { %7355 = vmatmul.msk.bf16.gmra.mxu2 %vm1141_vm0, %v7490_v29 }
  0x5f   : > { %4365 = vperm.xlu1 %8376, %v4348_v23  }
  0x61   : > { %4371 = vperm.xlu2 %8377, %v4348_v23  }
  0x67   : > { %8378 = vset.pattern.permute.xlu1 %v8762_v4 }
  0x69   : > { %8379 = vset.pattern.permute.xlu2 %v8810_v17 }
  0x6b   : > { %7292 = vmatmul.msk.bf16.gmra.mxu0 %vm1141_vm0, %v7427_v30  ;;  %7388 = vmatmul.msk.bf16.gmra.mxu3 %vm1141_vm0, %v7523_v41 }
  0x6d   : > { %7324 = vmatmul.msk.bf16.gmra.mxu1 %vm1141_vm0, %v7459_v31 }
  0x6e   : > { %7356 = vmatmul.msk.bf16.gmra.mxu2 %vm1141_vm0, %v7491_v34 }
  0x6f   : > { %4384 = vperm.xlu1 %8378, %v8848_v32  }
  0x71   : > { %4390 = vperm.xlu2 %8379, %v8848_v32  }
  0x77   : > { %8380 = vset.pattern.permute.xlu1 %v8791_v10 }
  0x79   : > { %8381 = vset.pattern.permute.xlu2 %v8755_v2 }
  0x7b   : > { %7293 = vmatmul.msk.bf16.gmra.mxu0 %vm1141_vm0, %v7428_v35  ;;  %7389 = vmatmul.msk.bf16.gmra.mxu3 %vm1141_vm0, %v7524_v49 }
  0x7d   : > { %7325 = vmatmul.msk.bf16.gmra.mxu1 %vm1141_vm0, %v7460_v36 }
  0x7e   : > { %7357 = vmatmul.msk.bf16.gmra.mxu2 %vm1141_vm0, %v7492_v38 }
  0x7f   : > { %4396 = vperm.xlu1 %8380, %v8848_v32  }
  0x81   : > { %4403 = vperm.xlu2 %8381, %v4398_v28  }
  0x87   : > { %8383 = vset.pattern.permute.xlu1 %v8810_v17 }
  0x89   : > { %8384 = vset.pattern.permute.xlu2 %v8791_v10 }
  0x8b   : > { %7294 = vmatmul.msk.bf16.gmra.mxu0 %vm1141_vm0, %v7429_v39  ;;  %7390 = vmatmul.msk.bf16.gmra.mxu3 %vm1141_vm0, %v7525_v21 }
  0x8d   : > { %7326 = vmatmul.msk.bf16.gmra.mxu1 %vm1141_vm0, %v7461_v40 }
  0x8e   : > { %7358 = vmatmul.msk.bf16.gmra.mxu2 %vm1141_vm0, %v7493_v42  ;;  %v7495_v42 = vld [vmem:[%s8768_s10 + $0x248] sm:$0xff] }
  0x8f   : > { %4415 = vperm.xlu1 %8383, %v4398_v28  }
  0x91   : > { %4421 = vperm.xlu2 %8384, %v4398_v28  }
  0x97   : > { %8385 = vset.pattern.permute.xlu1 %v8755_v2 }
  0x98   : > { %v1535_v44 = vpop.f32.mrf.mxu0 }
  0x99   : > { %8386 = vset.pattern.permute.xlu2 %v8762_v4  ;;  %v1536_v52 = vadd.f32 %v8891_v48, %v1535_v44 }
  0x9a   : > { %v8883_v46 = vpop.f32.mrf.mxu1 }
  0x9b   : > { %7295 = vmatmul.msk.bf16.gmra.mxu0 %vm1141_vm0, %v7430_v43  ;;  %v2175_v57 = vmax.f32 %v1536_v52, 0.0 }
  0x9d   : > { %7327 = vmatmul.msk.bf16.gmra.mxu1 %vm1141_vm0, %v7462_v45  ;;  %v2432_v62 = vmul.f32 %v8913_v58, %v2175_v57 }
  0x9e   : > { %v2015_v53 = vpop.f32.mrf.mxu3  ;;  %7359 = vmatmul.msk.bf16.gmra.mxu2 %vm1141_vm0, %v7494_v60 }
  0x9f   : > { %4428 = vperm.xlu1 %8385, %v8886_v47   ;;  %v2016_v61 = vadd.f32 %v8891_v48, %v2015_v53  ;;  %v8936_v18 = vadd.f32 %v8923_v63, %v2432_v62 }
  0xa0   : > { %v1537_v54 = vpop.f32.mrf.mxu0 }
  0xa1   : > { %4434 = vperm.xlu2 %8386, %v8886_v47   ;;  %v1538_v55 = vadd.f32 %v8891_v48, %v1537_v54  ;;  %v8930_v11 = vpop.f32.mrf.mxu2  ;;  %v2367_v14 = vmax.f32 %v2016_v61, 0.0  ;;  %v2946_v26 = vsel %vm2945_vm1, %v8936_v18, -inf  ;;  %v7464_v61 = vld [vmem:[%s8768_s10 + $0x150] sm:$0xff] }
  0xa2   : > { %v8908_v56 = vpop.f32.mrf.mxu1 }
  0xa3   : > { %v2176_v59 = vmax.f32 %v1538_v55, 0.0  ;;  %v2624_v24 = vmul.f32 %v8913_v58, %v2367_v14  ;;  %v7432_v55 = vld [vmem:[%s8768_s10 + $0x50] sm:$0xff] }
  0xa5   : > { %v2433_v0 = vmul.f32 %v8913_v58, %v2176_v59  ;;  %v8965_v36 = vadd.f32 %v8923_v63, %v2624_v24 }
  0xa6   : > { %v2017_v3 = vpop.f32.mrf.mxu3 }
  0xa7   : > { %8387 = vset.pattern.permute.xlu1 %v8791_v10  ;;  %v2018_v6 = vadd.f32 %v8891_v48, %v2017_v3  ;;  %v8939_v19 = vadd.f32 %v8923_v63, %v2433_v0  ;;  %13775 = vst [vmem:[#allocation11_spill] sm:$0xff] %v8965_v36  ;;  %v3570_v49 = vsel %vm2945_vm1, %v8965_v36, -inf }
  0xa8   : > { %v1540_v5 = vpop.f32.mrf.mxu0 }
  0xa9   : > { %8388 = vset.pattern.permute.xlu2 %v8755_v2  ;;  %v1541_v12 = vadd.f32 %v8891_v48, %v1540_v5  ;;  %v2368_v16 = vmax.f32 %v2018_v6, 0.0  ;;  %v2947_v27 = vsel %vm2945_vm1, %v8939_v19, -inf  ;;  %v8970_v39 = vpop.f32.mrf.mxu2 }
  0xaa   : > { %v8933_v13 = vpop.f32.mrf.mxu1  ;;  %v2948_v35 = vmax.f32 %v2946_v26, %v2947_v27 }
  0xab   : > { %v2177_v20 = vmax.f32 %v1541_v12, 0.0  ;;  %7296 = vmatmul.msk.bf16.gmra.mxu0 %vm1141_vm0, %v7431_v1  ;;  %v2625_v25 = vmul.f32 %v8913_v58, %v2368_v16  ;;  %v7526_v12 = vld [vmem:[%s8768_s10 + $0x340] sm:$0xff] }
  0xac   : > { %7391 = vmatmul.msk.bf16.gmra.mxu3 %vm1141_vm0, %v7526_v12 }
  0xad   : > { %7328 = vmatmul.msk.bf16.gmra.mxu1 %vm1141_vm0, %v7463_v8  ;;  %v2434_v23 = vmul.f32 %v8913_v58, %v2177_v20  ;;  %v8968_v37 = vadd.f32 %v8923_v63, %v2625_v25 }
  0xae   : > { %v2020_v29 = vpop.f32.mrf.mxu3  ;;  %7360 = vmatmul.msk.bf16.gmra.mxu2 %vm1141_vm0, %v7495_v42  ;;  %v7496_v42 = vld [vmem:[%s8768_s10 + $0x250] sm:$0xff] }
  0xaf   : > { %4446 = vperm.xlu1 %8387, %v8886_v47   ;;  %v8957_v28 = vadd.f32 %v8923_v63, %v2434_v23  ;;  %v2021_v31 = vadd.f32 %v8891_v48, %v2020_v29  ;;  %13776 = vst [vmem:[#allocation12_spill] sm:$0xff] %v8968_v37  ;;  %v3571_v52 = vsel %vm2945_vm1, %v8968_v37, -inf  ;;  %v9234_v47 = vperm.slane %v8898_v50, 2 }
  0xb0   : > { %v1542_v30 = vpop.f32.mrf.mxu0  ;;  %v3572_v0 = vmax.f32 %v3570_v49, %v3571_v52 }
  0xb1   : > { %13774 = vst [vmem:[#allocation10_spill] sm:$0xff] %v8957_v28  ;;  %4453 = vperm.xlu2 %8388, %v8944_v22   ;;  %v1543_v33 = vadd.f32 %v8891_v48, %v1542_v30  ;;  %v2369_v38 = vmax.f32 %v2021_v31, 0.0  ;;  %v2949_v40 = vsel %vm2945_vm1, %v8957_v28, -inf  ;;  %v8999_v8 = vpop.f32.mrf.mxu2  ;;  %v7470_v28 = vld [vmem:[%s8768_s10 + $0x180] sm:$0xff] }
  0xb2   : > { %v8962_v34 = vpop.f32.mrf.mxu1  ;;  %v2950_v45 = vmax.f32 %v2948_v35, %v2949_v40  ;;  %13801 = vst [vmem:[#allocation37_spill] sm:$0xff] %v9234_v47 }
  0xb3   : > { %v2178_v41 = vmax.f32 %v1543_v33, 0.0  ;;  %v2626_v43 = vmul.f32 %v8913_v58, %v2369_v38 }
  0xb5   : > { %v2435_v44 = vmul.f32 %v8913_v58, %v2178_v41  ;;  %v8984_v53 = vadd.f32 %v8923_v63, %v2626_v43 }
  0xb6   : > { %v2022_v57 = vpop.f32.mrf.mxu3 }
  0xb7   : > { %8389 = vset.pattern.permute.xlu1 %v8762_v4  ;;  %13777 = vst [vmem:[#allocation13_spill] sm:$0xff] %v8984_v53  ;;  %v8987_v54 = vadd.f32 %v8923_v63, %v2435_v44  ;;  %v2023_v60 = vadd.f32 %v8891_v48, %v2022_v57  ;;  %v3573_v5 = vsel %vm2945_vm1, %v8984_v53, -inf }
  0xb8   : > { %v1545_v59 = vpop.f32.mrf.mxu0  ;;  %v3574_v20 = vmax.f32 %v3572_v0, %v3573_v5  ;;  %v4473_v0 = vperm.slane %v8778_v7, 7 }
  0xb9   : > { %13778 = vst [vmem:[#allocation14_spill] sm:$0xff] %v8987_v54  ;;  %8390 = vset.pattern.permute.xlu2 %v8810_v17  ;;  %v2951_v62 = vsel %vm2945_vm1, %v8987_v54, -inf  ;;  %v2370_v6 = vmax.f32 %v2023_v60, 0.0  ;;  %v1546_v24 = vadd.f32 %v8891_v48, %v1545_v59  ;;  %v9017_v35 = vpop.f32.mrf.mxu2  ;;  %v7465_v60 = vld [vmem:[%s8768_s10 + $0x158] sm:$0xff] }
  0xba   : > { %v8995_v1 = vpop.f32.mrf.mxu1  ;;  %v2952_v3 = vmax.f32 %v2950_v45, %v2951_v62 }
  0xbb   : > { %7297 = vmatmul.msk.bf16.gmra.mxu0 %vm1141_vm0, %v7432_v55  ;;  %v2627_v14 = vmul.f32 %v8913_v58, %v2370_v6  ;;  %v2179_v38 = vmax.f32 %v1546_v24, 0.0  ;;  %v7433_v55 = vld [vmem:[%s8768_s10 + $0x58] sm:$0xff] }
  0xbc   : > { %v2953_v16 = vrot.slane %v2952_v3, 4 }
  0xbd   : > { %7329 = vmatmul.msk.bf16.gmra.mxu1 %vm1141_vm0, %v7464_v61  ;;  %v9008_v21 = vadd.f32 %v8923_v63, %v2627_v14  ;;  %v2436_v49 = vmul.f32 %v8913_v58, %v2179_v38  ;;  %v7527_v14 = vld [vmem:[%s8768_s10 + $0x348] sm:$0xff] }
  0xbe   : > { %v2954_v23 = vmax.f32 %v2952_v3, %v2953_v16  ;;  %7361 = vmatmul.msk.bf16.gmra.mxu2 %vm1141_vm0, %v7496_v42  ;;  %v9041_v16 = vperm.slane %v8898_v50, 6  ;;  %7392 = vmatmul.msk.bf16.gmra.mxu3 %vm1141_vm0, %v7527_v14  ;;  %v7497_v42 = vld [vmem:[%s8768_s10 + $0x258] sm:$0xff] }
  0xbf   : > { %4459 = vperm.xlu1 %8389, %v8944_v22   ;;  %13779 = vst [vmem:[#allocation15_spill] sm:$0xff] %v9008_v21  ;;  %v3575_v26 = vsel %vm2945_vm1, %v9008_v21, -inf  ;;  %v9033_v5 = vadd.f32 %v8923_v63, %v2436_v49  ;;  %v7499_v21 = vld [vmem:[%s8768_s10 + $0x268] sm:$0xff] }
  0xc0   : > { %v1547_v25 = vpop.f32.mrf.mxu0  ;;  %v2955_v27 = vrot.slane %v2954_v23, 2  ;;  %v3576_v30 = vmax.f32 %v3574_v20, %v3575_v26 }
  0xc1   : > { %4465 = vperm.xlu2 %8390, %v8944_v22   ;;  %v1548_v29 = vadd.f32 %v8891_v48, %v1547_v25  ;;  %v1865_v3 = vpop.f32.mrf.mxu2  ;;  %v2959_v7 = vsel %vm2945_vm1, %v9033_v5, -inf }
  0xc2   : > { %v9015_v31 = vpop.f32.mrf.mxu1  ;;  %v2956_v33 = vmax.f32 %v2954_v23, %v2955_v27  ;;  %v3577_v41 = vrot.slane %v3576_v30, 4 }
  0xc3   : > { %v2180_v40 = vmax.f32 %v1548_v29, 0.0 }
  0xc4   : > { %v2957_v43 = vrot.slane %v2956_v33, 1  ;;  %v3578_v44 = vmax.f32 %v3576_v30, %v3577_v41 }
  0xc5   : > { %v2437_v52 = vmul.f32 %v8913_v58, %v2180_v40 }
  0xc6   : > { %v2958_v45 = vmax.f32 %v2956_v33, %v2957_v43  ;;  %v3579_v59 = vrot.slane %v3578_v44, 2 }
  0xc7   : > { %8391 = vset.pattern.permute.xlu1 %v8755_v2  ;;  %v9036_v6 = vadd.f32 %v8923_v63, %v2437_v52  ;;  %v7434_v52 = vld [vmem:[%s8768_s10 + $0x60] sm:$0xff] }
  0xc8   : > { %v1550_v57 = vpop.f32.mrf.mxu0  ;;  %3842 = vrot.lane.b32.xlu0 %v2958_v45, %s8675_s30  ;;  %v3580_v20 = vmax.f32 %v3578_v44, %v3579_v59 }
  0xc9   : > { %8392 = vset.pattern.permute.xlu2 %v8762_v4  ;;  %v1551_v61 = vadd.f32 %v8891_v48, %v1550_v57  ;;  %v2960_v24 = vsel %vm2945_vm1, %v9036_v6, -inf  ;;  %v1867_v38 = vpop.f32.mrf.mxu2  ;;  %v7466_v57 = vld [vmem:[%s8768_s10 + $0x160] sm:$0xff] }
  0xca   : > { %v9029_v62 = vpop.f32.mrf.mxu1  ;;  %v3581_v27 = vrot.slane %v3580_v20, 1  ;;  %v2961_v33 = vmax.f32 %v2959_v7, %v2960_v24 }
  0xcb   : > { %v2181_v12 = vmax.f32 %v1551_v61, 0.0  ;;  %7298 = vmatmul.msk.bf16.gmra.mxu0 %vm1141_vm0, %v7433_v55 }
  0xcc   : > { %v3582_v43 = vmax.f32 %v3580_v20, %v3581_v27  ;;  %v1868_v20 = vadd.f32 %v8891_v48, %v1867_v38 }
  0xcd   : > { %7330 = vmatmul.msk.bf16.gmra.mxu1 %vm1141_vm0, %v7465_v60  ;;  %v2438_v23 = vmul.f32 %v8913_v58, %v2181_v12  ;;  %v1866_v60 = vadd.f32 %v8891_v48, %v1865_v3 }
  0xce   : > { %7362 = vmatmul.msk.bf16.gmra.mxu2 %vm1141_vm0, %v7497_v42 }
  0xcf   : > { %4478 = vperm.xlu1 %8391, %v4473_v0   ;;  %v9051_v25 = vadd.f32 %v8923_v63, %v2438_v23  ;;  %v7528_v23 = vld [vmem:[%s8768_s10 + $0x350] sm:$0xff]  ;;  %v2307_v24 = vmax.f32 %v1866_v60, 0.0 }
  0xd0   : > { %v1552_v26 = vpop.f32.mrf.mxu0  ;;  %4659 = vperm.xlu0 %8382, %v9041_v16   ;;  %7393 = vmatmul.msk.bf16.gmra.mxu3 %vm1141_vm0, %v7528_v23  ;;  %v7467_v23 = vld [vmem:[%s8768_s10 + $0x168] sm:$0xff] }
  0xd1   : > { %13780 = vst [vmem:[#allocation16_spill] sm:$0xff] %v9051_v25  ;;  %4484 = vperm.xlu2 %8392, %v4473_v0   ;;  %v1553_v29 = vadd.f32 %v8891_v48, %v1552_v26  ;;  %v2962_v40 = vsel %vm2945_vm1, %v9051_v25, -inf  ;;  %v1870_v14 = vpop.f32.mrf.mxu2  ;;  %v2308_v26 = vmax.f32 %v1868_v20, 0.0 }
  0xd2   : > { %v9055_v30 = vpop.f32.mrf.mxu1  ;;  %v2963_v45 = vmax.f32 %v2961_v33, %v2962_v40  ;;  %v2564_v33 = vmul.f32 %v8913_v58, %v2307_v24 }
  0xd3   : > { %v2182_v41 = vmax.f32 %v1553_v29, 0.0  ;;  %v2565_v38 = vmul.f32 %v8913_v58, %v2308_v26 }
  0xd5   : > { %v2439_v44 = vmul.f32 %v8913_v58, %v2182_v41  ;;  %v1871_v41 = vadd.f32 %v8891_v48, %v1870_v14  ;;  %v7435_v14 = vld [vmem:[%s8768_s10 + $0x68] sm:$0xff] }
  0xd7   : > { %8393 = vset.pattern.permute.xlu1 %v8810_v17  ;;  %v9064_v49 = vadd.f32 %v8923_v63, %v2439_v44  ;;  %v9085_v44 = vpop.f32.mrf.mxu3 }
  0xd8   : > { %v9068_v55 = vpop.f32.mrf.mxu0  ;;  %3938 = vrot.lane.b32.xlu0 %v3582_v43, %s8675_s30 }
  0xd9   : > { %13781 = vst [vmem:[#allocation17_spill] sm:$0xff] %v9064_v49  ;;  %8394 = vset.pattern.permute.xlu2 %v8791_v10  ;;  %v2964_v59 = vsel %vm2945_vm1, %v9064_v49, -inf  ;;  %v1872_v43 = vpop.f32.mrf.mxu2 }
  0xda   : > { %v1715_v61 = vpop.f32.mrf.mxu1  ;;  %v2965_v12 = vmax.f32 %v2963_v45, %v2964_v59  ;;  %v2309_v45 = vmax.f32 %v1871_v41, 0.0  ;;  %v9092_v59 = vadd.f32 %v8923_v63, %v2565_v38  ;;  %v1873_v41 = vadd.f32 %v8891_v48, %v1872_v43 }
  0xdb   : > { %7299 = vmatmul.msk.bf16.gmra.mxu0 %vm1141_vm0, %v7434_v52  ;;  %v7498_v52 = vld [vmem:[%s8768_s10 + $0x260] sm:$0xff] }
  0xdc   : > { %v2966_v7 = vrot.slane %v2965_v12, 4  ;;  %13783 = vst [vmem:[#allocation19_spill] sm:$0xff] %v9092_v59  ;;  %v2566_v60 = vmul.f32 %v8913_v58, %v2309_v45  ;;  %v3376_v24 = vsel %vm2945_vm1, %v9092_v59, -inf  ;;  %v7530_v59 = vld [vmem:[%s8768_s10 + $0x360] sm:$0xff] }
  0xdd   : > { %7331 = vmatmul.msk.bf16.gmra.mxu1 %vm1141_vm0, %v7466_v57 }
  0xde   : > { %v2967_v27 = vmax.f32 %v2965_v12, %v2966_v7  ;;  %7363 = vmatmul.msk.bf16.gmra.mxu2 %vm1141_vm0, %v7498_v52  ;;  %v9108_v26 = vadd.f32 %v8923_v63, %v2566_v60 }
  0xdf   : > { %4490 = vperm.xlu1 %8393, %v4473_v0   ;;  %v9115_v38 = vpop.f32.mrf.mxu3 }
  0xe0   : > { %v9080_v3 = vpop.f32.mrf.mxu0  ;;  %v2968_v29 = vrot.slane %v2967_v27, 2  ;;  %13784 = vst [vmem:[#allocation20_spill] sm:$0xff] %v9108_v26  ;;  %v3378_v52 = vsel %vm2945_vm1, %v9108_v26, -inf }
  0xe1   : > { %4496 = vperm.xlu2 %8394, %v4473_v0   ;;  %v9089_v0 = vadd.f32 %v8923_v63, %v2564_v33  ;;  %v9113_v33 = vpop.f32.mrf.mxu2 }
  0xe2   : > { %v1717_v40 = vpop.f32.mrf.mxu1  ;;  %v2969_v42 = vmax.f32 %v2967_v27, %v2968_v29  ;;  %v9111_v29 = vperm.slane %v8898_v50, 0 }
  0xe3   : > { %13782 = vst [vmem:[#allocation18_spill] sm:$0xff] %v9089_v0  ;;  %v3375_v7 = vsel %vm2945_vm1, %v9089_v0, -inf }
  0xe4   : > { %v2970_v57 = vrot.slane %v2969_v42, 1  ;;  %13785 = vst [vmem:[#allocation21_spill] sm:$0xff] %v9111_v29  ;;  %v3377_v45 = vmax.f32 %v3375_v7, %v3376_v24 }
  0xe6   : > { %v2971_v12 = vmax.f32 %v2969_v42, %v2970_v57  ;;  %v7529_v42 = vld [vmem:[%s8768_s10 + $0x358] sm:$0xff]  ;;  %v2310_v57 = vmax.f32 %v1873_v41, 0.0  ;;  %v3379_v43 = vmax.f32 %v3377_v45, %v3378_v52 }
  0xe7   : > { %8395 = vset.pattern.permute.xlu1 %v8762_v4  ;;  %7394 = vmatmul.msk.bf16.gmra.mxu3 %vm1141_vm0, %v7529_v42  ;;  %v9136_v42 = vpop.f32.mrf.mxu3 }
  0xe8   : > { %v9099_v20 = vpop.f32.mrf.mxu0  ;;  %3844 = vrot.lane.b32.xlu0 %v2971_v12, %s8675_s30  ;;  %v2567_v60 = vmul.f32 %v8913_v58, %v2310_v57 }
  0xe9   : > { %8396 = vset.pattern.permute.xlu2 %v8810_v17  ;;  %v9134_v41 = vpop.f32.mrf.mxu2 }
  0xea   : > { %v1720_v27 = vpop.f32.mrf.mxu1  ;;  %v9132_v7 = vadd.f32 %v8923_v63, %v2567_v60  ;;  %v7468_v60 = vld [vmem:[%s8768_s10 + $0x170] sm:$0xff] }
  0xeb   : > { %7300 = vmatmul.msk.bf16.gmra.mxu0 %vm1141_vm0, %v7435_v14  ;;  %v1716_v14 = vadd.f32 %v8891_v48, %v1715_v61  ;;  %v1721_v61 = vadd.f32 %v8891_v48, %v1720_v27 }
  0xec   : > { %13786 = vst [vmem:[#allocation22_spill] sm:$0xff] %v9132_v7  ;;  %v3380_v57 = vsel %vm2945_vm1, %v9132_v7, -inf }
  0xed   : > { %7332 = vmatmul.msk.bf16.gmra.mxu1 %vm1141_vm0, %v7467_v23  ;;  %v1718_v23 = vadd.f32 %v8891_v48, %v1717_v40  ;;  %v3381_v53 = vmax.f32 %v3379_v43, %v3380_v57  ;;  %v2247_v37 = vmax.f32 %v1716_v14, 0.0  ;;  %v7436_v40 = vld [vmem:[%s8768_s10 + $0x70] sm:$0xff]  ;;  %v2249_v14 = vmax.f32 %v1721_v61, 0.0 }
  0xee   : > { %7364 = vmatmul.msk.bf16.gmra.mxu2 %vm1141_vm0, %v7499_v21 }
  0xef   : > { %4509 = vperm.xlu1 %8395, %v9111_v29   ;;  %v2248_v45 = vmax.f32 %v1718_v23, 0.0  ;;  %v3382_v36 = vrot.slane %v3381_v53, 4  ;;  %v2504_v0 = vmul.f32 %v8913_v58, %v2247_v37  ;;  %v9156_v21 = vpop.f32.mrf.mxu3 }
  0xf0   : > { %v9127_v12 = vpop.f32.mrf.mxu0 }
  0xf1   : > { %4515 = vperm.xlu2 %8396, %v9111_v29   ;;  %v2505_v43 = vmul.f32 %v8913_v58, %v2248_v45  ;;  %v9154_v57 = vpop.f32.mrf.mxu2  ;;  %v3383_v7 = vmax.f32 %v3381_v53, %v3382_v36  ;;  %v9162_v26 = vadd.f32 %v8923_v63, %v2504_v0 }
  0xf2   : > { %v1722_v24 = vpop.f32.mrf.mxu1 }
  0xf3   : > { %v1723_v23 = vadd.f32 %v8891_v48, %v1722_v24  ;;  %13788 = vst [vmem:[#allocation24_spill] sm:$0xff] %v9162_v26  ;;  %v9165_v37 = vadd.f32 %v8923_v63, %v2505_v43  ;;  %v2506_v24 = vmul.f32 %v8913_v58, %v2249_v14  ;;  %v3384_v61 = vrot.slane %v3383_v7, 2 }
  0xf4   : > { %v3180_v53 = vsel %vm2945_vm1, %v9162_v26, -inf }
  0xf5   : > { %13789 = vst [vmem:[#allocation25_spill] sm:$0xff] %v9165_v37  ;;  %v2250_v45 = vmax.f32 %v1723_v23, 0.0  ;;  %v3385_v36 = vmax.f32 %v3383_v7, %v3384_v61  ;;  %v3181_v0 = vsel %vm2945_vm1, %v9165_v37, -inf  ;;  %v7500_v61 = vld [vmem:[%s8768_s10 + $0x270] sm:$0xff] }
  0xf7   : > { %8397 = vset.pattern.permute.xlu1 %v8791_v10  ;;  %7395 = vmatmul.msk.bf16.gmra.mxu3 %vm1141_vm0, %v7530_v59  ;;  %v2507_v59 = vmul.f32 %v8913_v58, %v2250_v45  ;;  %v9185_v23 = vpop.f32.mrf.mxu3  ;;  %v3386_v7 = vrot.slane %v3385_v36, 1  ;;  %v7437_v45 = vld [vmem:[%s8768_s10 + $0x78] sm:$0xff] }
  0xf8   : > { %v9146_v52 = vpop.f32.mrf.mxu0 }
  0xf9   : > { %8398 = vset.pattern.permute.xlu2 %v8755_v2  ;;  %v9183_v14 = vpop.f32.mrf.mxu2  ;;  %v9191_v37 = vadd.f32 %v8923_v63, %v2507_v59 }
  0xfa   : > { %v9152_v27 = vpop.f32.mrf.mxu1 }
  0xfb   : > { %13787 = vst [vmem:[#allocation23_spill] sm:$0xff] %v9152_v27  ;;  %7301 = vmatmul.msk.bf16.gmra.mxu0 %vm1141_vm0, %v7436_v40 }
  0xfc   : > { %13792 = vst [vmem:[#allocation28_spill] sm:$0xff] %v9191_v37 }
  0xfd   : > { %7333 = vmatmul.msk.bf16.gmra.mxu1 %vm1141_vm0, %v7468_v60  ;;  %v9178_v60 = vadd.f32 %v8923_v63, %v2506_v24  ;;  %v3387_v24 = vmax.f32 %v3385_v36, %v3386_v7 }
  0xfe   : > { %7365 = vmatmul.msk.bf16.gmra.mxu2 %vm1141_vm0, %v7500_v61  ;;  %v7531_v61 = vld [vmem:[%s8768_s10 + $0x368] sm:$0xff] }
  0xff   : > { %4521 = vperm.xlu1 %8397, %v9111_v29   ;;  %13790 = vst [vmem:[#allocation26_spill] sm:$0xff] %v9178_v60  ;;  %v3182_v29 = vmax.f32 %v3180_v53, %v3181_v0  ;;  %v3183_v26 = vsel %vm2945_vm1, %v9178_v60, -inf  ;;  %3908 = vrot.lane.b32.xlu0 %v3387_v24, %s8675_s30  ;;  %v7469_v53 = vld [vmem:[%s8768_s10 + $0x178] sm:$0xff]  ;;  %v3185_v0 = vsel %vm2945_vm1, %v9191_v37, -inf  ;;  %v9207_v7 = vpop.f32.mrf.mxu3 }
 0x100   : > { %v9171_v40 = vpop.f32.mrf.mxu0 }
 0x101   : > { %4528 = vperm.xlu2 %8398, %v8902_v51   ;;  %v3184_v32 = vmax.f32 %v3182_v29, %v3183_v26  ;;  %v9205_v36 = vpop.f32.mrf.mxu2 }
 0x102   : > { %v9181_v43 = vpop.f32.mrf.mxu1  ;;  %13795 = vst [vmem:[#allocation31_spill] sm:$0xff] %v9205_v36  ;;  %v7503_v36 = vld [vmem:[%s8768_s10 + $0x288] sm:$0xff] }
 0x103   : > { %13791 = vst [vmem:[#allocation27_spill] sm:$0xff] %v9181_v43  ;;  %v3186_v26 = vmax.f32 %v3184_v32, %v3185_v0  ;;  %v7501_v32 = vld [vmem:[%s8768_s10 + $0x278] sm:$0xff] }
 0x105   : > { %v3187_v24 = vrot.slane %v3186_v26, 4 }
 0x107   : > { %8399 = vset.pattern.permute.xlu1 %v8810_v17  ;;  %7396 = vmatmul.msk.bf16.gmra.mxu3 %vm1141_vm0, %v7531_v61  ;;  %v3188_v0 = vmax.f32 %v3186_v26, %v3187_v24  ;;  %v7438_v61 = vld [vmem:[%s8768_s10 + $0x80] sm:$0xff]  ;;  %v7532_v24 = vld [vmem:[%s8768_s10 + $0x370] sm:$0xff] }
 0x108   : > { %v9198_v49 = vpop.f32.mrf.mxu0 }
 0x109   : > { %8400 = vset.pattern.permute.xlu2 %v8791_v10  ;;  %13793 = vst [vmem:[#allocation29_spill] sm:$0xff] %v9198_v49  ;;  %v9219_v22 = vpop.f32.mrf.mxu2 }
 0x10a   : > { %v9203_v59 = vpop.f32.mrf.mxu1  ;;  %13798 = vst [vmem:[#allocation34_spill] sm:$0xff] %v9219_v22 }
 0x10b   : > { %13794 = vst [vmem:[#allocation30_spill] sm:$0xff] %v9203_v59  ;;  %7302 = vmatmul.msk.bf16.gmra.mxu0 %vm1141_vm0, %v7437_v45  ;;  %v9221_v45 = vpop.f32.mrf.mxu3 }
 0x10d   : > { %7334 = vmatmul.msk.bf16.gmra.mxu1 %vm1141_vm0, %v7469_v53  ;;  %v3189_v53 = vrot.slane %v3188_v0, 2 }
 0x10e   : > { %7366 = vmatmul.msk.bf16.gmra.mxu2 %vm1141_vm0, %v7501_v32 }
 0x10f   : > { %4540 = vperm.xlu1 %8399, %v8902_v51   ;;  %v3190_v54 = vmax.f32 %v3188_v0, %v3189_v53 }
 0x110   : > { %v9215_v29 = vpop.f32.mrf.mxu0 }
 0x111   : > { %4546 = vperm.xlu2 %8400, %v8902_v51   ;;  %13796 = vst [vmem:[#allocation32_spill] sm:$0xff] %v9215_v29  ;;  %v9236_v9 = vpop.f32.mrf.mxu2  ;;  %v3191_v32 = vrot.slane %v3190_v54, 1  ;;  %v4304_v29 = vpop.permute.xlu1 %4303 }
 0x112   : > { %v9217_v25 = vpop.f32.mrf.mxu1  ;;  %13802 = vst [vmem:[#allocation38_spill] sm:$0xff] %v9236_v9 }
 0x113   : > { %13797 = vst [vmem:[#allocation33_spill] sm:$0xff] %v9217_v25  ;;  %v9238_v26 = vpop.f32.mrf.mxu3  ;;  %v3192_v0 = vmax.f32 %v3190_v54, %v3191_v32  ;;  %v7439_v54 = vld [vmem:[%s8768_s10 + $0x88] sm:$0xff] }
 0x115   : > { %3878 = vrot.lane.b32.xlu0 %v3192_v0, %s8675_s30  ;;  %v1696_v0 = vadd.f32 %v8891_v48, %v8883_v46 }
 0x117   : > { %8401 = vset.pattern.permute.xlu1 %v8755_v2  ;;  %7397 = vmatmul.msk.bf16.gmra.mxu3 %vm1141_vm0, %v7532_v24  ;;  %v9256_v24 = vpop.permute.xlu0 %4409 }
 0x118   : > { %v9228_v51 = vpop.f32.mrf.mxu0  ;;  %13806 = vst [vmem:[#allocation42_spill] sm:$0xff] %v9256_v24  ;;  %v9272_v24 = vperm.slane %v8898_v50, 3 }
 0x119   : > { %8402 = vset.pattern.permute.xlu2 %v8762_v4  ;;  %13799 = vst [vmem:[#allocation35_spill] sm:$0xff] %v9228_v51 }
 0x11a   : > { %v9231_v15 = vpop.f32.mrf.mxu1  ;;  %13809 = vst [vmem:[#allocation45_spill] sm:$0xff] %v9272_v24 }
 0x11b   : > { %13800 = vst [vmem:[#allocation36_spill] sm:$0xff] %v9231_v15  ;;  %7303 = vmatmul.msk.bf16.gmra.mxu0 %vm1141_vm0, %v7438_v61  ;;  %v9251_v61 = vpop.f32.mrf.mxu2  ;;  %v2045_v60 = vpop.f32.mrf.mxu3  ;;  %v7471_v15 = vld [vmem:[%s8768_s10 + $0x188] sm:$0xff] }
 0x11c   : > { %13805 = vst [vmem:[#allocation41_spill] sm:$0xff] %v9251_v61  ;;  %v7533_v61 = vld [vmem:[%s8768_s10 + $0x378] sm:$0xff]  ;;  %v2046_v9 = vadd.f32 %v8891_v48, %v2045_v60 }
 0x11d   : > { %7335 = vmatmul.msk.bf16.gmra.mxu1 %vm1141_vm0, %v7470_v28  ;;  %v7502_v28 = vld [vmem:[%s8768_s10 + $0x280] sm:$0xff] }
 0x11e   : > { %7367 = vmatmul.msk.bf16.gmra.mxu2 %vm1141_vm0, %v7502_v28 }
 0x11f   : > { %4553 = vperm.xlu1 %8401, %v9234_v47  }
 0x120   : > { %v9246_v53 = vpop.f32.mrf.mxu0 }
 0x121   : > { %4559 = vperm.xlu2 %8402, %v9234_v47   ;;  %13803 = vst [vmem:[#allocation39_spill] sm:$0xff] %v9246_v53  ;;  %v1698_v53 = vadd.f32 %v8891_v48, %v8908_v56  ;;  %v1701_v56 = vadd.f32 %v8891_v48, %v8933_v13 }
 0x122   : > { %v9248_v37 = vpop.f32.mrf.mxu1 }
 0x123   : > { %13804 = vst [vmem:[#allocation40_spill] sm:$0xff] %v9248_v37  ;;  %v1895_v51 = vpop.f32.mrf.mxu2  ;;  %v2047_v28 = vpop.f32.mrf.mxu3  ;;  %v2240_v46 = vmax.f32 %v1698_v53, 0.0 }
 0x124   : > { %v2048_v13 = vadd.f32 %v8891_v48, %v2047_v28  ;;  %v7440_v28 = vld [vmem:[%s8768_s10 + $0x90] sm:$0xff] }
 0x125   : > { %v2497_v60 = vmul.f32 %v8913_v58, %v2240_v46 }
 0x127   : > { %8403 = vset.pattern.permute.xlu1 %v8791_v10  ;;  %7398 = vmatmul.msk.bf16.gmra.mxu3 %vm1141_vm0, %v7533_v61  ;;  %v9298_v46 = vadd.f32 %v8923_v63, %v2497_v60 }
 0x128   : > { %v9260_v32 = vpop.f32.mrf.mxu0 }
 0x129   : > { %8404 = vset.pattern.permute.xlu2 %v8755_v2  ;;  %13807 = vst [vmem:[#allocation43_spill] sm:$0xff] %v9260_v32  ;;  %v2239_v32 = vmax.f32 %v1696_v0, 0.0  ;;  %v2379_v0 = vmax.f32 %v2046_v9, 0.0 }
 0x12a   : > { %v9265_v37 = vpop.f32.mrf.mxu1  ;;  %13814 = vst [vmem:[#allocation50_spill] sm:$0xff] %v9298_v46 }
 0x12b   : > { %13808 = vst [vmem:[#allocation44_spill] sm:$0xff] %v9265_v37  ;;  %7304 = vmatmul.msk.bf16.gmra.mxu0 %vm1141_vm0, %v7439_v54  ;;  %v9283_v37 = vpop.permute.xlu0 %4534  ;;  %v1897_v53 = vpop.f32.mrf.mxu2  ;;  %v2636_v9 = vmul.f32 %v8913_v58, %v2379_v0 }
 0x12c   : > { %13811 = vst [vmem:[#allocation47_spill] sm:$0xff] %v9283_v37  ;;  %v2050_v61 = vpop.f32.mrf.mxu3  ;;  %v4310_v0 = vpop.permute.xlu2 %4309 }
 0x12d   : > { %7336 = vmatmul.msk.bf16.gmra.mxu1 %vm1141_vm0, %v7471_v15  ;;  %v2496_v15 = vmul.f32 %v8913_v58, %v2239_v32 }
 0x12e   : > { %7368 = vmatmul.msk.bf16.gmra.mxu2 %vm1141_vm0, %v7503_v36  ;;  %v7472_v36 = vld [vmem:[%s8768_s10 + $0x190] sm:$0xff] }
 0x12f   : > { %4571 = vperm.xlu1 %8403, %v9234_v47   ;;  %v1896_v47 = vadd.f32 %v8891_v48, %v1895_v51  ;;  %v9293_v37 = vadd.f32 %v8923_v63, %v2496_v15  ;;  %v1703_v51 = vadd.f32 %v8891_v48, %v8962_v34 }
 0x130   : > { %v9281_v54 = vpop.f32.mrf.mxu0 }
 0x131   : > { %4578 = vperm.xlu2 %8404, %v9272_v24   ;;  %13810 = vst [vmem:[#allocation46_spill] sm:$0xff] %v9281_v54  ;;  %v2241_v54 = vmax.f32 %v1701_v56, 0.0  ;;  %v2319_v32 = vmax.f32 %v1896_v47, 0.0  ;;  %v9313_v60 = vsel %vm2945_vm1, %v9293_v37, -inf }
 0x132   : > { %v9286_v22 = vpop.f32.mrf.mxu1  ;;  %13813 = vst [vmem:[#allocation49_spill] sm:$0xff] %v9293_v37  ;;  %v1898_v37 = vadd.f32 %v8891_v48, %v1897_v53 }
 0x133   : > { %13812 = vst [vmem:[#allocation48_spill] sm:$0xff] %v9286_v22  ;;  %v2380_v22 = vmax.f32 %v2048_v13, 0.0  ;;  %v2498_v15 = vmul.f32 %v8913_v58, %v2241_v54  ;;  %v9316_v13 = vadd.f32 %v8923_v63, %v2636_v9  ;;  %v2576_v34 = vmul.f32 %v8913_v58, %v2319_v32  ;;  %v1900_v59 = vpop.f32.mrf.mxu2 }
 0x134   : > { %v2051_v9 = vadd.f32 %v8891_v48, %v2050_v61  ;;  %v2242_v32 = vmax.f32 %v1703_v51, 0.0  ;;  %v2052_v27 = vpop.f32.mrf.mxu3 }
 0x135   : > { %v2637_v56 = vmul.f32 %v8913_v58, %v2380_v22  ;;  %13816 = vst [vmem:[#allocation52_spill] sm:$0xff] %v9316_v13  ;;  %v9321_v22 = vsel %vm2945_vm1, %v9298_v46, -inf  ;;  %v9343_v49 = vadd.f32 %v8923_v63, %v2498_v15 }
 0x136   : > { %v3156_v51 = vmax.f32 %v9313_v60, %v9321_v22  ;;  %v2499_v15 = vmul.f32 %v8913_v58, %v2242_v32 }
 0x137   : > { %8405 = vset.pattern.permute.xlu1 %v8762_v4  ;;  %13819 = vst [vmem:[#allocation55_spill] sm:$0xff] %v9343_v49  ;;  %v3157_v60 = vsel %vm2945_vm1, %v9343_v49, -inf }
 0x138   : > { %v9308_v47 = vpop.f32.mrf.mxu0 }
 0x139   : > { %8406 = vset.pattern.permute.xlu2 %v8810_v17  ;;  %13815 = vst [vmem:[#allocation51_spill] sm:$0xff] %v9308_v47  ;;  %v9330_v47 = vadd.f32 %v8923_v63, %v2637_v56  ;;  %v7534_v56 = vld [vmem:[%s8768_s10 + $0x380] sm:$0xff] }
 0x13a   : > { %v1745_v25 = vpop.f32.mrf.mxu1  ;;  %v9323_v54 = vpop.permute.xlu0 %3842  ;;  %7399 = vmatmul.msk.bf16.gmra.mxu3 %vm1141_vm0, %v7534_v56 }
 0x13b   : > { %13817 = vst [vmem:[#allocation53_spill] sm:$0xff] %v9323_v54  ;;  %v4034_v46 = vsel %vm2945_vm1, %v8936_v18, %v9323_v54  ;;  %v4035_v43 = vsel %vm2945_vm1, %v8939_v19, %v9323_v54  ;;  %7305 = vmatmul.msk.bf16.gmra.mxu0 %vm1141_vm0, %v7440_v28  ;;  %v3609_v18 = vsel %vm2945_vm1, %v9316_v13, -inf  ;;  %v9351_v19 = vadd.f32 %v8923_v63, %v2576_v34 }
 0x13c   : > { %13818 = vst [vmem:[#allocation54_spill] sm:$0xff] %v9330_v47  ;;  %v5898_v53 = vmul.f32 %v4304_v29, %v4034_v46  ;;  %v5899_v61 = vmul.f32 %v4310_v0, %v4035_v43  ;;  %v2320_v28 = vmax.f32 %v1898_v37, 0.0  ;;  %v3610_v43 = vsel %vm2945_vm1, %v9330_v47, -inf  ;;  %v7504_v47 = vld [vmem:[%s8768_s10 + $0x290] sm:$0xff] }
 0x13d   : > { %7337 = vmatmul.msk.bf16.gmra.mxu1 %vm1141_vm0, %v7472_v36  ;;  %13820 = vst [vmem:[#allocation56_spill] sm:$0xff] %v9351_v19  ;;  %v2381_v29 = vmax.f32 %v2051_v9, 0.0  ;;  %v2053_v46 = vadd.f32 %v8891_v48, %v2052_v27  ;;  %v1856_v36 = vadd.f32 %v8891_v48, %v8930_v11  ;;  %v1901_v37 = vadd.f32 %v8891_v48, %v1900_v59 }
 0x13e   : > { %v7557_v54 = vpack.c.bf16 %v5899_v61, %v5898_v53  ;;  %v2577_v0 = vmul.f32 %v8913_v58, %v2320_v28  ;;  %v1746_v27 = vadd.f32 %v8891_v48, %v1745_v25  ;;  %v1858_v59 = vadd.f32 %v8891_v48, %v8970_v39  ;;  %7369 = vmatmul.msk.bf16.gmra.mxu2 %vm1141_vm0, %v7504_v47 }
 0x13f   : > { %4584 = vperm.xlu1 %8405, %v9272_v24   ;;  %v2638_v22 = vmul.f32 %v8913_v58, %v2381_v29  ;;  %v2382_v11 = vmax.f32 %v2053_v46, 0.0  ;;  %v3414_v9 = vsel %vm2945_vm1, %v9351_v19, -inf  ;;  %v3611_v32 = vmax.f32 %v3609_v18, %v3610_v43  ;;  %v1902_v29 = vpop.f32.mrf.mxu2 }
 0x140   : > { %7558 = vst [vmem:[%s9366_s7] sm:$0xff] %v7557_v54   ;;  %v9370_v34 = vpop.f32.mrf.mxu0  ;;  %v9379_v56 = vadd.f32 %v8923_v63, %v2577_v0  ;;  %v2321_v61 = vmax.f32 %v1901_v37, 0.0  ;;  %v9387_v46 = vadd.f32 %v8923_v63, %v2499_v15  ;;  %v2303_v39 = vmax.f32 %v1856_v36, 0.0  ;;  %v9392_v0 = vpop.f32.mrf.mxu3 }
 0x141   : > { %4590 = vperm.xlu2 %8406, %v9272_v24   ;;  %v9382_v53 = vadd.f32 %v8923_v63, %v2638_v22  ;;  %v2639_v28 = vmul.f32 %v8913_v58, %v2382_v11  ;;  %v1903_v43 = vadd.f32 %v8891_v48, %v1902_v29  ;;  %v2259_v22 = vmax.f32 %v1746_v27, 0.0 }
 0x142   : > { %13821 = vst [vmem:[#allocation57_spill] sm:$0xff] %v9379_v56  ;;  %v1747_v54 = vpop.f32.mrf.mxu1  ;;  %v3415_v18 = vsel %vm2945_vm1, %v9379_v56, -inf  ;;  %v3158_v29 = vmax.f32 %v3156_v51, %v3157_v60  ;;  %v2304_v19 = vmax.f32 %v1858_v59, 0.0  ;;  %v1861_v27 = vadd.f32 %v8891_v48, %v8999_v8 }
 0x143   : > { %13822 = vst [vmem:[#allocation58_spill] sm:$0xff] %v9382_v53  ;;  %v1748_v25 = vadd.f32 %v8891_v48, %v1747_v54  ;;  %v3612_v37 = vsel %vm2945_vm1, %v9382_v53, -inf  ;;  %v2578_v54 = vmul.f32 %v8913_v58, %v2321_v61  ;;  %v3416_v15 = vmax.f32 %v3414_v9, %v3415_v18  ;;  %v9405_v53 = vpop.permute.xlu0 %4659  ;;  %v9411_v9 = vld [vmem:[%s8774_s14 + $0x10] sm:$0xff]  ;;  %v7441_v61 = vld [vmem:[%s8768_s10 + $0x98] sm:$0xff] }
 0x144   : > { %13823 = vst [vmem:[#allocation59_spill] sm:$0xff] %v9387_v46  ;;  %v3613_v13 = vmax.f32 %v3611_v32, %v3612_v37  ;;  %v9399_v36 = vadd.f32 %v8923_v63, %v2639_v28  ;;  %v2322_v56 = vmax.f32 %v1903_v43, 0.0  ;;  %v2560_v32 = vmul.f32 %v8913_v58, %v2303_v39  ;;  %v7473_v43 = vld [vmem:[%s8768_s10 + $0x198] sm:$0xff]  ;;  %v9429_v37 = vpop.permute.xlu2 %4328 }
 0x145   : > { %v2260_v11 = vmax.f32 %v1748_v25, 0.0  ;;  %13825 = vst [vmem:[#allocation61_spill] sm:$0xff] %v9405_v53  ;;  %v9408_v25 = vadd.f32 %v8923_v63, %v2578_v54  ;;  %v9419_v8 = vperm.slane %v9411_v9, 3  ;;  %v2516_v59 = vmul.f32 %v8913_v58, %v2259_v22 }
 0x146   : > { %13824 = vst [vmem:[#allocation60_spill] sm:$0xff] %v9399_v36  ;;  %v3614_v47 = vsel %vm2945_vm1, %v9399_v36, -inf  ;;  %v2579_v51 = vmul.f32 %v8913_v58, %v2322_v56  ;;  %v3159_v56 = vsel %vm2945_vm1, %v9387_v46, -inf  ;;  %v1863_v54 = vadd.f32 %v8891_v48, %v9017_v35 }
 0x147   : > { %8407 = vset.pattern.permute.xlu1 %v8755_v2  ;;  %13826 = vst [vmem:[#allocation62_spill] sm:$0xff] %v9408_v25  ;;  %v2517_v28 = vmul.f32 %v8913_v58, %v2260_v11  ;;  %v3417_v39 = vsel %vm2945_vm1, %v9408_v25, -inf  ;;  %v3615_v18 = vmax.f32 %v3613_v13, %v3614_v47  ;;  %4784 = vperm.xlu0 %8382, %v9419_v8   ;;  %v2305_v13 = vmax.f32 %v1861_v27, 0.0  ;;  %v9444_v25 = vpop.f32.mrf.mxu2 }
 0x148   : > { %v9422_v60 = vpop.f32.mrf.mxu0  ;;  %v3418_v36 = vmax.f32 %v3416_v15, %v3417_v39  ;;  %v9436_v49 = vadd.f32 %v8923_v63, %v2579_v51  ;;  %v2561_v22 = vmul.f32 %v8913_v58, %v2304_v19  ;;  %v9441_v11 = vperm.slane %v8898_v50, 4  ;;  %13828 = vst [vmem:[#allocation64_spill] sm:$0xff] %v9444_v25  ;;  %v9449_v15 = vpop.f32.mrf.mxu3 }
 0x149   : > { %8408 = vset.pattern.permute.xlu2 %v8762_v4  ;;  %v3616_v51 = vrot.slane %v3615_v18, 4  ;;  %v9452_v39 = vadd.f32 %v8923_v63, %v2516_v59  ;;  %v9455_v19 = vadd.f32 %v8923_v63, %v2517_v28  ;;  %v2306_v46 = vmax.f32 %v1863_v54, 0.0 }
 0x14a   : > { %v1750_v53 = vpop.f32.mrf.mxu1  ;;  %13827 = vst [vmem:[#allocation63_spill] sm:$0xff] %v9436_v49  ;;  %v3419_v35 = vsel %vm2945_vm1, %v9436_v49, -inf  ;;  %v9463_v24 = vadd.f32 %v8923_v63, %v2561_v22  ;;  %v2562_v59 = vmul.f32 %v8913_v58, %v2305_v13 }
 0x14b   : > { %v1751_v47 = vadd.f32 %v8891_v48, %v1750_v53  ;;  %7306 = vmatmul.msk.bf16.gmra.mxu0 %vm1141_vm0, %v7441_v61  ;;  %13829 = vst [vmem:[#allocation65_spill] sm:$0xff] %v9452_v39  ;;  %v3420_v27 = vmax.f32 %v3418_v36, %v3419_v35  ;;  %v7535_v48 = vld [vmem:[%s8768_s10 + $0x388] sm:$0xff]  ;;  %v3160_v53 = vmax.f32 %v3158_v29, %v3159_v56  ;;  %v9476_v56 = vpop.permute.xlu0 %3938  ;;  %v3220_v54 = vsel %vm2945_vm1, %v9455_v19, -inf }
 0x14c   : > { %13830 = vst [vmem:[#allocation66_spill] sm:$0xff] %v9455_v19  ;;  %v9460_v61 = vadd.f32 %v8923_v63, %v2560_v32  ;;  %v3617_v49 = vmax.f32 %v3615_v18, %v3616_v51  ;;  %7400 = vmatmul.msk.bf16.gmra.mxu3 %vm1141_vm0, %v7535_v48  ;;  %v3219_v18 = vsel %vm2945_vm1, %v9452_v39, -inf  ;;  %v2563_v35 = vmul.f32 %v8913_v58, %v2306_v46 }
 0x14d   : > { %v2261_v50 = vmax.f32 %v1751_v47, 0.0  ;;  %7338 = vmatmul.msk.bf16.gmra.mxu1 %vm1141_vm0, %v7473_v43  ;;  %13832 = vst [vmem:[#allocation68_spill] sm:$0xff] %v9463_v24  ;;  %v3421_v36 = vrot.slane %v3420_v27, 4  ;;  %v9469_v43 = vpop.permute.xlu1 %4321  ;;  %v9483_v47 = vpop.permute.xlu2 %4340  ;;  %v3161_v51 = vrot.slane %v3160_v53, 4  ;;  %v9491_v19 = vadd.f32 %v8923_v63, %v2562_v59  ;;  %v7505_v59 = vld [vmem:[%s8768_s10 + $0x298] sm:$0xff] }
 0x14e   : > { %13831 = vst [vmem:[#allocation67_spill] sm:$0xff] %v9460_v61  ;;  %v3618_v29 = vrot.slane %v3617_v49, 2  ;;  %v3221_v46 = vmax.f32 %v3219_v18, %v3220_v54  ;;  %v9507_v39 = vadd.f32 %v8923_v63, %v2563_v35  ;;  %v9515_v18 = vld [vmem:[%s13488_s3 + $0x1] ss:$0 sm:$0xff]  ;;  %7370 = vmatmul.msk.bf16.gmra.mxu2 %vm1141_vm0, %v7505_v59 }
 0x14f   : > { %4603 = vperm.xlu1 %8407, %v9441_v11   ;;  %v2518_v28 = vmul.f32 %v8913_v58, %v2261_v50  ;;  %13833 = vst [vmem:[#allocation69_spill] sm:$0xff] %v9469_v43  ;;  %v3422_v13 = vmax.f32 %v3420_v27, %v3421_v36  ;;  %v3362_v43 = vsel %vm2945_vm1, %v9460_v61, -inf  ;;  %v9496_v27 = vld [vmem:[%s13488_s3] ss:$0 sm:$0xff]  ;;  %v9499_v58 = vpop.f32.mrf.mxu2  ;;  %v3162_v25 = vmax.f32 %v3160_v53, %v3161_v51  ;;  %v9524_v51 = vld [vmem:[%s13488_s3 + $0x2] ss:$0 sm:$0xff] }
 0x150   : > { %v9472_v32 = vpop.f32.mrf.mxu0  ;;  %13835 = vst [vmem:[#allocation71_spill] sm:$0xff] %v9476_v56  ;;  %v3619_v48 = vmax.f32 %v3617_v49, %v3618_v29  ;;  %v3363_v56 = vsel %vm2945_vm1, %v9463_v24, -inf  ;;  %v9501_v49 = vpop.f32.mrf.mxu3 }
 0x151   : > { %4609 = vperm.xlu2 %8408, %v9441_v11   ;;  %13834 = vst [vmem:[#allocation70_spill] sm:$0xff] %v9472_v32  ;;  %v9481_v22 = vadd.f32 %v8923_v63, %v2518_v28  ;;  %v3423_v24 = vrot.slane %v3422_v13, 2  ;;  %v7442_v63 = vld [vmem:[%s8768_s10 + $0xa0] sm:$0xff] }
 0x152   : > { %13837 = vst [vmem:[#allocation73_spill] sm:$0xff] %v9483_v47  ;;  %v1752_v50 = vpop.f32.mrf.mxu1  ;;  %v3620_v61 = vrot.slane %v3619_v48, 1  ;;  %v3364_v47 = vmax.f32 %v3362_v43, %v3363_v56 }
 0x153   : > { %13836 = vst [vmem:[#allocation72_spill] sm:$0xff] %v9481_v22  ;;  %v1753_v28 = vadd.f32 %v9496_v27, %v1752_v50  ;;  %v3222_v36 = vsel %vm2945_vm1, %v9481_v22, -inf  ;;  %v3365_v50 = vsel %vm2945_vm1, %v9491_v19, -inf  ;;  %v3424_v43 = vmax.f32 %v3422_v13, %v3423_v24 }
 0x154   : > { %13838 = vst [vmem:[#allocation74_spill] sm:$0xff] %v9491_v19  ;;  %v3223_v56 = vmax.f32 %v3221_v46, %v3222_v36  ;;  %v3366_v24 = vmax.f32 %v3364_v47, %v3365_v50  ;;  %v3163_v13 = vrot.slane %v3162_v25, 2  ;;  %v3367_v36 = vsel %vm2945_vm1, %v9507_v39, -inf }
 0x155   : > { %13839 = vst [vmem:[#allocation75_spill] sm:$0xff] %v9499_v58  ;;  %v2262_v29 = vmax.f32 %v1753_v28, 0.0  ;;  %v3621_v28 = vmax.f32 %v3619_v48, %v3620_v61  ;;  %v4335_v53 = vpop.permute.xlu1 %4334  ;;  %v7474_v61 = vld [vmem:[%s8768_s10 + $0x1a0] sm:$0xff]  ;;  %v9531_v48 = vpop.permute.xlu2 %4359  ;;  %v3425_v22 = vrot.slane %v3424_v43, 1 }
 0x156   : > { %13840 = vst [vmem:[#allocation76_spill] sm:$0xff] %v9507_v39  ;;  %v3164_v58 = vmax.f32 %v3162_v25, %v3163_v13  ;;  %v1706_v25 = vadd.f32 %v9496_v27, %v8995_v1 }
 0x157   : > { %8409 = vset.pattern.permute.xlu1 %v8810_v17  ;;  %v2519_v54 = vmul.f32 %v9515_v18, %v2262_v29  ;;  %3944 = vrot.lane.b32.xlu0 %v3621_v28, %s8675_s30  ;;  %13842 = vst [vmem:[#allocation78_spill] sm:$0xff] %v9531_v48 }
 0x158   : > { %v1595_v35 = vpop.f32.mrf.mxu0  ;;  %v9550_v39 = vpop.f32.mrf.mxu3 }
 0x159   : > { %8410 = vset.pattern.permute.xlu2 %v8791_v10  ;;  %v9527_v19 = vadd.f32 %v9524_v51, %v2519_v54  ;;  %v9541_v54 = vpop.f32.mrf.mxu2 }
 0x15a   : > { %v9533_v46 = vpop.f32.mrf.mxu1  ;;  %v9537_v29 = vpop.permute.xlu0 %3844  ;;  %13845 = vst [vmem:[#allocation81_spill] sm:$0xff] %v9541_v54  ;;  %v3368_v54 = vmax.f32 %v3366_v24, %v3367_v36  ;;  %v2243_v36 = vmax.f32 %v1706_v25, 0.0 }
 0x15b   : > { %13841 = vst [vmem:[#allocation77_spill] sm:$0xff] %v9527_v19  ;;  %v3224_v59 = vsel %vm2945_vm1, %v9527_v19, -inf  ;;  %v4038_v28 = vsel %vm2945_vm1, %v9033_v5, %v9537_v29  ;;  %v4039_v47 = vsel %vm2945_vm1, %v9036_v6, %v9537_v29  ;;  %7307 = vmatmul.msk.bf16.gmra.mxu0 %vm1141_vm0, %v7442_v63  ;;  %v3426_v5 = vmax.f32 %v3424_v43, %v3425_v22 }
 0x15c   : > { %13843 = vst [vmem:[#allocation79_spill] sm:$0xff] %v9533_v46  ;;  %v3225_v50 = vmax.f32 %v3223_v56, %v3224_v59  ;;  %v5902_v48 = vmul.f32 %v9429_v37, %v4038_v28  ;;  %v5903_v19 = vmul.f32 %v4335_v53, %v4039_v47  ;;  %v7536_v46 = vld [vmem:[%s8768_s10 + $0x390] sm:$0xff]  ;;  %v1596_v63 = vadd.f32 %v9496_v27, %v1595_v35 }
 0x15d   : > { %13844 = vst [vmem:[#allocation80_spill] sm:$0xff] %v9537_v29  ;;  %7339 = vmatmul.msk.bf16.gmra.mxu1 %vm1141_vm0, %v7474_v61  ;;  %7401 = vmatmul.msk.bf16.gmra.mxu3 %vm1141_vm0, %v7536_v46  ;;  %v3165_v43 = vrot.slane %v3164_v58, 1  ;;  %v3369_v53 = vrot.slane %v3368_v54, 4  ;;  %v9568_v35 = vpop.permute.xlu1 %4353  ;;  %v7506_v46 = vld [vmem:[%s8768_s10 + $0x2a0] sm:$0xff] }
 0x15e   : > { %v7567_v32 = vpack.c.bf16 %v5903_v19, %v5902_v48  ;;  %v3226_v6 = vrot.slane %v3225_v50, 4  ;;  %v9563_v19 = vpop.permute.xlu2 %4371  ;;  %13847 = vst [vmem:[#allocation83_spill] sm:$0xff] %v9568_v35  ;;  %v2199_v48 = vmax.f32 %v1596_v63, 0.0  ;;  %7371 = vmatmul.msk.bf16.gmra.mxu2 %vm1141_vm0, %v7506_v46  ;;  %v7443_v63 = vld [vmem:[%s8768_s10 + $0xa8] sm:$0xff] }
 0x15f   : > { %4615 = vperm.xlu1 %8409, %v9441_v11   ;;  %3914 = vrot.lane.b32.xlu0 %v3426_v5, %s8675_s30  ;;  %13846 = vst [vmem:[#allocation82_spill] sm:$0xff] %v9563_v19  ;;  %v3166_v59 = vmax.f32 %v3164_v58, %v3165_v43  ;;  %v3370_v28 = vmax.f32 %v3368_v54, %v3369_v53  ;;  %v7475_v54 = vld [vmem:[%s8768_s10 + $0x1a8] sm:$0xff] }
 0x160   : > { %8195 = vst [vmem:[%s9366_s7 + $0x10] sm:$0xff] %v7567_v32   ;;  %v1597_v56 = vpop.f32.mrf.mxu0  ;;  %v3227_v37 = vmax.f32 %v3225_v50, %v3226_v6  ;;  %v9574_v13 = vpop.f32.mrf.mxu3  ;;  %v1711_v5 = vadd.f32 %v9496_v27, %v9029_v62 }
 0x161   : > { %4621 = vperm.xlu2 %8410, %v9441_v11   ;;  %v1598_v22 = vadd.f32 %v9496_v27, %v1597_v56  ;;  %v1708_v11 = vadd.f32 %v9496_v27, %v9015_v31  ;;  %v9572_v32 = vpop.f32.mrf.mxu2  ;;  %v2456_v31 = vmul.f32 %v9515_v18, %v2199_v48 }
 0x162   : > { %v9566_v61 = vpop.f32.mrf.mxu1  ;;  %v3228_v1 = vrot.slane %v3227_v37, 2 }
 0x163   : > { %v2200_v24 = vmax.f32 %v1598_v22, 0.0  ;;  %v2244_v50 = vmax.f32 %v1708_v11, 0.0  ;;  %v3371_v22 = vrot.slane %v3370_v28, 2 }
 0x164   : > { %v3229_v47 = vmax.f32 %v3227_v37, %v3228_v1  ;;  %v2500_v37 = vmul.f32 %v9515_v18, %v2243_v36  ;;  %v1713_v1 = vadd.f32 %v9496_v27, %v9055_v30  ;;  %v9601_v36 = vadd.f32 %v9524_v51, %v2456_v31  ;;  %v7537_v30 = vld [vmem:[%s8768_s10 + $0x398] sm:$0xff] }
 0x165   : > { %v2457_v6 = vmul.f32 %v9515_v18, %v2200_v24  ;;  %v9593_v11 = vpop.permute.xlu1 %4365  ;;  %v2501_v48 = vmul.f32 %v9515_v18, %v2244_v50  ;;  %v2245_v24 = vmax.f32 %v1711_v5, 0.0 }
 0x166   : > { %v3230_v56 = vrot.slane %v3229_v47, 1  ;;  %v9588_v62 = vpop.permute.xlu2 %4390  ;;  %13850 = vst [vmem:[#allocation86_spill] sm:$0xff] %v9593_v11  ;;  %v9619_v5 = vadd.f32 %v9524_v51, %v2500_v37  ;;  %v2246_v29 = vmax.f32 %v1713_v1, 0.0 }
 0x167   : > { %8411 = vset.pattern.permute.xlu1 %v8762_v4  ;;  %13848 = vst [vmem:[#allocation84_spill] sm:$0xff] %v9588_v62 }
 0x168   : > { %3874 = vrot.lane.b32.xlu1 %v3166_v59, %s8675_s30  ;;  %v1600_v58 = vpop.f32.mrf.mxu0  ;;  %v3231_v53 = vmax.f32 %v3229_v47, %v3230_v56  ;;  %v9604_v59 = vadd.f32 %v9524_v51, %v2457_v6  ;;  %v9608_v47 = vld [vmem:[%s8774_s14 + $0x8] sm:$0xff]  ;;  %v9614_v50 = vpop.f32.mrf.mxu3  ;;  %13853 = vst [vmem:[#allocation89_spill] sm:$0xff] %v9619_v5  ;;  %v3372_v6 = vmax.f32 %v3370_v28, %v3371_v22  ;;  %v3167_v22 = vsel %vm2945_vm1, %v9619_v5, -inf }
 0x169   : > { %8412 = vset.pattern.permute.xlu2 %v8810_v17  ;;  %v1601_v25 = vadd.f32 %v9496_v27, %v1600_v58  ;;  %v9598_v46 = vpop.f32.mrf.mxu2  ;;  %v9611_v56 = vperm.slane %v9608_v47, 5 }
 0x16a   : > { %v9591_v43 = vpop.f32.mrf.mxu1  ;;  %13851 = vst [vmem:[#allocation87_spill] sm:$0xff] %v9598_v46  ;;  %3884 = vrot.lane.b32.xlu0 %v3231_v53, %s8675_s30  ;;  %v3024_v53 = vsel %vm2945_vm1, %v9601_v36, -inf  ;;  %v3373_v1 = vrot.slane %v3372_v6, 1  ;;  %v2503_v46 = vmul.f32 %v9515_v18, %v2246_v29 }
 0x16b   : > { %13849 = vst [vmem:[#allocation85_spill] sm:$0xff] %v9591_v43  ;;  %v2201_v58 = vmax.f32 %v1601_v25, 0.0  ;;  %7308 = vmatmul.msk.bf16.gmra.mxu0 %vm1141_vm0, %v7443_v63  ;;  %v9623_v63 = vadd.f32 %v9524_v51, %v2501_v48  ;;  %v2502_v25 = vmul.f32 %v9515_v18, %v2245_v24 }
 0x16c   : > { %13852 = vst [vmem:[#allocation88_spill] sm:$0xff] %v9611_v56 }
 0x16d   : > { %7340 = vmatmul.msk.bf16.gmra.mxu1 %vm1141_vm0, %v7475_v54  ;;  %v2458_v31 = vmul.f32 %v9515_v18, %v2201_v58  ;;  %7402 = vmatmul.msk.bf16.gmra.mxu3 %vm1141_vm0, %v7537_v30  ;;  %v3025_v54 = vsel %vm2945_vm1, %v9604_v59, -inf  ;;  %v3168_v30 = vsel %vm2945_vm1, %v9623_v63, -inf  ;;  %v9648_v62 = vadd.f32 %v9524_v51, %v2502_v25  ;;  %v7507_v25 = vld [vmem:[%s8768_s10 + $0x2a8] sm:$0xff] }
 0x16e   : > { %v9638_v48 = vpop.permute.xlu2 %4403  ;;  %v3026_v19 = vmax.f32 %v3024_v53, %v3025_v54  ;;  %v3374_v53 = vmax.f32 %v3372_v6, %v3373_v1  ;;  %v3169_v54 = vmax.f32 %v3167_v22, %v3168_v30  ;;  %7372 = vmatmul.msk.bf16.gmra.mxu2 %vm1141_vm0, %v7507_v25 }
 0x16f   : > { %v9632_v37 = vadd.f32 %v9524_v51, %v2458_v31  ;;  %13855 = vst [vmem:[#allocation91_spill] sm:$0xff] %v9638_v48  ;;  %v9645_v31 = vpop.permute.xlu1 %4384  ;;  %v2026_v48 = vadd.f32 %v9496_v27, %v9085_v44  ;;  %v9666_v44 = vadd.f32 %v9524_v51, %v2503_v46  ;;  %v7476_v46 = vld [vmem:[%s8768_s10 + $0x1b0] sm:$0xff] }
 0x170   : > { %4634 = vperm.xlu1 %8411, %v9611_v56   ;;  %v1602_v28 = vpop.f32.mrf.mxu0  ;;  %13857 = vst [vmem:[#allocation93_spill] sm:$0xff] %v9645_v31  ;;  %v9659_v31 = vpop.f32.mrf.mxu3 }
 0x171   : > { %13854 = vst [vmem:[#allocation90_spill] sm:$0xff] %v9632_v37  ;;  %4640 = vperm.xlu2 %8412, %v9611_v56   ;;  %v1603_v24 = vadd.f32 %v9496_v27, %v1602_v28  ;;  %v9651_v11 = vpop.f32.mrf.mxu2  ;;  %v2028_v28 = vadd.f32 %v9496_v27, %v9115_v38  ;;  %v3172_v1 = vsel %vm2945_vm1, %v9666_v44, -inf }
 0x172   : > { %v9641_v58 = vpop.f32.mrf.mxu1  ;;  %13858 = vst [vmem:[#allocation94_spill] sm:$0xff] %v9648_v62 }
 0x173   : > { %13856 = vst [vmem:[#allocation92_spill] sm:$0xff] %v9641_v58  ;;  %v3027_v58 = vsel %vm2945_vm1, %v9632_v37, -inf  ;;  %v2202_v35 = vmax.f32 %v1603_v24, 0.0  ;;  %v2371_v37 = vmax.f32 %v2026_v48, 0.0  ;;  %v2372_v43 = vmax.f32 %v2028_v28, 0.0 }
 0x174   : > { %13859 = vst [vmem:[#allocation95_spill] sm:$0xff] %v9651_v11  ;;  %v3170_v11 = vsel %vm2945_vm1, %v9648_v62, -inf  ;;  %v3028_v38 = vmax.f32 %v3026_v19, %v3027_v58  ;;  %v2031_v24 = vadd.f32 %v9496_v27, %v9136_v42  ;;  %v7540_v62 = vld [vmem:[%s8768_s10 + $0x3b0] sm:$0xff] }
 0x175   : > { %v2459_v29 = vmul.f32 %v9515_v18, %v2202_v35  ;;  %13860 = vst [vmem:[#allocation96_spill] sm:$0xff] %v9666_v44  ;;  %v7444_v35 = vld [vmem:[%s8768_s10 + $0xb0] sm:$0xff]  ;;  %v3171_v48 = vmax.f32 %v3169_v54, %v3170_v11  ;;  %v2628_v25 = vmul.f32 %v9515_v18, %v2371_v37  ;;  %v7538_v54 = vld [vmem:[%s8768_s10 + $0x3a0] sm:$0xff] }
 0x176   : > { %v9680_v22 = vpop.permute.xlu2 %4421 }
 0x177   : > { %v9672_v5 = vadd.f32 %v9524_v51, %v2459_v29  ;;  %13863 = vst [vmem:[#allocation99_spill] sm:$0xff] %v9680_v22  ;;  %v9689_v58 = vpop.permute.xlu1 %4396  ;;  %v2629_v29 = vmul.f32 %v9515_v18, %v2372_v43  ;;  %v2373_v22 = vmax.f32 %v2031_v24, 0.0 }
 0x178   : > { %8413 = vset.pattern.permute.xlu1 %v8791_v10  ;;  %v9677_v6 = vpop.f32.mrf.mxu0  ;;  %13865 = vst [vmem:[#allocation101_spill] sm:$0xff] %v9689_v58 }
 0x179   : > { %13861 = vst [vmem:[#allocation97_spill] sm:$0xff] %v9672_v5  ;;  %8414 = vset.pattern.permute.xlu2 %v8755_v2  ;;  %v3029_v19 = vsel %vm2945_vm1, %v9672_v5, -inf  ;;  %v9691_v28 = vpop.f32.mrf.mxu2  ;;  %v2033_v5 = vadd.f32 %v9496_v27, %v9156_v21  ;;  %v9706_v37 = vadd.f32 %v9524_v51, %v2629_v29  ;;  %v2630_v43 = vmul.f32 %v9515_v18, %v2373_v22 }
 0x17a   : > { %13862 = vst [vmem:[#allocation98_spill] sm:$0xff] %v9677_v6  ;;  %3906 = vrot.lane.b32.xlu2 %v3374_v53, %s8675_s30  ;;  %v9685_v42 = vpop.f32.mrf.mxu1  ;;  %v3030_v30 = vmax.f32 %v3028_v38, %v3029_v19  ;;  %v9698_v53 = vpop.f32.mrf.mxu3  ;;  %v9703_v19 = vadd.f32 %v9524_v51, %v2628_v25 }
 0x17b   : > { %13864 = vst [vmem:[#allocation100_spill] sm:$0xff] %v9685_v42  ;;  %7309 = vmatmul.msk.bf16.gmra.mxu0 %vm1141_vm0, %v7444_v35  ;;  %v3173_v42 = vmax.f32 %v3171_v48, %v3172_v1  ;;  %v2374_v24 = vmax.f32 %v2033_v5, 0.0  ;;  %v3584_v29 = vsel %vm2945_vm1, %v9706_v37, -inf }
 0x17c   : > { %13866 = vst [vmem:[#allocation102_spill] sm:$0xff] %v9691_v28  ;;  %v3031_v11 = vrot.slane %v3030_v30, 4  ;;  %v3583_v25 = vsel %vm2945_vm1, %v9703_v19, -inf  ;;  %v7478_v28 = vld [vmem:[%s8768_s10 + $0x1c0] sm:$0xff] }
 0x17d   : > { %7341 = vmatmul.msk.bf16.gmra.mxu1 %vm1141_vm0, %v7476_v46  ;;  %13867 = vst [vmem:[#allocation103_spill] sm:$0xff] %v9703_v19  ;;  %7403 = vmatmul.msk.bf16.gmra.mxu3 %vm1141_vm0, %v7538_v54  ;;  %v3174_v22 = vrot.slane %v3173_v42, 4  ;;  %v2631_v54 = vmul.f32 %v9515_v18, %v2374_v24 }
 0x17e   : > { %v3032_v38 = vmax.f32 %v3030_v30, %v3031_v11  ;;  %13868 = vst [vmem:[#allocation104_spill] sm:$0xff] %v9706_v37  ;;  %v9713_v46 = vpop.permute.xlu2 %4434  ;;  %v9727_v11 = vadd.f32 %v9524_v51, %v2630_v43  ;;  %v7445_v37 = vld [vmem:[%s8768_s10 + $0xb8] sm:$0xff] }
 0x17f   : > { %13870 = vst [vmem:[#allocation106_spill] sm:$0xff] %v9713_v46  ;;  %v9718_v1 = vpop.permute.xlu1 %4415  ;;  %v9734_v19 = vadd.f32 %v9524_v51, %v2631_v54  ;;  %v7477_v43 = vld [vmem:[%s8768_s10 + $0x1b8] sm:$0xff]  ;;  %v1558_v54 = vadd.f32 %v9496_v27, %v9080_v3 }
 0x180   : > { %4646 = vperm.xlu1 %8413, %v9611_v56   ;;  %v9711_v21 = vpop.f32.mrf.mxu0  ;;  %v3033_v35 = vrot.slane %v3032_v38, 2  ;;  %13872 = vst [vmem:[#allocation108_spill] sm:$0xff] %v9718_v1  ;;  %v7508_v1 = vld [vmem:[%s8768_s10 + $0x2b0] sm:$0xff] }
 0x181   : > { %13869 = vst [vmem:[#allocation105_spill] sm:$0xff] %v9711_v21  ;;  %v9720_v5 = vpop.f32.mrf.mxu2  ;;  %v3586_v21 = vsel %vm2945_vm1, %v9727_v11, -inf  ;;  %7373 = vmatmul.msk.bf16.gmra.mxu2 %vm1141_vm0, %v7508_v1  ;;  %v3588_v1 = vsel %vm2945_vm1, %v9734_v19, -inf }
 0x182   : > { %4653 = vperm.xlu2 %8414, %v9041_v16   ;;  %v9716_v48 = vpop.f32.mrf.mxu1  ;;  %v3034_v30 = vmax.f32 %v3032_v38, %v3033_v35  ;;  %13873 = vst [vmem:[#allocation109_spill] sm:$0xff] %v9720_v5  ;;  %v2075_v56 = vpop.f32.mrf.mxu3  ;;  %v3585_v38 = vmax.f32 %v3583_v25, %v3584_v29  ;;  %v1556_v29 = vadd.f32 %v9496_v27, %v9068_v55 }
 0x183   : > { %13871 = vst [vmem:[#allocation107_spill] sm:$0xff] %v9716_v48  ;;  %v3175_v48 = vmax.f32 %v3173_v42, %v3174_v22 }
 0x184   : > { %13874 = vst [vmem:[#allocation110_spill] sm:$0xff] %v9727_v11  ;;  %v3035_v46 = vrot.slane %v3034_v30, 1  ;;  %v2076_v11 = vadd.f32 %v9496_v27, %v2075_v56 }
 0x185   : > { %13875 = vst [vmem:[#allocation111_spill] sm:$0xff] %v9734_v19  ;;  %v3176_v22 = vrot.slane %v3175_v48, 2 }
 0x186   : > { %v3036_v35 = vmax.f32 %v3034_v30, %v3035_v46  ;;  %v9743_v24 = vpop.permute.xlu2 %4453  ;;  %v3587_v30 = vmax.f32 %v3585_v38, %v3586_v21 }
 0x187   : > { %v9748_v46 = vpop.permute.xlu1 %4428  ;;  %v3177_v38 = vmax.f32 %v3175_v48, %v3176_v22 }
 0x188   : > { %8415 = vset.pattern.permute.xlu1 %v8810_v17  ;;  %v9738_v5 = vpop.f32.mrf.mxu0  ;;  %3854 = vrot.lane.b32.xlu0 %v3036_v35, %s8675_s30  ;;  %13878 = vst [vmem:[#allocation114_spill] sm:$0xff] %v9748_v46  ;;  %v7539_v46 = vld [vmem:[%s8768_s10 + $0x3a8] sm:$0xff]  ;;  %v3589_v21 = vmax.f32 %v3587_v30, %v3588_v1 }
 0x189   : > { %13876 = vst [vmem:[#allocation112_spill] sm:$0xff] %v9738_v5  ;;  %v1925_v25 = vpop.f32.mrf.mxu2  ;;  %v2184_v5 = vmax.f32 %v1558_v54, 0.0  ;;  %v3178_v30 = vrot.slane %v3177_v38, 1 }
 0x18a   : > { %8416 = vset.pattern.permute.xlu2 %v8791_v10  ;;  %v9746_v42 = vpop.f32.mrf.mxu1  ;;  %v2077_v35 = vpop.f32.mrf.mxu3  ;;  %v3590_v48 = vrot.slane %v3589_v21, 4  ;;  %v1926_v1 = vadd.f32 %v9496_v27, %v1925_v25 }
 0x18b   : > { %13877 = vst [vmem:[#allocation113_spill] sm:$0xff] %v9746_v42  ;;  %7310 = vmatmul.msk.bf16.gmra.mxu0 %vm1141_vm0, %v7445_v37  ;;  %v2183_v42 = vmax.f32 %v1556_v29, 0.0  ;;  %v2391_v37 = vmax.f32 %v2076_v11, 0.0  ;;  %v2078_v19 = vadd.f32 %v9496_v27, %v2077_v35  ;;  %v7509_v11 = vld [vmem:[%s8768_s10 + $0x2b8] sm:$0xff] }
 0x18c   : > { %v2331_v35 = vmax.f32 %v1926_v1, 0.0 }
 0x18d   : > { %7342 = vmatmul.msk.bf16.gmra.mxu1 %vm1141_vm0, %v7477_v43  ;;  %7404 = vmatmul.msk.bf16.gmra.mxu3 %vm1141_vm0, %v7539_v46  ;;  %v2440_v29 = vmul.f32 %v9515_v18, %v2183_v42  ;;  %v2441_v46 = vmul.f32 %v9515_v18, %v2184_v5  ;;  %v7446_v42 = vld [vmem:[%s8768_s10 + $0xc0] sm:$0xff] }
 0x18e   : > { %v9764_v3 = vpop.permute.xlu2 %4465 }
 0x18f   : > { %13880 = vst [vmem:[#allocation116_spill] sm:$0xff] %v9764_v3  ;;  %v9769_v56 = vpop.permute.xlu1 %4446  ;;  %v1561_v3 = vadd.f32 %v9496_v27, %v9099_v20  ;;  %v9780_v58 = vadd.f32 %v9524_v51, %v2440_v29  ;;  %v9783_v5 = vadd.f32 %v9524_v51, %v2441_v46 }
 0x190   : > { %4665 = vperm.xlu1 %8415, %v9041_v16   ;;  %v9762_v55 = vpop.f32.mrf.mxu0  ;;  %13882 = vst [vmem:[#allocation118_spill] sm:$0xff] %v9769_v56  ;;  %v3179_v56 = vmax.f32 %v3177_v38, %v3178_v30 }
 0x191   : > { %13879 = vst [vmem:[#allocation115_spill] sm:$0xff] %v9762_v55  ;;  %v1927_v22 = vpop.f32.mrf.mxu2  ;;  %v2392_v55 = vmax.f32 %v2078_v19, 0.0  ;;  %7374 = vmatmul.msk.bf16.gmra.mxu2 %vm1141_vm0, %v7509_v11  ;;  %v2185_v38 = vmax.f32 %v1561_v3, 0.0  ;;  %v9807_v1 = vsel %vm2945_vm1, %v9780_v58, -inf  ;;  %v9815_v3 = vperm.slane %v9608_v47, 7 }
 0x192   : > { %4671 = vperm.xlu2 %8416, %v9041_v16   ;;  %v9767_v43 = vpop.f32.mrf.mxu1  ;;  %v2080_v54 = vpop.f32.mrf.mxu3  ;;  %v2648_v16 = vmul.f32 %v9515_v18, %v2391_v37  ;;  %13883 = vst [vmem:[#allocation119_spill] sm:$0xff] %v9783_v5  ;;  %v2588_v11 = vmul.f32 %v9515_v18, %v2331_v35  ;;  %v1928_v35 = vadd.f32 %v9496_v27, %v1927_v22 }
 0x193   : > { %13881 = vst [vmem:[#allocation117_spill] sm:$0xff] %v9767_v43  ;;  %v3591_v43 = vmax.f32 %v3589_v21, %v3590_v48  ;;  %v2649_v37 = vmul.f32 %v9515_v18, %v2392_v55  ;;  %v2081_v29 = vadd.f32 %v9496_v27, %v2080_v54  ;;  %v2442_v47 = vmul.f32 %v9515_v18, %v2185_v38 }
 0x194   : > { %v9796_v19 = vadd.f32 %v9524_v51, %v2648_v16  ;;  %v9811_v16 = vsel %vm2945_vm1, %v9783_v5, -inf  ;;  %13888 = vst [vmem:[#allocation124_spill] sm:$0xff] %v9815_v3  ;;  %v9844_v22 = vadd.f32 %v9524_v51, %v2588_v11  ;;  %v2332_v38 = vmax.f32 %v1928_v35, 0.0 }
 0x195   : > { %v3592_v48 = vrot.slane %v3591_v43, 2  ;;  %v9802_v55 = vadd.f32 %v9524_v51, %v2649_v37  ;;  %v2393_v37 = vmax.f32 %v2081_v29, 0.0 }
 0x196   : > { %v9792_v20 = vpop.permute.xlu2 %4484  ;;  %13886 = vst [vmem:[#allocation122_spill] sm:$0xff] %v9796_v19  ;;  %v3648_v54 = vsel %vm2945_vm1, %v9796_v19, -inf  ;;  %v2589_v11 = vmul.f32 %v9515_v18, %v2332_v38 }
 0x197   : > { %13885 = vst [vmem:[#allocation121_spill] sm:$0xff] %v9792_v20  ;;  %v9798_v30 = vpop.permute.xlu1 %4459  ;;  %v3649_v20 = vsel %vm2945_vm1, %v9802_v55, -inf  ;;  %v3593_v44 = vmax.f32 %v3591_v43, %v3592_v48  ;;  %v2650_v19 = vmul.f32 %v9515_v18, %v2393_v37  ;;  %v2036_v48 = vadd.f32 %v9496_v27, %v9185_v23 }
 0x198   : > { %8417 = vset.pattern.permute.xlu1 %v8755_v2  ;;  %v9787_v25 = vpop.f32.mrf.mxu0  ;;  %13887 = vst [vmem:[#allocation123_spill] sm:$0xff] %v9802_v55  ;;  %v9870_v38 = vadd.f32 %v9524_v51, %v2589_v11 }
 0x199   : > { %13884 = vst [vmem:[#allocation120_spill] sm:$0xff] %v9787_v25  ;;  %v1930_v46 = vpop.f32.mrf.mxu2 }
 0x19a   : > { %8418 = vset.pattern.permute.xlu2 %v8762_v4  ;;  %v1775_v21 = vpop.f32.mrf.mxu1  ;;  %13890 = vst [vmem:[#allocation126_spill] sm:$0xff] %v9844_v22  ;;  %v1931_v37 = vadd.f32 %v9496_v27, %v1930_v46  ;;  %v3454_v11 = vsel %vm2945_vm1, %v9870_v38, -inf }
 0x19b   : > { %3876 = vrot.lane.b32.xlu2 %v3179_v56, %s8675_s30  ;;  %7311 = vmatmul.msk.bf16.gmra.mxu0 %vm1141_vm0, %v7446_v42  ;;  %v2082_v56 = vpop.f32.mrf.mxu3  ;;  %v1776_v29 = vadd.f32 %v9496_v27, %v1775_v21  ;;  %v9839_v42 = vadd.f32 %v9496_v27, %v9113_v33  ;;  %v2038_v21 = vadd.f32 %v9496_v27, %v9207_v7 }
 0x19c   : > { %v2083_v25 = vadd.f32 %v9496_v27, %v2082_v56  ;;  %13895 = vst [vmem:[#allocation131_spill] sm:$0xff] %v9870_v38 }
 0x19d   : > { %7343 = vmatmul.msk.bf16.gmra.mxu1 %vm1141_vm0, %v7478_v28  ;;  %v9831_v28 = vadd.f32 %v9496_v27, %v9127_v12  ;;  %7405 = vmatmul.msk.bf16.gmra.mxu3 %vm1141_vm0, %v7540_v62  ;;  %v3650_v12 = vmax.f32 %v3648_v54, %v3649_v20  ;;  %v9853_v62 = vadd.f32 %v9524_v51, %v2650_v19  ;;  %v3594_v20 = vrot.slane %v3593_v44, 1 }
 0x19e   : > { %v2394_v56 = vmax.f32 %v2083_v25, 0.0  ;;  %v9850_v25 = vpop.permute.xlu2 %4496  ;;  %v2271_v35 = vmax.f32 %v1776_v29, 0.0  ;;  %v2376_v5 = vmax.f32 %v2038_v21, 0.0 }
 0x19f   : > { %13891 = vst [vmem:[#allocation127_spill] sm:$0xff] %v9850_v25  ;;  %v9856_v55 = vpop.permute.xlu1 %4478  ;;  %v3651_v19 = vsel %vm2945_vm1, %v9853_v62, -inf  ;;  %v2333_v25 = vmax.f32 %v1931_v37, 0.0 }
 0x1a0   : > { %4678 = vperm.xlu1 %8417, %v9815_v3   ;;  %v9841_v43 = vpop.f32.mrf.mxu0  ;;  %13892 = vst [vmem:[#allocation128_spill] sm:$0xff] %v9853_v62  ;;  %v2651_v7 = vmul.f32 %v9515_v18, %v2394_v56  ;;  %v2375_v56 = vmax.f32 %v2036_v48, 0.0  ;;  %v2528_v48 = vmul.f32 %v9515_v18, %v2271_v35  ;;  %v9903_v35 = vadd.f32 %v9524_v51, %v2442_v47 }
 0x1a1   : > { %13889 = vst [vmem:[#allocation125_spill] sm:$0xff] %v9841_v43  ;;  %v1932_v54 = vpop.f32.mrf.mxu2  ;;  %v3453_v43 = vsel %vm2945_vm1, %v9844_v22, -inf  ;;  %v2590_v29 = vmul.f32 %v9515_v18, %v2333_v25  ;;  %v3595_v22 = vmax.f32 %v3593_v44, %v3594_v20 }
 0x1a2   : > { %v1777_v33 = vpop.f32.mrf.mxu1  ;;  %13893 = vst [vmem:[#allocation129_spill] sm:$0xff] %v9856_v55  ;;  %v1933_v46 = vadd.f32 %v9496_v27, %v1932_v54  ;;  %v9874_v62 = vadd.f32 %v9524_v51, %v2651_v7  ;;  %v7510_v54 = vld [vmem:[%s8768_s10 + $0x2c0] sm:$0xff]  ;;  %v3455_v25 = vmax.f32 %v3453_v43, %v3454_v11  ;;  %v9890_v7 = vld [vmem:[%s8774_s14 + $0x18] sm:$0xff] }
 0x1a3   : > { %4684 = vperm.xlu2 %8418, %v9815_v3   ;;  %v1778_v23 = vadd.f32 %v9496_v27, %v1777_v33  ;;  %v9865_v55 = vpop.f32.mrf.mxu3  ;;  %v3652_v33 = vmax.f32 %v3650_v12, %v3651_v19  ;;  %v7447_v12 = vld [vmem:[%s8768_s10 + $0xc8] sm:$0xff]  ;;  %7375 = vmatmul.msk.bf16.gmra.mxu2 %vm1141_vm0, %v7510_v54  ;;  %v9900_v43 = vperm.slane %v9890_v7, 0  ;;  %v2632_v54 = vmul.f32 %v9515_v18, %v2375_v56 }
 0x1a4   : > { %13894 = vst [vmem:[#allocation130_spill] sm:$0xff] %v9865_v55  ;;  %v2334_v37 = vmax.f32 %v1933_v46, 0.0  ;;  %v2041_v55 = vadd.f32 %v9496_v27, %v9221_v45  ;;  %v3653_v21 = vsel %vm2945_vm1, %v9874_v62, -inf  ;;  %v7479_v46 = vld [vmem:[%s8768_s10 + $0x1c8] sm:$0xff] }
 0x1a5   : > { %v2272_v6 = vmax.f32 %v1778_v23, 0.0  ;;  %13896 = vst [vmem:[#allocation132_spill] sm:$0xff] %v9874_v62  ;;  %v9885_v23 = vadd.f32 %v9524_v51, %v2590_v29  ;;  %v3654_v20 = vmax.f32 %v3652_v33, %v3653_v21  ;;  %v2186_v29 = vmax.f32 %v9831_v28, 0.0  ;;  %4909 = vperm.xlu0 %8382, %v9900_v43  }
 0x1a6   : > { %v2591_v19 = vmul.f32 %v9515_v18, %v2334_v37  ;;  %13899 = vst [vmem:[#allocation135_spill] sm:$0xff] %v9900_v43  ;;  %v9908_v11 = vpop.permute.xlu2 %4515  ;;  %v2311_v37 = vmax.f32 %v9839_v42, 0.0  ;;  %v2043_v42 = vadd.f32 %v9496_v27, %v9238_v26 }
 0x1a7   : > { %13897 = vst [vmem:[#allocation133_spill] sm:$0xff] %v9885_v23  ;;  %v2529_v44 = vmul.f32 %v9515_v18, %v2272_v6  ;;  %v3456_v6 = vsel %vm2945_vm1, %v9885_v23, -inf  ;;  %v9914_v21 = vpop.permute.xlu1 %4490  ;;  %v2377_v23 = vmax.f32 %v2041_v55, 0.0  ;;  %v2443_v55 = vmul.f32 %v9515_v18, %v2186_v29 }
 0x1a8   : > { %8419 = vset.pattern.permute.xlu1 %v8791_v10  ;;  %v9893_v45 = vpop.f32.mrf.mxu0  ;;  %13900 = vst [vmem:[#allocation136_spill] sm:$0xff] %v9908_v11  ;;  %v3457_v47 = vmax.f32 %v3455_v25, %v3456_v6  ;;  %v9926_v56 = vadd.f32 %v9524_v51, %v2591_v19  ;;  %v9931_v25 = vadd.f32 %v9524_v51, %v2528_v48  ;;  %v7541_v11 = vld [vmem:[%s8768_s10 + $0x3b8] sm:$0xff]  ;;  %v9944_v48 = vperm.slane %v9411_v9, 0 }
 0x1a9   : > { %3940 = vrot.lane.b32.xlu1 %v3595_v22, %s8675_s30  ;;  %13898 = vst [vmem:[#allocation134_spill] sm:$0xff] %v9893_v45  ;;  %v1878_v22 = vadd.f32 %v9496_v27, %v9134_v41  ;;  %v9918_v62 = vpop.f32.mrf.mxu2  ;;  %v2633_v41 = vmul.f32 %v9515_v18, %v2376_v5  ;;  %v9934_v6 = vadd.f32 %v9524_v51, %v2529_v44  ;;  %v3655_v5 = vrot.slane %v3654_v20, 4 }
 0x1aa   : > { %v1780_v33 = vpop.f32.mrf.mxu1  ;;  %13901 = vst [vmem:[#allocation137_spill] sm:$0xff] %v9914_v21  ;;  %v3458_v19 = vsel %vm2945_vm1, %v9926_v56, -inf  ;;  %v3258_v9 = vsel %vm2945_vm1, %v9931_v25, -inf }
 0x1ab   : > { %8420 = vset.pattern.permute.xlu2 %v8755_v2  ;;  %v1781_v28 = vadd.f32 %v9496_v27, %v1780_v33  ;;  %13902 = vst [vmem:[#allocation138_spill] sm:$0xff] %v9918_v62  ;;  %7312 = vmatmul.msk.bf16.gmra.mxu0 %vm1141_vm0, %v7447_v12  ;;  %v9928_v38 = vpop.f32.mrf.mxu3  ;;  %v2312_v26 = vmax.f32 %v1878_v22, 0.0  ;;  %v1881_v12 = vadd.f32 %v9496_v27, %v9154_v57  ;;  %v2378_v57 = vmax.f32 %v2043_v42, 0.0 }
 0x1ac   : > { %13903 = vst [vmem:[#allocation139_spill] sm:$0xff] %v9926_v56  ;;  %v3459_v21 = vmax.f32 %v3457_v47, %v3458_v19  ;;  %v9951_v29 = vadd.f32 %v9524_v51, %v2633_v41  ;;  %v2634_v22 = vmul.f32 %v9515_v18, %v2377_v23  ;;  %v2975_v23 = vsel %vm2945_vm1, %v9903_v35, -inf }
 0x1ad   : > { %13904 = vst [vmem:[#allocation140_spill] sm:$0xff] %v9928_v38  ;;  %v2273_v33 = vmax.f32 %v1781_v28, 0.0  ;;  %7344 = vmatmul.msk.bf16.gmra.mxu1 %vm1141_vm0, %v7479_v46  ;;  %v3656_v28 = vmax.f32 %v3654_v20, %v3655_v5  ;;  %v9948_v46 = vadd.f32 %v9524_v51, %v2632_v54  ;;  %7406 = vmatmul.msk.bf16.gmra.mxu3 %vm1141_vm0, %v7541_v11  ;;  %v3259_v20 = vsel %vm2945_vm1, %v9934_v6, -inf }
 0x1ae   : > { %13905 = vst [vmem:[#allocation141_spill] sm:$0xff] %v9931_v25  ;;  %v9968_v41 = vadd.f32 %v9524_v51, %v2443_v55  ;;  %v2568_v11 = vmul.f32 %v9515_v18, %v2311_v37  ;;  %v9971_v42 = vpop.permute.xlu2 %4528  ;;  %v3460_v5 = vrot.slane %v3459_v21, 4  ;;  %v2569_v19 = vmul.f32 %v9515_v18, %v2312_v26 }
 0x1af   : > { %13906 = vst [vmem:[#allocation142_spill] sm:$0xff] %v9934_v6  ;;  %v2530_v44 = vmul.f32 %v9515_v18, %v2273_v33  ;;  %v3657_v47 = vrot.slane %v3656_v28, 2  ;;  %v9976_v25 = vpop.permute.xlu1 %4509  ;;  %v3596_v37 = vsel %vm2945_vm1, %v9948_v46, -inf  ;;  %v9987_v26 = vadd.f32 %v9524_v51, %v2634_v22 }
 0x1b0   : > { %13907 = vst [vmem:[#allocation143_spill] sm:$0xff] %v9944_v48  ;;  %v9956_v56 = vpop.f32.mrf.mxu0  ;;  %v9999_v22 = vadd.f32 %v9524_v51, %v2568_v11  ;;  %v10003_v45 = vadd.f32 %v9524_v51, %v2569_v19  ;;  %v7480_v19 = vld [vmem:[%s8768_s10 + $0x1d0] sm:$0xff] }
 0x1b1   : > { %13908 = vst [vmem:[#allocation144_spill] sm:$0xff] %v9948_v46  ;;  %4696 = vperm.xlu1 %8419, %v9815_v3   ;;  %v9963_v54 = vadd.f32 %v9524_v51, %v2530_v44  ;;  %v2313_v3 = vmax.f32 %v1881_v12, 0.0  ;;  %v1883_v44 = vadd.f32 %v9496_v27, %v9183_v14  ;;  %v9980_v6 = vpop.f32.mrf.mxu2  ;;  %v3260_v12 = vmax.f32 %v3258_v9, %v3259_v20  ;;  %v7511_v9 = vld [vmem:[%s8768_s10 + $0x2c8] sm:$0xff] }
 0x1b2   : > { %13909 = vst [vmem:[#allocation145_spill] sm:$0xff] %v9951_v29  ;;  %v1782_v33 = vpop.f32.mrf.mxu1  ;;  %v1566_v46 = vadd.f32 %v9496_v27, %v9146_v52  ;;  %v3461_v20 = vmax.f32 %v3459_v21, %v3460_v5  ;;  %v7448_v52 = vld [vmem:[%s8768_s10 + $0xd0] sm:$0xff] }
 0x1b3   : > { %13910 = vst [vmem:[#allocation146_spill] sm:$0xff] %v9956_v56  ;;  %4703 = vperm.xlu2 %8420, %v9944_v48   ;;  %v1783_v55 = vadd.f32 %v9496_v27, %v1782_v33  ;;  %v3597_v56 = vsel %vm2945_vm1, %v9951_v29, -inf  ;;  %v9989_v14 = vpop.f32.mrf.mxu3  ;;  %v3261_v33 = vsel %vm2945_vm1, %v9963_v54, -inf  ;;  %v1568_v29 = vadd.f32 %v9496_v27, %v9171_v40  ;;  %7376 = vmatmul.msk.bf16.gmra.mxu2 %vm1141_vm0, %v7511_v9 }
 0x1b4   : > { %13911 = vst [vmem:[#allocation147_spill] sm:$0xff] %v9963_v54  ;;  %v3262_v43 = vmax.f32 %v3260_v12, %v3261_v33  ;;  %v3599_v40 = vsel %vm2945_vm1, %v9987_v26, -inf  ;;  %v2187_v33 = vmax.f32 %v1566_v46, 0.0 }
 0x1b5   : > { %13912 = vst [vmem:[#allocation148_spill] sm:$0xff] %v9971_v42  ;;  %v2274_v62 = vmax.f32 %v1783_v55, 0.0  ;;  %v13963_v42 = vld [vmem:[#allocation38_spill] sm:$0xff] }
 0x1b6   : > { %13913 = vst [vmem:[#allocation149_spill] sm:$0xff] %v9976_v25  ;;  %v2635_v25 = vmul.f32 %v9515_v18, %v2378_v57  ;;  %v2314_v57 = vmax.f32 %v1883_v44, 0.0  ;;  %v2977_v44 = vsel %vm2945_vm1, %v9968_v41, -inf }
 0x1b7   : > { %13914 = vst [vmem:[#allocation150_spill] sm:$0xff] %v9980_v6  ;;  %v3658_v6 = vmax.f32 %v3656_v28, %v3657_v47  ;;  %v2531_v54 = vmul.f32 %v9515_v18, %v2274_v62  ;;  %v2570_v28 = vmul.f32 %v9515_v18, %v2313_v3  ;;  %v3598_v47 = vmax.f32 %v3596_v37, %v3597_v56  ;;  %v10024_v37 = vpop.permute.xlu2 %4546 }
 0x1b8   : > { %13915 = vst [vmem:[#allocation151_spill] sm:$0xff] %v9987_v26  ;;  %v10011_v11 = vadd.f32 %v9524_v51, %v2635_v25  ;;  %v1625_v21 = vpop.f32.mrf.mxu0  ;;  %v13921_v3 = vmax.f32 %v9807_v1, %v9811_v16  ;;  %v3389_v16 = vsel %vm2945_vm1, %v10003_v45, -inf  ;;  %v13928_v26 = vld [vmem:[#allocation29_spill] sm:$0xff] }
 0x1b9   : > { %13916 = vst [vmem:[#allocation152_spill] sm:$0xff] %v9989_v14  ;;  %v3659_v55 = vrot.slane %v3658_v6, 1  ;;  %v3462_v14 = vrot.slane %v3461_v20, 2  ;;  %8421 = vset.pattern.permute.xlu1 %v8762_v4  ;;  %v10015_v5 = vadd.f32 %v9524_v51, %v2531_v54  ;;  %v3388_v54 = vsel %vm2945_vm1, %v9999_v22, -inf  ;;  %v10043_v9 = vpop.f32.mrf.mxu2 }
 0x1ba   : > { %13917 = vst [vmem:[#allocation153_spill] sm:$0xff] %v9999_v22  ;;  %v2976_v56 = vmax.f32 %v13921_v3, %v2975_v23  ;;  %v10026_v25 = vpop.f32.mrf.mxu1  ;;  %v10040_v23 = vadd.f32 %v9524_v51, %v2570_v28  ;;  %v3600_v46 = vmax.f32 %v3598_v47, %v3599_v40  ;;  %v3601_v3 = vsel %vm2945_vm1, %v10011_v11, -inf  ;;  %v13929_v22 = vld [vmem:[#allocation23_spill] sm:$0xff] }
 0x1bb   : > { %13918 = vst [vmem:[#allocation154_spill] sm:$0xff] %v10003_v45  ;;  %v3660_v62 = vmax.f32 %v3658_v6, %v3659_v55  ;;  %v3463_v12 = vmax.f32 %v3461_v20, %v3462_v14  ;;  %v2571_v6 = vmul.f32 %v9515_v18, %v2314_v57  ;;  %v10031_v55 = vpop.permute.xlu1 %4521  ;;  %8422 = vset.pattern.permute.xlu2 %v8810_v17  ;;  %v3263_v1 = vsel %vm2945_vm1, %v10015_v5, -inf  ;;  %v10045_v20 = vpop.f32.mrf.mxu3 }
 0x1bc   : > { %13919 = vst [vmem:[#allocation155_spill] sm:$0xff] %v10011_v11  ;;  %7313 = vmatmul.msk.bf16.gmra.mxu0 %vm1141_vm0, %v7448_v52  ;;  %v3264_v14 = vmax.f32 %v3262_v43, %v3263_v1  ;;  %v2188_v57 = vmax.f32 %v1568_v29, 0.0  ;;  %v1571_v28 = vadd.f32 %v9496_v27, %v13928_v26  ;;  %v1726_v47 = vadd.f32 %v9496_v27, %v13929_v22  ;;  %v7542_v29 = vld [vmem:[%s8768_s10 + $0x3c0] sm:$0xff] }
 0x1bd   : > { %13920 = vst [vmem:[#allocation156_spill] sm:$0xff] %v10015_v5  ;;  %3950 = vrot.lane.b32.xlu0 %v3660_v62, %s8675_s30  ;;  %7345 = vmatmul.msk.bf16.gmra.mxu1 %vm1141_vm0, %v7480_v19  ;;  %v2978_v62 = vmax.f32 %v2976_v56, %v2977_v44  ;;  %v3464_v40 = vrot.slane %v3463_v12, 1  ;;  %v2444_v43 = vmul.f32 %v9515_v18, %v2187_v33  ;;  %v3391_v11 = vsel %vm2945_vm1, %v10040_v23, -inf }
 0x1be   : > { %13922 = vst [vmem:[#allocation157_spill] sm:$0xff] %v10024_v37  ;;  %v3390_v52 = vmax.f32 %v3388_v54, %v3389_v16  ;;  %v10056_v1 = vadd.f32 %v9524_v51, %v2571_v6  ;;  %v3265_v45 = vrot.slane %v3264_v14, 4  ;;  %v3602_v19 = vmax.f32 %v3600_v46, %v3601_v3  ;;  %7407 = vmatmul.msk.bf16.gmra.mxu3 %vm1141_vm0, %v7542_v29 }
 0x1bf   : > { %13923 = vst [vmem:[#allocation158_spill] sm:$0xff] %v10026_v25  ;;  %v1626_v56 = vadd.f32 %v9496_v27, %v1625_v21  ;;  %v3465_v44 = vmax.f32 %v3463_v12, %v3464_v40  ;;  %v2445_v26 = vmul.f32 %v9515_v18, %v2188_v57  ;;  %v2189_v6 = vmax.f32 %v1571_v28, 0.0  ;;  %v10067_v16 = vpop.permute.xlu2 %4559  ;;  %v13934_v21 = vld [vmem:[#allocation32_spill] sm:$0xff]  ;;  %v10078_v40 = vpop.permute.xlu0 %3908 }
 0x1c0   : > { %13924 = vst [vmem:[#allocation159_spill] sm:$0xff] %v10031_v55  ;;  %v13931_v55 = vld [vmem:[#allocation27_spill] sm:$0xff]  ;;  %v1627_v33 = vpop.f32.mrf.mxu0  ;;  %v3266_v54 = vmax.f32 %v3264_v14, %v3265_v45  ;;  %v1573_v12 = vadd.f32 %v9496_v27, %v13934_v21  ;;  %v3392_v57 = vmax.f32 %v3390_v52, %v3391_v11  ;;  %v2979_v45 = vrot.slane %v2978_v62, 4 }
 0x1c1   : > { %13925 = vst [vmem:[#allocation160_spill] sm:$0xff] %v10040_v23  ;;  %v1728_v22 = vadd.f32 %v9496_v27, %v13931_v55  ;;  %4709 = vperm.xlu1 %8421, %v9944_v48   ;;  %v1628_v23 = vadd.f32 %v9496_v27, %v1627_v33  ;;  %v3393_v55 = vsel %vm2945_vm1, %v10056_v1, -inf  ;;  %v2211_v14 = vmax.f32 %v1626_v56, 0.0  ;;  %v10082_v33 = vpop.f32.mrf.mxu2  ;;  %v13941_v56 = vld [vmem:[#allocation30_spill] sm:$0xff] }
 0x1c2   : > { %13926 = vst [vmem:[#allocation161_spill] sm:$0xff] %v10043_v9  ;;  %v10070_v46 = vpop.f32.mrf.mxu1  ;;  %v3603_v29 = vrot.slane %v3602_v19, 4  ;;  %v3267_v52 = vrot.slane %v3266_v54, 2  ;;  %v10087_v21 = vadd.f32 %v9524_v51, %v2444_v43  ;;  %v2190_v5 = vmax.f32 %v1573_v12, 0.0 }
 0x1c3   : > { %13927 = vst [vmem:[#allocation162_spill] sm:$0xff] %v10045_v20  ;;  %v10076_v3 = vpop.permute.xlu1 %4540  ;;  %4715 = vperm.xlu2 %8422, %v9944_v48   ;;  %v2212_v28 = vmax.f32 %v1628_v23, 0.0  ;;  %v10084_v11 = vpop.f32.mrf.mxu3  ;;  %v1731_v23 = vadd.f32 %v9496_v27, %v13941_v56  ;;  %v2980_v25 = vmax.f32 %v2978_v62, %v2979_v45  ;;  %v2468_v9 = vmul.f32 %v9515_v18, %v2211_v14 }
 0x1c4   : > { %13930 = vst [vmem:[#allocation29_spill] sm:$0xff] %v10056_v1  ;;  %v10090_v1 = vadd.f32 %v9524_v51, %v2445_v26  ;;  %v3268_v48 = vmax.f32 %v3266_v54, %v3267_v52  ;;  %v3604_v26 = vmax.f32 %v3602_v19, %v3603_v29  ;;  %v2447_v14 = vmul.f32 %v9515_v18, %v2190_v5 }
 0x1c5   : > { %13932 = vst [vmem:[#allocation23_spill] sm:$0xff] %v10067_v16  ;;  %3920 = vrot.lane.b32.xlu0 %v3465_v44, %s8675_s30  ;;  %v2252_v16 = vmax.f32 %v1728_v22, 0.0  ;;  %v2446_v44 = vmul.f32 %v9515_v18, %v2189_v6  ;;  %v2469_v43 = vmul.f32 %v9515_v18, %v2212_v28  ;;  %v7481_v6 = vld [vmem:[%s8768_s10 + $0x1d8] sm:$0xff]  ;;  %v2253_v19 = vmax.f32 %v1731_v23, 0.0  ;;  %v13945_v28 = vld [vmem:[#allocation33_spill] sm:$0xff] }
 0x1c6   : > { %13933 = vst [vmem:[#allocation27_spill] sm:$0xff] %v10070_v46  ;;  %v3394_v46 = vmax.f32 %v3392_v57, %v3393_v55  ;;  %v3269_v20 = vrot.slane %v3268_v48, 1  ;;  %v2986_v22 = vsel %vm2945_vm1, %v10090_v1, -inf  ;;  %v10116_v55 = vld [vmem:[%s13488_s3] ss:$0 sm:$0xff]  ;;  %v10130_v23 = vadd.f32 %v9524_v51, %v2468_v9 }
 0x1c7   : > { %13935 = vst [vmem:[#allocation32_spill] sm:$0xff] %v10076_v3  ;;  %v2509_v54 = vmul.f32 %v9515_v18, %v2252_v16  ;;  %v10109_v12 = vadd.f32 %v9524_v51, %v2446_v44  ;;  %v10111_v57 = vpop.permute.xlu2 %4578  ;;  %v1733_v29 = vadd.f32 %v10116_v55, %v13945_v28  ;;  %v10126_v52 = vpop.permute.xlu0 %3878  ;;  %v2981_v44 = vrot.slane %v2980_v25, 2 }
 0x1c8   : > { %13936 = vst [vmem:[#allocation163_spill] sm:$0xff] %v10078_v40  ;;  %v2251_v40 = vmax.f32 %v1726_v47, 0.0  ;;  %v2985_v47 = vsel %vm2945_vm1, %v10087_v21, -inf  ;;  %v1630_v62 = vpop.f32.mrf.mxu0  ;;  %v3270_v45 = vmax.f32 %v3268_v48, %v3269_v20  ;;  %v3395_v56 = vrot.slane %v3394_v46, 4 }
 0x1c9   : > { %13937 = vst [vmem:[#allocation164_spill] sm:$0xff] %v10082_v33  ;;  %v7512_v33 = vld [vmem:[%s8768_s10 + $0x2d0] sm:$0xff]  ;;  %8423 = vset.pattern.permute.xlu1 %v8755_v2  ;;  %v10137_v5 = vpop.f32.mrf.mxu2  ;;  %v10145_v9 = vadd.f32 %v9524_v51, %v2509_v54  ;;  %v10166_v54 = vld [vmem:[%s13488_s3 + $0x2] ss:$0 sm:$0xff] }
 0x1ca   : > { %13938 = vst [vmem:[#allocation165_spill] sm:$0xff] %v10084_v11  ;;  %v7449_v11 = vld [vmem:[%s8768_s10 + $0xd8] sm:$0xff]  ;;  %v2508_v27 = vmul.f32 %v9515_v18, %v2251_v40  ;;  %7377 = vmatmul.msk.bf16.gmra.mxu2 %vm1141_vm0, %v7512_v33  ;;  %v1631_v40 = vadd.f32 %v10116_v55, %v1630_v62  ;;  %v10119_v16 = vpop.f32.mrf.mxu1  ;;  %v10133_v62 = vadd.f32 %v9524_v51, %v2469_v43  ;;  %v3605_v18 = vrot.slane %v3604_v26, 2 }
 0x1cb   : > { %13939 = vst [vmem:[#allocation166_spill] sm:$0xff] %v10087_v21  ;;  %v10124_v33 = vpop.permute.xlu1 %4553  ;;  %8424 = vset.pattern.permute.xlu2 %v8762_v4  ;;  %v10139_v20 = vpop.f32.mrf.mxu3  ;;  %v10148_v21 = vld [vmem:[%s8774_s14 + $0x10] sm:$0xff] }
 0x1cc   : > { %13940 = vst [vmem:[#allocation167_spill] sm:$0xff] %v10090_v1  ;;  %v2213_v48 = vmax.f32 %v1631_v40, 0.0  ;;  %7314 = vmatmul.msk.bf16.gmra.mxu0 %vm1141_vm0, %v7449_v11  ;;  %v10142_v28 = vadd.f32 %v9524_v51, %v2508_v27  ;;  %v10151_v43 = vperm.slane %v10148_v21, 1  ;;  %v2987_v11 = vmax.f32 %v2985_v47, %v2986_v22 }
 0x1cd   : > { %13942 = vst [vmem:[#allocation30_spill] sm:$0xff] %v10109_v12  ;;  %3890 = vrot.lane.b32.xlu0 %v3270_v45, %s8675_s30  ;;  %7346 = vmatmul.msk.bf16.gmra.mxu1 %vm1141_vm0, %v7481_v6  ;;  %v2988_v40 = vsel %vm2945_vm1, %v10109_v12, -inf  ;;  %v10159_v45 = vld [vmem:[%s13488_s3 + $0x1] ss:$0 sm:$0xff]  ;;  %v10169_v6 = vadd.f32 %v10166_v54, %v2447_v14  ;;  %v2254_v47 = vmax.f32 %v1733_v29, 0.0  ;;  %v2982_v22 = vmax.f32 %v2980_v25, %v2981_v44  ;;  %v13954_v44 = vld [vmem:[#allocation31_spill] sm:$0xff] }
 0x1ce   : > { %13943 = vst [vmem:[#allocation168_spill] sm:$0xff] %v10111_v57  ;;  %v2510_v27 = vmul.f32 %v10159_v45, %v2253_v19  ;;  %v2470_v51 = vmul.f32 %v10159_v45, %v2213_v48  ;;  %v3396_v1 = vmax.f32 %v3394_v46, %v3395_v56  ;;  %v7543_v57 = vld [vmem:[%s8768_s10 + $0x3c8] sm:$0xff]  ;;  %v3064_v19 = vsel %vm2945_vm1, %v10133_v62, -inf }
 0x1cf   : > { %13944 = vst [vmem:[#allocation169_spill] sm:$0xff] %v10119_v16  ;;  %v3193_v16 = vsel %vm2945_vm1, %v10142_v28, -inf  ;;  %v3194_v14 = vsel %vm2945_vm1, %v10145_v9, -inf  ;;  %7408 = vmatmul.msk.bf16.gmra.mxu3 %vm1141_vm0, %v7543_v57  ;;  %v2989_v46 = vmax.f32 %v2987_v11, %v2988_v40  ;;  %v1886_v56 = vadd.f32 %v10116_v55, %v13954_v44  ;;  %v10197_v57 = vpop.permute.xlu0 %4784 }
 0x1d0   : > { %13946 = vst [vmem:[#allocation33_spill] sm:$0xff] %v10124_v33  ;;  %v3063_v33 = vsel %vm2945_vm1, %v10130_v23, -inf  ;;  %v10177_v48 = vadd.f32 %v10166_v54, %v2470_v51  ;;  %v1632_v25 = vpop.f32.mrf.mxu0  ;;  %v10186_v29 = vadd.f32 %v10166_v54, %v2510_v27  ;;  %v2511_v51 = vmul.f32 %v10159_v45, %v2254_v47  ;;  %v13959_v47 = vld [vmem:[#allocation34_spill] sm:$0xff] }
 0x1d1   : > { %13947 = vst [vmem:[#allocation170_spill] sm:$0xff] %v10126_v52  ;;  %4728 = vperm.xlu1 %8423, %v10151_v43   ;;  %v3065_v38 = vmax.f32 %v3063_v33, %v3064_v19  ;;  %v2983_v52 = vrot.slane %v2982_v22, 1  ;;  %v3397_v11 = vrot.slane %v3396_v1, 2  ;;  %v2990_v40 = vsel %vm2945_vm1, %v10169_v6, -inf }
 0x1d2   : > { %13948 = vst [vmem:[#allocation171_spill] sm:$0xff] %v10137_v5  ;;  %v3606_v5 = vmax.f32 %v3604_v26, %v3605_v18  ;;  %v1633_v26 = vadd.f32 %v10116_v55, %v1632_v25  ;;  %v10191_v18 = vpop.f32.mrf.mxu1  ;;  %v3066_v27 = vsel %vm2945_vm1, %v10177_v48, -inf  ;;  %v1888_v33 = vadd.f32 %v10116_v55, %v13959_v47 }
 0x1d3   : > { %13949 = vst [vmem:[#allocation172_spill] sm:$0xff] %v10139_v20  ;;  %v10194_v20 = vpop.permute.xlu1 %4571  ;;  %4734 = vperm.xlu2 %8424, %v10151_v43   ;;  %v10207_v19 = vpop.f32.mrf.mxu3  ;;  %v2984_v12 = vmax.f32 %v2982_v22, %v2983_v52  ;;  %v3398_v37 = vmax.f32 %v3396_v1, %v3397_v11  ;;  %v10216_v3 = vadd.f32 %v10166_v54, %v2511_v51  ;;  %v2315_v47 = vmax.f32 %v1886_v56, 0.0  ;;  %v13968_v11 = vld [vmem:[#allocation41_spill] sm:$0xff] }
 0x1d4   : > { %13950 = vst [vmem:[#allocation173_spill] sm:$0xff] %v10142_v28  ;;  %v2214_v25 = vmax.f32 %v1633_v26, 0.0  ;;  %v3607_v44 = vrot.slane %v3606_v5, 1  ;;  %v3067_v26 = vmax.f32 %v3065_v38, %v3066_v27  ;;  %v7482_v38 = vld [vmem:[%s8768_s10 + $0x1e0] sm:$0xff] }
 0x1d5   : > { %13951 = vst [vmem:[#allocation174_spill] sm:$0xff] %v10145_v9  ;;  %v10211_v9 = vpop.permute.xlu2 %4590  ;;  %v3198_v56 = vsel %vm2945_vm1, %v10216_v3, -inf }
 0x1d6   : > { %13952 = vst [vmem:[#allocation175_spill] sm:$0xff] %v10169_v6  ;;  %v2471_v28 = vmul.f32 %v10159_v45, %v2214_v25  ;;  %v2991_v6 = vmax.f32 %v2989_v46, %v2990_v40  ;;  %v1893_v40 = vadd.f32 %v10116_v55, %v13968_v11 }
 0x1d7   : > { %13953 = vst [vmem:[#allocation176_spill] sm:$0xff] %v10186_v29  ;;  %v10247_v27 = vpop.permute.xlu0 %3944 }
 0x1d8   : > { %13955 = vst [vmem:[#allocation31_spill] sm:$0xff] %v10191_v18  ;;  %v10203_v18 = vpop.f32.mrf.mxu2  ;;  %v10225_v46 = vpop.f32.mrf.mxu0  ;;  %v2318_v11 = vmax.f32 %v1893_v40, 0.0 }
 0x1d9   : > { %13956 = vst [vmem:[#allocation177_spill] sm:$0xff] %v10194_v20  ;;  %v3195_v20 = vmax.f32 %v3193_v16, %v3194_v14  ;;  %v3608_v16 = vmax.f32 %v3606_v5, %v3607_v44  ;;  %v7450_v14 = vld [vmem:[%s8768_s10 + $0xe0] sm:$0xff]  ;;  %3846 = vrot.lane.b32.xlu1 %v2984_v12, %s8675_s30  ;;  %v2992_v12 = vrot.slane %v2991_v6, 4 }
 0x1da   : > { %13957 = vst [vmem:[#allocation178_spill] sm:$0xff] %v10197_v57  ;;  %v3196_v57 = vsel %vm2945_vm1, %v10186_v29, -inf  ;;  %v2316_v29 = vmax.f32 %v1888_v33, 0.0  ;;  %8425 = vset.pattern.permute.xlu1 %v8810_v17  ;;  %v10232_v52 = vpop.f32.mrf.mxu1 }
 0x1db   : > { %13958 = vst [vmem:[#allocation179_spill] sm:$0xff] %v10203_v18  ;;  %v7513_v18 = vld [vmem:[%s8768_s10 + $0x2d8] sm:$0xff]  ;;  %v3197_v5 = vmax.f32 %v3195_v20, %v3196_v57  ;;  %8426 = vset.pattern.permute.xlu2 %v8791_v10  ;;  %v10250_v44 = vpop.f32.mrf.mxu3 }
 0x1dc   : > { %13960 = vst [vmem:[#allocation34_spill] sm:$0xff] %v10207_v19  ;;  %v10219_v19 = vadd.f32 %v10166_v54, %v2471_v28  ;;  %7378 = vmatmul.msk.bf16.gmra.mxu2 %vm1141_vm0, %v7513_v18  ;;  %v10234_v28 = vpop.permute.xlu1 %4584  ;;  %v2572_v18 = vmul.f32 %v10159_v45, %v2315_v47  ;;  %3942 = vrot.lane.b32.xlu2 %v3608_v16, %s8675_s30 }
 0x1dd   : > { %13961 = vst [vmem:[#allocation180_spill] sm:$0xff] %v10211_v9  ;;  %v1891_v9 = vadd.f32 %v10116_v55, %v13963_v42  ;;  %v3399_v42 = vrot.slane %v3398_v37, 1  ;;  %7315 = vmatmul.msk.bf16.gmra.mxu0 %vm1141_vm0, %v7450_v14  ;;  %v2573_v20 = vmul.f32 %v10159_v45, %v2316_v29  ;;  %7347 = vmatmul.msk.bf16.gmra.mxu1 %vm1141_vm0, %v7482_v38 }
 0x1de   : > { %13962 = vst [vmem:[#allocation181_spill] sm:$0xff] %v10216_v3  ;;  %v3068_v1 = vsel %vm2945_vm1, %v10219_v19, -inf  ;;  %v3199_v33 = vmax.f32 %v3197_v5, %v3198_v56  ;;  %v2993_v16 = vmax.f32 %v2991_v6, %v2992_v12  ;;  %v10253_v14 = vadd.f32 %v10166_v54, %v2572_v18 }
 0x1df   : > { %13964 = vst [vmem:[#allocation38_spill] sm:$0xff] %v10225_v46  ;;  %v3069_v22 = vmax.f32 %v3067_v26, %v3068_v1  ;;  %v2317_v57 = vmax.f32 %v1891_v9, 0.0  ;;  %v3400_v26 = vmax.f32 %v3398_v37, %v3399_v42  ;;  %v10255_v1 = vpop.permute.xlu2 %4609  ;;  %v10258_v9 = vadd.f32 %v10166_v54, %v2573_v20  ;;  %v7451_v46 = vld [vmem:[%s8768_s10 + $0xe8] sm:$0xff] }
 0x1e0   : > { %13965 = vst [vmem:[#allocation182_spill] sm:$0xff] %v10232_v52  ;;  %v10242_v51 = vpop.f32.mrf.mxu2  ;;  %v10262_v38 = vpop.f32.mrf.mxu0  ;;  %v3200_v42 = vrot.slane %v3199_v33, 4  ;;  %v3401_v12 = vsel %vm2945_vm1, %v10253_v14, -inf  ;;  %v13981_v52 = vld [vmem:[#allocation39_spill] sm:$0xff] }
 0x1e1   : > { %13966 = vst [vmem:[#allocation183_spill] sm:$0xff] %v10234_v28  ;;  %v3070_v25 = vrot.slane %v3069_v22, 4  ;;  %v2574_v29 = vmul.f32 %v10159_v45, %v2317_v57  ;;  %3910 = vrot.lane.b32.xlu1 %v3400_v26, %s8675_s30  ;;  %v3402_v18 = vsel %vm2945_vm1, %v10258_v9, -inf  ;;  %v2575_v57 = vmul.f32 %v10159_v45, %v2318_v11 }
 0x1e2   : > { %13967 = vst [vmem:[#allocation184_spill] sm:$0xff] %v10242_v51  ;;  %v10264_v5 = vpop.f32.mrf.mxu1 }
 0x1e3   : > { %13969 = vst [vmem:[#allocation41_spill] sm:$0xff] %v10247_v27  ;;  %v3071_v47 = vmax.f32 %v3069_v22, %v3070_v25  ;;  %v2994_v22 = vrot.slane %v2993_v16, 2  ;;  %v10276_v20 = vadd.f32 %v10166_v54, %v2574_v29  ;;  %v13979_v25 = vld [vmem:[#allocation35_spill] sm:$0xff]  ;;  %v10289_v11 = vadd.f32 %v10166_v54, %v2575_v57 }
 0x1e4   : > { %13970 = vst [vmem:[#allocation185_spill] sm:$0xff] %v10250_v44  ;;  %v10266_v37 = vpop.permute.xlu1 %4603  ;;  %4746 = vperm.xlu2 %8426, %v10151_v43   ;;  %v1576_v26 = vadd.f32 %v10116_v55, %v13979_v25 }
 0x1e5   : > { %13971 = vst [vmem:[#allocation186_spill] sm:$0xff] %v10253_v14  ;;  %v3072_v27 = vrot.slane %v3071_v47, 2  ;;  %v10281_v14 = vpop.permute.xlu0 %3914  ;;  %v2995_v28 = vmax.f32 %v2993_v16, %v2994_v22  ;;  %v3404_v29 = vsel %vm2945_vm1, %v10276_v20, -inf  ;;  %v13986_v22 = vld [vmem:[#allocation43_spill] sm:$0xff] }
 0x1e6   : > { %13972 = vst [vmem:[#allocation187_spill] sm:$0xff] %v10255_v1  ;;  %v7452_v1 = vld [vmem:[%s8768_s10 + $0xf0] sm:$0xff] }
 0x1e7   : > { %13973 = vst [vmem:[#allocation188_spill] sm:$0xff] %v10258_v9  ;;  %v3073_v6 = vmax.f32 %v3071_v47, %v3072_v27  ;;  %v2105_v27 = vpop.f32.mrf.mxu3  ;;  %v3403_v9 = vmax.f32 %v3401_v12, %v3402_v18  ;;  %v10296_v16 = vpop.permute.xlu2 %4621  ;;  %v2996_v18 = vrot.slane %v2995_v28, 1 }
 0x1e8   : > { %13974 = vst [vmem:[#allocation189_spill] sm:$0xff] %v10262_v38  ;;  %v10271_v56 = vpop.f32.mrf.mxu2  ;;  %v1578_v38 = vadd.f32 %v10116_v55, %v13981_v52  ;;  %v2191_v52 = vmax.f32 %v1576_v26, 0.0 }
 0x1e9   : > { %13975 = vst [vmem:[#allocation190_spill] sm:$0xff] %v10264_v5  ;;  %v3074_v40 = vrot.slane %v3073_v6, 1  ;;  %v3201_v5 = vmax.f32 %v3199_v33, %v3200_v42  ;;  %4740 = vperm.xlu1 %8425, %v10151_v43   ;;  %v1581_v42 = vadd.f32 %v10116_v55, %v13986_v22  ;;  %v3405_v25 = vmax.f32 %v3403_v9, %v3404_v29 }
 0x1ea   : > { %13976 = vst [vmem:[#allocation191_spill] sm:$0xff] %v10266_v37  ;;  %v10298_v33 = vpop.f32.mrf.mxu1  ;;  %v3406_v43 = vsel %vm2945_vm1, %v10289_v11, -inf  ;;  %v10312_v9 = vperm.slane %v10148_v21, 2 }
 0x1eb   : > { %13977 = vst [vmem:[#allocation192_spill] sm:$0xff] %v10271_v56  ;;  %v3075_v47 = vmax.f32 %v3073_v6, %v3074_v40  ;;  %v10292_v56 = vpop.f32.mrf.mxu0  ;;  %v7483_v6 = vld [vmem:[%s8768_s10 + $0x1e8] sm:$0xff]  ;;  %v3202_v57 = vrot.slane %v3201_v5, 2  ;;  %v2192_v40 = vmax.f32 %v1578_v38, 0.0  ;;  %v2193_v22 = vmax.f32 %v1581_v42, 0.0  ;;  %v13992_v42 = vld [vmem:[#allocation40_spill] sm:$0xff] }
 0x1ec   : > { %13978 = vst [vmem:[#allocation193_spill] sm:$0xff] %v10276_v20  ;;  %v10302_v12 = vpop.permute.xlu1 %4615  ;;  %8428 = vset.pattern.permute.xlu2 %v8810_v17  ;;  %v2448_v20 = vmul.f32 %v10159_v45, %v2191_v52  ;;  %v3407_v38 = vmax.f32 %v3405_v25, %v3406_v43 }
 0x1ed   : > { %13980 = vst [vmem:[#allocation35_spill] sm:$0xff] %v10281_v14  ;;  %3860 = vrot.lane.b32.xlu0 %v3075_v47, %s8675_s30  ;;  %7316 = vmatmul.msk.bf16.gmra.mxu0 %vm1141_vm0, %v7451_v46  ;;  %v2997_v14 = vmax.f32 %v2995_v28, %v2996_v18  ;;  %v2106_v46 = vadd.f32 %v10116_v55, %v2105_v27 }
 0x1ee   : > { %13982 = vst [vmem:[#allocation39_spill] sm:$0xff] %v10289_v11  ;;  %7348 = vmatmul.msk.bf16.gmra.mxu1 %vm1141_vm0, %v7483_v6  ;;  %v10318_v6 = vpop.permute.xlu0 %3884  ;;  %v13991_v11 = vld [vmem:[#allocation36_spill] sm:$0xff]  ;;  %v1738_v28 = vadd.f32 %v10116_v55, %v13992_v42  ;;  %v2450_v18 = vmul.f32 %v10159_v45, %v2193_v22  ;;  %v10329_v27 = vadd.f32 %v10166_v54, %v2448_v20  ;;  %v3408_v25 = vrot.slane %v3407_v38, 4  ;;  %v13997_v22 = vld [vmem:[#allocation46_spill] sm:$0xff] }
 0x1ef   : > { %13983 = vst [vmem:[#allocation194_spill] sm:$0xff] %v10292_v56  ;;  %v2107_v26 = vpop.f32.mrf.mxu3  ;;  %v2449_v56 = vmul.f32 %v10159_v45, %v2192_v40  ;;  %v1736_v52 = vadd.f32 %v10116_v55, %v13991_v11  ;;  %v10334_v40 = vpop.permute.xlu2 %4640  ;;  %v2403_v11 = vmax.f32 %v2106_v46, 0.0 }
 0x1f0   : > { %13984 = vst [vmem:[#allocation195_spill] sm:$0xff] %v10296_v16  ;;  %v1955_v47 = vpop.f32.mrf.mxu2  ;;  %v2108_v42 = vadd.f32 %v10116_v55, %v2107_v26  ;;  %v2256_v51 = vmax.f32 %v1738_v28, 0.0 }
 0x1f1   : > { %13985 = vst [vmem:[#allocation196_spill] sm:$0xff] %v10298_v33  ;;  %v3203_v33 = vmax.f32 %v3201_v5, %v3202_v57  ;;  %3848 = vrot.lane.b32.xlu1 %v2997_v14, %s8675_s30  ;;  %v10332_v14 = vadd.f32 %v10166_v54, %v2449_v56  ;;  %v2255_v20 = vmax.f32 %v1736_v52, 0.0  ;;  %v10343_v56 = vadd.f32 %v10166_v54, %v2450_v18 }
 0x1f2   : > { %13987 = vst [vmem:[#allocation43_spill] sm:$0xff] %v10302_v12  ;;  %8427 = vset.pattern.permute.xlu1 %v8762_v4  ;;  %v10325_v5 = vpop.f32.mrf.mxu1  ;;  %v2404_v46 = vmax.f32 %v2108_v42, 0.0  ;;  %v2998_v12 = vsel %vm2945_vm1, %v10329_v27, -inf  ;;  %v3409_v52 = vmax.f32 %v3407_v38, %v3408_v25  ;;  %v1956_v18 = vadd.f32 %v10116_v55, %v1955_v47 }
 0x1f3   : > { %13988 = vst [vmem:[#allocation197_spill] sm:$0xff] %v10312_v9  ;;  %v10316_v29 = vpop.f32.mrf.mxu0  ;;  %v3204_v57 = vrot.slane %v3203_v33, 1  ;;  %v2999_v26 = vsel %vm2945_vm1, %v10332_v14, -inf  ;;  %v3001_v3 = vsel %vm2945_vm1, %v10343_v56, -inf }
 0x1f4   : > { %13989 = vst [vmem:[#allocation198_spill] sm:$0xff] %v10316_v29  ;;  %4765 = vperm.xlu2 %8428, %v10312_v9   ;;  %v10337_v43 = vpop.permute.xlu1 %3874  ;;  %v1583_v29 = vadd.f32 %v10116_v55, %v13997_v22  ;;  %v2660_v22 = vmul.f32 %v10159_v45, %v2403_v11  ;;  %v3000_v37 = vmax.f32 %v2998_v12, %v2999_v26  ;;  %v2343_v25 = vmax.f32 %v1956_v18, 0.0 }
 0x1f5   : > { %13990 = vst [vmem:[#allocation199_spill] sm:$0xff] %v10318_v6  ;;  %v3205_v16 = vmax.f32 %v3203_v33, %v3204_v57  ;;  %v2512_v57 = vmul.f32 %v10159_v45, %v2255_v20 }
 0x1f6   : > { %13993 = vst [vmem:[#allocation36_spill] sm:$0xff] %v10325_v5  ;;  %v2194_v33 = vmax.f32 %v1583_v29, 0.0  ;;  %v10373_v12 = vadd.f32 %v10166_v54, %v2660_v22  ;;  %v3410_v29 = vrot.slane %v3409_v52, 2 }
 0x1f7   : > { %13994 = vst [vmem:[#allocation40_spill] sm:$0xff] %v10332_v14  ;;  %v2110_v44 = vpop.f32.mrf.mxu3  ;;  %v2513_v14 = vmul.f32 %v10159_v45, %v2256_v51 }
 0x1f8   : > { %13995 = vst [vmem:[#allocation200_spill] sm:$0xff] %v10334_v40  ;;  %v1957_v5 = vpop.f32.mrf.mxu2  ;;  %v13998_v40 = vld [vmem:[#allocation44_spill] sm:$0xff]  ;;  %v2111_v26 = vadd.f32 %v10116_v55, %v2110_v44 }
 0x1f9   : > { %13996 = vst [vmem:[#allocation201_spill] sm:$0xff] %v10337_v43  ;;  %v1741_v6 = vadd.f32 %v10116_v55, %v13998_v40  ;;  %3880 = vrot.lane.b32.xlu1 %v3205_v16, %s8675_s30  ;;  %v2661_v40 = vmul.f32 %v10159_v45, %v2404_v46  ;;  %v2451_v46 = vmul.f32 %v10159_v45, %v2194_v33  ;;  %v14005_v33 = vld [vmem:[#allocation48_spill] sm:$0xff] }
 0x1fa   : > { %v1805_v42 = vpop.f32.mrf.mxu1  ;;  %v10362_v38 = vpop.permute.xlu0 %3854  ;;  %14001 = vst [vmem:[#allocation202_spill] sm:$0xff] %v10373_v12  ;;  %v2405_v44 = vmax.f32 %v2111_v26, 0.0 }
 0x1fb   : > { %v10354_v28 = vpop.f32.mrf.mxu0  ;;  %v2257_v11 = vmax.f32 %v1741_v6, 0.0  ;;  %14000 = vst [vmem:[#allocation44_spill] sm:$0xff] %v10362_v38  ;;  %v4058_v16 = vsel %vm2945_vm1, %v9601_v36, %v10362_v38  ;;  %v4059_v47 = vsel %vm2945_vm1, %v9604_v59, %v10362_v38  ;;  %v10378_v20 = vadd.f32 %v10166_v54, %v2661_v40 }
 0x1fc   : > { %13999 = vst [vmem:[#allocation46_spill] sm:$0xff] %v10354_v28  ;;  %8430 = vset.pattern.permute.xlu2 %v8755_v2  ;;  %v5922_v51 = vmul.f32 %v9743_v24, %v4058_v16  ;;  %v5923_v6 = vmul.f32 %v9798_v30, %v4059_v47  ;;  %v10382_v59 = vadd.f32 %v10166_v54, %v2512_v57  ;;  %v10395_v18 = vpop.permute.xlu1 %4634 }
 0x1fd   : > { %7317 = vmatmul.msk.bf16.gmra.mxu0 %vm1141_vm0, %v7452_v1  ;;  %14002 = vst [vmem:[#allocation203_spill] sm:$0xff] %v10378_v20  ;;  %v10384_v1 = vpop.permute.xlu2 %3906  ;;  %v10387_v38 = vmax.f32 %v3000_v37, %v3001_v3  ;;  %v10390_v24 = vadd.f32 %v10166_v54, %v2513_v14  ;;  %v10393_v30 = vmul.f32 %v10159_v45, %v2257_v11  ;;  %v3687_v37 = vsel %vm2945_vm1, %v10373_v12, -inf }
 0x1fe   : > { %14003 = vst [vmem:[#allocation204_spill] sm:$0xff] %v10384_v1  ;;  %v7617_v40 = vpack.c.bf16 %v5923_v6, %v5922_v51  ;;  %v10399_v57 = vadd.f32 %v10116_v55, %v14005_v33  ;;  %v3411_v16 = vmax.f32 %v3409_v52, %v3410_v29  ;;  %v1958_v47 = vadd.f32 %v10116_v55, %v1957_v5 }
 0x1ff   : > { %v2112_v22 = vpop.f32.mrf.mxu3  ;;  %14004 = vst [vmem:[#allocation205_spill] sm:$0xff] %v10395_v18  ;;  %v2600_v14 = vmul.f32 %v10159_v45, %v2343_v25  ;;  %v3688_v11 = vsel %vm2945_vm1, %v10378_v20, -inf  ;;  %v10413_v52 = vadd.f32 %v10166_v54, %v2451_v46  ;;  %v2056_v5 = vadd.f32 %v10116_v55, %v9392_v0 }
 0x200   : > { %v1960_v36 = vpop.f32.mrf.mxu2  ;;  %8205 = vst [vmem:[%s9366_s7 + $0x60] sm:$0xff] %v7617_v40   ;;  %v2113_v51 = vadd.f32 %v10116_v55, %v2112_v22  ;;  %v2058_v29 = vadd.f32 %v10116_v55, %v9449_v15  ;;  %v2344_v6 = vmax.f32 %v1958_v47, 0.0  ;;  %v1806_v40 = vadd.f32 %v10116_v55, %v1805_v42 }
 0x201   : > { %4759 = vperm.xlu1 %8427, %v10312_v9   ;;  %v2662_v25 = vmul.f32 %v10159_v45, %v2405_v44  ;;  %v1961_v33 = vadd.f32 %v10116_v55, %v1960_v36  ;;  %v3412_v22 = vrot.slane %v3411_v16, 1  ;;  %v3689_v46 = vmax.f32 %v3687_v37, %v3688_v11 }
 0x202   : > { %v1807_v26 = vpop.f32.mrf.mxu1  ;;  %v2406_v12 = vmax.f32 %v2113_v51, 0.0  ;;  %v2601_v20 = vmul.f32 %v10159_v45, %v2344_v6  ;;  %v10426_v18 = vadd.f32 %v10166_v54, %v2600_v14  ;;  %v2383_v44 = vmax.f32 %v2056_v5, 0.0 }
 0x203   : > { %v10404_v3 = vpop.f32.mrf.mxu0  ;;  %v1808_v0 = vadd.f32 %v10116_v55, %v1807_v26  ;;  %v10429_v15 = vadd.f32 %v10166_v54, %v2662_v25  ;;  %v2345_v42 = vmax.f32 %v1961_v33, 0.0  ;;  %v2384_v51 = vmax.f32 %v2058_v29, 0.0  ;;  %v7453_v33 = vld [vmem:[%s8768_s10 + $0xf8] sm:$0xff] }
 0x204   : > { %14006 = vst [vmem:[#allocation48_spill] sm:$0xff] %v10404_v3  ;;  %4778 = vperm.xlu2 %8430, %v9419_v8   ;;  %v2663_v47 = vmul.f32 %v10159_v45, %v2406_v12  ;;  %v10435_v37 = vadd.f32 %v10166_v54, %v2601_v20  ;;  %v10440_v14 = vpop.permute.xlu1 %4646  ;;  %v2283_v26 = vmax.f32 %v1806_v40, 0.0  ;;  %v2061_v29 = vadd.f32 %v10116_v55, %v9501_v49 }
 0x205   : > { %14007 = vst [vmem:[#allocation206_spill] sm:$0xff] %v10426_v18  ;;  %v10432_v1 = vpop.permute.xlu2 %4653  ;;  %v3690_v25 = vsel %vm2945_vm1, %v10429_v15, -inf  ;;  %v2602_v12 = vmul.f32 %v10159_v45, %v2345_v42  ;;  %v3413_v20 = vmax.f32 %v3411_v16, %v3412_v22  ;;  %v3492_v40 = vsel %vm2945_vm1, %v10426_v18, -inf }
 0x206   : > { %14008 = vst [vmem:[#allocation207_spill] sm:$0xff] %v10429_v15  ;;  %v10446_v5 = vadd.f32 %v10166_v54, %v2663_v47  ;;  %v3493_v42 = vsel %vm2945_vm1, %v10435_v37, -inf  ;;  %v3003_v16 = vsel %vm2945_vm1, %v10413_v52, -inf  ;;  %v2258_v22 = vmax.f32 %v10399_v57, 0.0 }
 0x207   : > { %14009 = vst [vmem:[#allocation208_spill] sm:$0xff] %v10432_v1  ;;  %v10438_v6 = vpop.f32.mrf.mxu3  ;;  %v3691_v1 = vmax.f32 %v3689_v46, %v3690_v25  ;;  %v10459_v47 = vadd.f32 %v10166_v54, %v2602_v12  ;;  %v2640_v46 = vmul.f32 %v10159_v45, %v2383_v44  ;;  %v2641_v15 = vmul.f32 %v10159_v45, %v2384_v51 }
 0x208   : > { %v1962_v36 = vpop.f32.mrf.mxu2  ;;  %14010 = vst [vmem:[#allocation209_spill] sm:$0xff] %v10435_v37  ;;  %v3692_v49 = vsel %vm2945_vm1, %v10446_v5, -inf  ;;  %v2540_v18 = vmul.f32 %v10159_v45, %v2283_v26  ;;  %v2063_v44 = vadd.f32 %v10116_v55, %v9550_v39  ;;  %v10482_v26 = vperm.slane %v9890_v7, 5 }
 0x209   : > { %v1963_v11 = vadd.f32 %v10116_v55, %v1962_v36  ;;  %14011 = vst [vmem:[#allocation210_spill] sm:$0xff] %v10438_v6  ;;  %v2284_v36 = vmax.f32 %v1808_v0, 0.0  ;;  %8429 = vset.pattern.permute.xlu1 %v8791_v10  ;;  %v3693_v37 = vmax.f32 %v3691_v1, %v3692_v49  ;;  %v3495_v1 = vsel %vm2945_vm1, %v10459_v47, -inf }
 0x20a   : > { %14012 = vst [vmem:[#allocation211_spill] sm:$0xff] %v10440_v14  ;;  %v1810_v0 = vpop.f32.mrf.mxu1  ;;  %v2385_v14 = vmax.f32 %v2061_v29, 0.0  ;;  %v3206_v29 = vsel %vm2945_vm1, %v10382_v59, -inf  ;;  %v10490_v39 = vadd.f32 %v10166_v54, %v10393_v30  ;;  %v10499_v7 = vadd.f32 %v10166_v54, %v2640_v46  ;;  %5034 = vperm.xlu0 %8382, %v10482_v26  }
 0x20b   : > { %14013 = vst [vmem:[#allocation212_spill] sm:$0xff] %v10446_v5  ;;  %v10452_v3 = vpop.f32.mrf.mxu0  ;;  %v2346_v25 = vmax.f32 %v1963_v11, 0.0  ;;  %v1811_v12 = vadd.f32 %v10116_v55, %v1810_v0  ;;  %v3494_v5 = vmax.f32 %v3492_v40, %v3493_v42  ;;  %v2515_v40 = vmul.f32 %v10159_v45, %v2258_v22 }
 0x20c   : > { %14014 = vst [vmem:[#allocation213_spill] sm:$0xff] %v10452_v3  ;;  %8432 = vset.pattern.permute.xlu2 %v8791_v10  ;;  %v2541_v3 = vmul.f32 %v10159_v45, %v2284_v36  ;;  %v10501_v42 = vpop.permute.xlu1 %4665  ;;  %v10504_v49 = vadd.f32 %v10166_v54, %v2540_v18  ;;  %v3694_v0 = vrot.slane %v3693_v37, 4  ;;  %v3004_v30 = vmax.f32 %v10387_v38, %v3003_v16 }
 0x20d   : > { %14015 = vst [vmem:[#allocation214_spill] sm:$0xff] %v10459_v47  ;;  %7318 = vmatmul.msk.bf16.gmra.mxu0 %vm1141_vm0, %v7453_v33  ;;  %v2603_v57 = vmul.f32 %v10159_v45, %v2346_v25  ;;  %3912 = vrot.lane.b32.xlu2 %v3413_v20, %s8675_s30  ;;  %v2285_v51 = vmax.f32 %v1811_v12, 0.0  ;;  %v3207_v33 = vsel %vm2945_vm1, %v10390_v24, -inf  ;;  %v10508_v25 = vpop.permute.xlu2 %4671  ;;  %v10515_v46 = vadd.f32 %v10166_v54, %v2641_v15 }
 0x20e   : > { %14017 = vst [vmem:[#allocation216_spill] sm:$0xff] %v10482_v26  ;;  %v10511_v12 = vadd.f32 %v10166_v54, %v2541_v3  ;;  %v2642_v47 = vmul.f32 %v10159_v45, %v2385_v14  ;;  %v2386_v18 = vmax.f32 %v2063_v44, 0.0  ;;  %v3208_v16 = vmax.f32 %v3206_v29, %v3207_v33 }
 0x20f   : > { %14018 = vst [vmem:[#allocation217_spill] sm:$0xff] %v10490_v39  ;;  %v10493_v20 = vadd.f32 %v10166_v54, %v2603_v57  ;;  %v10495_v36 = vpop.f32.mrf.mxu3  ;;  %v3496_v57 = vmax.f32 %v3494_v5, %v3495_v1  ;;  %v2542_v22 = vmul.f32 %v10159_v45, %v2285_v51  ;;  %v3209_v3 = vsel %vm2945_vm1, %v10490_v39, -inf }
 0x210   : > { %v10479_v11 = vpop.f32.mrf.mxu2  ;;  %14020 = vst [vmem:[#allocation219_spill] sm:$0xff] %v10495_v36  ;;  %v10526_v1 = vadd.f32 %v10166_v54, %v2515_v40  ;;  %v3622_v15 = vsel %vm2945_vm1, %v10499_v7, -inf  ;;  %v3297_v14 = vsel %vm2945_vm1, %v10504_v49, -inf  ;;  %v3695_v44 = vmax.f32 %v3693_v37, %v3694_v0  ;;  %v14106_v36 = vld [vmem:[#allocation95_spill] sm:$0xff] }
 0x211   : > { %14016 = vst [vmem:[#allocation215_spill] sm:$0xff] %v10479_v11  ;;  %4771 = vperm.xlu1 %8429, %v10312_v9   ;;  %v3497_v38 = vsel %vm2945_vm1, %v10493_v20, -inf  ;;  %v3298_v51 = vsel %vm2945_vm1, %v10511_v12, -inf  ;;  %v3623_v40 = vsel %vm2945_vm1, %v10515_v46, -inf  ;;  %v3005_v37 = vrot.slane %v3004_v30, 4 }
 0x212   : > { %14019 = vst [vmem:[#allocation218_spill] sm:$0xff] %v10493_v20  ;;  %v1812_v5 = vpop.f32.mrf.mxu1  ;;  %v10535_v20 = vadd.f32 %v10166_v54, %v2542_v22  ;;  %v3498_v29 = vmax.f32 %v3496_v57, %v3497_v38  ;;  %v3210_v22 = vmax.f32 %v3208_v16, %v3209_v3  ;;  %v3211_v57 = vsel %vm2945_vm1, %v10526_v1, -inf }
 0x213   : > { %14021 = vst [vmem:[#allocation220_spill] sm:$0xff] %v10499_v7  ;;  %v1813_v33 = vadd.f32 %v10116_v55, %v1812_v5  ;;  %v2643_v7 = vmul.f32 %v10159_v45, %v2386_v18  ;;  %v3299_v5 = vmax.f32 %v3297_v14, %v3298_v51  ;;  %v3006_v3 = vmax.f32 %v3004_v30, %v3005_v37 }
 0x214   : > { %14022 = vst [vmem:[#allocation221_spill] sm:$0xff] %v10501_v42  ;;  %v10519_v42 = vpop.f32.mrf.mxu0  ;;  %v10551_v38 = vpop.permute.xlu1 %4678  ;;  %v3300_v18 = vsel %vm2945_vm1, %v10535_v20, -inf  ;;  %v3212_v51 = vmax.f32 %v3210_v22, %v3211_v57 }
 0x215   : > { %14023 = vst [vmem:[#allocation222_spill] sm:$0xff] %v10504_v49  ;;  %4796 = vperm.xlu2 %8432, %v9419_v8   ;;  %v2286_v9 = vmax.f32 %v1813_v33, 0.0  ;;  %v3007_v30 = vrot.slane %v3006_v3, 2 }
 0x216   : > { %14024 = vst [vmem:[#allocation223_spill] sm:$0xff] %v10508_v25  ;;  %v10541_v25 = vadd.f32 %v10166_v54, %v2642_v47  ;;  %v3624_v47 = vmax.f32 %v3622_v15, %v3623_v40 }
 0x217   : > { %14025 = vst [vmem:[#allocation224_spill] sm:$0xff] %v10511_v12  ;;  %v10547_v39 = vpop.f32.mrf.mxu3  ;;  %v2543_v49 = vmul.f32 %v10159_v45, %v2286_v9  ;;  %v3499_v12 = vrot.slane %v3498_v29, 4  ;;  %v3301_v9 = vmax.f32 %v3299_v5, %v3300_v18 }
 0x218   : > { %14026 = vst [vmem:[#allocation225_spill] sm:$0xff] %v10515_v46  ;;  %v10545_v0 = vpop.f32.mrf.mxu2  ;;  %v3696_v46 = vrot.slane %v3695_v44, 2  ;;  %v3625_v33 = vsel %vm2945_vm1, %v10541_v25, -inf }
 0x219   : > { %14027 = vst [vmem:[#allocation226_spill] sm:$0xff] %v10519_v42  ;;  %8431 = vset.pattern.permute.xlu1 %v8810_v17  ;;  %v10565_v15 = vadd.f32 %v10166_v54, %v2543_v49 }
 0x21a   : > { %14028 = vst [vmem:[#allocation227_spill] sm:$0xff] %v10526_v1  ;;  %v10562_v1 = vpop.permute.xlu2 %3876  ;;  %v10567_v14 = vpop.f32.mrf.mxu1  ;;  %v3697_v40 = vmax.f32 %v3695_v44, %v3696_v46 }
 0x21b   : > { %14029 = vst [vmem:[#allocation228_spill] sm:$0xff] %v10535_v20  ;;  %v3626_v20 = vmax.f32 %v3624_v47, %v3625_v33  ;;  %v3008_v47 = vmax.f32 %v3006_v3, %v3007_v30  ;;  %v14041_v33 = vld [vmem:[#allocation51_spill] sm:$0xff] }
 0x21c   : > { %14030 = vst [vmem:[#allocation229_spill] sm:$0xff] %v10541_v25  ;;  %v1655_v16 = vpop.f32.mrf.mxu0  ;;  %v3302_v25 = vsel %vm2945_vm1, %v10565_v15, -inf  ;;  %v3698_v22 = vrot.slane %v3697_v40, 1  ;;  %v10579_v5 = vpop.permute.xlu1 %3940 }
 0x21d   : > { %14031 = vst [vmem:[#allocation230_spill] sm:$0xff] %v10545_v0  ;;  %v10559_v0 = vadd.f32 %v10166_v54, %v2643_v7  ;;  %v3500_v7 = vmax.f32 %v3498_v29, %v3499_v12  ;;  %8434 = vset.pattern.permute.xlu2 %v8762_v4  ;;  %v3303_v42 = vmax.f32 %v3301_v9, %v3302_v25  ;;  %v10583_v12 = vperm.slane %v10148_v21, 4 }
 0x21e   : > { %14032 = vst [vmem:[#allocation231_spill] sm:$0xff] %v10547_v39  ;;  %v1656_v46 = vadd.f32 %v10116_v55, %v1655_v16  ;;  %v3699_v18 = vmax.f32 %v3697_v40, %v3698_v22  ;;  %v1588_v16 = vadd.f32 %v10116_v55, %v9370_v34  ;;  %v3009_v30 = vrot.slane %v3008_v47, 1 }
 0x21f   : > { %14033 = vst [vmem:[#allocation232_spill] sm:$0xff] %v10551_v38  ;;  %v3627_v11 = vsel %vm2945_vm1, %v10559_v0, -inf  ;;  %v10576_v49 = vpop.f32.mrf.mxu3  ;;  %v3501_v44 = vrot.slane %v3500_v7, 2 }
 0x220   : > { %14034 = vst [vmem:[#allocation233_spill] sm:$0xff] %v10559_v0  ;;  %v10574_v37 = vpop.f32.mrf.mxu2  ;;  %v3628_v57 = vmax.f32 %v3626_v20, %v3627_v11  ;;  %v1586_v0 = vadd.f32 %v10116_v55, %v14041_v33  ;;  %3956 = vrot.lane.b32.xlu0 %v3699_v18, %s8675_s30 }
 0x221   : > { %14035 = vst [vmem:[#allocation234_spill] sm:$0xff] %v10565_v15  ;;  %4790 = vperm.xlu1 %8431, %v9419_v8   ;;  %v3304_v8 = vrot.slane %v3303_v42, 4  ;;  %v3502_v40 = vmax.f32 %v3500_v7, %v3501_v44  ;;  %v3010_v7 = vmax.f32 %v3008_v47, %v3009_v30 }
 0x222   : > { %14036 = vst [vmem:[#allocation235_spill] sm:$0xff] %v10567_v14  ;;  %v3213_v14 = vrot.slane %v3212_v51, 4  ;;  %v10587_v25 = vpop.permute.xlu2 %4684  ;;  %v10590_v20 = vpop.f32.mrf.mxu1  ;;  %v3629_v3 = vrot.slane %v3628_v57, 4  ;;  %v2195_v33 = vmax.f32 %v1586_v0, 0.0 }
 0x223   : > { %14037 = vst [vmem:[#allocation236_spill] sm:$0xff] %v10574_v37  ;;  %v3305_v34 = vmax.f32 %v3303_v42, %v3304_v8  ;;  %v1591_v42 = vadd.f32 %v10116_v55, %v9422_v60 }
 0x224   : > { %14038 = vst [vmem:[#allocation237_spill] sm:$0xff] %v10576_v49  ;;  %v1657_v29 = vpop.f32.mrf.mxu0  ;;  %v3214_v9 = vmax.f32 %v3212_v51, %v3213_v14 }
 0x225   : > { %14039 = vst [vmem:[#allocation238_spill] sm:$0xff] %v10579_v5  ;;  %v1658_v11 = vadd.f32 %v10116_v55, %v1657_v29  ;;  %v2223_v5 = vmax.f32 %v1656_v46, 0.0  ;;  %4809 = vperm.xlu2 %8434, %v10583_v12   ;;  %v3503_v29 = vrot.slane %v3502_v40, 1  ;;  %v3630_v46 = vmax.f32 %v3628_v57, %v3629_v3 }
 0x226   : > { %14040 = vst [vmem:[#allocation239_spill] sm:$0xff] %v10583_v12  ;;  %v3215_v28 = vrot.slane %v3214_v9, 2 }
 0x227   : > { %14042 = vst [vmem:[#allocation51_spill] sm:$0xff] %v10587_v25  ;;  %v2224_v15 = vmax.f32 %v1658_v11, 0.0  ;;  %v10598_v37 = vpop.f32.mrf.mxu3  ;;  %v2480_v14 = vmul.f32 %v10159_v45, %v2223_v5  ;;  %v3504_v18 = vmax.f32 %v3502_v40, %v3503_v29  ;;  %v3306_v11 = vrot.slane %v3305_v34, 2  ;;  %v10610_v5 = vpop.permute.xlu1 %4696 }
 0x228   : > { %14043 = vst [vmem:[#allocation240_spill] sm:$0xff] %v10590_v20  ;;  %v10596_v22 = vpop.f32.mrf.mxu2  ;;  %v2196_v20 = vmax.f32 %v1588_v16, 0.0  ;;  %v3631_v40 = vrot.slane %v3630_v46, 2  ;;  %v2197_v29 = vmax.f32 %v1591_v42, 0.0 }
 0x229   : > { %14044 = vst [vmem:[#allocation241_spill] sm:$0xff] %v10596_v22  ;;  %v2481_v51 = vmul.f32 %v10159_v45, %v2224_v15  ;;  %8433 = vset.pattern.permute.xlu1 %v8755_v2  ;;  %v2452_v22 = vmul.f32 %v10159_v45, %v2195_v33  ;;  %v3216_v15 = vmax.f32 %v3214_v9, %v3215_v28 }
 0x22a   : > { %14045 = vst [vmem:[#allocation242_spill] sm:$0xff] %v10598_v37  ;;  %v10605_v49 = vpop.f32.mrf.mxu1  ;;  %v2453_v16 = vmul.f32 %v10159_v45, %v2196_v20  ;;  %3926 = vrot.lane.b32.xlu0 %v3504_v18, %s8675_s30  ;;  %v4704_v57 = vpop.permute.xlu2 %4703  ;;  %v10614_v47 = vadd.f32 %v10166_v54, %v2480_v14  ;;  %v3307_v20 = vmax.f32 %v3305_v34, %v3306_v11  ;;  %v14055_v37 = vld [vmem:[#allocation50_spill] sm:$0xff] }
 0x22b   : > { %14046 = vst [vmem:[#allocation243_spill] sm:$0xff] %v10605_v49  ;;  %v10617_v8 = vadd.f32 %v10166_v54, %v2481_v51  ;;  %v10621_v30 = vadd.f32 %v10166_v54, %v2452_v22  ;;  %v3217_v14 = vrot.slane %v3216_v15, 1  ;;  %v2066_v49 = vadd.f32 %v10116_v55, %v9574_v13  ;;  %v10659_v13 = vpop.permute.xlu0 %4909 }
 0x22c   : > { %v1660_v44 = vpop.f32.mrf.mxu0  ;;  %14047 = vst [vmem:[#allocation244_spill] sm:$0xff] %v10610_v5  ;;  %v10630_v33 = vadd.f32 %v10166_v54, %v2453_v16  ;;  %v3308_v51 = vrot.slane %v3307_v20, 1  ;;  %v3102_v34 = vsel %vm2945_vm1, %v10614_v47, -inf }
 0x22d   : > { %v1661_v0 = vadd.f32 %v10116_v55, %v1660_v44  ;;  %3850 = vrot.lane.b32.xlu2 %v3010_v7, %s8675_s30  ;;  %v3103_v22 = vsel %vm2945_vm1, %v10617_v8, -inf  ;;  %v3632_v7 = vmax.f32 %v3630_v46, %v3631_v40  ;;  %v14050_v44 = vld [vmem:[#allocation70_spill] sm:$0xff]  ;;  %v14053_v46 = vld [vmem:[#allocation49_spill] sm:$0xff]  ;;  %v3218_v26 = vmax.f32 %v3216_v15, %v3217_v14 }
 0x22e   : > { %8436 = vset.pattern.permute.xlu2 %v8755_v2  ;;  %v1593_v11 = vadd.f32 %v10116_v55, %v14050_v44  ;;  %v3309_v5 = vmax.f32 %v3307_v20, %v3308_v51  ;;  %v4098_v40 = vsel %vm2945_vm1, %v14053_v46, %v10337_v43  ;;  %v4099_v20 = vsel %vm2945_vm1, %v14055_v37, %v10337_v43  ;;  %v14057_v37 = vld [vmem:[#allocation81_spill] sm:$0xff] }
 0x22f   : > { %v2225_v3 = vmax.f32 %v1661_v0, 0.0  ;;  %v10627_v9 = vpop.f32.mrf.mxu3  ;;  %v14051_v0 = vld [vmem:[#allocation64_spill] sm:$0xff]  ;;  %v1911_v15 = vadd.f32 %v10116_v55, %v14057_v37  ;;  %v2387_v14 = vmax.f32 %v2066_v49, 0.0 }
 0x230   : > { %v10625_v28 = vpop.f32.mrf.mxu2  ;;  %14049 = vst [vmem:[#allocation246_spill] sm:$0xff] %v10627_v9  ;;  %v1906_v16 = vadd.f32 %v10116_v55, %v14051_v0  ;;  %v5962_v9 = vmul.f32 %v4704_v57, %v4098_v40  ;;  %v2454_v57 = vmul.f32 %v10159_v45, %v2197_v29  ;;  %v3012_v29 = vsel %vm2945_vm1, %v10630_v33, -inf }
 0x231   : > { %v2482_v60 = vmul.f32 %v10159_v45, %v2225_v3  ;;  %14048 = vst [vmem:[#allocation245_spill] sm:$0xff] %v10625_v28  ;;  %v14052_v3 = vld [vmem:[#allocation75_spill] sm:$0xff]  ;;  %4803 = vperm.xlu1 %8433, %v10583_v12  }
 0x232   : > { %v1908_v42 = vadd.f32 %v10116_v55, %v14052_v3  ;;  %v10654_v0 = vpop.f32.mrf.mxu1  ;;  %v3104_v3 = vmax.f32 %v3102_v34, %v3103_v22  ;;  %3896 = vrot.lane.b32.xlu0 %v3309_v5, %s8675_s30  ;;  %v2323_v34 = vmax.f32 %v1906_v16, 0.0 }
 0x233   : > { %v10637_v18 = vadd.f32 %v10166_v54, %v2482_v60  ;;  %v2068_v60 = vadd.f32 %v10116_v55, %v9614_v50  ;;  %14054 = vst [vmem:[#allocation70_spill] sm:$0xff] %v10654_v0  ;;  %v4710_v51 = vpop.permute.xlu1 %4709  ;;  %v10662_v50 = vpop.permute.xlu2 %4715  ;;  %v3633_v0 = vrot.slane %v3632_v7, 1 }
 0x234   : > { %v1662_v28 = vpop.f32.mrf.mxu0  ;;  %14056 = vst [vmem:[#allocation64_spill] sm:$0xff] %v10662_v50  ;;  %v2324_v22 = vmax.f32 %v1908_v42, 0.0 }
 0x235   : > { %v1663_v44 = vadd.f32 %v10116_v55, %v1662_v28  ;;  %v3105_v46 = vsel %vm2945_vm1, %v10637_v18, -inf  ;;  %v5963_v28 = vmul.f32 %v4710_v51, %v4099_v20  ;;  %3882 = vrot.lane.b32.xlu2 %v3218_v26, %s8675_s30  ;;  %v2198_v20 = vmax.f32 %v1593_v11, 0.0 }
 0x236   : > { %v3106_v16 = vmax.f32 %v3104_v3, %v3105_v46  ;;  %v2388_v26 = vmax.f32 %v2068_v60, 0.0  ;;  %v2071_v51 = vadd.f32 %v10116_v55, %v9659_v31  ;;  %v2581_v37 = vmul.f32 %v10159_v45, %v2324_v22 }
 0x237   : > { %v2226_v25 = vmax.f32 %v1663_v44, 0.0  ;;  %v7717_v5 = vpack.c.bf16 %v5963_v28, %v5962_v9  ;;  %v3011_v44 = vsel %vm2945_vm1, %v10621_v30, -inf  ;;  %v10677_v42 = vpop.f32.mrf.mxu3  ;;  %v10686_v9 = vadd.f32 %v10166_v54, %v2454_v57 }
 0x238   : > { %v10671_v50 = vpop.f32.mrf.mxu2  ;;  %14059 = vst [vmem:[#allocation49_spill] sm:$0xff] %v10677_v42  ;;  %v2580_v28 = vmul.f32 %v10159_v45, %v2323_v34  ;;  %v10692_v11 = vperm.slane %v10148_v21, 5  ;;  %v2325_v31 = vmax.f32 %v1911_v15, 0.0  ;;  %v1913_v3 = vadd.f32 %v10116_v55, %v9572_v32 }
 0x239   : > { %v2483_v40 = vmul.f32 %v10159_v45, %v2226_v25  ;;  %14058 = vst [vmem:[#allocation75_spill] sm:$0xff] %v10671_v50  ;;  %v3634_v25 = vmax.f32 %v3632_v7, %v3633_v0  ;;  %8435 = vset.pattern.permute.xlu1 %v8791_v10  ;;  %v2644_v7 = vmul.f32 %v10159_v45, %v2387_v14  ;;  %v3014_v14 = vsel %vm2945_vm1, %v10686_v9, -inf }
 0x23a   : > { %8225 = vst [vmem:[%s9366_s7 + $0x100] sm:$0xff] %v7717_v5   ;;  %v10702_v46 = vpop.f32.mrf.mxu1  ;;  %v2073_v57 = vadd.f32 %v10116_v55, %v9698_v53  ;;  %v3013_v34 = vmax.f32 %v3011_v44, %v3012_v29  ;;  %v2455_v22 = vmul.f32 %v10159_v45, %v2198_v20  ;;  %v2645_v15 = vmul.f32 %v10159_v45, %v2388_v26 }
 0x23b   : > { %v10683_v49 = vadd.f32 %v10166_v54, %v2483_v40  ;;  %14060 = vst [vmem:[#allocation50_spill] sm:$0xff] %v10686_v9  ;;  %3946 = vrot.lane.b32.xlu1 %v3634_v25, %s8675_s30  ;;  %v2389_v5 = vmax.f32 %v2071_v51, 0.0  ;;  %v4735_v32 = vpop.permute.xlu2 %4734  ;;  %v10711_v40 = vadd.f32 %v10166_v54, %v2580_v28  ;;  %v10714_v25 = vpop.permute.xlu0 %3950  ;;  %v10717_v53 = vadd.f32 %v10166_v54, %v2581_v37 }
 0x23c   : > { %14061 = vst [vmem:[#allocation81_spill] sm:$0xff] %v10692_v11  ;;  %v10694_v60 = vpop.f32.mrf.mxu0  ;;  %v2582_v55 = vmul.f32 %v10159_v45, %v2325_v31  ;;  %v2326_v44 = vmax.f32 %v1913_v3, 0.0  ;;  %v10721_v29 = vadd.f32 %v10166_v54, %v2644_v7  ;;  %v2390_v20 = vmax.f32 %v2073_v57, 0.0  ;;  %v14072_v3 = vld [vmem:[#allocation79_spill] sm:$0xff] }
 0x23d   : > { %14062 = vst [vmem:[#allocation247_spill] sm:$0xff] %v10694_v60  ;;  %v3107_v0 = vsel %vm2945_vm1, %v10683_v49, -inf  ;;  %4828 = vperm.xlu2 %8436, %v10692_v11   ;;  %v3015_v51 = vmax.f32 %v3013_v34, %v3014_v14  ;;  %v10726_v28 = vadd.f32 %v10166_v54, %v2455_v22  ;;  %v2646_v37 = vmul.f32 %v10159_v45, %v2389_v5 }
 0x23e   : > { %14063 = vst [vmem:[#allocation248_spill] sm:$0xff] %v10702_v46  ;;  %v3108_v21 = vmax.f32 %v3106_v16, %v3107_v0  ;;  %v10729_v0 = vadd.f32 %v10166_v54, %v2645_v15  ;;  %v3427_v31 = vsel %vm2945_vm1, %v10711_v40, -inf  ;;  %v3428_v22 = vsel %vm2945_vm1, %v10717_v53, -inf }
 0x23f   : > { %14064 = vst [vmem:[#allocation249_spill] sm:$0xff] %v10711_v40  ;;  %v10750_v15 = vadd.f32 %v10166_v54, %v2582_v55  ;;  %v2583_v5 = vmul.f32 %v10159_v45, %v2326_v44  ;;  %v3635_v14 = vsel %vm2945_vm1, %v10721_v29, -inf  ;;  %v4103_v40 = vsel %vm2945_vm1, %v9623_v63, %v10562_v1 }
 0x240   : > { %14065 = vst [vmem:[#allocation250_spill] sm:$0xff] %v10714_v25  ;;  %v3109_v43 = vrot.slane %v3108_v21, 4  ;;  %v10723_v26 = vpop.f32.mrf.mxu2  ;;  %v10732_v25 = vpop.f32.mrf.mxu3  ;;  %v3636_v44 = vsel %vm2945_vm1, %v10729_v0, -inf  ;;  %v5967_v60 = vmul.f32 %v4735_v32, %v4103_v40  ;;  %v10782_v32 = vld [vmem:[%s13488_s3 + $0x2] ss:$0 sm:$0xff] }
 0x241   : > { %14066 = vst [vmem:[#allocation251_spill] sm:$0xff] %v10717_v53  ;;  %v14076_v53 = vld [vmem:[#allocation89_spill] sm:$0xff]  ;;  %v10785_v40 = vadd.f32 %v10782_v32, %v2583_v5 }
 0x242   : > { %14067 = vst [vmem:[#allocation252_spill] sm:$0xff] %v10721_v29  ;;  %v3110_v16 = vmax.f32 %v3108_v21, %v3109_v43  ;;  %v10739_v43 = vld [vmem:[%s13488_s3] ss:$0 sm:$0xff]  ;;  %v4102_v55 = vsel %vm2945_vm1, %v14076_v53, %v10562_v1  ;;  %v10768_v29 = vadd.f32 %v10166_v54, %v2646_v37  ;;  %v10806_v5 = vld [vmem:[%s13488_s3 + $0x1] ss:$0 sm:$0xff] }
 0x243   : > { %14068 = vst [vmem:[#allocation253_spill] sm:$0xff] %v10723_v26  ;;  %v1756_v7 = vadd.f32 %v10739_v43, %v14072_v3  ;;  %v1758_v57 = vadd.f32 %v10739_v43, %v9566_v61  ;;  %4821 = vperm.xlu1 %8435, %v10583_v12   ;;  %v10756_v3 = vpop.f32.mrf.mxu1  ;;  %v2647_v61 = vmul.f32 %v10159_v45, %v2390_v20  ;;  %v4729_v46 = vpop.permute.xlu1 %4728  ;;  %v3016_v45 = vsel %vm2945_vm1, %v10726_v28, -inf  ;;  %v14107_v12 = vld [vmem:[#allocation157_spill] sm:$0xff] }
 0x244   : > { %14069 = vst [vmem:[#allocation254_spill] sm:$0xff] %v10726_v28  ;;  %v10745_v21 = vpop.f32.mrf.mxu0  ;;  %v3111_v34 = vrot.slane %v3110_v16, 2  ;;  %v3429_v26 = vmax.f32 %v3427_v31, %v3428_v22  ;;  %v10777_v37 = vpop.permute.xlu2 %3942  ;;  %v3637_v31 = vmax.f32 %v3635_v14, %v3636_v44  ;;  %v1918_v6 = vadd.f32 %v10739_v43, %v14106_v36 }
 0x245   : > { %14070 = vst [vmem:[#allocation255_spill] sm:$0xff] %v10729_v0  ;;  %v2263_v20 = vmax.f32 %v1756_v7, 0.0  ;;  %8438 = vset.pattern.permute.xlu2 %v8810_v17  ;;  %v2264_v53 = vmax.f32 %v1758_v57, 0.0  ;;  %v10788_v7 = vadd.f32 %v10782_v32, %v2647_v61  ;;  %v10790_v22 = vpop.permute.xlu0 %3920 }
 0x246   : > { %14071 = vst [vmem:[#allocation256_spill] sm:$0xff] %v10732_v25 }
 0x247   : > { %14073 = vst [vmem:[#allocation79_spill] sm:$0xff] %v10745_v21  ;;  %v3112_v21 = vmax.f32 %v3110_v16, %v3111_v34  ;;  %v3430_v16 = vsel %vm2945_vm1, %v10750_v15, -inf  ;;  %v14078_v34 = vld [vmem:[#allocation85_spill] sm:$0xff]  ;;  %v2521_v14 = vmul.f32 %v10806_v5, %v2264_v53 }
 0x248   : > { %14074 = vst [vmem:[#allocation257_spill] sm:$0xff] %v10750_v15  ;;  %v1761_v54 = vadd.f32 %v10739_v43, %v14078_v34  ;;  %v3017_v34 = vmax.f32 %v3015_v51, %v3016_v45  ;;  %v3431_v61 = vmax.f32 %v3429_v26, %v3430_v16  ;;  %v2135_v51 = vpop.f32.mrf.mxu3  ;;  %v3432_v45 = vsel %vm2945_vm1, %v10785_v40, -inf  ;;  %v14090_v15 = vld [vmem:[#allocation86_spill] sm:$0xff] }
 0x249   : > { %14075 = vst [vmem:[#allocation258_spill] sm:$0xff] %v10756_v3  ;;  %v5966_v3 = vmul.f32 %v4729_v46, %v4102_v55  ;;  %v3113_v63 = vrot.slane %v3112_v21, 1  ;;  %v10792_v55 = vpop.f32.mrf.mxu2 }
 0x24a   : > { %14077 = vst [vmem:[#allocation89_spill] sm:$0xff] %v10768_v29  ;;  %v2265_v44 = vmax.f32 %v1761_v54, 0.0  ;;  %v3018_v9 = vrot.slane %v3017_v34, 4 }
 0x24b   : > { %14079 = vst [vmem:[#allocation85_spill] sm:$0xff] %v10777_v37  ;;  %v7727_v46 = vpack.c.bf16 %v5967_v60, %v5966_v3  ;;  %v3114_v57 = vmax.f32 %v3112_v21, %v3113_v63  ;;  %v3638_v60 = vsel %vm2945_vm1, %v10768_v29, -inf  ;;  %v10798_v3 = vld [vmem:[%s8774_s14 + $0x20] sm:$0xff]  ;;  %v2520_v21 = vmul.f32 %v10806_v5, %v2263_v20  ;;  %8437 = vset.pattern.permute.xlu1 %v8762_v4  ;;  %v10811_v63 = vpop.f32.mrf.mxu1  ;;  %v3847_v29 = vpop.permute.xlu1 %3846  ;;  %v14087_v20 = vld [vmem:[#allocation119_spill] sm:$0xff] }
 0x24c   : > { %14080 = vst [vmem:[#allocation259_spill] sm:$0xff] %v10785_v40  ;;  %v10800_v0 = vpop.f32.mrf.mxu0  ;;  %v10818_v37 = vperm.slane %v10798_v3, 2  ;;  %v4042_v26 = vsel %vm2945_vm1, %v9780_v58, %v3847_v29  ;;  %v4043_v53 = vsel %vm2945_vm1, %v14087_v20, %v3847_v29  ;;  %v4044_v16 = vsel %vm2945_vm1, %v9903_v35, %v3847_v29 }
 0x24d   : > { %14081 = vst [vmem:[#allocation260_spill] sm:$0xff] %v10788_v7  ;;  %3866 = vrot.lane.b32.xlu0 %v3114_v57, %s8675_s30  ;;  %v3640_v57 = vsel %vm2945_vm1, %v10788_v7, -inf  ;;  %v4045_v54 = vsel %vm2945_vm1, %v9968_v41, %v3847_v29  ;;  %4840 = vperm.xlu2 %8438, %v10692_v11   ;;  %v14089_v7 = vld [vmem:[#allocation78_spill] sm:$0xff]  ;;  %v5908_v40 = vmul.f32 %v14090_v15, %v4044_v16 }
 0x24e   : > { %14082 = vst [vmem:[#allocation261_spill] sm:$0xff] %v10790_v22  ;;  %v5907_v22 = vmul.f32 %v14089_v7, %v4043_v53  ;;  %v10836_v41 = vadd.f32 %v10782_v32, %v2520_v21  ;;  %v10839_v7 = vadd.f32 %v10782_v32, %v2521_v14  ;;  %v2522_v15 = vmul.f32 %v10806_v5, %v2265_v44 }
 0x24f   : > { %14083 = vst [vmem:[#allocation262_spill] sm:$0xff] %v10792_v55  ;;  %v3433_v55 = vmax.f32 %v3431_v61, %v3432_v45  ;;  %v3019_v61 = vmax.f32 %v3017_v34, %v3018_v9  ;;  %v2136_v9 = vadd.f32 %v10739_v43, %v2135_v51 }
 0x250   : > { %8227 = vst [vmem:[%s9366_s7 + $0x110] sm:$0xff] %v7727_v46   ;;  %v3639_v46 = vmax.f32 %v3637_v31, %v3638_v60  ;;  %v14088_v31 = vld [vmem:[#allocation83_spill] sm:$0xff]  ;;  %v3233_v16 = vsel %vm2945_vm1, %v10839_v7, -inf }
 0x251   : > { %14084 = vst [vmem:[#allocation263_spill] sm:$0xff] %v10800_v0  ;;  %v5906_v60 = vmul.f32 %v14088_v31, %v4042_v26  ;;  %v14092_v0 = vld [vmem:[#allocation92_spill] sm:$0xff]  ;;  %v4747_v26 = vpop.permute.xlu2 %4746  ;;  %v1985_v31 = vpop.f32.mrf.mxu2  ;;  %v3434_v44 = vrot.slane %v3433_v55, 4 }
 0x252   : > { %14085 = vst [vmem:[#allocation264_spill] sm:$0xff] %v10811_v63  ;;  %v14091_v63 = vld [vmem:[#allocation82_spill] sm:$0xff]  ;;  %v1763_v20 = vadd.f32 %v10739_v43, %v14092_v0  ;;  %v3641_v29 = vmax.f32 %v3639_v46, %v3640_v57  ;;  %v2137_v46 = vpop.f32.mrf.mxu3  ;;  %v3232_v57 = vsel %vm2945_vm1, %v10836_v41, -inf }
 0x253   : > { %14086 = vst [vmem:[#allocation265_spill] sm:$0xff] %v10818_v37  ;;  %v5909_v58 = vmul.f32 %v14091_v63, %v4045_v54  ;;  %v7577_v35 = vpack.c.bf16 %v5907_v22, %v5906_v60  ;;  %v14094_v63 = vld [vmem:[#allocation87_spill] sm:$0xff]  ;;  %4834 = vperm.xlu1 %8437, %v10692_v11   ;;  %v10852_v21 = vpop.f32.mrf.mxu1  ;;  %v10854_v14 = vpop.permute.xlu1 %3910  ;;  %v10861_v54 = vadd.f32 %v10782_v32, %v2522_v15 }
 0x254   : > { %14093 = vst [vmem:[#allocation119_spill] sm:$0xff] %v10839_v7  ;;  %v1916_v53 = vadd.f32 %v10739_v43, %v14094_v63  ;;  %v10845_v0 = vpop.f32.mrf.mxu0  ;;  %v2266_v22 = vmax.f32 %v1763_v20, 0.0  ;;  %v3642_v45 = vrot.slane %v3641_v29, 4  ;;  %v3435_v34 = vmax.f32 %v3433_v55, %v3434_v44  ;;  %v14099_v63 = vld [vmem:[#allocation98_spill] sm:$0xff] }
 0x255   : > { %v7582_v50 = vpack.c.bf16 %v5909_v58, %v5908_v40  ;;  %8197 = vst [vmem:[%s9366_s7 + $0x20] sm:$0xff] %v7577_v35   ;;  %5159 = vperm.xlu0 %8382, %v10818_v37   ;;  %v10848_v40 = vpop.permute.xlu0 %3890  ;;  %8440 = vset.pattern.permute.xlu2 %v8762_v4  ;;  %v3020_v58 = vrot.slane %v3019_v61, 2  ;;  %v3234_v20 = vmax.f32 %v3232_v57, %v3233_v16  ;;  %v3235_v37 = vsel %vm2945_vm1, %v10861_v54, -inf }
 0x256   : > { %14095 = vst [vmem:[#allocation83_spill] sm:$0xff] %v10845_v0  ;;  %v2523_v60 = vmul.f32 %v10806_v5, %v2266_v22  ;;  %v3643_v35 = vmax.f32 %v3641_v29, %v3642_v45  ;;  %v14101_v29 = vld [vmem:[#allocation96_spill] sm:$0xff]  ;;  %v14102_v45 = vld [vmem:[#allocation94_spill] sm:$0xff]  ;;  %v2138_v16 = vadd.f32 %v10739_v43, %v2137_v46  ;;  %v3436_v25 = vrot.slane %v3435_v34, 2 }
 0x257   : > { %8198 = vst [vmem:[%s9366_s7 + $0x28] sm:$0xff] %v7582_v50   ;;  %v2327_v50 = vmax.f32 %v1916_v53, 0.0  ;;  %v4105_v44 = vsel %vm2945_vm1, %v14101_v29, %v10562_v1  ;;  %v4104_v57 = vsel %vm2945_vm1, %v14102_v45, %v10562_v1  ;;  %v3021_v28 = vmax.f32 %v3019_v61, %v3020_v58  ;;  %v14103_v61 = vld [vmem:[#allocation148_spill] sm:$0xff] }
 0x258   : > { %14096 = vst [vmem:[#allocation78_spill] sm:$0xff] %v10852_v21  ;;  %v10876_v21 = vld [vmem:[%s8774_s14 + $0x10] sm:$0xff]  ;;  %v10884_v55 = vadd.f32 %v10782_v32, %v2523_v60  ;;  %v5969_v0 = vmul.f32 %v4747_v26, %v4105_v44  ;;  %v2415_v60 = vmax.f32 %v2136_v9, 0.0  ;;  %v3644_v39 = vrot.slane %v3643_v35, 2  ;;  %v14105_v44 = vld [vmem:[#allocation32_spill] sm:$0xff] }
 0x259   : > { %14097 = vst [vmem:[#allocation86_spill] sm:$0xff] %v10854_v14  ;;  %v10868_v14 = vadd.f32 %v10739_v43, %v14099_v63  ;;  %v2584_v15 = vmul.f32 %v10806_v5, %v2327_v50  ;;  %v10873_v53 = vpop.permute.xlu2 %4765  ;;  %v10879_v22 = vperm.slane %v10876_v21, 6  ;;  %v1987_v63 = vpop.f32.mrf.mxu2  ;;  %v14104_v9 = vld [vmem:[#allocation47_spill] sm:$0xff]  ;;  %v10910_v7 = vmax.f32 %v3234_v20, %v3235_v37 }
 0x25a   : > { %14098 = vst [vmem:[#allocation82_spill] sm:$0xff] %v10861_v54  ;;  %v3022_v54 = vrot.slane %v3021_v28, 1  ;;  %v10922_v36 = vsel %vm2945_vm1, %v10884_v55, -inf }
 0x25b   : > { %8439 = vset.pattern.permute.xlu1 %v8755_v2  ;;  %v1835_v50 = vpop.f32.mrf.mxu1  ;;  %v4741_v11 = vpop.permute.xlu1 %4740 }
 0x25c   : > { %v10881_v51 = vpop.f32.mrf.mxu0  ;;  %v5968_v42 = vmul.f32 %v4741_v11, %v4104_v57  ;;  %v1986_v11 = vadd.f32 %v10739_v43, %v1985_v31  ;;  %v2140_v57 = vpop.f32.mrf.mxu3 }
 0x25d   : > { %14100 = vst [vmem:[#allocation92_spill] sm:$0xff] %v10881_v51  ;;  %4859 = vperm.xlu2 %8440, %v10879_v22  }
 0x25e   : > { %v7732_v58 = vpack.c.bf16 %v5969_v0, %v5968_v42  ;;  %v2355_v37 = vmax.f32 %v1986_v11, 0.0  ;;  %v1836_v11 = vadd.f32 %v10739_v43, %v1835_v50 }
 0x25f   : > { %v3861_v51 = vpop.permute.xlu0 %3860 }
 0x260   : > { %v4070_v29 = vsel %vm2945_vm1, %v10130_v23, %v3861_v51  ;;  %v4071_v38 = vsel %vm2945_vm1, %v10133_v62, %v3861_v51  ;;  %v4072_v1 = vsel %vm2945_vm1, %v10177_v48, %v3861_v51  ;;  %v4073_v26 = vsel %vm2945_vm1, %v10219_v19, %v3861_v51  ;;  %8228 = vst [vmem:[%s9366_s7 + $0x118] sm:$0xff] %v7732_v58   ;;  %v14112_v58 = vld [vmem:[#allocation30_spill] sm:$0xff] }
 0x261   : > { %v5934_v46 = vmul.f32 %v14103_v61, %v4070_v29  ;;  %v5935_v23 = vmul.f32 %v14104_v9, %v4071_v38  ;;  %v5936_v45 = vmul.f32 %v14105_v44, %v4072_v1  ;;  %v2416_v62 = vmax.f32 %v2138_v16, 0.0  ;;  %v4779_v1 = vpop.permute.xlu2 %4778  ;;  %v14115_v9 = vld [vmem:[#allocation101_spill] sm:$0xff] }
 0x262   : > { %v5937_v48 = vmul.f32 %v14107_v12, %v4073_v26  ;;  %v10913_v19 = vadd.f32 %v10782_v32, %v2584_v15  ;;  %v2672_v51 = vmul.f32 %v10806_v5, %v2415_v60  ;;  %v3437_v16 = vmax.f32 %v3435_v34, %v3436_v25  ;;  %v14111_v60 = vld [vmem:[#allocation102_spill] sm:$0xff] }
 0x263   : > { %v7647_v42 = vpack.c.bf16 %v5935_v23, %v5934_v46  ;;  %4853 = vperm.xlu1 %8439, %v10879_v22   ;;  %v3645_v12 = vmax.f32 %v3643_v35, %v3644_v39  ;;  %v2673_v20 = vmul.f32 %v10806_v5, %v2416_v62  ;;  %v1837_v15 = vpop.f32.mrf.mxu1  ;;  %v2328_v29 = vmax.f32 %v1918_v6, 0.0  ;;  %v10928_v61 = vpop.permute.xlu1 %3848  ;;  %v14113_v35 = vld [vmem:[#allocation175_spill] sm:$0xff] }
 0x264   : > { %14108 = vst [vmem:[#allocation87_spill] sm:$0xff] %v10913_v19  ;;  %v7652_v31 = vpack.c.bf16 %v5937_v48, %v5936_v45  ;;  %v10917_v0 = vpop.f32.mrf.mxu0  ;;  %v3023_v26 = vmax.f32 %v3021_v28, %v3022_v54  ;;  %v1988_v25 = vadd.f32 %v10739_v43, %v1987_v63  ;;  %v2141_v34 = vadd.f32 %v10739_v43, %v2140_v57  ;;  %v1990_v28 = vpop.f32.mrf.mxu2  ;;  %v14114_v54 = vld [vmem:[#allocation84_spill] sm:$0xff] }
 0x265   : > { %14109 = vst [vmem:[#allocation98_spill] sm:$0xff] %v10917_v0  ;;  %v1921_v46 = vadd.f32 %v10739_v43, %v14111_v60  ;;  %v4048_v39 = vsel %vm2945_vm1, %v14112_v58, %v10928_v61  ;;  %v4049_v6 = vsel %vm2945_vm1, %v14113_v35, %v10928_v61  ;;  %v10945_v44 = vadd.f32 %v10782_v32, %v2672_v51 }
 0x266   : > { %8211 = vst [vmem:[%s9366_s7 + $0x90] sm:$0xff] %v7647_v42   ;;  %3852 = vrot.lane.b32.xlu2 %v3023_v26, %s8675_s30  ;;  %v5912_v63 = vmul.f32 %v14114_v54, %v4048_v39  ;;  %v5913_v23 = vmul.f32 %v14115_v9, %v4049_v6  ;;  %v3438_v45 = vrot.slane %v3437_v16, 1  ;;  %v3646_v62 = vrot.slane %v3645_v12, 1  ;;  %v2142_v6 = vpop.f32.mrf.mxu3 }
 0x267   : > { %8212 = vst [vmem:[%s9366_s7 + $0x98] sm:$0xff] %v7652_v31   ;;  %8442 = vset.pattern.permute.xlu2 %v8791_v10  ;;  %v2612_v57 = vmul.f32 %v10806_v5, %v2355_v37  ;;  %v10950_v48 = vadd.f32 %v10782_v32, %v2673_v20  ;;  %v2356_v50 = vmax.f32 %v1988_v25, 0.0  ;;  %v2417_v31 = vmax.f32 %v2141_v34, 0.0 }
 0x268   : > { %14110 = vst [vmem:[#allocation96_spill] sm:$0xff] %v10928_v61  ;;  %v7592_v42 = vpack.c.bf16 %v5913_v23, %v5912_v63  ;;  %v1838_v26 = vadd.f32 %v10739_v43, %v1837_v15  ;;  %v1991_v60 = vadd.f32 %v10739_v43, %v1990_v28  ;;  %v2585_v51 = vmul.f32 %v10806_v5, %v2328_v29 }
 0x269   : > { %14116 = vst [vmem:[#allocation94_spill] sm:$0xff] %v10945_v44  ;;  %v2329_v58 = vmax.f32 %v1921_v46, 0.0  ;;  %v2295_v39 = vmax.f32 %v1836_v11, 0.0  ;;  %v2613_v35 = vmul.f32 %v10806_v5, %v2356_v50  ;;  %v3439_v54 = vmax.f32 %v3437_v16, %v3438_v45  ;;  %v14122_v45 = vld [vmem:[#allocation173_spill] sm:$0xff] }
 0x26a   : > { %14117 = vst [vmem:[#allocation148_spill] sm:$0xff] %v10950_v48  ;;  %v2674_v20 = vmul.f32 %v10806_v5, %v2417_v31  ;;  %v2296_v25 = vmax.f32 %v1838_v26, 0.0  ;;  %v2357_v63 = vmax.f32 %v1991_v60, 0.0  ;;  %v3726_v15 = vsel %vm2945_vm1, %v10945_v44, -inf  ;;  %v14125_v60 = vld [vmem:[#allocation109_spill] sm:$0xff] }
 0x26b   : > { %8200 = vst [vmem:[%s9366_s7 + $0x38] sm:$0xff] %v7592_v42   ;;  %8441 = vset.pattern.permute.xlu1 %v8810_v17  ;;  %v3647_v34 = vmax.f32 %v3645_v12, %v3646_v62  ;;  %v10964_v29 = vadd.f32 %v10782_v32, %v2612_v57  ;;  %v10967_v46 = vadd.f32 %v10782_v32, %v2613_v35  ;;  %v1840_v11 = vpop.f32.mrf.mxu1  ;;  %v10970_v16 = vpop.permute.xlu1 %3880  ;;  %v3727_v28 = vsel %vm2945_vm1, %v10950_v48, -inf  ;;  %v14123_v57 = vld [vmem:[#allocation174_spill] sm:$0xff] }
 0x26c   : > { %v10957_v37 = vpop.f32.mrf.mxu0  ;;  %3916 = vrot.lane.b32.xlu1 %v3439_v54, %s8675_s30  ;;  %v10975_v9 = vadd.f32 %v10782_v32, %v2674_v20  ;;  %v2614_v23 = vmul.f32 %v10806_v5, %v2357_v63  ;;  %v2143_v12 = vadd.f32 %v10739_v43, %v2142_v6  ;;  %v4110_v62 = vsel %vm2945_vm1, %v14122_v45, %v10970_v16  ;;  %v10992_v54 = vpop.permute.xlu2 %3912  ;;  %v14127_v20 = vld [vmem:[#allocation178_spill] sm:$0xff] }
 0x26d   : > { %14118 = vst [vmem:[#allocation47_spill] sm:$0xff] %v10957_v37  ;;  %v4111_v50 = vsel %vm2945_vm1, %v14123_v57, %v10970_v16  ;;  %v2552_v42 = vmul.f32 %v10806_v5, %v2295_v39  ;;  %v2553_v31 = vmul.f32 %v10806_v5, %v2296_v25  ;;  %v10988_v26 = vadd.f32 %v10782_v32, %v2585_v51  ;;  %v1992_v57 = vpop.f32.mrf.mxu2 }
 0x26e   : > { %14119 = vst [vmem:[#allocation32_spill] sm:$0xff] %v10964_v29  ;;  %v1923_v35 = vadd.f32 %v10739_v43, %v14125_v60  ;;  %3948 = vrot.lane.b32.xlu2 %v3647_v34, %s8675_s30  ;;  %v5974_v6 = vmul.f32 %v4779_v1, %v4110_v62  ;;  %v5975_v63 = vmul.f32 %v14127_v20, %v4111_v50  ;;  %v3531_v39 = vsel %vm2945_vm1, %v10964_v29, -inf }
 0x26f   : > { %14120 = vst [vmem:[#allocation95_spill] sm:$0xff] %v10967_v46  ;;  %v2586_v45 = vmul.f32 %v10806_v5, %v2329_v58  ;;  %v3728_v25 = vmax.f32 %v3726_v15, %v3727_v28  ;;  %v3532_v51 = vsel %vm2945_vm1, %v10967_v46, -inf  ;;  %v3729_v60 = vsel %vm2945_vm1, %v10975_v9, -inf  ;;  %v14141_v46 = vld [vmem:[#allocation105_spill] sm:$0xff] }
 0x270   : > { %14121 = vst [vmem:[#allocation157_spill] sm:$0xff] %v10975_v9  ;;  %v7747_v38 = vpack.c.bf16 %v5975_v63, %v5974_v6  ;;  %v11004_v34 = vadd.f32 %v10782_v32, %v2614_v23  ;;  %v2418_v1 = vmax.f32 %v2143_v12, 0.0  ;;  %v3440_v62 = vsel %vm2945_vm1, %v10913_v19, -inf  ;;  %v14144_v19 = vld [vmem:[#allocation170_spill] sm:$0xff] }
 0x271   : > { %14124 = vst [vmem:[#allocation102_spill] sm:$0xff] %v10988_v26  ;;  %v11009_v58 = vadd.f32 %v10782_v32, %v2552_v42  ;;  %v11012_v15 = vadd.f32 %v10782_v32, %v2553_v31  ;;  %v1841_v28 = vadd.f32 %v10739_v43, %v1840_v11  ;;  %v3238_v50 = vmax.f32 %v10910_v7, %v10922_v36 }
 0x272   : > { %14126 = vst [vmem:[#allocation30_spill] sm:$0xff] %v10992_v54  ;;  %v2330_v6 = vmax.f32 %v1923_v35, 0.0  ;;  %v2675_v12 = vmul.f32 %v10806_v5, %v2418_v1  ;;  %v1993_v20 = vadd.f32 %v10739_v43, %v1992_v57  ;;  %v3441_v42 = vsel %vm2945_vm1, %v10988_v26, -inf  ;;  %v7544_v57 = vld [vmem:[%s8768_s10 + $0x3d0] sm:$0xff] }
 0x273   : > { %14128 = vst [vmem:[#allocation175_spill] sm:$0xff] %v11004_v34  ;;  %v3533_v63 = vmax.f32 %v3531_v39, %v3532_v51  ;;  %v3730_v31 = vmax.f32 %v3728_v25, %v3729_v60  ;;  %v2297_v9 = vmax.f32 %v1841_v28, 0.0  ;;  %v11025_v11 = vadd.f32 %v10782_v32, %v2586_v45  ;;  %v1842_v35 = vpop.f32.mrf.mxu1  ;;  %7409 = vmatmul.msk.bf16.gmra.mxu3 %vm1141_vm0, %v7544_v57 }
 0x274   : > { %14129 = vst [vmem:[#allocation84_spill] sm:$0xff] %v11009_v58  ;;  %v11018_v23 = vpop.f32.mrf.mxu0  ;;  %4865 = vperm.xlu1 %8441, %v10879_v22   ;;  %v3534_v7 = vsel %vm2945_vm1, %v11004_v34, -inf  ;;  %v2358_v36 = vmax.f32 %v1993_v20, 0.0  ;;  %v3336_v1 = vsel %vm2945_vm1, %v11009_v58, -inf  ;;  %v3337_v39 = vsel %vm2945_vm1, %v11012_v15, -inf  ;;  %v11052_v34 = vpop.permute.xlu2 %4796  ;;  %v11663_v58 = vld [vmem:[%s8774_s14 + $0x20] sm:$0xff] }
 0x275   : > { %14130 = vst [vmem:[#allocation101_spill] sm:$0xff] %v11012_v15  ;;  %v2554_v45 = vmul.f32 %v10806_v5, %v2297_v9  ;;  %v1843_v25 = vadd.f32 %v10739_v43, %v1842_v35  ;;  %v2587_v51 = vmul.f32 %v10806_v5, %v2330_v6  ;;  %v3535_v20 = vmax.f32 %v3533_v63, %v3534_v7 }
 0x276   : > { %8231 = vst [vmem:[%s9366_s7 + $0x130] sm:$0xff] %v7747_v38   ;;  %v11031_v38 = vadd.f32 %v10782_v32, %v2675_v12  ;;  %4871 = vperm.xlu2 %8442, %v10879_v22   ;;  %v2615_v28 = vmul.f32 %v10806_v5, %v2358_v36  ;;  %v3239_v12 = vrot.slane %v3238_v50, 4  ;;  %v14135_v35 = vmax.f32 %v10868_v14, 0.0  ;;  %v14137_v36 = vld [vmem:[#allocation100_spill] sm:$0xff] }
 0x277   : > { %14131 = vst [vmem:[#allocation173_spill] sm:$0xff] %v11018_v23  ;;  %v11047_v48 = vadd.f32 %v10782_v32, %v2554_v45  ;;  %v2298_v9 = vmax.f32 %v1843_v25, 0.0  ;;  %v3338_v22 = vmax.f32 %v3336_v1, %v3337_v39  ;;  %v1766_v29 = vadd.f32 %v10739_v43, %v14137_v36 }
 0x278   : > { %14132 = vst [vmem:[#allocation174_spill] sm:$0xff] %v11025_v11  ;;  %v3731_v60 = vsel %vm2945_vm1, %v11031_v38, -inf  ;;  %v2460_v6 = vmul.f32 %v10806_v5, %v14135_v35  ;;  %v3442_v57 = vmax.f32 %v3440_v62, %v3441_v42  ;;  %v3443_v14 = vsel %vm2945_vm1, %v11025_v11, -inf  ;;  %v11072_v35 = vpop.permute.xlu1 %4759  ;;  %v14143_v11 = vld [vmem:[#allocation107_spill] sm:$0xff] }
 0x279   : > { %14133 = vst [vmem:[#allocation109_spill] sm:$0xff] %v11031_v38  ;;  %v3732_v44 = vmax.f32 %v3730_v31, %v3731_v60  ;;  %v11055_v38 = vadd.f32 %v10782_v32, %v2615_v28  ;;  %v3339_v63 = vsel %vm2945_vm1, %v11047_v48, -inf  ;;  %v2555_v31 = vmul.f32 %v10806_v5, %v2298_v9 }
 0x27a   : > { %14134 = vst [vmem:[#allocation178_spill] sm:$0xff] %v11047_v48  ;;  %v11067_v39 = vadd.f32 %v10782_v32, %v2587_v51  ;;  %v3240_v60 = vmax.f32 %v3238_v50, %v3239_v12  ;;  %v3340_v62 = vmax.f32 %v3338_v22, %v3339_v63  ;;  %v11076_v9 = vadd.f32 %v10782_v32, %v2460_v6 }
 0x27b   : > { %14136 = vst [vmem:[#allocation266_spill] sm:$0xff] %v11055_v38  ;;  %v3733_v7 = vrot.slane %v3732_v44, 4  ;;  %v3536_v1 = vsel %vm2945_vm1, %v11055_v38, -inf  ;;  %v11070_v28 = vadd.f32 %v10782_v32, %v2555_v31  ;;  %v2267_v36 = vmax.f32 %v1766_v29, 0.0 }
 0x27c   : > { %v1685_v45 = vpop.f32.mrf.mxu0  ;;  %14138 = vst [vmem:[#allocation100_spill] sm:$0xff] %v11067_v39  ;;  %v3537_v25 = vmax.f32 %v3535_v20, %v3536_v1  ;;  %8443 = vset.pattern.permute.xlu1 %v8762_v4  ;;  %v1608_v50 = vadd.f32 %v10739_v43, %v14141_v46  ;;  %v3444_v12 = vmax.f32 %v3442_v57, %v3443_v14  ;;  %v3445_v31 = vsel %vm2945_vm1, %v11067_v39, -inf }
 0x27d   : > { %14139 = vst [vmem:[#allocation267_spill] sm:$0xff] %v11070_v28  ;;  %v3734_v42 = vmax.f32 %v3732_v44, %v3733_v7  ;;  %v3341_v38 = vsel %vm2945_vm1, %v11070_v28, -inf  ;;  %v3241_v22 = vrot.slane %v3240_v60, 2  ;;  %v1686_v6 = vadd.f32 %v10739_v43, %v1685_v45 }
 0x27e   : > { %14140 = vst [vmem:[#allocation268_spill] sm:$0xff] %v11072_v35  ;;  %v3538_v51 = vrot.slane %v3537_v25, 4  ;;  %8444 = vset.pattern.permute.xlu2 %v8810_v17  ;;  %v11089_v29 = vperm.slane %v10876_v21, 7  ;;  %v3342_v7 = vmax.f32 %v3340_v62, %v3341_v38  ;;  %v11093_v46 = vsel %vm2945_vm1, %v11076_v9, -inf  ;;  %v14145_v35 = vld [vmem:[#allocation26_spill] sm:$0xff] }
 0x27f   : > { %v3735_v20 = vrot.slane %v3734_v42, 2  ;;  %v11086_v63 = vpop.permute.xlu2 %4809  ;;  %v2524_v57 = vmul.f32 %v10806_v5, %v2267_v36  ;;  %v2204_v39 = vmax.f32 %v1608_v50, 0.0  ;;  %v3446_v45 = vmax.f32 %v3444_v12, %v3445_v31  ;;  %v14146_v50 = vld [vmem:[#allocation28_spill] sm:$0xff] }
 0x280   : > { %v3539_v44 = vmax.f32 %v3537_v25, %v3538_v51  ;;  %14142 = vst [vmem:[#allocation105_spill] sm:$0xff] %v11089_v29  ;;  %v1768_v25 = vadd.f32 %v10739_v43, %v14143_v11  ;;  %v4108_v21 = vsel %vm2945_vm1, %v14145_v35, %v14144_v19  ;;  %v3242_v62 = vmax.f32 %v3240_v60, %v3241_v22 }
 0x281   : > { %v3736_v1 = vmax.f32 %v3734_v42, %v3735_v20  ;;  %v7545_v20 = vld [vmem:[%s8768_s10 + $0x3d8] sm:$0xff]  ;;  %v2235_v61 = vmax.f32 %v1686_v6, 0.0  ;;  %v4109_v11 = vsel %vm2945_vm1, %v14146_v50, %v14144_v19  ;;  %v3343_v31 = vrot.slane %v3342_v7, 4  ;;  %v14154_v19 = vld [vmem:[#allocation99_spill] sm:$0xff] }
 0x282   : > { %v3540_v14 = vrot.slane %v3539_v44, 2  ;;  %v5972_v54 = vmul.f32 %v10873_v53, %v4108_v21  ;;  %v11110_v60 = vadd.f32 %v10782_v32, %v2524_v57  ;;  %v2268_v22 = vmax.f32 %v1768_v25, 0.0  ;;  %v14148_v6 = vld [vmem:[#allocation112_spill] sm:$0xff] }
 0x283   : > { %v3737_v26 = vrot.slane %v3736_v1, 1  ;;  %v4772_v36 = vpop.permute.xlu1 %4771  ;;  %v3243_v21 = vrot.slane %v3242_v62, 1  ;;  %7410 = vmatmul.msk.bf16.gmra.mxu3 %vm1141_vm0, %v7545_v20  ;;  %v14150_v50 = vld [vmem:[#allocation40_spill] sm:$0xff] }
 0x284   : > { %v1687_v51 = vpop.f32.mrf.mxu0  ;;  %v3541_v42 = vmax.f32 %v3539_v44, %v3540_v14  ;;  %4884 = vperm.xlu1 %8443, %v11089_v29   ;;  %v5973_v23 = vmul.f32 %v4772_v36, %v4109_v11  ;;  %14147 = vst [vmem:[#allocation107_spill] sm:$0xff] %v11110_v60  ;;  %v3344_v44 = vmax.f32 %v3342_v7, %v3343_v31 }
 0x285   : > { %v1688_v38 = vadd.f32 %v10739_v43, %v1687_v51  ;;  %v3738_v12 = vmax.f32 %v3736_v1, %v3737_v26  ;;  %v2461_v51 = vmul.f32 %v10806_v5, %v2204_v39  ;;  %v1611_v26 = vadd.f32 %v10739_v43, %v14148_v6  ;;  %v14149_v1 = vld [vmem:[#allocation113_spill] sm:$0xff]  ;;  %v14153_v6 = vld [vmem:[#allocation108_spill] sm:$0xff] }
 0x286   : > { %v3542_v35 = vrot.slane %v3541_v42, 1  ;;  %4890 = vperm.xlu2 %8444, %v11089_v29   ;;  %v1771_v53 = vadd.f32 %v10739_v43, %v14149_v1  ;;  %v7742_v14 = vpack.c.bf16 %v5973_v23, %v5972_v54  ;;  %v2492_v39 = vmul.f32 %v10806_v5, %v2235_v61  ;;  %v14151_v61 = vld [vmem:[#allocation91_spill] sm:$0xff] }
 0x287   : > { %v2236_v37 = vmax.f32 %v1688_v38, 0.0  ;;  %3962 = vrot.lane.b32.xlu0 %v3738_v12, %s8675_s30  ;;  %v3851_v25 = vpop.permute.xlu2 %3850  ;;  %v3447_v38 = vrot.slane %v3446_v45, 4  ;;  %v3345_v36 = vrot.slane %v3344_v44, 2 }
 0x288   : > { %8230 = vst [vmem:[%s9366_s7 + $0x128] sm:$0xff] %v7742_v14   ;;  %v4050_v7 = vsel %vm2945_vm1, %v10329_v27, %v3851_v25  ;;  %v4051_v11 = vsel %vm2945_vm1, %v14150_v50, %v3851_v25  ;;  %v4052_v54 = vsel %vm2945_vm1, %v10343_v56, %v3851_v25  ;;  %v3543_v23 = vmax.f32 %v3541_v42, %v3542_v35 }
 0x289   : > { %v2493_v57 = vmul.f32 %v10806_v5, %v2236_v37  ;;  %v4053_v20 = vsel %vm2945_vm1, %v10413_v52, %v3851_v25  ;;  %v5914_v12 = vmul.f32 %v14151_v61, %v4050_v7  ;;  %v14152_v37 = vld [vmem:[#allocation42_spill] sm:$0xff]  ;;  %v5916_v1 = vmul.f32 %v14153_v6, %v4052_v54  ;;  %v14158_v7 = vld [vmem:[#allocation140_spill] sm:$0xff] }
 0x28a   : > { %v5915_v31 = vmul.f32 %v14152_v37, %v4051_v11  ;;  %v5917_v28 = vmul.f32 %v14154_v19, %v4053_v20  ;;  %v3244_v27 = vmax.f32 %v3242_v62, %v3243_v21  ;;  %v3346_v0 = vmax.f32 %v3344_v44, %v3345_v36  ;;  %v14160_v20 = vld [vmem:[#allocation181_spill] sm:$0xff] }
 0x28b   : > { %v11136_v56 = vadd.f32 %v10782_v32, %v2461_v51  ;;  %v2525_v42 = vmul.f32 %v10806_v5, %v2268_v22  ;;  %v3448_v35 = vmax.f32 %v3446_v45, %v3447_v38  ;;  %v11141_v25 = vadd.f32 %v10782_v32, %v2492_v39  ;;  %v14155_v51 = vld [vmem:[#allocation115_spill] sm:$0xff]  ;;  %v14156_v39 = vld [vmem:[#allocation117_spill] sm:$0xff] }
 0x28c   : > { %v1690_v14 = vpop.f32.mrf.mxu0  ;;  %v7597_v52 = vpack.c.bf16 %v5915_v31, %v5914_v12  ;;  %8445 = vset.pattern.permute.xlu1 %v8791_v10  ;;  %v11144_v19 = vadd.f32 %v10782_v32, %v2493_v57  ;;  %v7602_v62 = vpack.c.bf16 %v5917_v28, %v5916_v1  ;;  %v2205_v21 = vmax.f32 %v1611_v26, 0.0  ;;  %v14157_v57 = vld [vmem:[#allocation130_spill] sm:$0xff] }
 0x28d   : > { %v1691_v50 = vadd.f32 %v10739_v43, %v1690_v14  ;;  %3886 = vrot.lane.b32.xlu1 %v3244_v27, %s8675_s30  ;;  %v1613_v36 = vadd.f32 %v10739_v43, %v14155_v51  ;;  %v2269_v22 = vmax.f32 %v1771_v53, 0.0  ;;  %v3347_v45 = vrot.slane %v3346_v0, 1 }
 0x28e   : > { %8201 = vst [vmem:[%s9366_s7 + $0x40] sm:$0xff] %v7597_v52   ;;  %8446 = vset.pattern.permute.xlu2 %v8755_v2  ;;  %v1773_v38 = vadd.f32 %v10739_v43, %v14156_v39  ;;  %v2086_v28 = vadd.f32 %v10739_v43, %v14157_v57  ;;  %v2088_v11 = vadd.f32 %v10739_v43, %v14158_v7  ;;  %v3038_v53 = vsel %vm2945_vm1, %v11136_v56, -inf  ;;  %v7546_v39 = vld [vmem:[%s8768_s10 + $0x3e0] sm:$0xff]  ;;  %v14161_v57 = vld [vmem:[#allocation152_spill] sm:$0xff] }
 0x28f   : > { %v2237_v44 = vmax.f32 %v1691_v50, 0.0  ;;  %3932 = vrot.lane.b32.xlu0 %v3543_v23, %s8675_s30  ;;  %8202 = vst [vmem:[%s9366_s7 + $0x48] sm:$0xff] %v7602_v62   ;;  %v11164_v54 = vsel %vm2945_vm1, %v11110_v60, -inf  ;;  %v11167_v23 = vadd.f32 %v10782_v32, %v2525_v42  ;;  %v4113_v61 = vsel %vm2945_vm1, %v14160_v20, %v10970_v16  ;;  %v14162_v60 = vld [vmem:[#allocation176_spill] sm:$0xff] }
 0x290   : > { %v3141_v12 = vsel %vm2945_vm1, %v11141_v25, -inf  ;;  %v3142_v37 = vsel %vm2945_vm1, %v11144_v19, -inf  ;;  %v3449_v6 = vrot.slane %v3448_v35, 2  ;;  %v2462_v1 = vmul.f32 %v10806_v5, %v2205_v21 }
 0x291   : > { %v2494_v26 = vmul.f32 %v10806_v5, %v2237_v44  ;;  %14159 = vst [vmem:[#allocation26_spill] sm:$0xff] %v11167_v23  ;;  %v2206_v14 = vmax.f32 %v1613_v36, 0.0  ;;  %v2526_v27 = vmul.f32 %v10806_v5, %v2269_v22  ;;  %v3348_v42 = vmax.f32 %v3346_v0, %v3347_v45  ;;  %v11189_v22 = vpop.permute.xlu0 %5034 }
 0x292   : > { %v2270_v52 = vmax.f32 %v1773_v38, 0.0  ;;  %v2395_v62 = vmax.f32 %v2086_v28, 0.0  ;;  %v2396_v44 = vmax.f32 %v2088_v11, 0.0  ;;  %v2091_v7 = vadd.f32 %v10739_v43, %v14161_v57  ;;  %14163 = vst [vmem:[#allocation28_spill] sm:$0xff] %v11189_v22 }
 0x293   : > { %v11177_v31 = vadd.f32 %v10782_v32, %v2494_v26  ;;  %v5977_v26 = vmul.f32 %v11052_v34, %v4113_v61  ;;  %v3143_v20 = vmax.f32 %v3141_v12, %v3142_v37  ;;  %v4112_v21 = vsel %vm2945_vm1, %v14162_v60, %v10970_v16  ;;  %v4791_v36 = vpop.permute.xlu1 %4790  ;;  %v14164_v61 = vld [vmem:[#allocation135_spill] sm:$0xff]  ;;  %7411 = vmatmul.msk.bf16.gmra.mxu3 %vm1141_vm0, %v7546_v39 }
 0x294   : > { %v1692_v50 = vpop.f32.mrf.mxu0  ;;  %v5976_v45 = vmul.f32 %v4791_v36, %v4112_v21  ;;  %v3450_v28 = vmax.f32 %v3448_v35, %v3449_v6  ;;  %v11195_v11 = vadd.f32 %v10782_v32, %v2462_v1  ;;  %v2463_v34 = vmul.f32 %v10806_v5, %v2206_v14 }
 0x295   : > { %v1693_v51 = vadd.f32 %v10739_v43, %v1692_v50  ;;  %v3144_v0 = vsel %vm2945_vm1, %v11177_v31, -inf  ;;  %4896 = vperm.xlu1 %8445, %v11089_v29   ;;  %v3246_v16 = vsel %vm2945_vm1, %v11167_v23, -inf  ;;  %v11201_v60 = vadd.f32 %v10782_v32, %v2526_v27  ;;  %v14165_v50 = vld [vmem:[#allocation162_spill] sm:$0xff] }
 0x296   : > { %4903 = vperm.xlu2 %8446, %v14164_v61   ;;  %v2527_v12 = vmul.f32 %v10806_v5, %v2270_v52  ;;  %v2652_v35 = vmul.f32 %v10806_v5, %v2395_v62  ;;  %v7752_v37 = vpack.c.bf16 %v5977_v26, %v5976_v45  ;;  %v2653_v1 = vmul.f32 %v10806_v5, %v2396_v44 }
 0x297   : > { %v2238_v38 = vmax.f32 %v1693_v51, 0.0  ;;  %3902 = vrot.lane.b32.xlu0 %v3348_v42, %s8675_s30  ;;  %v2397_v14 = vmax.f32 %v2091_v7, 0.0  ;;  %v2093_v27 = vadd.f32 %v10739_v43, %v14165_v50  ;;  %v3145_v51 = vmax.f32 %v3143_v20, %v3144_v0 }
 0x298   : > { %8232 = vst [vmem:[%s9366_s7 + $0x138] sm:$0xff] %v7752_v37   ;;  %v3451_v42 = vrot.slane %v3450_v28, 1  ;;  %v3039_v52 = vmax.f32 %v11093_v46, %v3038_v53  ;;  %v3040_v62 = vsel %vm2945_vm1, %v11195_v11, -inf  ;;  %v3247_v26 = vmax.f32 %v11164_v54, %v3246_v16 }
 0x299   : > { %v2495_v6 = vmul.f32 %v10806_v5, %v2238_v38  ;;  %v3248_v44 = vsel %vm2945_vm1, %v11201_v60, -inf  ;;  %v11223_v39 = vadd.f32 %v10782_v32, %v2463_v34  ;;  %v11226_v7 = vadd.f32 %v10782_v32, %v2527_v12  ;;  %v11238_v38 = vpop.permute.xlu2 %3882  ;;  %v11241_v34 = vpop.permute.xlu0 %3956 }
 0x29a   : > { %v11229_v20 = vadd.f32 %v10782_v32, %v2652_v35  ;;  %v11234_v53 = vadd.f32 %v10782_v32, %v2653_v1  ;;  %v2654_v54 = vmul.f32 %v10806_v5, %v2397_v14  ;;  %v2398_v21 = vmax.f32 %v2093_v27, 0.0  ;;  %14168 = vst [vmem:[#allocation40_spill] sm:$0xff] %v11241_v34 }
 0x29b   : > { %v11214_v57 = vadd.f32 %v10782_v32, %v2495_v6  ;;  %v3452_v0 = vmax.f32 %v3450_v28, %v3451_v42  ;;  %v3041_v45 = vmax.f32 %v3039_v52, %v3040_v62  ;;  %v3042_v12 = vsel %vm2945_vm1, %v11223_v39, -inf }
 0x29c   : > { %14166 = vst [vmem:[#allocation112_spill] sm:$0xff] %v11229_v20  ;;  %v3249_v35 = vmax.f32 %v3247_v26, %v3248_v44  ;;  %v3250_v37 = vsel %vm2945_vm1, %v11226_v7, -inf  ;;  %v3661_v6 = vsel %vm2945_vm1, %v11229_v20, -inf  ;;  %v3662_v28 = vsel %vm2945_vm1, %v11234_v53, -inf }
 0x29d   : > { %v3146_v46 = vsel %vm2945_vm1, %v11214_v57, -inf  ;;  %14167 = vst [vmem:[#allocation113_spill] sm:$0xff] %v11234_v53  ;;  %8447 = vset.pattern.permute.xlu1 %v8810_v17  ;;  %v11253_v1 = vadd.f32 %v10782_v32, %v2654_v54  ;;  %v2655_v14 = vmul.f32 %v10806_v5, %v2398_v21  ;;  %v4115_v27 = vsel %vm2945_vm1, %v10390_v24, %v11238_v38 }
 0x29e   : > { %v3147_v36 = vmax.f32 %v3145_v51, %v3146_v46  ;;  %8448 = vset.pattern.permute.xlu2 %v8791_v10  ;;  %v3043_v42 = vmax.f32 %v3041_v45, %v3042_v12  ;;  %v3251_v52 = vmax.f32 %v3249_v35, %v3250_v37  ;;  %v3663_v62 = vmax.f32 %v3661_v6, %v3662_v28  ;;  %v7547_v45 = vld [vmem:[%s8768_s10 + $0x3e8] sm:$0xff] }
 0x29f   : > { %3918 = vrot.lane.b32.xlu2 %v3452_v0, %s8675_s30  ;;  %14169 = vst [vmem:[#allocation91_spill] sm:$0xff] %v11253_v1  ;;  %v3664_v26 = vsel %vm2945_vm1, %v11253_v1, -inf  ;;  %v11262_v44 = vadd.f32 %v10782_v32, %v2655_v14  ;;  %v4114_v46 = vsel %vm2945_vm1, %v10382_v59, %v11238_v38  ;;  %v5979_v24 = vmul.f32 %v11086_v63, %v4115_v27 }
 0x2a0   : > { %v3148_v16 = vrot.slane %v3147_v36, 4  ;;  %v3665_v12 = vmax.f32 %v3663_v62, %v3664_v26  ;;  %v3252_v37 = vrot.slane %v3251_v52, 4  ;;  %v11282_v27 = vperm.slane %v10798_v3, 7 }
 0x2a1   : > { %14170 = vst [vmem:[#allocation42_spill] sm:$0xff] %v11262_v44  ;;  %v3666_v6 = vsel %vm2945_vm1, %v11262_v44, -inf  ;;  %v11273_v59 = vpop.permute.xlu2 %4828  ;;  %v11275_v14 = vpop.permute.xlu0 %3926 }
 0x2a2   : > { %v3149_v50 = vmax.f32 %v3147_v36, %v3148_v16  ;;  %v3044_v16 = vrot.slane %v3043_v42, 4  ;;  %14171 = vst [vmem:[#allocation108_spill] sm:$0xff] %v11275_v14 }
 0x2a3   : > { %v4804_v54 = vpop.permute.xlu1 %4803  ;;  %7412 = vmatmul.msk.bf16.gmra.mxu3 %vm1141_vm0, %v7547_v45  ;;  %14172 = vst [vmem:[#allocation99_spill] sm:$0xff] %v11282_v27 }
 0x2a4   : > { %v3150_v51 = vrot.slane %v3149_v50, 2  ;;  %v5978_v36 = vmul.f32 %v4804_v54, %v4114_v46  ;;  %v3045_v63 = vmax.f32 %v3043_v42, %v3044_v16  ;;  %v11288_v54 = vld [vmem:[%s8774_s14 + $0x18] sm:$0xff] }
 0x2a5   : > { %4915 = vperm.xlu1 %8447, %v14164_v61   ;;  %v11291_v42 = vperm.slane %v11288_v54, 1 }
 0x2a6   : > { %v3151_v21 = vmax.f32 %v3149_v50, %v3150_v51  ;;  %v7757_v35 = vpack.c.bf16 %v5979_v24, %v5978_v36  ;;  %v3667_v50 = vmax.f32 %v3665_v12, %v3666_v6  ;;  %v3046_v62 = vrot.slane %v3045_v63, 2  ;;  %v11299_v36 = vld [vmem:[%s8774_s14 + $0x28] sm:$0xff]  ;;  %v7548_v12 = vld [vmem:[%s8768_s10 + $0x3f0] sm:$0xff] }
 0x2a7   : > { %4921 = vperm.xlu2 %8448, %v14164_v61   ;;  %v3253_v61 = vmax.f32 %v3251_v52, %v3252_v37  ;;  %v14177_v37 = vld [vmem:[#allocation125_spill] sm:$0xff] }
 0x2a8   : > { %v3152_v0 = vrot.slane %v3151_v21, 1  ;;  %8233 = vst [vmem:[%s9366_s7 + $0x140] sm:$0xff] %v7757_v35   ;;  %v3668_v51 = vrot.slane %v3667_v50, 4  ;;  %v3047_v24 = vmax.f32 %v3045_v63, %v3046_v62  ;;  %v11306_v35 = vperm.slane %v11299_v36, 4 }
 0x2a9   : > { %v11285_v26 = vpop.permute.xlu2 %4840  ;;  %v3254_v46 = vrot.slane %v3253_v61, 2  ;;  %v11294_v52 = vpop.permute.xlu0 %3896  ;;  %v1618_v6 = vadd.f32 %v10739_v43, %v14177_v37  ;;  %v14178_v37 = vld [vmem:[#allocation134_spill] sm:$0xff] }
 0x2aa   : > { %v3153_v28 = vmax.f32 %v3151_v21, %v3152_v0  ;;  %14173 = vst [vmem:[#allocation115_spill] sm:$0xff] %v11285_v26  ;;  %v3669_v21 = vmax.f32 %v3667_v50, %v3668_v51  ;;  %v14175_v0 = vld [vmem:[#allocation120_spill] sm:$0xff]  ;;  %v1621_v1 = vadd.f32 %v10739_v43, %v14178_v37  ;;  %v14183_v37 = vld [vmem:[#allocation195_spill] sm:$0xff]  ;;  %v14221_v26 = vld [vmem:[#allocation37_spill] sm:$0xff] }
 0x2ab   : > { %v1616_v45 = vadd.f32 %v10739_v43, %v14175_v0  ;;  %v3255_v16 = vmax.f32 %v3253_v61, %v3254_v46  ;;  %14176 = vst [vmem:[#allocation130_spill] sm:$0xff] %v11306_v35  ;;  %v11315_v61 = vld [vmem:[%s8774_s14 + $0x30] sm:$0xff]  ;;  %v2208_v46 = vmax.f32 %v1618_v6, 0.0 }
 0x2ac   : > { %3872 = vrot.lane.b32.xlu0 %v3153_v28, %s8675_s30  ;;  %v3048_v28 = vrot.slane %v3047_v24, 1  ;;  %v3670_v50 = vrot.slane %v3669_v21, 2 }
 0x2ad   : > { %8449 = vset.pattern.permute.xlu1 %v8755_v2  ;;  %v11296_v3 = vpop.permute.xlu1 %3946  ;;  %v2207_v63 = vmax.f32 %v1616_v45, 0.0  ;;  %v3256_v62 = vrot.slane %v3255_v16, 1  ;;  %v11322_v45 = vperm.slane %v11315_v61, 1 }
 0x2ae   : > { %14174 = vst [vmem:[#allocation117_spill] sm:$0xff] %v11296_v3  ;;  %v3049_v0 = vmax.f32 %v3047_v24, %v3048_v28  ;;  %v3671_v34 = vmax.f32 %v3669_v21, %v3670_v50  ;;  %v14181_v28 = vld [vmem:[#allocation187_spill] sm:$0xff] }
 0x2af   : > { %8450 = vset.pattern.permute.xlu2 %v8762_v4  ;;  %v2464_v44 = vmul.f32 %v10806_v5, %v2207_v63  ;;  %v3257_v20 = vmax.f32 %v3255_v16, %v3256_v62  ;;  %14179 = vst [vmem:[#allocation140_spill] sm:$0xff] %v11322_v45  ;;  %v14180_v16 = vld [vmem:[#allocation191_spill] sm:$0xff] }
 0x2b0   : > { %v14182_v63 = vld [vmem:[#allocation43_spill] sm:$0xff] }
 0x2b3   : > { %7413 = vmatmul.msk.bf16.gmra.mxu3 %vm1141_vm0, %v7548_v12 }
 0x2b4   : > { %5284 = vperm.xlu0 %8382, %v11282_v27  }
 0x2b5   : > { %4928 = vperm.xlu1 %8449, %v11291_v42   ;;  %v11324_v3 = vpop.permute.xlu1 %4821 }
 0x2b7   : > { %4934 = vperm.xlu2 %8450, %v11291_v42   ;;  %v11311_v51 = vpop.permute.xlu2 %4859 }
 0x2bc   : > { %5409 = vperm.xlu0 %8382, %v11306_v35  }
 0x2bd   : > { %3856 = vrot.lane.b32.xlu1 %v3049_v0, %s8675_s30 }
 0x2be   : > { %8451 = vset.pattern.permute.xlu1 %v8791_v10 }
 0x2bf   : > { %v3867_v53 = vpop.permute.xlu0 %3866  ;;  %8452 = vset.pattern.permute.xlu2 %v8755_v2 }
 0x2c0   : > { %v4082_v12 = vsel %vm2945_vm1, %v10614_v47, %v3867_v53  ;;  %v4083_v21 = vsel %vm2945_vm1, %v10617_v8, %v3867_v53  ;;  %v4084_v24 = vsel %vm2945_vm1, %v10637_v18, %v3867_v53  ;;  %v4085_v43 = vsel %vm2945_vm1, %v10683_v49, %v3867_v53  ;;  %v11345_v49 = vld [vmem:[%s13488_s3] ss:$0 sm:$0xff]  ;;  %v14184_v53 = vld [vmem:[#allocation138_spill] sm:$0xff]  ;;  %3888 = vrot.lane.b32.xlu2 %v3257_v20, %s8675_s30 }
 0x2c1   : > { %v5946_v6 = vmul.f32 %v14180_v16, %v4082_v12  ;;  %v5947_v50 = vmul.f32 %v14181_v28, %v4083_v21  ;;  %v5948_v62 = vmul.f32 %v14182_v63, %v4084_v24  ;;  %v5949_v0 = vmul.f32 %v14183_v37, %v4085_v43  ;;  %v11350_v21 = vpop.permute.xlu2 %3852  ;;  %v14186_v16 = vld [vmem:[#allocation150_spill] sm:$0xff] }
 0x2c2   : > { %v2465_v47 = vmul.f32 %v10806_v5, %v2208_v46  ;;  %v3672_v8 = vrot.slane %v3671_v34, 1  ;;  %v2209_v18 = vmax.f32 %v1621_v1, 0.0  ;;  %v1936_v12 = vadd.f32 %v11345_v49, %v14184_v53  ;;  %v14187_v63 = vld [vmem:[#allocation146_spill] sm:$0xff]  ;;  %v14191_v53 = vld [vmem:[#allocation165_spill] sm:$0xff] }
 0x2c3   : > { %v7677_v24 = vpack.c.bf16 %v5947_v50, %v5946_v6  ;;  %v7682_v46 = vpack.c.bf16 %v5949_v0, %v5948_v62  ;;  %v11353_v43 = vadd.f32 %v10782_v32, %v2464_v44  ;;  %v1938_v1 = vadd.f32 %v11345_v49, %v14186_v16  ;;  %v14188_v6 = vld [vmem:[#allocation114_spill] sm:$0xff]  ;;  %v14192_v16 = vld [vmem:[#allocation172_spill] sm:$0xff] }
 0x2c4   : > { %v4054_v28 = vsel %vm2945_vm1, %v10621_v30, %v11350_v21  ;;  %v4055_v20 = vsel %vm2945_vm1, %v10630_v33, %v11350_v21  ;;  %v1623_v37 = vadd.f32 %v11345_v49, %v14187_v63  ;;  %v14189_v62 = vld [vmem:[#allocation106_spill] sm:$0xff]  ;;  %5534 = vperm.xlu0 %8382, %v11322_v45   ;;  %v11370_v0 = vadd.f32 %v10782_v32, %v2465_v47  ;;  %v14193_v32 = vld [vmem:[#allocation161_spill] sm:$0xff]  ;;  %v14194_v45 = vld [vmem:[#allocation199_spill] sm:$0xff] }
 0x2c5   : > { %14185 = vst [vmem:[#allocation181_spill] sm:$0xff] %v11353_v43  ;;  %v5918_v50 = vmul.f32 %v14188_v6, %v4054_v28  ;;  %v5919_v44 = vmul.f32 %v14189_v62, %v4055_v20  ;;  %v2096_v30 = vadd.f32 %v11345_v49, %v14191_v53  ;;  %v2098_v14 = vadd.f32 %v11345_v49, %v14192_v16  ;;  %v7549_v20 = vld [vmem:[%s8768_s10 + $0x3f8] sm:$0xff]  ;;  %v14195_v53 = vld [vmem:[#allocation65_spill] sm:$0xff]  ;;  %v14198_v16 = vld [vmem:[#allocation34_spill] sm:$0xff] }
 0x2c6   : > { %8217 = vst [vmem:[%s9366_s7 + $0xc0] sm:$0xff] %v7677_v24   ;;  %v3673_v33 = vmax.f32 %v3671_v34, %v3672_v8  ;;  %v2466_v63 = vmul.f32 %v10806_v5, %v2209_v18  ;;  %v2335_v28 = vmax.f32 %v1936_v12, 0.0  ;;  %v11379_v24 = vperm.slane %v11288_v54, 2  ;;  %v14196_v34 = vld [vmem:[#allocation66_spill] sm:$0xff]  ;;  %7414 = vmatmul.msk.bf16.gmra.mxu3 %vm1141_vm0, %v7549_v20 }
 0x2c7   : > { %14190 = vst [vmem:[#allocation152_spill] sm:$0xff] %v11370_v0  ;;  %v7607_v6 = vpack.c.bf16 %v5919_v44, %v5918_v50  ;;  %v2336_v62 = vmax.f32 %v1938_v1, 0.0  ;;  %v1941_v47 = vadd.f32 %v11345_v49, %v14193_v32  ;;  %v4118_v35 = vsel %vm2945_vm1, %v14195_v53, %v14194_v45 }
 0x2c8   : > { %8218 = vst [vmem:[%s9366_s7 + $0xc8] sm:$0xff] %v7682_v46   ;;  %3952 = vrot.lane.b32.xlu1 %v3673_v33, %s8675_s30  ;;  %v4835_v46 = vpop.permute.xlu1 %4834  ;;  %v4119_v5 = vsel %vm2945_vm1, %v14196_v34, %v14194_v45  ;;  %v2210_v8 = vmax.f32 %v1623_v37, 0.0  ;;  %v5982_v18 = vmul.f32 %v11273_v59, %v4118_v35  ;;  %v11394_v1 = vperm.slane %v11315_v61, 6  ;;  %4953 = vperm.xlu2 %8452, %v11379_v24   ;;  %v11403_v59 = vld [vmem:[%s13488_s3 + $0x1] ss:$0 sm:$0xff] }
 0x2c9   : > { %8203 = vst [vmem:[%s9366_s7 + $0x50] sm:$0xff] %v7607_v6   ;;  %v5983_v12 = vmul.f32 %v4835_v46, %v4119_v5  ;;  %v2399_v50 = vmax.f32 %v2096_v30, 0.0  ;;  %v2400_v44 = vmax.f32 %v2098_v14, 0.0  ;;  %v2101_v32 = vadd.f32 %v11345_v49, %v14198_v16  ;;  %v14199_v14 = vld [vmem:[#allocation164_spill] sm:$0xff]  ;;  %v11416_v46 = vld [vmem:[%s13488_s3 + $0x2] ss:$0 sm:$0xff]  ;;  %v11474_v23 = vpop.permute.xlu2 %3948 }
 0x2ca   : > { %14197 = vst [vmem:[#allocation176_spill] sm:$0xff] %v11394_v1  ;;  %v2592_v35 = vmul.f32 %v11403_v59, %v2335_v28  ;;  %v2593_v37 = vmul.f32 %v11403_v59, %v2336_v62  ;;  %v2337_v30 = vmax.f32 %v1941_v47, 0.0  ;;  %v1943_v6 = vadd.f32 %v11345_v49, %v14199_v14  ;;  %v11429_v16 = vld [vmem:[%s8774_s14 + $0x38] sm:$0xff] }
 0x2cb   : > { %v7767_v33 = vpack.c.bf16 %v5983_v12, %v5982_v18  ;;  %v3050_v53 = vsel %vm2945_vm1, %v11353_v43, -inf  ;;  %v3051_v20 = vsel %vm2945_vm1, %v11370_v0, -inf  ;;  %v11419_v34 = vadd.f32 %v11416_v46, %v2466_v63  ;;  %v14200_v18 = vld [vmem:[#allocation185_spill] sm:$0xff]  ;;  %14208 = vst [vmem:[#allocation43_spill] sm:$0xff] %v11474_v23  ;;  %v14216_v0 = vld [vmem:[#allocation31_spill] sm:$0xff] }
 0x2cc   : > { %v2467_v28 = vmul.f32 %v11403_v59, %v2210_v8  ;;  %5659 = vperm.xlu0 %8382, %v11394_v1   ;;  %v2656_v62 = vmul.f32 %v11403_v59, %v2399_v50  ;;  %v2657_v47 = vmul.f32 %v11403_v59, %v2400_v44  ;;  %v2401_v5 = vmax.f32 %v2101_v32, 0.0 }
 0x2cd   : > { %8235 = vst [vmem:[%s9366_s7 + $0x150] sm:$0xff] %v7767_v33   ;;  %v2103_v12 = vadd.f32 %v11345_v49, %v14200_v18  ;;  %v11432_v14 = vadd.f32 %v11416_v46, %v2592_v35  ;;  %v11435_v63 = vadd.f32 %v11416_v46, %v2593_v37  ;;  %v2594_v8 = vmul.f32 %v11403_v59, %v2337_v30 }
 0x2ce   : > { %v2338_v33 = vmax.f32 %v1943_v6, 0.0  ;;  %v3052_v50 = vmax.f32 %v3050_v53, %v3051_v20  ;;  %v3053_v44 = vsel %vm2945_vm1, %v11419_v34, -inf  ;;  %v11442_v32 = vadd.f32 %v11416_v46, %v2467_v28 }
 0x2cf   : > { %14201 = vst [vmem:[#allocation135_spill] sm:$0xff] %v11432_v14  ;;  %v11445_v18 = vperm.slane %v11429_v16, 3  ;;  %v11448_v35 = vadd.f32 %v11416_v46, %v2656_v62  ;;  %v11451_v37 = vadd.f32 %v11416_v46, %v2657_v47  ;;  %v2658_v30 = vmul.f32 %v11403_v59, %v2401_v5 }
 0x2d0   : > { %14202 = vst [vmem:[#allocation162_spill] sm:$0xff] %v11435_v63  ;;  %4946 = vperm.xlu1 %8451, %v11291_v42   ;;  %v2402_v6 = vmax.f32 %v2103_v12, 0.0  ;;  %8454 = vset.pattern.permute.xlu2 %v8810_v17  ;;  %v3466_v53 = vsel %vm2945_vm1, %v11432_v14, -inf  ;;  %v3467_v20 = vsel %vm2945_vm1, %v11435_v63, -inf  ;;  %v11460_v28 = vadd.f32 %v11416_v46, %v2594_v8 }
 0x2d1   : > { %14203 = vst [vmem:[#allocation120_spill] sm:$0xff] %v11445_v18  ;;  %v2595_v62 = vmul.f32 %v11403_v59, %v2338_v33  ;;  %v3054_v1 = vmax.f32 %v3052_v50, %v3053_v44  ;;  %v3055_v47 = vsel %vm2945_vm1, %v11442_v32, -inf  ;;  %v3674_v5 = vsel %vm2945_vm1, %v11448_v35, -inf }
 0x2d2   : > { %14204 = vst [vmem:[#allocation125_spill] sm:$0xff] %v11448_v35  ;;  %v3675_v12 = vsel %vm2945_vm1, %v11451_v37, -inf  ;;  %v11471_v14 = vadd.f32 %v11416_v46, %v2658_v30  ;;  %v2659_v8 = vmul.f32 %v11403_v59, %v2402_v6  ;;  %v3468_v63 = vmax.f32 %v3466_v53, %v3467_v20 }
 0x2d3   : > { %14205 = vst [vmem:[#allocation134_spill] sm:$0xff] %v11451_v37  ;;  %v3469_v33 = vsel %vm2945_vm1, %v11460_v28, -inf  ;;  %v11479_v50 = vadd.f32 %v11416_v46, %v2595_v62  ;;  %v3056_v44 = vmax.f32 %v3054_v1, %v3055_v47  ;;  %v3676_v35 = vmax.f32 %v3674_v5, %v3675_v12  ;;  %v11495_v5 = vpop.permute.xlu2 %4871 }
 0x2d4   : > { %14206 = vst [vmem:[#allocation191_spill] sm:$0xff] %v11460_v28  ;;  %5784 = vperm.xlu0 %8382, %v11445_v18   ;;  %v3677_v37 = vsel %vm2945_vm1, %v11471_v14, -inf  ;;  %v11485_v30 = vadd.f32 %v11416_v46, %v2659_v8  ;;  %v3470_v6 = vmax.f32 %v3468_v63, %v3469_v33  ;;  %v14211_v8 = vld [vmem:[#allocation158_spill] sm:$0xff]  ;;  %v14214_v28 = vld [vmem:[#allocation169_spill] sm:$0xff] }
 0x2d5   : > { %14207 = vst [vmem:[#allocation187_spill] sm:$0xff] %v11471_v14  ;;  %v3471_v53 = vsel %vm2945_vm1, %v11479_v50, -inf  ;;  %v3057_v20 = vrot.slane %v3056_v44, 4  ;;  %v3678_v18 = vmax.f32 %v3676_v35, %v3677_v37  ;;  %v11490_v62 = vpop.permute.xlu1 %4853  ;;  %v1786_v33 = vadd.f32 %v11345_v49, %v14211_v8  ;;  %v14212_v14 = vld [vmem:[#allocation27_spill] sm:$0xff] }
 0x2d6   : > { %14209 = vst [vmem:[#allocation195_spill] sm:$0xff] %v11479_v50  ;;  %v3679_v1 = vsel %vm2945_vm1, %v11485_v30, -inf  ;;  %v3472_v47 = vmax.f32 %v3470_v6, %v3471_v53  ;;  %v1788_v35 = vadd.f32 %v11345_v49, %v14212_v14  ;;  %v14213_v50 = vld [vmem:[#allocation5_spill] sm:$0xff]  ;;  %v1791_v43 = vadd.f32 %v11345_v49, %v14214_v28 }
 0x2d7   : > { %14210 = vst [vmem:[#allocation138_spill] sm:$0xff] %v11485_v30  ;;  %v3058_v63 = vmax.f32 %v3056_v44, %v3057_v20  ;;  %v3680_v12 = vmax.f32 %v3678_v18, %v3679_v1  ;;  %v2275_v6 = vmax.f32 %v1786_v33, 0.0  ;;  %v11509_v20 = vperm.slane %v11288_v54, 3 }
 0x2d8   : > { %8453 = vset.pattern.permute.xlu1 %v8762_v4  ;;  %4965 = vperm.xlu2 %8454, %v11379_v24   ;;  %v3473_v37 = vrot.slane %v3472_v47, 4  ;;  %v2276_v53 = vmax.f32 %v1788_v35, 0.0  ;;  %v2277_v35 = vmax.f32 %v1791_v43, 0.0  ;;  %v1793_v28 = vadd.f32 %v11345_v49, %v14216_v0 }
 0x2d9   : > { %v3681_v23 = vrot.slane %v3680_v12, 4  ;;  %v3059_v30 = vrot.slane %v3058_v63, 2 }
 0x2da   : > { %v3474_v44 = vmax.f32 %v3472_v47, %v3473_v37  ;;  %v2533_v33 = vmul.f32 %v11403_v59, %v2276_v53  ;;  %v14218_v53 = vld [vmem:[#allocation142_spill] sm:$0xff] }
 0x2db   : > { %v3682_v14 = vmax.f32 %v3680_v12, %v3681_v23  ;;  %v3060_v8 = vmax.f32 %v3058_v63, %v3059_v30  ;;  %v2534_v63 = vmul.f32 %v11403_v59, %v2277_v35  ;;  %v2278_v12 = vmax.f32 %v1793_v28, 0.0  ;;  %v14219_v35 = vld [vmem:[#allocation141_spill] sm:$0xff] }
 0x2dc   : > { %8559 = vset.pattern.permute.xlu0 %v8810_v17  ;;  %v3475_v47 = vrot.slane %v3474_v44, 2  ;;  %v11524_v30 = vadd.f32 %v11416_v46, %v2533_v33  ;;  %v4131_v22 = vsel %vm2945_vm1, %v14218_v53, %v10848_v40  ;;  %v4130_v28 = vsel %vm2945_vm1, %v14219_v35, %v10848_v40 }
 0x2dd   : > { %v3061_v37 = vrot.slane %v3060_v8, 1  ;;  %v3683_v27 = vrot.slane %v3682_v14, 2  ;;  %v11536_v29 = vadd.f32 %v11416_v46, %v2534_v63 }
 0x2de   : > { %v11506_v18 = vpop.permute.xlu1 %3916  ;;  %v3476_v43 = vmax.f32 %v3474_v44, %v3475_v47  ;;  %v3272_v33 = vsel %vm2945_vm1, %v11524_v30, -inf  ;;  %v2535_v44 = vmul.f32 %v11403_v59, %v2278_v12  ;;  %v5995_v47 = vmul.f32 %v10659_v13, %v4131_v22 }
 0x2df   : > { %14215 = vst [vmem:[#allocation150_spill] sm:$0xff] %v11506_v18  ;;  %v14217_v18 = vld [vmem:[#allocation8_spill] sm:$0xff]  ;;  %v3274_v35 = vsel %vm2945_vm1, %v11536_v29, -inf }
 0x2e0   : > { %4959 = vperm.xlu1 %8453, %v11379_v24   ;;  %8456 = vset.pattern.permute.xlu2 %v8762_v4  ;;  %v11512_v1 = vpop.permute.xlu2 %4890 }
 0x2e4   : > { %4315 = vperm.xlu0 %8559, %v14213_v50   ;;  %v2532_v50 = vmul.f32 %v11403_v59, %v2275_v6  ;;  %v3062_v6 = vmax.f32 %v3060_v8, %v3061_v37  ;;  %v14220_v37 = vld [vmem:[#allocation171_spill] sm:$0xff] }
 0x2e5   : > { %v1946_v63 = vadd.f32 %v11345_v49, %v14220_v37 }
 0x2e6   : > { %v11521_v23 = vadd.f32 %v11416_v46, %v2532_v50  ;;  %v4866_v0 = vpop.permute.xlu1 %4865 }
 0x2e7   : > { %v2339_v22 = vmax.f32 %v1946_v63, 0.0 }
 0x2e8   : > { %8455 = vset.pattern.permute.xlu1 %v8755_v2  ;;  %4984 = vperm.xlu2 %8456, %v11509_v20   ;;  %v3271_v50 = vsel %vm2945_vm1, %v11521_v23, -inf }
 0x2e9   : > { %v3273_v12 = vmax.f32 %v3271_v50, %v3272_v33 }
 0x2eb   : > { %v3275_v33 = vmax.f32 %v3273_v12, %v3274_v35 }
 0x2ec   : > { %4440 = vperm.xlu0 %8559, %v14217_v18   ;;  %v3684_v18 = vmax.f32 %v3682_v14, %v3683_v27  ;;  %v3477_v27 = vrot.slane %v3476_v43, 1 }
 0x2ee   : > { %v3685_v53 = vrot.slane %v3684_v18, 1  ;;  %v3478_v13 = vmax.f32 %v3476_v43, %v3477_v27  ;;  %v14226_v43 = vld [vmem:[#allocation124_spill] sm:$0xff] }
 0x2f0   : > { %4978 = vperm.xlu1 %8455, %v11509_v20   ;;  %3858 = vrot.lane.b32.xlu2 %v3062_v6, %s8675_s30  ;;  %v4904_v8 = vpop.permute.xlu2 %4903  ;;  %v14222_v6 = vld [vmem:[#allocation179_spill] sm:$0xff] }
 0x2f1   : > { %v5994_v14 = vmul.f32 %v4904_v8, %v4130_v28  ;;  %8458 = vset.pattern.permute.xlu2 %v8791_v10  ;;  %v1948_v45 = vadd.f32 %v11345_v49, %v14222_v6  ;;  %v11553_v8 = vadd.f32 %v11416_v46, %v2535_v44  ;;  %v11557_v28 = vpop.permute.xlu0 %5159 }
 0x2f2   : > { %14223 = vst [vmem:[#allocation146_spill] sm:$0xff] %v11557_v28 }
 0x2f3   : > { %v7797_v48 = vpack.c.bf16 %v5995_v47, %v5994_v14  ;;  %v2340_v14 = vmax.f32 %v1948_v45, 0.0  ;;  %v14225_v47 = vld [vmem:[#allocation184_spill] sm:$0xff]  ;;  %v3276_v44 = vsel %vm2945_vm1, %v11553_v8, -inf }
 0x2f4   : > { %4565 = vperm.xlu0 %8559, %v14221_v26   ;;  %v3686_v26 = vmax.f32 %v3684_v18, %v3685_v53  ;;  %v1951_v37 = vadd.f32 %v11345_v49, %v14225_v47  ;;  %v3277_v27 = vmax.f32 %v3275_v33, %v3276_v44  ;;  %v14227_v53 = vld [vmem:[#allocation192_spill] sm:$0xff]  ;;  %v14233_v44 = vld [vmem:[#allocation119_spill] sm:$0xff] }
 0x2f5   : > { %8241 = vst [vmem:[%s9366_s7 + $0x180] sm:$0xff] %v7797_v48   ;;  %v2596_v48 = vmul.f32 %v11403_v59, %v2339_v22  ;;  %v2597_v63 = vmul.f32 %v11403_v59, %v2340_v14  ;;  %v1953_v12 = vadd.f32 %v11345_v49, %v14227_v53 }
 0x2f6   : > { %v11560_v50 = vpop.permute.xlu1 %4884  ;;  %v2341_v18 = vmax.f32 %v1951_v37, 0.0  ;;  %v11572_v45 = vpop.f32.mrf.mxu3 }
 0x2f7   : > { %14224 = vst [vmem:[#allocation114_spill] sm:$0xff] %v11560_v50  ;;  %v11575_v6 = vadd.f32 %v11416_v46, %v2596_v48  ;;  %v11581_v22 = vadd.f32 %v11416_v46, %v2597_v63  ;;  %v2342_v33 = vmax.f32 %v1953_v12, 0.0 }
 0x2f8   : > { %8457 = vset.pattern.permute.xlu1 %v8810_v17  ;;  %3954 = vrot.lane.b32.xlu2 %v3686_v26, %s8675_s30  ;;  %14228 = vst [vmem:[#allocation106_spill] sm:$0xff] %v11572_v45  ;;  %v2598_v26 = vmul.f32 %v11403_v59, %v2341_v18  ;;  %v14256_v45 = vld [vmem:[#allocation36_spill] sm:$0xff] }
 0x2f9   : > { %3922 = vrot.lane.b32.xlu1 %v3478_v13, %s8675_s30  ;;  %14229 = vst [vmem:[#allocation165_spill] sm:$0xff] %v11575_v6  ;;  %v11578_v35 = vpop.permute.xlu0 %3962  ;;  %v3278_v13 = vrot.slane %v3277_v27, 4  ;;  %v11584_v14 = vpop.permute.xlu2 %3918 }
 0x2fa   : > { %14230 = vst [vmem:[#allocation172_spill] sm:$0xff] %v11578_v35  ;;  %v11604_v28 = vadd.f32 %v11416_v46, %v2598_v26 }
 0x2fb   : > { %14231 = vst [vmem:[#allocation161_spill] sm:$0xff] %v11581_v22 }
 0x2fc   : > { %4690 = vperm.xlu0 %8559, %v14226_v43   ;;  %14232 = vst [vmem:[#allocation65_spill] sm:$0xff] %v11584_v14  ;;  %v14234_v43 = vld [vmem:[#allocation82_spill] sm:$0xff]  ;;  %v14235_v14 = vld [vmem:[#allocation239_spill] sm:$0xff] }
 0x2fd   : > { %14236 = vst [vmem:[#allocation66_spill] sm:$0xff] %v11604_v28 }
 0x2ff   : > { %v3887_v47 = vpop.permute.xlu1 %3886 }
 0x300   : > { %4996 = vperm.xlu2 %8458, %v11509_v20   ;;  %v4122_v37 = vsel %vm2945_vm1, %v10836_v41, %v3887_v47  ;;  %v4123_v48 = vsel %vm2945_vm1, %v14233_v44, %v3887_v47  ;;  %v4124_v53 = vsel %vm2945_vm1, %v14234_v43, %v3887_v47  ;;  %v4125_v63 = vsel %vm2945_vm1, %v10884_v55, %v3887_v47 }
 0x301   : > { %4990 = vperm.xlu1 %8457, %v11509_v20   ;;  %v5986_v18 = vmul.f32 %v11490_v62, %v4122_v37  ;;  %v5987_v12 = vmul.f32 %v11311_v51, %v4123_v48  ;;  %v5988_v35 = vmul.f32 %v4866_v0, %v4124_v53  ;;  %v5989_v20 = vmul.f32 %v11495_v5, %v4125_v63  ;;  %v11607_v62 = vpop.f32.mrf.mxu3  ;;  %v14238_v0 = vld [vmem:[#allocation38_spill] sm:$0xff]  ;;  %v11620_v26 = vpop.permute.xlu0 %3932 }
 0x302   : > { %v3479_v44 = vsel %vm2945_vm1, %v11575_v6, -inf  ;;  %v3480_v43 = vsel %vm2945_vm1, %v11581_v22, -inf  ;;  %v2599_v55 = vmul.f32 %v11403_v59, %v2342_v33  ;;  %14237 = vst [vmem:[#allocation34_spill] sm:$0xff] %v11607_v62  ;;  %v3279_v51 = vmax.f32 %v3277_v27, %v3278_v13  ;;  %v14241_v33 = vld [vmem:[#allocation189_spill] sm:$0xff]  ;;  %v14243_v63 = vld [vmem:[#allocation182_spill] sm:$0xff] }
 0x303   : > { %v7777_v41 = vpack.c.bf16 %v5987_v12, %v5986_v18  ;;  %v7782_v50 = vpack.c.bf16 %v5989_v20, %v5988_v35  ;;  %v3481_v5 = vmax.f32 %v3479_v44, %v3480_v43  ;;  %v1636_v35 = vadd.f32 %v11345_v49, %v14238_v0  ;;  %14240 = vst [vmem:[#allocation185_spill] sm:$0xff] %v11620_v26  ;;  %v14249_v26 = vld [vmem:[#allocation196_spill] sm:$0xff] }
 0x304   : > { %4815 = vperm.xlu0 %8559, %v14235_v14   ;;  %v3482_v14 = vsel %vm2945_vm1, %v11604_v28, -inf  ;;  %v11617_v47 = vadd.f32 %v11416_v46, %v2599_v55  ;;  %v1638_v27 = vadd.f32 %v11345_v49, %v14241_v33  ;;  %v3280_v13 = vrot.slane %v3279_v51, 2 }
 0x305   : > { %8237 = vst [vmem:[%s9366_s7 + $0x160] sm:$0xff] %v7777_v41   ;;  %v11625_v37 = vperm.slane %v11288_v54, 4  ;;  %v3483_v48 = vmax.f32 %v3481_v5, %v3482_v14  ;;  %v2215_v53 = vmax.f32 %v1636_v35, 0.0  ;;  %v1796_v18 = vadd.f32 %v11345_v49, %v14243_v63  ;;  %v14245_v14 = vld [vmem:[#allocation190_spill] sm:$0xff] }
 0x306   : > { %8238 = vst [vmem:[%s9366_s7 + $0x168] sm:$0xff] %v7782_v50   ;;  %v4922_v50 = vpop.permute.xlu2 %4921  ;;  %v3484_v12 = vsel %vm2945_vm1, %v11617_v47, -inf  ;;  %v2216_v41 = vmax.f32 %v1638_v27, 0.0  ;;  %v3281_v44 = vmax.f32 %v3279_v51, %v3280_v13  ;;  %v11636_v43 = vperm.slane %v11288_v54, 6  ;;  %v14246_v13 = vld [vmem:[#allocation194_spill] sm:$0xff] }
 0x307   : > { %14239 = vst [vmem:[#allocation164_spill] sm:$0xff] %v11617_v47  ;;  %v3485_v55 = vmax.f32 %v3483_v48, %v3484_v12  ;;  %v4897_v0 = vpop.permute.xlu1 %4896  ;;  %v2279_v5 = vmax.f32 %v1796_v18, 0.0  ;;  %v1798_v33 = vadd.f32 %v11345_v49, %v14245_v14  ;;  %v1641_v63 = vadd.f32 %v11345_v49, %v14246_v13  ;;  %v14250_v13 = vld [vmem:[#allocation198_spill] sm:$0xff] }
 0x308   : > { %8460 = vset.pattern.permute.xlu2 %v8810_v17  ;;  %14242 = vst [vmem:[#allocation158_spill] sm:$0xff] %v11625_v37  ;;  %v2473_v35 = vmul.f32 %v11403_v59, %v2216_v41  ;;  %v3282_v51 = vrot.slane %v3281_v44, 1  ;;  %v1801_v22 = vadd.f32 %v11345_v49, %v14249_v26  ;;  %v1643_v47 = vadd.f32 %v11345_v49, %v14250_v13  ;;  %v14253_v26 = vld [vmem:[#allocation156_spill] sm:$0xff] }
 0x309   : > { %8459 = vset.pattern.permute.xlu1 %v8762_v4  ;;  %v11632_v20 = vpop.f32.mrf.mxu3  ;;  %v11648_v48 = vpop.permute.xlu0 %3902  ;;  %v2536_v12 = vmul.f32 %v11403_v59, %v2279_v5  ;;  %v2280_v14 = vmax.f32 %v1798_v33, 0.0  ;;  %v2217_v28 = vmax.f32 %v1641_v63, 0.0  ;;  %v14252_v33 = vld [vmem:[#allocation210_spill] sm:$0xff]  ;;  %v14254_v63 = vld [vmem:[#allocation147_spill] sm:$0xff] }
 0x30a   : > { %14244 = vst [vmem:[#allocation27_spill] sm:$0xff] %v11632_v20  ;;  %v11655_v41 = vadd.f32 %v11416_v46, %v2473_v35  ;;  %v3283_v6 = vmax.f32 %v3281_v44, %v3282_v51  ;;  %v2116_v15 = vadd.f32 %v11345_v49, %v14252_v33  ;;  %v4133_v44 = vsel %vm2945_vm1, %v14253_v26, %v10848_v40 }
 0x30b   : > { %14247 = vst [vmem:[#allocation5_spill] sm:$0xff] %v11648_v48  ;;  %v4132_v13 = vsel %vm2945_vm1, %v14254_v63, %v10848_v40  ;;  %v2537_v20 = vmul.f32 %v11403_v59, %v2280_v14  ;;  %v2281_v40 = vmax.f32 %v1801_v22, 0.0  ;;  %v7514_v63 = vld [vmem:[%s8768_s10 + $0x2e0] sm:$0xff]  ;;  %v2218_v62 = vmax.f32 %v1643_v47, 0.0  ;;  %v14258_v47 = vld [vmem:[#allocation231_spill] sm:$0xff] }
 0x30c   : > { %4940 = vperm.xlu0 %8559, %v11291_v42   ;;  %v2472_v42 = vmul.f32 %v11403_v59, %v2215_v53  ;;  %v3486_v53 = vrot.slane %v3485_v55, 4  ;;  %v3077_v26 = vsel %vm2945_vm1, %v11655_v41, -inf  ;;  %7379 = vmatmul.msk.bf16.gmra.mxu2 %vm1141_vm0, %v7514_v63 }
 0x30e   : > { %v11651_v18 = vadd.f32 %v11416_v46, %v2472_v42  ;;  %v11666_v42 = vperm.slane %v11663_v58, 3  ;;  %v3487_v35 = vmax.f32 %v3485_v55, %v3486_v53  ;;  %v5997_v53 = vmul.f32 %v4922_v50, %v4133_v44 }
 0x30f   : > { %v1803_v50 = vadd.f32 %v11345_v49, %v14256_v45  ;;  %v2121_v45 = vadd.f32 %v11345_v49, %v14258_v47 }
 0x310   : > { %5015 = vperm.xlu2 %8460, %v11625_v37   ;;  %14248 = vst [vmem:[#allocation169_spill] sm:$0xff] %v11651_v18  ;;  %v11681_v48 = vsel %vm2945_vm1, %v11651_v18, -inf  ;;  %v2474_v18 = vmul.f32 %v11403_v59, %v2217_v28  ;;  %v3488_v14 = vrot.slane %v3487_v35, 2 }
 0x311   : > { %5009 = vperm.xlu1 %8459, %v11625_v37   ;;  %v11643_v27 = vpop.permute.xlu2 %4934  ;;  %v11668_v5 = vpop.f32.mrf.mxu3  ;;  %v2282_v47 = vmax.f32 %v1803_v50, 0.0  ;;  %v14263_v50 = vld [vmem:[#allocation237_spill] sm:$0xff] }
 0x312   : > { %14251 = vst [vmem:[#allocation31_spill] sm:$0xff] %v11668_v5  ;;  %v14255_v5 = vld [vmem:[#allocation219_spill] sm:$0xff] }
 0x313   : > { %v2118_v55 = vadd.f32 %v11345_v49, %v14255_v5 }
 0x314   : > { %5065 = vperm.xlu0 %8559, %v11636_v43  }
 0x315   : > { %v2408_v28 = vmax.f32 %v2118_v55, 0.0 }
 0x317   : > { %v4916_v51 = vpop.permute.xlu1 %4915 }
 0x318   : > { %8462 = vset.pattern.permute.xlu2 %v8755_v2  ;;  %v5996_v33 = vmul.f32 %v4916_v51, %v4132_v13  ;;  %v2407_v51 = vmax.f32 %v2116_v15, 0.0 }
 0x319   : > { %8461 = vset.pattern.permute.xlu1 %v8791_v10 }
 0x31a   : > { %3892 = vrot.lane.b32.xlu1 %v3283_v6, %s8675_s30  ;;  %v11689_v6 = vadd.f32 %v11416_v46, %v2536_v12  ;;  %v7802_v5 = vpack.c.bf16 %v5997_v53, %v5996_v33  ;;  %v11696_v44 = vpop.permute.xlu2 %3888  ;;  %v11713_v33 = vadd.f32 %v11416_v46, %v2537_v20  ;;  %v11727_v20 = vpop.f32.mrf.mxu3 }
 0x31b   : > { %14257 = vst [vmem:[#allocation8_spill] sm:$0xff] %v11696_v44  ;;  %v4128_v12 = vsel %vm2945_vm1, %v11201_v60, %v11696_v44  ;;  %v4129_v22 = vsel %vm2945_vm1, %v11226_v7, %v11696_v44  ;;  %v2538_v60 = vmul.f32 %v11403_v59, %v2281_v40  ;;  %v11730_v40 = vadd.f32 %v11416_v46, %v2474_v18 }
 0x31c   : > { %5190 = vperm.xlu0 %8559, %v11666_v42   ;;  %8242 = vst [vmem:[%s9366_s7 + $0x188] sm:$0xff] %v7802_v5   ;;  %v5992_v13 = vmul.f32 %v11512_v1, %v4128_v12  ;;  %v5993_v53 = vmul.f32 %v4897_v0, %v4129_v22  ;;  %v14259_v5 = vld [vmem:[#allocation232_spill] sm:$0xff]  ;;  %v14260_v0 = vld [vmem:[#allocation51_spill] sm:$0xff]  ;;  %v11725_v22 = vperm.slane %v11299_v36, 0  ;;  %v3284_v18 = vsel %vm2945_vm1, %v11689_v6, -inf }
 0x31e   : > { %v11710_v15 = vpop.permute.xlu0 %3872  ;;  %v7792_v63 = vpack.c.bf16 %v5993_v53, %v5992_v13  ;;  %14261 = vst [vmem:[#allocation142_spill] sm:$0xff] %v11725_v22  ;;  %v2664_v13 = vmul.f32 %v11403_v59, %v2407_v51  ;;  %v2665_v53 = vmul.f32 %v11403_v59, %v2408_v28  ;;  %v3079_v51 = vsel %vm2945_vm1, %v11730_v40, -inf }
 0x31f   : > { %v4094_v7 = vsel %vm2945_vm1, %v11141_v25, %v11710_v15  ;;  %v4095_v55 = vsel %vm2945_vm1, %v11144_v19, %v11710_v15  ;;  %v2475_v25 = vmul.f32 %v11403_v59, %v2218_v62  ;;  %v3489_v19 = vmax.f32 %v3487_v35, %v3488_v14 }
 0x320   : > { %v5958_v1 = vmul.f32 %v14259_v5, %v4094_v7  ;;  %v5959_v12 = vmul.f32 %v14260_v0, %v4095_v55  ;;  %v2409_v7 = vmax.f32 %v2121_v45, 0.0  ;;  %8240 = vst [vmem:[%s9366_s7 + $0x178] sm:$0xff] %v7792_v63   ;;  %v14262_v55 = vld [vmem:[#allocation216_spill] sm:$0xff]  ;;  %v3078_v0 = vmax.f32 %v11681_v48, %v3077_v26 }
 0x321   : > { %5028 = vperm.xlu2 %8462, %v14262_v55   ;;  %v3285_v62 = vsel %vm2945_vm1, %v11713_v33, -inf  ;;  %v2123_v35 = vadd.f32 %v11345_v49, %v14263_v50  ;;  %v11750_v14 = vadd.f32 %v11416_v46, %v2475_v25  ;;  %v11753_v48 = vadd.f32 %v11416_v46, %v2538_v60 }
 0x322   : > { %5021 = vperm.xlu1 %8461, %v11625_v37   ;;  %v7707_v5 = vpack.c.bf16 %v5959_v12, %v5958_v1  ;;  %v3490_v26 = vrot.slane %v3489_v19, 1  ;;  %v2539_v28 = vmul.f32 %v11403_v59, %v2282_v47  ;;  %v11757_v45 = vadd.f32 %v11416_v46, %v2664_v13  ;;  %v11768_v60 = vpop.f32.mrf.mxu3 }
 0x323   : > { %14264 = vst [vmem:[#allocation141_spill] sm:$0xff] %v11753_v48  ;;  %v11760_v63 = vadd.f32 %v11416_v46, %v2665_v53  ;;  %v2666_v1 = vmul.f32 %v11403_v59, %v2409_v7  ;;  %v2410_v50 = vmax.f32 %v2123_v35, 0.0  ;;  %v11766_v25 = vperm.slane %v11299_v36, 5  ;;  %v7515_v35 = vld [vmem:[%s8768_s10 + $0x2e8] sm:$0xff] }
 0x324   : > { %8223 = vst [vmem:[%s9366_s7 + $0xf0] sm:$0xff] %v7707_v5   ;;  %5315 = vperm.xlu0 %8559, %v11725_v22   ;;  %v3286_v5 = vmax.f32 %v3284_v18, %v3285_v62  ;;  %v3080_v44 = vmax.f32 %v3078_v0, %v3079_v51  ;;  %v3081_v47 = vsel %vm2945_vm1, %v11750_v14, -inf  ;;  %v3287_v13 = vsel %vm2945_vm1, %v11753_v48, -inf  ;;  %7380 = vmatmul.msk.bf16.gmra.mxu2 %vm1141_vm0, %v7515_v35 }
 0x325   : > { %14265 = vst [vmem:[#allocation171_spill] sm:$0xff] %v11757_v45  ;;  %v3491_v53 = vmax.f32 %v3489_v19, %v3490_v26  ;;  %v11778_v18 = vadd.f32 %v11416_v46, %v2539_v28  ;;  %v3700_v36 = vsel %vm2945_vm1, %v11757_v45, -inf  ;;  %v3701_v0 = vsel %vm2945_vm1, %v11760_v63, -inf }
 0x326   : > { %14266 = vst [vmem:[#allocation37_spill] sm:$0xff] %v11760_v63  ;;  %v11763_v12 = vpop.permute.xlu0 %5284  ;;  %v11785_v62 = vadd.f32 %v11416_v46, %v2666_v1  ;;  %v2667_v19 = vmul.f32 %v11403_v59, %v2410_v50  ;;  %v3082_v51 = vmax.f32 %v3080_v44, %v3081_v47  ;;  %v3288_v26 = vmax.f32 %v3286_v5, %v3287_v13  ;;  %v11797_v1 = vpop.permute.xlu2 %4953 }
 0x327   : > { %14267 = vst [vmem:[#allocation179_spill] sm:$0xff] %v11763_v12  ;;  %v11775_v7 = vpop.permute.xlu1 %4928  ;;  %v3702_v28 = vmax.f32 %v3700_v36, %v3701_v0  ;;  %v3289_v45 = vsel %vm2945_vm1, %v11778_v18, -inf }
 0x328   : > { %14268 = vst [vmem:[#allocation184_spill] sm:$0xff] %v11766_v25  ;;  %v3703_v63 = vsel %vm2945_vm1, %v11785_v62, -inf  ;;  %v3083_v5 = vrot.slane %v3082_v51, 4  ;;  %v3290_v47 = vmax.f32 %v3288_v26, %v3289_v45  ;;  %v14276_v45 = vld [vmem:[#allocation129_spill] sm:$0xff] }
 0x329   : > { %14269 = vst [vmem:[#allocation124_spill] sm:$0xff] %v11768_v60  ;;  %8464 = vset.pattern.permute.xlu2 %v8791_v10  ;;  %v3704_v13 = vmax.f32 %v3702_v28, %v3703_v63  ;;  %v14277_v26 = vld [vmem:[#allocation121_spill] sm:$0xff] }
 0x32a   : > { %8463 = vset.pattern.permute.xlu1 %v8810_v17  ;;  %14270 = vst [vmem:[#allocation192_spill] sm:$0xff] %v11778_v18  ;;  %3924 = vrot.lane.b32.xlu2 %v3491_v53, %s8675_s30  ;;  %v11800_v53 = vadd.f32 %v11416_v46, %v2667_v19  ;;  %v11807_v44 = vpop.f32.mrf.mxu3  ;;  %v3291_v18 = vrot.slane %v3290_v47, 4  ;;  %v3084_v48 = vmax.f32 %v3082_v51, %v3083_v5  ;;  %v14284_v51 = vld [vmem:[#allocation46_spill] sm:$0xff] }
 0x32b   : > { %14271 = vst [vmem:[#allocation119_spill] sm:$0xff] %v11785_v62  ;;  %v1646_v5 = vadd.f32 %v11345_v49, %v14284_v51 }
 0x32c   : > { %5440 = vperm.xlu0 %8559, %v11766_v25   ;;  %14272 = vst [vmem:[#allocation82_spill] sm:$0xff] %v11800_v53  ;;  %v11805_v25 = vperm.slane %v11315_v61, 2 }
 0x32d   : > { %14275 = vst [vmem:[#allocation189_spill] sm:$0xff] %v11807_v44  ;;  %v14301_v44 = vld [vmem:[#allocation236_spill] sm:$0xff] }
 0x32e   : > { %v11802_v50 = vpop.permute.xlu0 %5409  ;;  %14274 = vst [vmem:[#allocation38_spill] sm:$0xff] %v11805_v25 }
 0x32f   : > { %14273 = vst [vmem:[#allocation239_spill] sm:$0xff] %v11802_v50  ;;  %v3857_v36 = vpop.permute.xlu1 %3856  ;;  %v14278_v50 = vld [vmem:[#allocation137_spill] sm:$0xff] }
 0x330   : > { %v4062_v0 = vsel %vm2945_vm1, %v11076_v9, %v3857_v36  ;;  %v4063_v19 = vsel %vm2945_vm1, %v11136_v56, %v3857_v36  ;;  %v4064_v35 = vsel %vm2945_vm1, %v11195_v11, %v3857_v36  ;;  %v4065_v62 = vsel %vm2945_vm1, %v11223_v39, %v3857_v36  ;;  %v14279_v9 = vld [vmem:[#allocation127_spill] sm:$0xff] }
 0x331   : > { %v5926_v63 = vmul.f32 %v14276_v45, %v4062_v0  ;;  %v5927_v28 = vmul.f32 %v14277_v26, %v4063_v19  ;;  %v5928_v12 = vmul.f32 %v14278_v50, %v4064_v35  ;;  %v5929_v22 = vmul.f32 %v14279_v9, %v4065_v62  ;;  %v7484_v45 = vld [vmem:[%s8768_s10 + $0x1f0] sm:$0xff] }
 0x332   : > { %5040 = vperm.xlu1 %8463, %v14262_v55   ;;  %5046 = vperm.xlu2 %8464, %v14262_v55   ;;  %v3705_v56 = vsel %vm2945_vm1, %v11800_v53, -inf  ;;  %v11829_v55 = vperm.slane %v11315_v61, 7  ;;  %v11831_v36 = vpop.f32.mrf.mxu3  ;;  %v3292_v62 = vmax.f32 %v3290_v47, %v3291_v18  ;;  %v11834_v50 = vpop.permute.xlu2 %4965  ;;  %v11845_v18 = vperm.slane %v11429_v16, 4  ;;  %v14288_v16 = vld [vmem:[#allocation213_spill] sm:$0xff] }
 0x333   : > { %v7627_v37 = vpack.c.bf16 %v5927_v28, %v5926_v63  ;;  %v7632_v11 = vpack.c.bf16 %v5929_v22, %v5928_v12  ;;  %v3706_v39 = vmax.f32 %v3704_v13, %v3705_v56  ;;  %14281 = vst [vmem:[#allocation190_spill] sm:$0xff] %v11831_v36  ;;  %v3085_v22 = vrot.slane %v3084_v48, 2  ;;  %v14285_v13 = vld [vmem:[#allocation48_spill] sm:$0xff]  ;;  %7349 = vmatmul.msk.bf16.gmra.mxu1 %vm1141_vm0, %v7484_v45  ;;  %v14290_v53 = vld [vmem:[#allocation53_spill] sm:$0xff] }
 0x334   : > { %5565 = vperm.xlu0 %8559, %v11805_v25   ;;  %14280 = vst [vmem:[#allocation182_spill] sm:$0xff] %v11829_v55  ;;  %v1648_v35 = vadd.f32 %v11345_v49, %v14285_v13 }
 0x335   : > { %8207 = vst [vmem:[%s9366_s7 + $0x70] sm:$0xff] %v7627_v37   ;;  %v3707_v19 = vrot.slane %v3706_v39, 4  ;;  %v3293_v37 = vrot.slane %v3292_v62, 2  ;;  %v3086_v61 = vmax.f32 %v3084_v48, %v3085_v22  ;;  %v2219_v48 = vmax.f32 %v1646_v5, 0.0 }
 0x336   : > { %8208 = vst [vmem:[%s9366_s7 + $0x78] sm:$0xff] %v7632_v11   ;;  %v11836_v0 = vpop.permute.xlu0 %5534  ;;  %v2220_v9 = vmax.f32 %v1648_v35, 0.0 }
 0x337   : > { %14282 = vst [vmem:[#allocation194_spill] sm:$0xff] %v11834_v50  ;;  %v3708_v12 = vmax.f32 %v3706_v39, %v3707_v19  ;;  %v3294_v63 = vmax.f32 %v3292_v62, %v3293_v37  ;;  %v3087_v26 = vrot.slane %v3086_v61, 1  ;;  %v1651_v39 = vadd.f32 %v11345_v49, %v14288_v16 }
 0x338   : > { %14283 = vst [vmem:[#allocation196_spill] sm:$0xff] %v11836_v0  ;;  %v2476_v51 = vmul.f32 %v11403_v59, %v2219_v48  ;;  %v2477_v13 = vmul.f32 %v11403_v59, %v2220_v9  ;;  %v14300_v0 = vld [vmem:[#allocation159_spill] sm:$0xff] }
 0x339   : > { %14286 = vst [vmem:[#allocation198_spill] sm:$0xff] %v11845_v18  ;;  %v3709_v28 = vrot.slane %v3708_v12, 2  ;;  %v3295_v19 = vrot.slane %v3294_v63, 1  ;;  %v3088_v62 = vmax.f32 %v3086_v61, %v3087_v26  ;;  %v2221_v35 = vmax.f32 %v1651_v39, 0.0  ;;  %v14293_v61 = vld [vmem:[#allocation215_spill] sm:$0xff]  ;;  %v14294_v26 = vld [vmem:[#allocation230_spill] sm:$0xff] }
 0x33a   : > { %8465 = vset.pattern.permute.xlu1 %v8755_v2  ;;  %8466 = vset.pattern.permute.xlu2 %v8762_v4  ;;  %v2165_v47 = vpop.f32.mrf.mxu3  ;;  %v11858_v22 = vpop.permute.xlu1 %3952  ;;  %v11878_v9 = vadd.f32 %v11416_v46, %v2477_v13 }
 0x33b   : > { %14289 = vst [vmem:[#allocation156_spill] sm:$0xff] %v11858_v22  ;;  %v3710_v37 = vmax.f32 %v3708_v12, %v3709_v28  ;;  %v3296_v45 = vmax.f32 %v3294_v63, %v3295_v19  ;;  %v1966_v12 = vadd.f32 %v11345_v49, %v14293_v61  ;;  %v1968_v28 = vadd.f32 %v11345_v49, %v14294_v26  ;;  %v14298_v26 = vld [vmem:[#allocation246_spill] sm:$0xff] }
 0x33c   : > { %5690 = vperm.xlu0 %8559, %v11829_v55   ;;  %v11875_v63 = vadd.f32 %v11416_v46, %v2476_v51  ;;  %v2166_v39 = vadd.f32 %v11345_v49, %v2165_v47  ;;  %v2478_v19 = vmul.f32 %v11403_v59, %v2221_v35  ;;  %v14299_v55 = vld [vmem:[#allocation136_spill] sm:$0xff] }
 0x33d   : > { %v3711_v48 = vrot.slane %v3710_v37, 1  ;;  %v2347_v50 = vmax.f32 %v1966_v12, 0.0  ;;  %v7485_v12 = vld [vmem:[%s8768_s10 + $0x1f8] sm:$0xff] }
 0x33e   : > { %v11853_v11 = vpop.permute.xlu0 %5659 }
 0x33f   : > { %14287 = vst [vmem:[#allocation210_spill] sm:$0xff] %v11853_v11  ;;  %v14292_v11 = vld [vmem:[#allocation226_spill] sm:$0xff]  ;;  %v3712_v36 = vmax.f32 %v3710_v37, %v3711_v48 }
 0x340   : > { %v1653_v22 = vadd.f32 %v11345_v49, %v14292_v11 }
 0x342   : > { %5053 = vperm.xlu1 %8465, %v11636_v43   ;;  %5059 = vperm.xlu2 %8466, %v11636_v43   ;;  %v11851_v56 = vpop.permute.xlu2 %4984  ;;  %v2167_v5 = vpop.f32.mrf.mxu3  ;;  %v2222_v25 = vmax.f32 %v1653_v22, 0.0 }
 0x343   : > { %v2168_v13 = vadd.f32 %v11345_v49, %v2167_v5  ;;  %v11910_v22 = vpop.permute.xlu1 %4946  ;;  %7350 = vmatmul.msk.bf16.gmra.mxu1 %vm1141_vm0, %v7485_v12 }
 0x344   : > { %5815 = vperm.xlu0 %8559, %v11845_v18   ;;  %v14291_v18 = vld [vmem:[#allocation14_spill] sm:$0xff] }
 0x345   : > { %v4037_v16 = vsel %vm2945_vm1, %v14291_v18, %v14290_v53  ;;  %v2428_v37 = vmax.f32 %v2168_v13, 0.0  ;;  %v14304_v13 = vld [vmem:[#allocation241_spill] sm:$0xff] }
 0x346   : > { %v11884_v11 = vpop.permute.xlu0 %5784 }
 0x347   : > { %14296 = vst [vmem:[#allocation219_spill] sm:$0xff] %v11884_v11  ;;  %v2128_v11 = vadd.f32 %v11345_v49, %v14298_v26  ;;  %v2604_v26 = vmul.f32 %v11403_v59, %v2347_v50 }
 0x349   : > { %v2412_v48 = vmax.f32 %v2128_v11, 0.0 }
 0x34a   : > { %3862 = vrot.lane.b32.xlu1 %v3088_v62, %s8675_s30  ;;  %8468 = vset.pattern.permute.xlu2 %v8755_v2  ;;  %v11881_v18 = vpop.permute.xlu2 %3858  ;;  %v2170_v60 = vpop.f32.mrf.mxu3 }
 0x34b   : > { %8467 = vset.pattern.permute.xlu1 %v8791_v10  ;;  %3894 = vrot.lane.b32.xlu2 %v3296_v45, %s8675_s30  ;;  %14295 = vst [vmem:[#allocation147_spill] sm:$0xff] %v11881_v18  ;;  %v4068_v62 = vsel %vm2945_vm1, %v11419_v34, %v11881_v18  ;;  %v4069_v51 = vsel %vm2945_vm1, %v11442_v32, %v11881_v18  ;;  %v14297_v45 = vld [vmem:[#allocation242_spill] sm:$0xff]  ;;  %v2348_v34 = vmax.f32 %v1968_v28, 0.0  ;;  %v11904_v18 = vperm.slane %v11288_v54, 7 }
 0x34c   : > { %8564 = vset.pattern.permute.xlu0 %v8791_v10  ;;  %v2126_v61 = vadd.f32 %v11345_v49, %v14297_v45  ;;  %v5932_v47 = vmul.f32 %v14299_v55, %v4068_v62  ;;  %v5933_v35 = vmul.f32 %v14300_v0, %v4069_v51  ;;  %v1971_v32 = vadd.f32 %v11345_v49, %v14301_v44 }
 0x34d   : > { %v2427_v45 = vmax.f32 %v2166_v39, 0.0  ;;  %v3089_v55 = vsel %vm2945_vm1, %v11875_v63, -inf  ;;  %v3090_v0 = vsel %vm2945_vm1, %v11878_v9, -inf  ;;  %v2171_v44 = vadd.f32 %v11345_v49, %v2170_v60  ;;  %v14302_v39 = vld [vmem:[#allocation49_spill] sm:$0xff] }
 0x34e   : > { %v7642_v5 = vpack.c.bf16 %v5933_v35, %v5932_v47  ;;  %v11916_v28 = vadd.f32 %v11416_v46, %v2478_v19  ;;  %v2411_v54 = vmax.f32 %v2126_v61, 0.0  ;;  %v2131_v62 = vadd.f32 %v11345_v49, %v14302_v39  ;;  %v14303_v47 = vld [vmem:[#allocation69_spill] sm:$0xff]  ;;  %v14305_v61 = vld [vmem:[#allocation6_spill] sm:$0xff] }
 0x34f   : > { %v2479_v51 = vmul.f32 %v11403_v59, %v2222_v25  ;;  %v5901_v35 = vmul.f32 %v14303_v47, %v4037_v16  ;;  %v2605_v60 = vmul.f32 %v11403_v59, %v2348_v34  ;;  %v1973_v19 = vadd.f32 %v11345_v49, %v14304_v13  ;;  %v14306_v25 = vld [vmem:[#allocation10_spill] sm:$0xff] }
 0x350   : > { %8210 = vst [vmem:[%s9366_s7 + $0x88] sm:$0xff] %v7642_v5   ;;  %v2684_v11 = vmul.f32 %v11403_v59, %v2427_v45  ;;  %v3091_v5 = vmax.f32 %v3089_v55, %v3090_v0  ;;  %v4036_v50 = vsel %vm2945_vm1, %v14306_v25, %v14290_v53  ;;  %v2685_v16 = vmul.f32 %v11403_v59, %v2428_v37  ;;  %v14309_v0 = vld [vmem:[#allocation256_spill] sm:$0xff] }
 0x351   : > { %v2429_v12 = vmax.f32 %v2171_v44, 0.0  ;;  %v3092_v34 = vsel %vm2945_vm1, %v11916_v28, -inf  ;;  %v2669_v39 = vmul.f32 %v11403_v59, %v2412_v48  ;;  %v2413_v47 = vmax.f32 %v2131_v62, 0.0 }
 0x352   : > { %3958 = vrot.lane.b32.xlu1 %v3712_v36, %s8675_s30  ;;  %v2349_v36 = vmax.f32 %v1971_v32, 0.0  ;;  %v2668_v32 = vmul.f32 %v11403_v59, %v2411_v54  ;;  %v11940_v45 = vadd.f32 %v11416_v46, %v2479_v51  ;;  %v11943_v55 = vadd.f32 %v11416_v46, %v2604_v26  ;;  %v2172_v62 = vpop.f32.mrf.mxu3  ;;  %v11954_v51 = vpop.permute.xlu1 %4959 }
 0x353   : > { %5078 = vperm.xlu2 %8468, %v11904_v18   ;;  %v2133_v53 = vadd.f32 %v11345_v49, %v14309_v0  ;;  %v11948_v44 = vadd.f32 %v11416_v46, %v2605_v60  ;;  %v2350_v54 = vmax.f32 %v1973_v19, 0.0  ;;  %v11952_v48 = vadd.f32 %v11416_v46, %v2684_v11 }
 0x354   : > { %4346 = vperm.xlu0 %8564, %v14305_v61   ;;  %14307 = vst [vmem:[#allocation36_spill] sm:$0xff] %v11940_v45  ;;  %v2606_v61 = vmul.f32 %v11403_v59, %v2349_v36  ;;  %v11958_v25 = vadd.f32 %v11416_v46, %v2685_v16  ;;  %v2173_v60 = vadd.f32 %v11345_v49, %v2172_v62 }
 0x355   : > { %14308 = vst [vmem:[#allocation231_spill] sm:$0xff] %v11943_v55  ;;  %v11963_v36 = vadd.f32 %v11416_v46, %v2668_v32  ;;  %v11966_v19 = vadd.f32 %v11416_v46, %v2669_v39  ;;  %v2670_v11 = vmul.f32 %v11403_v59, %v2413_v47  ;;  %v2414_v16 = vmax.f32 %v2133_v53, 0.0  ;;  %v14316_v32 = vld [vmem:[#allocation9_spill] sm:$0xff]  ;;  %v14317_v39 = vld [vmem:[#allocation254_spill] sm:$0xff] }
 0x356   : > { %v4316_v13 = vpop.permute.xlu0 %4315  ;;  %14310 = vst [vmem:[#allocation232_spill] sm:$0xff] %v11948_v44  ;;  %v3506_v49 = vsel %vm2945_vm1, %v11948_v44, -inf  ;;  %v4057_v47 = vsel %vm2945_vm1, %v14317_v39, %v11350_v21  ;;  %v3765_v0 = vsel %vm2945_vm1, %v11952_v48, -inf  ;;  %v3766_v53 = vsel %vm2945_vm1, %v11958_v25, -inf }
 0x357   : > { %v5900_v37 = vmul.f32 %v4316_v13, %v4036_v50  ;;  %14311 = vst [vmem:[#allocation51_spill] sm:$0xff] %v11952_v48  ;;  %v2686_v50 = vmul.f32 %v11403_v59, %v2429_v12  ;;  %v3093_v13 = vmax.f32 %v3091_v5, %v3092_v34  ;;  %v2430_v12 = vmax.f32 %v2173_v60, 0.0  ;;  %v14320_v60 = vld [vmem:[#allocation50_spill] sm:$0xff] }
 0x358   : > { %14312 = vst [vmem:[#allocation216_spill] sm:$0xff] %v11958_v25  ;;  %v11977_v5 = vadd.f32 %v11416_v46, %v2606_v61  ;;  %v2607_v34 = vmul.f32 %v11403_v59, %v2350_v54  ;;  %v3713_v54 = vsel %vm2945_vm1, %v11963_v36, -inf  ;;  %v3714_v62 = vsel %vm2945_vm1, %v11966_v19, -inf  ;;  %v14322_v48 = vld [vmem:[#allocation118_spill] sm:$0xff] }
 0x359   : > { %v7562_v26 = vpack.c.bf16 %v5901_v35, %v5900_v37  ;;  %14313 = vst [vmem:[#allocation237_spill] sm:$0xff] %v11963_v36  ;;  %v3505_v35 = vsel %vm2945_vm1, %v11943_v55, -inf  ;;  %v11990_v37 = vadd.f32 %v11416_v46, %v2686_v50  ;;  %v2687_v61 = vmul.f32 %v11403_v59, %v2430_v12  ;;  %v14321_v50 = vld [vmem:[#allocation224_spill] sm:$0xff] }
 0x35a   : > { %5071 = vperm.xlu1 %8467, %v11636_v43   ;;  %14314 = vst [vmem:[#allocation129_spill] sm:$0xff] %v11966_v19  ;;  %v3094_v43 = vsel %vm2945_vm1, %v11940_v45, -inf  ;;  %v2671_v25 = vmul.f32 %v11403_v59, %v2414_v16  ;;  %v4143_v12 = vsel %vm2945_vm1, %v14321_v50, %v11294_v52  ;;  %v5921_v44 = vmul.f32 %v14322_v48, %v4057_v47  ;;  %v14324_v59 = vld [vmem:[#allocation222_spill] sm:$0xff] }
 0x35b   : > { %8194 = vst [vmem:[%s9366_s7 + $0x8] sm:$0xff] %v7562_v26   ;;  %8470 = vset.pattern.permute.xlu2 %v8810_v17  ;;  %v11998_v26 = vadd.f32 %v11416_v46, %v2670_v11  ;;  %v3507_v55 = vmax.f32 %v3505_v35, %v3506_v49  ;;  %v3508_v11 = vsel %vm2945_vm1, %v11977_v5, -inf  ;;  %v12011_v19 = vadd.f32 %v11416_v46, %v2607_v34 }
 0x35c   : > { %14315 = vst [vmem:[#allocation121_spill] sm:$0xff] %v11977_v5  ;;  %4471 = vperm.xlu0 %8564, %v14316_v32   ;;  %v4056_v32 = vsel %vm2945_vm1, %v14320_v60, %v11350_v21  ;;  %v3767_v45 = vmax.f32 %v3765_v0, %v3766_v53  ;;  %v4142_v16 = vsel %vm2945_vm1, %v14324_v59, %v11294_v52  ;;  %v3768_v48 = vsel %vm2945_vm1, %v11990_v37, -inf }
 0x35d   : > { %14318 = vst [vmem:[#allocation137_spill] sm:$0xff] %v11990_v37  ;;  %v12020_v35 = vadd.f32 %v11416_v46, %v2687_v61  ;;  %v3095_v49 = vmax.f32 %v3093_v13, %v3094_v43  ;;  %v3715_v47 = vmax.f32 %v3713_v54, %v3714_v62  ;;  %v6007_v34 = vmul.f32 %v11851_v56, %v4143_v12  ;;  %v14327_v61 = vld [vmem:[#allocation45_spill] sm:$0xff]  ;;  %v7516_v43 = vld [vmem:[%s8768_s10 + $0x2f0] sm:$0xff]  ;;  %v14337_v37 = vld [vmem:[#allocation70_spill] sm:$0xff] }
 0x35e   : > { %14319 = vst [vmem:[#allocation127_spill] sm:$0xff] %v11998_v26  ;;  %v4441_v39 = vpop.permute.xlu0 %4440  ;;  %v3716_v53 = vsel %vm2945_vm1, %v11998_v26, -inf  ;;  %v3510_v13 = vsel %vm2945_vm1, %v12011_v19, -inf  ;;  %7381 = vmatmul.msk.bf16.gmra.mxu2 %vm1141_vm0, %v7516_v43  ;;  %v12047_v12 = vld [vmem:[%s13488_s3] ss:$0 sm:$0xff]  ;;  %v14333_v43 = vld [vmem:[#allocation243_spill] sm:$0xff] }
 0x35f   : > { %v5920_v36 = vmul.f32 %v4441_v39, %v4056_v32  ;;  %14323 = vst [vmem:[#allocation46_spill] sm:$0xff] %v12011_v19  ;;  %v12026_v32 = vadd.f32 %v11416_v46, %v2671_v25  ;;  %v3769_v39 = vmax.f32 %v3767_v45, %v3768_v48  ;;  %v3770_v56 = vsel %vm2945_vm1, %v12020_v35, -inf  ;;  %v12041_v25 = vpop.permute.xlu2 %3954  ;;  %v14331_v48 = vld [vmem:[#allocation240_spill] sm:$0xff] }
 0x360   : > { %14325 = vst [vmem:[#allocation48_spill] sm:$0xff] %v12020_v35  ;;  %v3096_v54 = vrot.slane %v3095_v49, 4  ;;  %v3717_v62 = vmax.f32 %v3715_v47, %v3716_v53  ;;  %v1818_v47 = vadd.f32 %v12047_v12, %v14331_v48  ;;  %v14332_v53 = vld [vmem:[#allocation143_spill] sm:$0xff] }
 0x361   : > { %v7612_v60 = vpack.c.bf16 %v5921_v44, %v5920_v36  ;;  %14326 = vst [vmem:[#allocation213_spill] sm:$0xff] %v12026_v32  ;;  %v3509_v44 = vmax.f32 %v3507_v55, %v3508_v11  ;;  %v3718_v55 = vsel %vm2945_vm1, %v12026_v32, -inf  ;;  %v3771_v50 = vmax.f32 %v3769_v39, %v3770_v56  ;;  %v14329_v11 = vld [vmem:[#allocation235_spill] sm:$0xff] }
 0x362   : > { %8469 = vset.pattern.permute.xlu1 %v8762_v4  ;;  %v4979_v21 = vpop.permute.xlu1 %4978  ;;  %14328 = vst [vmem:[#allocation53_spill] sm:$0xff] %v12041_v25  ;;  %v3097_v59 = vmax.f32 %v3095_v49, %v3096_v54  ;;  %v4097_v49 = vsel %vm2945_vm1, %v11214_v57, %v11710_v15  ;;  %v2288_v56 = vmax.f32 %v1818_v47, 0.0  ;;  %v1821_v54 = vadd.f32 %v12047_v12, %v14333_v43 }
 0x363   : > { %v6006_v0 = vmul.f32 %v4979_v21, %v4142_v16  ;;  %8204 = vst [vmem:[%s9366_s7 + $0x58] sm:$0xff] %v7612_v60   ;;  %5090 = vperm.xlu2 %8470, %v11904_v18   ;;  %v3511_v45 = vmax.f32 %v3509_v44, %v3510_v13  ;;  %v1816_v21 = vadd.f32 %v12047_v12, %v14329_v11  ;;  %v12071_v57 = vperm.slane %v11663_v58, 0 }
 0x364   : > { %4596 = vperm.xlu0 %8564, %v14327_v61   ;;  %v3719_v16 = vmax.f32 %v3717_v62, %v3718_v55  ;;  %v4096_v44 = vsel %vm2945_vm1, %v11177_v31, %v11710_v15  ;;  %v3098_v13 = vrot.slane %v3097_v59, 2  ;;  %v14334_v55 = vld [vmem:[#allocation244_spill] sm:$0xff]  ;;  %v14335_v31 = vld [vmem:[#allocation234_spill] sm:$0xff] }
 0x365   : > { %v7827_v36 = vpack.c.bf16 %v6007_v34, %v6006_v0  ;;  %v3512_v34 = vrot.slane %v3511_v45, 4  ;;  %v3772_v0 = vrot.slane %v3771_v50, 4  ;;  %v5961_v11 = vmul.f32 %v14334_v55, %v4097_v49  ;;  %v14336_v49 = vld [vmem:[#allocation228_spill] sm:$0xff] }
 0x366   : > { %v12037_v46 = vpop.permute.xlu0 %4565  ;;  %v3720_v39 = vrot.slane %v3719_v16, 4  ;;  %v4145_v35 = vsel %vm2945_vm1, %v14335_v31, %v11294_v52  ;;  %v3099_v43 = vmax.f32 %v3097_v59, %v3098_v13  ;;  %v2289_v31 = vmax.f32 %v1821_v54, 0.0  ;;  %v14340_v13 = vld [vmem:[#allocation227_spill] sm:$0xff]  ;;  %v14341_v54 = vld [vmem:[#allocation217_spill] sm:$0xff] }
 0x367   : > { %8247 = vst [vmem:[%s9366_s7 + $0x1b0] sm:$0xff] %v7827_v36   ;;  %v2287_v36 = vmax.f32 %v1816_v21, 0.0  ;;  %v4997_v62 = vpop.permute.xlu2 %4996  ;;  %v3773_v15 = vmax.f32 %v3771_v50, %v3772_v0  ;;  %v12076_v21 = vld [vmem:[%s13488_s3 + $0x1] ss:$0 sm:$0xff] }
 0x368   : > { %v2545_v50 = vmul.f32 %v12076_v21, %v2288_v56  ;;  %v6009_v0 = vmul.f32 %v4997_v62, %v4145_v35  ;;  %v3100_v56 = vrot.slane %v3099_v43, 1  ;;  %v4116_v62 = vsel %vm2945_vm1, %v14341_v54, %v11238_v38 }
 0x369   : > { %v2544_v47 = vmul.f32 %v12076_v21, %v2287_v36  ;;  %v1823_v36 = vadd.f32 %v12047_v12, %v14337_v37  ;;  %v4117_v37 = vsel %vm2945_vm1, %v14340_v13, %v11238_v38 }
 0x36a   : > { %5084 = vperm.xlu1 %8469, %v11904_v18   ;;  %v3101_v54 = vmax.f32 %v3099_v43, %v3100_v56 }
 0x36b   : > { %v12052_v60 = vpop.permute.xlu1 %3922  ;;  %8472 = vset.pattern.permute.xlu2 %v8762_v4 }
 0x36c   : > { %14330 = vst [vmem:[#allocation14_spill] sm:$0xff] %v12052_v60  ;;  %4721 = vperm.xlu0 %8564, %v14332_v53   ;;  %v3513_v53 = vmax.f32 %v3511_v45, %v3512_v34  ;;  %v3721_v45 = vmax.f32 %v3719_v16, %v3720_v39  ;;  %v3774_v39 = vrot.slane %v3773_v15, 2  ;;  %v12333_v60 = vld [vmem:[%s8774_s14 + $0x38] sm:$0xff] }
 0x36e   : > { %v4691_v61 = vpop.permute.xlu0 %4690  ;;  %v3514_v16 = vrot.slane %v3513_v53, 2  ;;  %v3775_v26 = vmax.f32 %v3773_v15, %v3774_v39 }
 0x36f   : > { %v5960_v48 = vmul.f32 %v4691_v61, %v4096_v44  ;;  %v4144_v61 = vsel %vm2945_vm1, %v14336_v49, %v11294_v52  ;;  %v12093_v52 = vld [vmem:[%s13488_s3 + $0x2] ss:$0 sm:$0xff] }
 0x370   : > { %v12096_v35 = vadd.f32 %v12093_v52, %v2544_v47  ;;  %v12105_v49 = vadd.f32 %v12093_v52, %v2545_v50  ;;  %v12109_v47 = vpop.permute.xlu2 %5015  ;;  %v3515_v13 = vmax.f32 %v3513_v53, %v3514_v16  ;;  %v3776_v15 = vrot.slane %v3775_v26, 1 }
 0x371   : > { %v7712_v44 = vpack.c.bf16 %v5961_v11, %v5960_v48  ;;  %v14338_v11 = vld [vmem:[#allocation81_spill] sm:$0xff]  ;;  %v7517_v48 = vld [vmem:[%s8768_s10 + $0x2f8] sm:$0xff] }
 0x372   : > { %8471 = vset.pattern.permute.xlu1 %v8755_v2  ;;  %14339 = vst [vmem:[#allocation226_spill] sm:$0xff] %v12096_v35  ;;  %7382 = vmatmul.msk.bf16.gmra.mxu2 %vm1141_vm0, %v7517_v48  ;;  %v3310_v32 = vsel %vm2945_vm1, %v12096_v35, -inf  ;;  %v3516_v53 = vrot.slane %v3515_v13, 1  ;;  %v14344_v48 = vld [vmem:[#allocation75_spill] sm:$0xff] }
 0x373   : > { %v4991_v34 = vpop.permute.xlu1 %4990  ;;  %8224 = vst [vmem:[%s9366_s7 + $0xf8] sm:$0xff] %v7712_v44   ;;  %5109 = vperm.xlu2 %8472, %v12071_v57  }
 0x374   : > { %v6008_v55 = vmul.f32 %v4991_v34, %v4144_v61  ;;  %4846 = vperm.xlu0 %8564, %v14338_v11   ;;  %v3722_v34 = vrot.slane %v3721_v45, 2  ;;  %14342 = vst [vmem:[#allocation215_spill] sm:$0xff] %v12105_v49  ;;  %v5981_v61 = vmul.f32 %v11324_v3, %v4117_v37  ;;  %v2290_v11 = vmax.f32 %v1823_v36, 0.0 }
 0x375   : > { %v3311_v3 = vsel %vm2945_vm1, %v12105_v49, -inf  ;;  %v1978_v37 = vadd.f32 %v12047_v12, %v14344_v48 }
 0x376   : > { %v7832_v59 = vpack.c.bf16 %v6009_v0, %v6008_v55  ;;  %v4816_v44 = vpop.permute.xlu0 %4815  ;;  %v2546_v55 = vmul.f32 %v12076_v21, %v2289_v31  ;;  %v3723_v50 = vmax.f32 %v3721_v45, %v3722_v34  ;;  %v2547_v31 = vmul.f32 %v12076_v21, %v2290_v11  ;;  %v14343_v45 = vld [vmem:[#allocation245_spill] sm:$0xff] }
 0x377   : > { %v5980_v0 = vmul.f32 %v4816_v44, %v4116_v62  ;;  %v1976_v43 = vadd.f32 %v12047_v12, %v14343_v45  ;;  %v3312_v39 = vmax.f32 %v3310_v32, %v3311_v3  ;;  %v3517_v44 = vmax.f32 %v3515_v13, %v3516_v53 }
 0x378   : > { %8248 = vst [vmem:[%s9366_s7 + $0x1b8] sm:$0xff] %v7832_v59   ;;  %v12120_v59 = vadd.f32 %v12093_v52, %v2546_v55  ;;  %v3724_v36 = vrot.slane %v3723_v50, 1  ;;  %v12133_v62 = vadd.f32 %v12093_v52, %v2547_v31  ;;  %v2352_v11 = vmax.f32 %v1978_v37, 0.0 }
 0x379   : > { %v7762_v38 = vpack.c.bf16 %v5981_v61, %v5980_v0  ;;  %v2351_v61 = vmax.f32 %v1976_v43, 0.0 }
 0x37a   : > { %5103 = vperm.xlu1 %8471, %v12071_v57   ;;  %v3313_v56 = vsel %vm2945_vm1, %v12120_v59, -inf  ;;  %v3725_v0 = vmax.f32 %v3723_v50, %v3724_v36  ;;  %v3315_v3 = vsel %vm2945_vm1, %v12133_v62, -inf  ;;  %v2609_v50 = vmul.f32 %v12076_v21, %v2352_v11 }
 0x37b   : > { %8234 = vst [vmem:[%s9366_s7 + $0x148] sm:$0xff] %v7762_v38   ;;  %3864 = vrot.lane.b32.xlu2 %v3101_v54, %s8675_s30  ;;  %v12135_v34 = vpop.permute.xlu2 %5028  ;;  %v3314_v55 = vmax.f32 %v3312_v39, %v3313_v56  ;;  %v14346_v38 = vld [vmem:[#allocation253_spill] sm:$0xff] }
 0x37c   : > { %4971 = vperm.xlu0 %8564, %v11379_v24   ;;  %8474 = vset.pattern.permute.xlu2 %v8791_v10  ;;  %v3777_v24 = vmax.f32 %v3775_v26, %v3776_v15  ;;  %v1981_v54 = vadd.f32 %v12047_v12, %v14346_v38  ;;  %v2608_v26 = vmul.f32 %v12076_v21, %v2351_v61  ;;  %v14347_v15 = vld [vmem:[#allocation262_spill] sm:$0xff] }
 0x37d   : > { %v3316_v31 = vmax.f32 %v3314_v55, %v3315_v3  ;;  %v1983_v45 = vadd.f32 %v12047_v12, %v14347_v15  ;;  %v12158_v39 = vadd.f32 %v12093_v52, %v2609_v50  ;;  %v12202_v15 = vperm.slane %v11663_v58, 1 }
 0x37e   : > { %v4941_v16 = vpop.permute.xlu0 %4940  ;;  %v2353_v53 = vmax.f32 %v1981_v54, 0.0  ;;  %v12154_v43 = vadd.f32 %v12093_v52, %v2608_v26 }
 0x37f   : > { %v3317_v36 = vrot.slane %v3316_v31, 4  ;;  %14349 = vst [vmem:[#allocation246_spill] sm:$0xff] %v12158_v39  ;;  %v2354_v37 = vmax.f32 %v1983_v45, 0.0 }
 0x380   : > { %14348 = vst [vmem:[#allocation242_spill] sm:$0xff] %v12154_v43  ;;  %v2610_v48 = vmul.f32 %v12076_v21, %v2353_v53 }
 0x382   : > { %8473 = vset.pattern.permute.xlu1 %v8810_v17  ;;  %v12183_v26 = vadd.f32 %v12093_v52, %v2610_v48  ;;  %v14355_v48 = vld [vmem:[#allocation247_spill] sm:$0xff] }
 0x383   : > { %3928 = vrot.lane.b32.xlu1 %v3517_v44, %s8675_s30  ;;  %v12139_v32 = vpop.permute.xlu1 %5009  ;;  %3960 = vrot.lane.b32.xlu2 %v3725_v0, %s8675_s30 }
 0x384   : > { %14345 = vst [vmem:[#allocation230_spill] sm:$0xff] %v12139_v32  ;;  %3968 = vrot.lane.b32.xlu0 %v3777_v24, %s8675_s30  ;;  %v12161_v56 = vpop.permute.xlu2 %3924  ;;  %v3521_v50 = vsel %vm2945_vm1, %v12183_v26, -inf }
 0x385   : > { %14350 = vst [vmem:[#allocation136_spill] sm:$0xff] %v12161_v56 }
 0x386   : > { %v12148_v13 = vpop.permute.xlu0 %5065  ;;  %14352 = vst [vmem:[#allocation236_spill] sm:$0xff] %v12183_v26  ;;  %v14364_v26 = vld [vmem:[#allocation264_spill] sm:$0xff] }
 0x38b   : > { %5115 = vperm.xlu1 %8473, %v12071_v57   ;;  %5121 = vperm.xlu2 %8474, %v12071_v57  }
 0x38c   : > { %v3893_v44 = vpop.permute.xlu1 %3892  ;;  %5096 = vperm.xlu0 %8564, %v11904_v18  }
 0x38d   : > { %v4134_v24 = vsel %vm2945_vm1, %v11521_v23, %v3893_v44  ;;  %v4135_v61 = vsel %vm2945_vm1, %v11524_v30, %v3893_v44  ;;  %v4136_v0 = vsel %vm2945_vm1, %v11536_v29, %v3893_v44  ;;  %v4137_v55 = vsel %vm2945_vm1, %v11553_v8, %v3893_v44 }
 0x38e   : > { %v5998_v11 = vmul.f32 %v11775_v7, %v4134_v24  ;;  %v5999_v38 = vmul.f32 %v11643_v27, %v4135_v61  ;;  %v6000_v54 = vmul.f32 %v4941_v16, %v4136_v0  ;;  %v6001_v57 = vmul.f32 %v11910_v22, %v4137_v55  ;;  %v12176_v23 = vpop.permute.xlu0 %5190  ;;  %v12192_v16 = vpop.permute.xlu2 %5046  ;;  %v14356_v24 = vld [vmem:[#allocation79_spill] sm:$0xff]  ;;  %v12213_v55 = vld [vmem:[%s8774_s14 + $0x28] sm:$0xff] }
 0x38f   : > { %14351 = vst [vmem:[#allocation159_spill] sm:$0xff] %v12176_v23  ;;  %v3518_v29 = vsel %vm2945_vm1, %v12154_v43, -inf  ;;  %v3519_v8 = vsel %vm2945_vm1, %v12158_v39, -inf  ;;  %v2611_v27 = vmul.f32 %v12076_v21, %v2354_v37  ;;  %v3318_v7 = vmax.f32 %v3316_v31, %v3317_v36 }
 0x390   : > { %v7807_v30 = vpack.c.bf16 %v5999_v38, %v5998_v11  ;;  %v7812_v3 = vpack.c.bf16 %v6001_v57, %v6000_v54  ;;  %v12188_v22 = vperm.slane %v11663_v58, 4  ;;  %v3520_v18 = vmax.f32 %v3518_v29, %v3519_v8  ;;  %v14358_v54 = vld [vmem:[#allocation248_spill] sm:$0xff] }
 0x391   : > { %v12197_v53 = vadd.f32 %v12093_v52, %v2611_v27  ;;  %v3319_v31 = vrot.slane %v3318_v7, 2  ;;  %v1666_v37 = vadd.f32 %v12047_v12, %v14355_v48  ;;  %v1668_v61 = vadd.f32 %v12047_v12, %v14356_v24 }
 0x392   : > { %8243 = vst [vmem:[%s9366_s7 + $0x190] sm:$0xff] %v7807_v30   ;;  %v3522_v36 = vmax.f32 %v3520_v18, %v3521_v50  ;;  %v12216_v11 = vperm.slane %v12213_v55, 1  ;;  %v1826_v57 = vadd.f32 %v12047_v12, %v14358_v54 }
 0x393   : > { %8244 = vst [vmem:[%s9366_s7 + $0x198] sm:$0xff] %v7812_v3   ;;  %8475 = vset.pattern.permute.xlu1 %v8762_v4  ;;  %8476 = vset.pattern.permute.xlu2 %v8810_v17  ;;  %v3523_v44 = vsel %vm2945_vm1, %v12197_v53, -inf  ;;  %v3320_v0 = vmax.f32 %v3318_v7, %v3319_v31  ;;  %v2227_v38 = vmax.f32 %v1666_v37, 0.0  ;;  %v2228_v30 = vmax.f32 %v1668_v61, 0.0  ;;  %v14359_v3 = vld [vmem:[#allocation258_spill] sm:$0xff]  ;;  %v14360_v7 = vld [vmem:[#allocation263_spill] sm:$0xff] }
 0x394   : > { %14353 = vst [vmem:[#allocation49_spill] sm:$0xff] %v12197_v53  ;;  %5221 = vperm.xlu0 %8564, %v12188_v22   ;;  %v3524_v58 = vmax.f32 %v3522_v36, %v3523_v44  ;;  %v1828_v29 = vadd.f32 %v12047_v12, %v14359_v3  ;;  %v1671_v18 = vadd.f32 %v12047_v12, %v14360_v7  ;;  %v2291_v36 = vmax.f32 %v1826_v57, 0.0  ;;  %v14363_v3 = vld [vmem:[#allocation83_spill] sm:$0xff]  ;;  %v14365_v57 = vld [vmem:[#allocation106_spill] sm:$0xff]  ;;  %v12243_v53 = vpop.permute.xlu1 %5021 }
 0x395   : > { %14357 = vst [vmem:[#allocation241_spill] sm:$0xff] %v12216_v11  ;;  %v3321_v27 = vrot.slane %v3320_v0, 1  ;;  %v2484_v31 = vmul.f32 %v12076_v21, %v2227_v38  ;;  %v2485_v37 = vmul.f32 %v12076_v21, %v2228_v30  ;;  %v12234_v61 = vperm.slane %v12213_v55, 6 }
 0x396   : > { %v12204_v45 = vpop.permute.xlu0 %5315  ;;  %v3525_v50 = vrot.slane %v3524_v58, 4  ;;  %v2292_v44 = vmax.f32 %v1828_v29, 0.0  ;;  %v2229_v54 = vmax.f32 %v1671_v18, 0.0  ;;  %v1673_v25 = vadd.f32 %v12047_v12, %v14363_v3  ;;  %v14367_v3 = vld [vmem:[#allocation78_spill] sm:$0xff] }
 0x397   : > { %14354 = vst [vmem:[#allocation69_spill] sm:$0xff] %v12204_v45  ;;  %v3322_v24 = vmax.f32 %v3320_v0, %v3321_v27  ;;  %v1831_v7 = vadd.f32 %v12047_v12, %v14364_v26  ;;  %v14366_v0 = vld [vmem:[#allocation34_spill] sm:$0xff]  ;;  %v12250_v29 = vadd.f32 %v12093_v52, %v2484_v31  ;;  %v12253_v26 = vadd.f32 %v12093_v52, %v2485_v37 }
 0x398   : > { %14362 = vst [vmem:[#allocation10_spill] sm:$0xff] %v12234_v61  ;;  %v3526_v38 = vmax.f32 %v3524_v58, %v3525_v50  ;;  %v2148_v30 = vadd.f32 %v12047_v12, %v14366_v0  ;;  %v2548_v58 = vmul.f32 %v12076_v21, %v2291_v36  ;;  %v2549_v27 = vmul.f32 %v12076_v21, %v2292_v44 }
 0x399   : > { %v2486_v18 = vmul.f32 %v12076_v21, %v2229_v54  ;;  %v2230_v50 = vmax.f32 %v1673_v25, 0.0  ;;  %v14368_v54 = vld [vmem:[#allocation27_spill] sm:$0xff] }
 0x39a   : > { %v3527_v44 = vrot.slane %v3526_v38, 2  ;;  %v2420_v19 = vmax.f32 %v2148_v30, 0.0  ;;  %v2151_v25 = vadd.f32 %v12047_v12, %v14368_v54  ;;  %v12276_v5 = vadd.f32 %v12093_v52, %v2548_v58 }
 0x39b   : > { %5134 = vperm.xlu1 %8475, %v12202_v15   ;;  %5140 = vperm.xlu2 %8476, %v12202_v15  }
 0x39c   : > { %v12224_v8 = vpop.permute.xlu2 %5059  ;;  %5346 = vperm.xlu0 %8564, %v12216_v11   ;;  %v3528_v39 = vmax.f32 %v3526_v38, %v3527_v44  ;;  %v2677_v45 = vmul.f32 %v12076_v21, %v2420_v19  ;;  %v2421_v56 = vmax.f32 %v2151_v25, 0.0  ;;  %v14372_v19 = vld [vmem:[#allocation31_spill] sm:$0xff] }
 0x39e   : > { %v12230_v48 = vpop.permute.xlu0 %5440 }
 0x39f   : > { %14361 = vst [vmem:[#allocation6_spill] sm:$0xff] %v12230_v48  ;;  %v2146_v48 = vadd.f32 %v12047_v12, %v14365_v57  ;;  %v1833_v57 = vadd.f32 %v12047_v12, %v14367_v3 }
 0x3a1   : > { %v2419_v31 = vmax.f32 %v2146_v48, 0.0  ;;  %v3115_v48 = vsel %vm2945_vm1, %v12250_v29, -inf  ;;  %v2294_v54 = vmax.f32 %v1833_v57, 0.0 }
 0x3a3   : > { %8477 = vset.pattern.permute.xlu1 %v8791_v10  ;;  %8478 = vset.pattern.permute.xlu2 %v8755_v2  ;;  %v2551_v25 = vmul.f32 %v12076_v21, %v2294_v54  ;;  %v12336_v54 = vperm.slane %v12333_v60, 0 }
 0x3a4   : > { %3898 = vrot.lane.b32.xlu1 %v3322_v24, %s8675_s30  ;;  %5471 = vperm.xlu0 %8564, %v12234_v61   ;;  %v2293_v24 = vmax.f32 %v1831_v7, 0.0  ;;  %v12296_v43 = vpop.permute.xlu1 %5040  ;;  %v2676_v61 = vmul.f32 %v12076_v21, %v2419_v31  ;;  %v2153_v31 = vadd.f32 %v12047_v12, %v14372_v19  ;;  %v14377_v19 = vld [vmem:[#allocation84_spill] sm:$0xff] }
 0x3a5   : > { %v12261_v0 = vpop.permute.xlu2 %3894  ;;  %14378 = vst [vmem:[#allocation224_spill] sm:$0xff] %v12336_v54  ;;  %v12344_v11 = vadd.f32 %v12093_v52, %v2551_v25 }
 0x3a6   : > { %v4138_v37 = vsel %vm2945_vm1, %v11689_v6, %v12261_v0  ;;  %v4139_v36 = vsel %vm2945_vm1, %v11713_v33, %v12261_v0  ;;  %v12279_v6 = vadd.f32 %v12093_v52, %v2549_v27  ;;  %v12282_v33 = vld [vmem:[%s8774_s14 + $0x30] sm:$0xff]  ;;  %v12293_v58 = vpop.permute.xlu0 %5565  ;;  %v2487_v27 = vmul.f32 %v12076_v21, %v2230_v50 }
 0x3a7   : > { %v6002_v7 = vmul.f32 %v11797_v1, %v4138_v37  ;;  %v6003_v3 = vmul.f32 %v11954_v51, %v4139_v36  ;;  %v12285_v30 = vperm.slane %v12282_v33, 3  ;;  %v3116_v1 = vsel %vm2945_vm1, %v12253_v26, -inf  ;;  %14370 = vst [vmem:[#allocation9_spill] sm:$0xff] %v12293_v58 }
 0x3a8   : > { %v12290_v51 = vadd.f32 %v12093_v52, %v2486_v18  ;;  %v2550_v37 = vmul.f32 %v12076_v21, %v2293_v24  ;;  %v14371_v18 = vld [vmem:[#allocation265_spill] sm:$0xff]  ;;  %v3117_v24 = vmax.f32 %v3115_v48, %v3116_v1  ;;  %v3324_v38 = vsel %vm2945_vm1, %v12279_v6, -inf }
 0x3a9   : > { %14369 = vst [vmem:[#allocation256_spill] sm:$0xff] %v12285_v30  ;;  %v7817_v36 = vpack.c.bf16 %v6003_v3, %v6002_v7  ;;  %v3323_v7 = vsel %vm2945_vm1, %v12276_v5, -inf  ;;  %v12316_v44 = vadd.f32 %v12093_v52, %v2487_v27  ;;  %v14373_v3 = vld [vmem:[#allocation5_spill] sm:$0xff]  ;;  %v12323_v58 = vadd.f32 %v12093_v52, %v2676_v61 }
 0x3aa   : > { %v3118_v50 = vsel %vm2945_vm1, %v12290_v51, -inf  ;;  %v12311_v57 = vadd.f32 %v12093_v52, %v2550_v37  ;;  %v14374_v48 = vld [vmem:[#allocation101_spill] sm:$0xff]  ;;  %v2678_v37 = vmul.f32 %v12076_v21, %v2421_v56  ;;  %v4154_v27 = vsel %vm2945_vm1, %v14377_v19, %v14373_v3 }
 0x3ab   : > { %8245 = vst [vmem:[%s9366_s7 + $0x1a0] sm:$0xff] %v7817_v36   ;;  %5153 = vperm.xlu2 %8478, %v14371_v18   ;;  %v4155_v1 = vsel %vm2945_vm1, %v14374_v48, %v14373_v3  ;;  %v3529_v36 = vrot.slane %v3528_v39, 1  ;;  %v3119_v32 = vmax.f32 %v3117_v24, %v3118_v50  ;;  %v3325_v48 = vmax.f32 %v3323_v7, %v3324_v38 }
 0x3ac   : > { %5146 = vperm.xlu1 %8477, %v12202_v15   ;;  %5596 = vperm.xlu0 %8564, %v12285_v30   ;;  %14375 = vst [vmem:[#allocation254_spill] sm:$0xff] %v12323_v58  ;;  %v12326_v30 = vadd.f32 %v12093_v52, %v2677_v45  ;;  %v2422_v35 = vmax.f32 %v2153_v31, 0.0  ;;  %v6019_v61 = vmul.f32 %v12224_v8, %v4155_v1  ;;  %v3120_v45 = vsel %vm2945_vm1, %v12316_v44, -inf }
 0x3ad   : > { %v3326_v56 = vsel %vm2945_vm1, %v12311_v57, -inf  ;;  %v3530_v19 = vmax.f32 %v3528_v39, %v3529_v36  ;;  %v3739_v24 = vsel %vm2945_vm1, %v12323_v58, -inf  ;;  %v12352_v7 = vadd.f32 %v12093_v52, %v2678_v37 }
 0x3ae   : > { %14376 = vst [vmem:[#allocation50_spill] sm:$0xff] %v12326_v30  ;;  %v3740_v8 = vsel %vm2945_vm1, %v12326_v30, -inf  ;;  %v12355_v38 = vpop.permute.xlu0 %5690  ;;  %v2679_v39 = vmul.f32 %v12076_v21, %v2422_v35  ;;  %v3121_v25 = vmax.f32 %v3119_v32, %v3120_v45  ;;  %v3327_v1 = vmax.f32 %v3325_v48, %v3326_v56  ;;  %v14384_v45 = vld [vmem:[#allocation169_spill] sm:$0xff] }
 0x3af   : > { %14379 = vst [vmem:[#allocation118_spill] sm:$0xff] %v12352_v7  ;;  %v3741_v36 = vmax.f32 %v3739_v24, %v3740_v8  ;;  %v3328_v30 = vsel %vm2945_vm1, %v12344_v11, -inf  ;;  %v3742_v37 = vsel %vm2945_vm1, %v12352_v7, -inf }
 0x3b0   : > { %14380 = vst [vmem:[#allocation222_spill] sm:$0xff] %v12355_v38  ;;  %v3122_v35 = vrot.slane %v3121_v25, 4 }
 0x3b1   : > { %v3743_v32 = vmax.f32 %v3741_v36, %v3742_v37  ;;  %v14387_v37 = vld [vmem:[#allocation177_spill] sm:$0xff] }
 0x3b2   : > { %v3123_v7 = vmax.f32 %v3121_v25, %v3122_v35  ;;  %v14393_v25 = vld [vmem:[#allocation17_spill] sm:$0xff] }
 0x3b3   : > { %8480 = vset.pattern.permute.xlu2 %v8791_v10 }
 0x3b4   : > { %8479 = vset.pattern.permute.xlu1 %v8810_v17  ;;  %v5054_v49 = vpop.permute.xlu1 %5053  ;;  %3930 = vrot.lane.b32.xlu2 %v3530_v19, %s8675_s30  ;;  %v12371_v19 = vperm.slane %v12333_v60, 5 }
 0x3b5   : > { %v6018_v50 = vmul.f32 %v5054_v49, %v4154_v27  ;;  %5721 = vperm.xlu0 %8564, %v12336_v54   ;;  %v12366_v49 = vadd.f32 %v12093_v52, %v2679_v39  ;;  %v12368_v27 = vpop.permute.xlu2 %5078 }
 0x3b6   : > { %14382 = vst [vmem:[#allocation235_spill] sm:$0xff] %v12368_v27  ;;  %v12389_v58 = vpop.permute.xlu0 %5815 }
 0x3b7   : > { %v7857_v31 = vpack.c.bf16 %v6019_v61, %v6018_v50  ;;  %14381 = vst [vmem:[#allocation45_spill] sm:$0xff] %v12366_v49  ;;  %v3329_v61 = vmax.f32 %v3327_v1, %v3328_v30  ;;  %v14385_v30 = vld [vmem:[#allocation33_spill] sm:$0xff] }
 0x3b8   : > { %14383 = vst [vmem:[#allocation240_spill] sm:$0xff] %v12371_v19 }
 0x3b9   : > { %8253 = vst [vmem:[%s9366_s7 + $0x1e0] sm:$0xff] %v7857_v31   ;;  %v14386_v31 = vld [vmem:[#allocation23_spill] sm:$0xff] }
 0x3ba   : > { %14388 = vst [vmem:[#allocation143_spill] sm:$0xff] %v12389_v58 }
 0x3bc   : > { %5165 = vperm.xlu1 %8479, %v14371_v18   ;;  %v3863_v48 = vpop.permute.xlu1 %3862  ;;  %5171 = vperm.xlu2 %8480, %v14371_v18   ;;  %v3330_v18 = vrot.slane %v3329_v61, 4 }
 0x3bd   : > { %v4074_v56 = vsel %vm2945_vm1, %v14384_v45, %v3863_v48  ;;  %v4075_v24 = vsel %vm2945_vm1, %v11655_v41, %v3863_v48  ;;  %v4076_v8 = vsel %vm2945_vm1, %v11730_v40, %v3863_v48  ;;  %v4077_v50 = vsel %vm2945_vm1, %v11750_v14, %v3863_v48  ;;  %v12391_v40 = vpop.f32.mrf.mxu2  ;;  %5846 = vperm.xlu0 %8564, %v12371_v19  }
 0x3be   : > { %v5938_v39 = vmul.f32 %v14385_v30, %v4074_v56  ;;  %v5939_v1 = vmul.f32 %v14386_v31, %v4075_v24  ;;  %v5940_v36 = vmul.f32 %v12037_v46, %v4076_v8  ;;  %v5941_v45 = vmul.f32 %v14387_v37, %v4077_v50  ;;  %v12399_v8 = vpop.permute.xlu2 %5090  ;;  %v14391_v50 = vld [vmem:[#allocation80_spill] sm:$0xff] }
 0x3bf   : > { %v3744_v41 = vsel %vm2945_vm1, %v12366_v49, -inf  ;;  %v3331_v24 = vmax.f32 %v3329_v61, %v3330_v18  ;;  %14390 = vst [vmem:[#allocation244_spill] sm:$0xff] %v12399_v8  ;;  %v14392_v30 = vld [vmem:[#allocation16_spill] sm:$0xff]  ;;  %v4041_v35 = vsel %vm2945_vm1, %v14393_v25, %v14391_v50  ;;  %v14394_v61 = vld [vmem:[#allocation178_spill] sm:$0xff] }
 0x3c0   : > { %v7657_v14 = vpack.c.bf16 %v5939_v1, %v5938_v39  ;;  %v7662_v48 = vpack.c.bf16 %v5941_v45, %v5940_v36  ;;  %v3745_v56 = vmax.f32 %v3743_v32, %v3744_v41  ;;  %v4040_v31 = vsel %vm2945_vm1, %v14392_v30, %v14391_v50  ;;  %v14395_v36 = vld [vmem:[#allocation73_spill] sm:$0xff]  ;;  %v14397_v18 = vld [vmem:[#allocation98_spill] sm:$0xff]  ;;  %v14398_v50 = vld [vmem:[#allocation267_spill] sm:$0xff] }
 0x3c1   : > { %v3124_v39 = vrot.slane %v3123_v7, 2  ;;  %v4156_v1 = vsel %vm2945_vm1, %v14394_v61, %v14373_v3  ;;  %v5904_v45 = vmul.f32 %v14395_v36, %v4040_v31  ;;  %v1678_v30 = vadd.f32 %v12047_v12, %v14397_v18 }
 0x3c2   : > { %8213 = vst [vmem:[%s9366_s7 + $0xa0] sm:$0xff] %v7657_v14   ;;  %v3746_v37 = vrot.slane %v3745_v56, 4  ;;  %v14396_v14 = vld [vmem:[#allocation92_spill] sm:$0xff]  ;;  %v3332_v49 = vrot.slane %v3331_v24, 2  ;;  %v4157_v25 = vsel %vm2945_vm1, %v14398_v50, %v14373_v3  ;;  %v6020_v61 = vmul.f32 %v12148_v13, %v4156_v1 }
 0x3c3   : > { %8214 = vst [vmem:[%s9366_s7 + $0xa8] sm:$0xff] %v7662_v48   ;;  %v1676_v48 = vadd.f32 %v12047_v12, %v14396_v14  ;;  %v3125_v38 = vmax.f32 %v3123_v7, %v3124_v39  ;;  %v2232_v18 = vmax.f32 %v1678_v30, 0.0  ;;  %v14401_v7 = vld [vmem:[#allocation47_spill] sm:$0xff]  ;;  %v14404_v50 = vld [vmem:[#allocation116_spill] sm:$0xff] }
 0x3c4   : > { %8481 = vset.pattern.permute.xlu1 %v8755_v2  ;;  %v12397_v46 = vpop.permute.xlu1 %3958  ;;  %8482 = vset.pattern.permute.xlu2 %v8762_v4  ;;  %v1681_v13 = vadd.f32 %v12047_v12, %v14401_v7 }
 0x3c5   : > { %14389 = vst [vmem:[#allocation243_spill] sm:$0xff] %v12397_v46  ;;  %8569 = vset.pattern.permute.xlu0 %v8755_v2  ;;  %v1997_v58 = vpop.f32.mrf.mxu2  ;;  %v3747_v46 = vmax.f32 %v3745_v56, %v3746_v37  ;;  %v2231_v14 = vmax.f32 %v1676_v48, 0.0  ;;  %v3333_v37 = vmax.f32 %v3331_v24, %v3332_v49  ;;  %v3126_v3 = vrot.slane %v3125_v38, 1 }
 0x3c6   : > { %v4347_v32 = vpop.permute.xlu0 %4346  ;;  %v2233_v54 = vmax.f32 %v1681_v13, 0.0 }
 0x3c7   : > { %v5905_v41 = vmul.f32 %v4347_v32, %v4041_v35  ;;  %v14399_v35 = vld [vmem:[#allocation44_spill] sm:$0xff]  ;;  %v14400_v32 = vld [vmem:[#allocation90_spill] sm:$0xff] }
 0x3c8   : > { %v4060_v36 = vsel %vm2945_vm1, %v14400_v32, %v14399_v35  ;;  %v3334_v32 = vrot.slane %v3333_v37, 1  ;;  %v2490_v13 = vmul.f32 %v12076_v21, %v2233_v54 }
 0x3c9   : > { %v7572_v19 = vpack.c.bf16 %v5905_v41, %v5904_v45  ;;  %v3748_v45 = vrot.slane %v3747_v46, 2  ;;  %v14403_v41 = vld [vmem:[#allocation97_spill] sm:$0xff]  ;;  %v5924_v49 = vmul.f32 %v14404_v50, %v4060_v36 }
 0x3ca   : > { %v4061_v48 = vsel %vm2945_vm1, %v14403_v41, %v14399_v35 }
 0x3cb   : > { %8196 = vst [vmem:[%s9366_s7 + $0x18] sm:$0xff] %v7572_v19   ;;  %v14402_v19 = vld [vmem:[#allocation7_spill] sm:$0xff]  ;;  %v3749_v7 = vmax.f32 %v3747_v46, %v3748_v45  ;;  %v14406_v46 = vld [vmem:[#allocation124_spill] sm:$0xff] }
 0x3cc   : > { %5178 = vperm.xlu1 %8481, %v11666_v42   ;;  %v5072_v31 = vpop.permute.xlu1 %5071  ;;  %5184 = vperm.xlu2 %8482, %v11666_v42  }
 0x3cd   : > { %v6021_v56 = vmul.f32 %v5072_v31, %v4157_v25  ;;  %v12429_v1 = vpop.permute.xlu2 %5109  ;;  %4378 = vperm.xlu0 %8569, %v14402_v19   ;;  %v2488_v25 = vmul.f32 %v12076_v21, %v2231_v14  ;;  %v2489_v31 = vmul.f32 %v12076_v21, %v2232_v18  ;;  %v2000_v8 = vpop.f32.mrf.mxu2  ;;  %v3335_v19 = vmax.f32 %v3333_v37, %v3334_v32  ;;  %v14405_v14 = vld [vmem:[#allocation173_spill] sm:$0xff]  ;;  %v14411_v32 = vld [vmem:[#allocation180_spill] sm:$0xff] }
 0x3ce   : > { %v4472_v30 = vpop.permute.xlu0 %4471  ;;  %v1683_v18 = vadd.f32 %v12047_v12, %v14405_v14  ;;  %v3750_v45 = vrot.slane %v3749_v7, 1  ;;  %v1998_v37 = vadd.f32 %v12047_v12, %v1997_v58 }
 0x3cf   : > { %v7862_v39 = vpack.c.bf16 %v6021_v56, %v6020_v61  ;;  %v5925_v24 = vmul.f32 %v4472_v30, %v4061_v48  ;;  %v3127_v61 = vmax.f32 %v3125_v38, %v3126_v3  ;;  %v12442_v35 = vadd.f32 %v12093_v52, %v2488_v25  ;;  %v14407_v48 = vld [vmem:[#allocation21_spill] sm:$0xff]  ;;  %v14410_v25 = vld [vmem:[#allocation183_spill] sm:$0xff] }
 0x3d0   : > { %v12445_v36 = vadd.f32 %v12093_v52, %v2489_v31  ;;  %v2156_v38 = vadd.f32 %v12047_v12, %v11727_v20  ;;  %v2158_v3 = vadd.f32 %v12047_v12, %v14406_v46  ;;  %v3751_v46 = vmax.f32 %v3749_v7, %v3750_v45  ;;  %v14416_v45 = vld [vmem:[#allocation59_spill] sm:$0xff] }
 0x3d1   : > { %8254 = vst [vmem:[%s9366_s7 + $0x1e8] sm:$0xff] %v7862_v39   ;;  %v7622_v56 = vpack.c.bf16 %v5925_v24, %v5924_v49  ;;  %v1996_v39 = vadd.f32 %v12047_v12, %v12391_v40  ;;  %v14408_v49 = vld [vmem:[#allocation36_spill] sm:$0xff]  ;;  %v3128_v7 = vsel %vm2945_vm1, %v12442_v35, -inf }
 0x3d2   : > { %v14409_v24 = vld [vmem:[#allocation168_spill] sm:$0xff]  ;;  %v2423_v14 = vmax.f32 %v2156_v38, 0.0 }
 0x3d3   : > { %8206 = vst [vmem:[%s9366_s7 + $0x68] sm:$0xff] %v7622_v56   ;;  %v2359_v27 = vmax.f32 %v1996_v39, 0.0 }
 0x3d4   : > { %3868 = vrot.lane.b32.xlu1 %v3127_v61, %s8675_s30  ;;  %8484 = vset.pattern.permute.xlu2 %v8755_v2 }
 0x3d5   : > { %8483 = vset.pattern.permute.xlu1 %v8791_v10  ;;  %3900 = vrot.lane.b32.xlu2 %v3335_v19, %s8675_s30  ;;  %v3865_v41 = vpop.permute.xlu2 %3864  ;;  %v2234_v19 = vmax.f32 %v1683_v18, 0.0  ;;  %v14415_v18 = vld [vmem:[#allocation64_spill] sm:$0xff] }
 0x3d6   : > { %4503 = vperm.xlu0 %8569, %v14407_v48   ;;  %v4597_v30 = vpop.permute.xlu0 %4596  ;;  %v4078_v20 = vsel %vm2945_vm1, %v11875_v63, %v3865_v41  ;;  %v4079_v50 = vsel %vm2945_vm1, %v11878_v9, %v3865_v41  ;;  %v4080_v54 = vsel %vm2945_vm1, %v11916_v28, %v3865_v41  ;;  %v4081_v40 = vsel %vm2945_vm1, %v14408_v49, %v3865_v41  ;;  %v14412_v48 = vld [vmem:[#allocation189_spill] sm:$0xff]  ;;  %v14414_v49 = vld [vmem:[#allocation55_spill] sm:$0xff] }
 0x3d7   : > { %v5942_v58 = vmul.f32 %v14409_v24, %v4078_v20  ;;  %v5943_v31 = vmul.f32 %v14410_v25, %v4079_v50  ;;  %v5944_v61 = vmul.f32 %v14411_v32, %v4080_v54  ;;  %v5945_v56 = vmul.f32 %v4597_v30, %v4081_v40  ;;  %v14413_v41 = vld [vmem:[#allocation201_spill] sm:$0xff]  ;;  %v14417_v25 = vld [vmem:[#allocation190_spill] sm:$0xff] }
 0x3d8   : > { %v2424_v63 = vmax.f32 %v2158_v3, 0.0  ;;  %v2161_v9 = vadd.f32 %v12047_v12, %v14412_v48  ;;  %v4100_v20 = vsel %vm2945_vm1, %v14414_v49, %v14413_v41  ;;  %v2360_v50 = vmax.f32 %v1998_v37, 0.0  ;;  %v2002_v3 = vpop.f32.mrf.mxu2 }
 0x3d9   : > { %v7667_v28 = vpack.c.bf16 %v5943_v31, %v5942_v58  ;;  %v7672_v23 = vpack.c.bf16 %v5945_v56, %v5944_v61  ;;  %v2001_v54 = vadd.f32 %v12047_v12, %v2000_v8  ;;  %v5964_v38 = vmul.f32 %v14415_v18, %v4100_v20  ;;  %v12499_v61 = vpop.f32.mrf.mxu1  ;;  %v14418_v56 = vld [vmem:[#allocation88_spill] sm:$0xff] }
 0x3da   : > { %v4101_v39 = vsel %vm2945_vm1, %v14416_v45, %v14413_v41  ;;  %v3129_v30 = vsel %vm2945_vm1, %v12445_v36, -inf  ;;  %v12489_v37 = vadd.f32 %v12093_v52, %v2490_v13  ;;  %v2491_v8 = vmul.f32 %v12076_v21, %v2234_v19  ;;  %v14422_v45 = vld [vmem:[#allocation199_spill] sm:$0xff] }
 0x3db   : > { %8215 = vst [vmem:[%s9366_s7 + $0xb0] sm:$0xff] %v7667_v28   ;;  %v2680_v40 = vmul.f32 %v12076_v21, %v2423_v14  ;;  %v2681_v24 = vmul.f32 %v12076_v21, %v2424_v63  ;;  %v2425_v58 = vmax.f32 %v2161_v9, 0.0  ;;  %v2163_v31 = vadd.f32 %v12047_v12, %v14417_v25  ;;  %v14425_v25 = vld [vmem:[#allocation77_spill] sm:$0xff] }
 0x3dc   : > { %3964 = vrot.lane.b32.xlu1 %v3751_v46, %s8675_s30  ;;  %8216 = vst [vmem:[%s9366_s7 + $0xb8] sm:$0xff] %v7672_v23   ;;  %v2616_v32 = vmul.f32 %v12076_v21, %v2359_v27  ;;  %v2617_v19 = vmul.f32 %v12076_v21, %v2360_v50  ;;  %v2361_v46 = vmax.f32 %v2001_v54, 0.0  ;;  %v2003_v23 = vadd.f32 %v12047_v12, %v2002_v3  ;;  %v12523_v3 = vpop.permute.xlu1 %5084 }
 0x3dd   : > { %5203 = vperm.xlu2 %8484, %v12188_v22   ;;  %v3130_v63 = vmax.f32 %v3128_v7, %v3129_v30  ;;  %v3131_v48 = vsel %vm2945_vm1, %v12489_v37, -inf  ;;  %v12507_v27 = vadd.f32 %v12093_v52, %v2491_v8  ;;  %v12510_v9 = vadd.f32 %v12093_v52, %v2680_v40  ;;  %v14424_v40 = vld [vmem:[#allocation115_spill] sm:$0xff] }
 0x3de   : > { %4628 = vperm.xlu0 %8569, %v14418_v56   ;;  %v4722_v13 = vpop.permute.xlu0 %4721  ;;  %v12513_v41 = vadd.f32 %v12093_v52, %v2681_v24  ;;  %v2682_v49 = vmul.f32 %v12076_v21, %v2425_v58  ;;  %v2426_v20 = vmax.f32 %v2163_v31, 0.0  ;;  %v12517_v50 = vadd.f32 %v12093_v52, %v2616_v32 }
 0x3df   : > { %v5965_v14 = vmul.f32 %v4722_v13, %v4101_v39  ;;  %14419 = vst [vmem:[#allocation234_spill] sm:$0xff] %v12510_v9  ;;  %v12520_v54 = vadd.f32 %v12093_v52, %v2617_v19  ;;  %v2618_v18 = vmul.f32 %v12076_v21, %v2361_v46  ;;  %v2362_v7 = vmax.f32 %v2003_v23, 0.0  ;;  %v14423_v39 = vld [vmem:[#allocation72_spill] sm:$0xff]  ;;  %v14427_v19 = vld [vmem:[#allocation197_spill] sm:$0xff] }
 0x3e0   : > { %14420 = vst [vmem:[#allocation228_spill] sm:$0xff] %v12513_v41  ;;  %v4120_v30 = vsel %vm2945_vm1, %v14423_v39, %v14422_v45  ;;  %v3133_v8 = vsel %vm2945_vm1, %v12507_v27, -inf  ;;  %v3752_v58 = vsel %vm2945_vm1, %v12510_v9, -inf  ;;  %v4121_v31 = vsel %vm2945_vm1, %v14425_v25, %v14422_v45  ;;  %v14429_v25 = vld [vmem:[#allocation68_spill] sm:$0xff] }
 0x3e1   : > { %v7722_v28 = vpack.c.bf16 %v5965_v14, %v5964_v38  ;;  %14421 = vst [vmem:[#allocation70_spill] sm:$0xff] %v12520_v54  ;;  %v3132_v38 = vmax.f32 %v3130_v63, %v3131_v48  ;;  %v5984_v24 = vmul.f32 %v14424_v40, %v4120_v30  ;;  %v12541_v32 = vadd.f32 %v12093_v52, %v2682_v49  ;;  %v14428_v40 = vld [vmem:[#allocation204_spill] sm:$0xff] }
 0x3e2   : > { %v2683_v56 = vmul.f32 %v12076_v21, %v2426_v20  ;;  %v3544_v13 = vsel %vm2945_vm1, %v12517_v50, -inf  ;;  %v3545_v23 = vsel %vm2945_vm1, %v12520_v54, -inf  ;;  %v12551_v14 = vadd.f32 %v12093_v52, %v2618_v18 }
 0x3e3   : > { %8226 = vst [vmem:[%s9366_s7 + $0x108] sm:$0xff] %v7722_v28   ;;  %v2619_v63 = vmul.f32 %v12076_v21, %v2362_v7  ;;  %v1847_v28 = vpop.f32.mrf.mxu1  ;;  %v3134_v45 = vmax.f32 %v3132_v38, %v3133_v8  ;;  %v3755_v39 = vsel %vm2945_vm1, %v12541_v32, -inf  ;;  %v3546_v30 = vmax.f32 %v3544_v13, %v3545_v23  ;;  %v14431_v38 = vld [vmem:[#allocation67_spill] sm:$0xff] }
 0x3e4   : > { %5196 = vperm.xlu1 %8483, %v11666_v42   ;;  %v3753_v42 = vsel %vm2945_vm1, %v12513_v41, -inf  ;;  %14426 = vst [vmem:[#allocation81_spill] sm:$0xff] %v12541_v32  ;;  %v12560_v9 = vadd.f32 %v12093_v52, %v2683_v56  ;;  %v3547_v18 = vsel %vm2945_vm1, %v12551_v14, -inf  ;;  %v4162_v8 = vsel %vm2945_vm1, %v14431_v38, %v14428_v40  ;;  %v14433_v56 = vld [vmem:[#allocation141_spill] sm:$0xff] }
 0x3e5   : > { %8486 = vset.pattern.permute.xlu2 %v8810_v17  ;;  %v3754_v49 = vmax.f32 %v3752_v58, %v3753_v42  ;;  %v12565_v7 = vadd.f32 %v12093_v52, %v2619_v63  ;;  %v4140_v13 = vsel %vm2945_vm1, %v14433_v56, %v12261_v0  ;;  %v3135_v23 = vrot.slane %v3134_v45, 4 }
 0x3e6   : > { %4753 = vperm.xlu0 %8569, %v14427_v19   ;;  %v4847_v46 = vpop.permute.xlu0 %4846  ;;  %v4163_v19 = vsel %vm2945_vm1, %v14429_v25, %v14428_v40  ;;  %14430 = vst [vmem:[#allocation227_spill] sm:$0xff] %v12560_v9  ;;  %v3548_v63 = vmax.f32 %v3546_v30, %v3547_v18  ;;  %v14434_v25 = vld [vmem:[#allocation105_spill] sm:$0xff]  ;;  %v3757_v38 = vsel %vm2945_vm1, %v12560_v9, -inf  ;;  %v12588_v18 = vpop.f32.mrf.mxu2 }
 0x3e7   : > { %v5985_v48 = vmul.f32 %v4847_v46, %v4121_v31  ;;  %v6027_v58 = vmul.f32 %v12429_v1, %v4163_v19  ;;  %v12573_v31 = vpop.permute.xlu2 %3960  ;;  %v3756_v46 = vmax.f32 %v3754_v49, %v3755_v39  ;;  %v14436_v49 = vld [vmem:[#allocation194_spill] sm:$0xff] }
 0x3e8   : > { %14432 = vst [vmem:[#allocation217_spill] sm:$0xff] %v12573_v31  ;;  %v6004_v39 = vmul.f32 %v14436_v49, %v4140_v13  ;;  %v14437_v13 = vld [vmem:[#allocation158_spill] sm:$0xff] }
 0x3e9   : > { %v7772_v20 = vpack.c.bf16 %v5985_v48, %v5984_v24 }
 0x3eb   : > { %8236 = vst [vmem:[%s9366_s7 + $0x158] sm:$0xff] %v7772_v20   ;;  %v14435_v20 = vld [vmem:[#allocation192_spill] sm:$0xff] }
 0x3ec   : > { %8485 = vset.pattern.permute.xlu1 %v8762_v4  ;;  %v5104_v24 = vpop.permute.xlu1 %5103  ;;  %v4141_v1 = vsel %vm2945_vm1, %v14435_v20, %v12261_v0 }
 0x3ed   : > { %v6026_v42 = vmul.f32 %v5104_v24, %v4162_v8  ;;  %5215 = vperm.xlu2 %8486, %v12188_v22   ;;  %v3549_v8 = vsel %vm2945_vm1, %v12565_v7, -inf }
 0x3ee   : > { %4878 = vperm.xlu0 %8569, %v14434_v25   ;;  %v4972_v19 = vpop.permute.xlu0 %4971  ;;  %v3550_v56 = vmax.f32 %v3548_v63, %v3549_v8  ;;  %v1850_v25 = vpop.f32.mrf.mxu1 }
 0x3ef   : > { %v7877_v48 = vpack.c.bf16 %v6027_v58, %v6026_v42  ;;  %v6005_v30 = vmul.f32 %v4972_v19, %v4141_v1  ;;  %v3136_v58 = vmax.f32 %v3134_v45, %v3135_v23  ;;  %v3758_v42 = vmax.f32 %v3756_v46, %v3757_v38  ;;  %v5122_v9 = vpop.permute.xlu2 %5121  ;;  %v2007_v23 = vpop.f32.mrf.mxu2  ;;  %v8604_v19 = vld [vmem:[%s8774_s14 + $0x20] sm:$0xff] }
 0x3f0   : > { %v3551_v32 = vrot.slane %v3550_v56, 4  ;;  %v1846_v45 = vadd.f32 %v12047_v12, %v12499_v61  ;;  %v1848_v46 = vadd.f32 %v12047_v12, %v1847_v28  ;;  %v12603_v38 = vperm.slane %v8604_v19, 5  ;;  %v14440_v28 = vld [vmem:[#allocation74_spill] sm:$0xff] }
 0x3f1   : > { %8257 = vst [vmem:[%s9366_s7 + $0x200] sm:$0xff] %v7877_v48   ;;  %v7822_v24 = vpack.c.bf16 %v6005_v30, %v6004_v39  ;;  %v3759_v20 = vrot.slane %v3758_v42, 4  ;;  %v3137_v48 = vrot.slane %v3136_v58, 2  ;;  %v14439_v39 = vld [vmem:[#allocation76_spill] sm:$0xff] }
 0x3f2   : > { %v3552_v63 = vmax.f32 %v3550_v56, %v3551_v32  ;;  %v2299_v49 = vmax.f32 %v1846_v45, 0.0  ;;  %v4165_v30 = vsel %vm2945_vm1, %v14439_v39, %v14428_v40 }
 0x3f3   : > { %8246 = vst [vmem:[%s9366_s7 + $0x1a8] sm:$0xff] %v7822_v24   ;;  %v3138_v8 = vmax.f32 %v3136_v58, %v3137_v48  ;;  %v2300_v24 = vmax.f32 %v1848_v46, 0.0  ;;  %v6029_v56 = vmul.f32 %v5122_v9, %v4165_v30 }
 0x3f4   : > { %5209 = vperm.xlu1 %8485, %v12188_v22   ;;  %v3760_v22 = vmax.f32 %v3758_v42, %v3759_v20  ;;  %v4164_v42 = vsel %vm2945_vm1, %v14440_v28, %v14428_v40  ;;  %v3553_v45 = vrot.slane %v3552_v63, 2 }
 0x3f5   : > { %v12593_v0 = vpop.permute.xlu1 %3928  ;;  %8488 = vset.pattern.permute.xlu2 %v8762_v4  ;;  %v3139_v48 = vrot.slane %v3138_v8, 1  ;;  %v2557_v40 = vmul.f32 %v12076_v21, %v2300_v24  ;;  %v14441_v24 = vld [vmem:[#allocation86_spill] sm:$0xff] }
 0x3f6   : > { %5003 = vperm.xlu0 %8569, %v14437_v13   ;;  %v12597_v1 = vpop.permute.xlu0 %3968  ;;  %v1851_v13 = vadd.f32 %v12047_v12, %v1850_v25  ;;  %v1852_v61 = vpop.f32.mrf.mxu1  ;;  %v3761_v46 = vrot.slane %v3760_v22, 2  ;;  %v2556_v25 = vmul.f32 %v12076_v21, %v2299_v49  ;;  %v3554_v28 = vmax.f32 %v3552_v63, %v3553_v45  ;;  %v14443_v63 = vld [vmem:[#allocation153_spill] sm:$0xff] }
 0x3f7   : > { %14438 = vst [vmem:[#allocation245_spill] sm:$0xff] %v12597_v1  ;;  %v12613_v58 = vpop.permute.xlu2 %5140  ;;  %v1853_v39 = vadd.f32 %v12047_v12, %v1852_v61  ;;  %v3140_v30 = vmax.f32 %v3138_v8, %v3139_v48  ;;  %v2010_v49 = vpop.f32.mrf.mxu2  ;;  %v12630_v12 = vadd.f32 %v12093_v52, %v2557_v40 }
 0x3f8   : > { %v2301_v9 = vmax.f32 %v1851_v13, 0.0  ;;  %v14442_v13 = vld [vmem:[#allocation154_spill] sm:$0xff]  ;;  %v3555_v8 = vrot.slane %v3554_v28, 1 }
 0x3f9   : > { %v2302_v31 = vmax.f32 %v1853_v39, 0.0  ;;  %v3350_v40 = vsel %vm2945_vm1, %v12630_v12, -inf }
 0x3fa   : > { %v2558_v61 = vmul.f32 %v12076_v21, %v2301_v9 }
 0x3fc   : > { %8487 = vset.pattern.permute.xlu1 %v8755_v2  ;;  %v12651_v9 = vadd.f32 %v12093_v52, %v2558_v61 }
 0x3fd   : > { %v5116_v32 = vpop.permute.xlu1 %5115  ;;  %5234 = vperm.xlu2 %8488, %v12603_v38  }
 0x3fe   : > { %v6028_v20 = vmul.f32 %v5116_v32, %v4164_v42  ;;  %5128 = vperm.xlu0 %8569, %v12202_v15   ;;  %v12619_v41 = vpop.permute.xlu0 %5096  ;;  %v3762_v42 = vmax.f32 %v3760_v22, %v3761_v46  ;;  %v12623_v32 = vperm.slane %v8604_v19, 6  ;;  %v12626_v15 = vadd.f32 %v12093_v52, %v2556_v25 }
 0x3ff   : > { %v4170_v19 = vsel %vm2945_vm1, %v14443_v63, %v14441_v24  ;;  %v2559_v46 = vmul.f32 %v12076_v21, %v2302_v31  ;;  %v3556_v21 = vmax.f32 %v3554_v28, %v3555_v8  ;;  %v3352_v61 = vsel %vm2945_vm1, %v12651_v9, -inf  ;;  %v2012_v8 = vpop.f32.mrf.mxu2 }
 0x400   : > { %v7882_v1 = vpack.c.bf16 %v6029_v56, %v6028_v20  ;;  %v3763_v56 = vrot.slane %v3762_v42, 1  ;;  %v14444_v20 = vld [vmem:[#allocation146_spill] sm:$0xff]  ;;  %v3349_v45 = vsel %vm2945_vm1, %v12626_v15, -inf }
 0x402   : > { %8258 = vst [vmem:[%s9366_s7 + $0x208] sm:$0xff] %v7882_v1   ;;  %v4171_v1 = vsel %vm2945_vm1, %v14442_v13, %v14441_v24  ;;  %v3764_v31 = vmax.f32 %v3762_v42, %v3763_v56  ;;  %v8606_v56 = vld [vmem:[%s13488_s3 + $0x1] ss:$0 sm:$0xff] }
 0x403   : > { %v6035_v48 = vmul.f32 %v14444_v20, %v4171_v1  ;;  %v12661_v20 = vadd.f32 %v12093_v52, %v2559_v46 }
 0x404   : > { %5228 = vperm.xlu1 %8487, %v12603_v38  }
 0x405   : > { %3870 = vrot.lane.b32.xlu2 %v3140_v30, %s8675_s30  ;;  %v5154_v22 = vpop.permute.xlu2 %5153  ;;  %v8605_v30 = vld [vmem:[%s13488_s3] ss:$0 sm:$0xff] }
 0x406   : > { %5253 = vperm.xlu0 %8569, %v12623_v32   ;;  %v6034_v25 = vmul.f32 %v5154_v22, %v4170_v19  ;;  %8490 = vset.pattern.permute.xlu2 %v8791_v10  ;;  %v12646_v39 = vpop.permute.xlu0 %5221  ;;  %v2006_v13 = vadd.f32 %v8605_v30, %v12588_v18  ;;  %v2008_v1 = vadd.f32 %v8605_v30, %v2007_v23  ;;  %v12658_v22 = vperm.slane %v12213_v55, 3 }
 0x407   : > { %v3351_v19 = vmax.f32 %v3349_v45, %v3350_v40  ;;  %v2011_v42 = vadd.f32 %v8605_v30, %v2010_v49  ;;  %v3354_v55 = vsel %vm2945_vm1, %v12661_v20, -inf  ;;  %v2013_v40 = vadd.f32 %v8605_v30, %v2012_v8 }
 0x408   : > { %v7897_v63 = vpack.c.bf16 %v6035_v48, %v6034_v25  ;;  %v2363_v18 = vmax.f32 %v2006_v13, 0.0  ;;  %v2364_v28 = vmax.f32 %v2008_v1, 0.0  ;;  %v12680_v49 = vperm.slane %v12282_v33, 0  ;;  %v8607_v1 = vld [vmem:[%s13488_s3 + $0x2] ss:$0 sm:$0xff] }
 0x409   : > { %v3353_v52 = vmax.f32 %v3351_v19, %v3352_v61  ;;  %v2365_v25 = vmax.f32 %v2011_v42, 0.0  ;;  %v2366_v19 = vmax.f32 %v2013_v40, 0.0 }
 0x40a   : > { %8261 = vst [vmem:[%s9366_s7 + $0x220] sm:$0xff] %v7897_v63   ;;  %v2620_v48 = vmul.f32 %v8606_v56, %v2363_v18  ;;  %v2621_v45 = vmul.f32 %v8606_v56, %v2364_v28 }
 0x40b   : > { %v3355_v13 = vmax.f32 %v3353_v52, %v3354_v55 }
 0x40c   : > { %8489 = vset.pattern.permute.xlu1 %v8810_v17  ;;  %v12685_v63 = vadd.f32 %v8607_v1, %v2620_v48 }
 0x40d   : > { %3934 = vrot.lane.b32.xlu1 %v3556_v21, %s8675_s30  ;;  %v12668_v23 = vpop.permute.xlu1 %5134  ;;  %3966 = vrot.lane.b32.xlu2 %v3764_v31, %s8675_s30  ;;  %v12688_v21 = vadd.f32 %v8607_v1, %v2621_v45  ;;  %v2622_v31 = vmul.f32 %v8606_v56, %v2365_v25  ;;  %v3356_v42 = vrot.slane %v3355_v13, 4 }
 0x40e   : > { %5378 = vperm.xlu0 %8569, %v12658_v22   ;;  %v12677_v46 = vpop.permute.xlu0 %5346  ;;  %v12690_v61 = vpop.permute.xlu2 %3930  ;;  %v3557_v55 = vsel %vm2945_vm1, %v12685_v63, -inf }
 0x40f   : > { %v12708_v48 = vadd.f32 %v8607_v1, %v2622_v31  ;;  %v3357_v40 = vmax.f32 %v3355_v13, %v3356_v42  ;;  %v14445_v31 = vld [vmem:[#allocation163_spill] sm:$0xff] }
 0x415   : > { %5240 = vperm.xlu1 %8489, %v12603_v38   ;;  %5246 = vperm.xlu2 %8490, %v12603_v38   ;;  %v3558_v38 = vsel %vm2945_vm1, %v12688_v21, -inf }
 0x416   : > { %v12692_v18 = vpop.permute.xlu1 %3898  ;;  %5503 = vperm.xlu0 %8569, %v12680_v49   ;;  %v12710_v25 = vpop.permute.xlu0 %5471  ;;  %v3559_v54 = vmax.f32 %v3557_v55, %v3558_v38 }
 0x417   : > { %v4148_v30 = vsel %vm2945_vm1, %v12120_v59, %v12692_v18  ;;  %v4149_v28 = vsel %vm2945_vm1, %v12133_v62, %v12692_v18  ;;  %v2623_v59 = vmul.f32 %v8606_v56, %v2366_v19  ;;  %v12713_v62 = vperm.slane %v12282_v33, 5 }
 0x418   : > { %v6012_v8 = vmul.f32 %v12109_v47, %v4148_v30  ;;  %v6013_v52 = vmul.f32 %v12243_v53, %v4149_v28  ;;  %v3560_v47 = vsel %vm2945_vm1, %v12708_v48, -inf  ;;  %v14446_v30 = vld [vmem:[#allocation20_spill] sm:$0xff]  ;;  %v14447_v28 = vld [vmem:[#allocation22_spill] sm:$0xff] }
 0x419   : > { %v12719_v53 = vadd.f32 %v8607_v1, %v2623_v59  ;;  %v4168_v56 = vsel %vm2945_vm1, %v14446_v30, %v14445_v31  ;;  %v4169_v33 = vsel %vm2945_vm1, %v14447_v28, %v14445_v31  ;;  %v3358_v1 = vrot.slane %v3357_v40, 2 }
 0x41a   : > { %v7842_v45 = vpack.c.bf16 %v6013_v52, %v6012_v8  ;;  %v6032_v13 = vmul.f32 %v12613_v58, %v4168_v56  ;;  %v5172_v8 = vpop.permute.xlu2 %5171  ;;  %v3561_v52 = vmax.f32 %v3559_v54, %v3560_v47  ;;  %v12734_v59 = vperm.slane %v12333_v60, 2  ;;  %v14448_v60 = vld [vmem:[#allocation29_spill] sm:$0xff] }
 0x41b   : > { %v3562_v38 = vsel %vm2945_vm1, %v12719_v53, -inf  ;;  %v3359_v30 = vmax.f32 %v3357_v40, %v3358_v1  ;;  %v4173_v40 = vsel %vm2945_vm1, %v14448_v60, %v14441_v24  ;;  %v14450_v60 = vld [vmem:[#allocation28_spill] sm:$0xff] }
 0x41c   : > { %8250 = vst [vmem:[%s9366_s7 + $0x1c8] sm:$0xff] %v7842_v45   ;;  %v3563_v45 = vmax.f32 %v3561_v52, %v3562_v38  ;;  %v6037_v52 = vmul.f32 %v5172_v8, %v4173_v40 }
 0x41d   : > { %8491 = vset.pattern.permute.xlu1 %v8762_v4  ;;  %8492 = vset.pattern.permute.xlu2 %v8810_v17  ;;  %v3360_v56 = vrot.slane %v3359_v30, 1 }
 0x41e   : > { %v5147_v19 = vpop.permute.xlu1 %5146  ;;  %5628 = vperm.xlu0 %8569, %v12713_v62   ;;  %v12737_v58 = vpop.permute.xlu0 %5596  ;;  %v3564_v54 = vrot.slane %v3563_v45, 4 }
 0x41f   : > { %v6033_v42 = vmul.f32 %v5147_v19, %v4169_v33  ;;  %v3361_v28 = vmax.f32 %v3359_v30, %v3360_v56  ;;  %v14449_v33 = vld [vmem:[#allocation160_spill] sm:$0xff] }
 0x420   : > { %v3565_v19 = vmax.f32 %v3563_v45, %v3564_v54 }
 0x421   : > { %v7892_v55 = vpack.c.bf16 %v6033_v42, %v6032_v13  ;;  %v4172_v13 = vsel %vm2945_vm1, %v14449_v33, %v14441_v24 }
 0x422   : > { %v3566_v38 = vrot.slane %v3565_v19, 2 }
 0x423   : > { %8260 = vst [vmem:[%s9366_s7 + $0x218] sm:$0xff] %v7892_v55  }
 0x425   : > { %5259 = vperm.xlu1 %8491, %v12623_v32   ;;  %5265 = vperm.xlu2 %8492, %v12623_v32  }
 0x426   : > { %5753 = vperm.xlu0 %8569, %v12734_v59   ;;  %v5185_v47 = vpop.permute.xlu2 %5184 }
 0x427   : > { %v12750_v55 = vpop.permute.xlu0 %5721 }
 0x42d   : > { %8493 = vset.pattern.permute.xlu1 %v8791_v10  ;;  %8494 = vset.pattern.permute.xlu2 %v8755_v2 }
 0x42e   : > { %3904 = vrot.lane.b32.xlu1 %v3361_v28, %s8675_s30  ;;  %v5166_v42 = vpop.permute.xlu1 %5165 }
 0x42f   : > { %v6036_v1 = vmul.f32 %v5166_v42, %v4172_v13  ;;  %v3901_v30 = vpop.permute.xlu2 %3900 }
 0x430   : > { %v4150_v54 = vsel %vm2945_vm1, %v12276_v5, %v3901_v30  ;;  %v4151_v56 = vsel %vm2945_vm1, %v12279_v6, %v3901_v30  ;;  %v4152_v24 = vsel %vm2945_vm1, %v12311_v57, %v3901_v30  ;;  %v4153_v8 = vsel %vm2945_vm1, %v12344_v11, %v3901_v30  ;;  %v14451_v6 = vld [vmem:[#allocation99_spill] sm:$0xff]  ;;  %v12768_v57 = vpop.permute.xlu0 %5846 }
 0x431   : > { %v7902_v45 = vpack.c.bf16 %v6037_v52, %v6036_v1  ;;  %v6014_v28 = vmul.f32 %v12135_v34, %v4150_v54  ;;  %v6015_v40 = vmul.f32 %v14450_v60, %v4151_v56  ;;  %v6016_v33 = vmul.f32 %v12296_v43, %v4152_v24  ;;  %v14452_v34 = vld [vmem:[#allocation30_spill] sm:$0xff]  ;;  %v14455_v54 = vld [vmem:[#allocation96_spill] sm:$0xff]  ;;  %v14456_v56 = vld [vmem:[#allocation167_spill] sm:$0xff] }
 0x432   : > { %v6017_v13 = vmul.f32 %v12192_v16, %v4153_v8  ;;  %v3567_v5 = vmax.f32 %v3565_v19, %v3566_v38  ;;  %v14454_v16 = vld [vmem:[#allocation186_spill] sm:$0xff]  ;;  %v4047_v24 = vsel %vm2945_vm1, %v14456_v56, %v14455_v54  ;;  %v14464_v56 = vld [vmem:[#allocation63_spill] sm:$0xff] }
 0x433   : > { %8262 = vst [vmem:[%s9366_s7 + $0x228] sm:$0xff] %v7902_v45   ;;  %v7847_v42 = vpack.c.bf16 %v6015_v40, %v6014_v28  ;;  %v14453_v45 = vld [vmem:[#allocation188_spill] sm:$0xff]  ;;  %v4174_v19 = vsel %vm2945_vm1, %v14454_v16, %v14452_v34  ;;  %v14457_v60 = vld [vmem:[#allocation166_spill] sm:$0xff] }
 0x434   : > { %v7852_v52 = vpack.c.bf16 %v6017_v13, %v6016_v33  ;;  %v3568_v11 = vrot.slane %v3567_v5, 1  ;;  %v4175_v43 = vsel %vm2945_vm1, %v14453_v45, %v14452_v34  ;;  %v4046_v40 = vsel %vm2945_vm1, %v14457_v60, %v14455_v54  ;;  %v14458_v13 = vld [vmem:[#allocation93_spill] sm:$0xff]  ;;  %v14460_v45 = vld [vmem:[#allocation152_spill] sm:$0xff]  ;;  %v14463_v54 = vld [vmem:[#allocation35_spill] sm:$0xff] }
 0x435   : > { %8251 = vst [vmem:[%s9366_s7 + $0x1d0] sm:$0xff] %v7847_v42   ;;  %5278 = vperm.xlu2 %8494, %v14451_v6   ;;  %v6039_v38 = vmul.f32 %v5185_v47, %v4175_v43  ;;  %v14465_v60 = vld [vmem:[#allocation62_spill] sm:$0xff] }
 0x436   : > { %5271 = vperm.xlu1 %8493, %v12623_v32   ;;  %8252 = vst [vmem:[%s9366_s7 + $0x1d8] sm:$0xff] %v7852_v52   ;;  %v3569_v1 = vmax.f32 %v3567_v5, %v3568_v11  ;;  %v5911_v5 = vmul.f32 %v14458_v13, %v4047_v24  ;;  %v14459_v11 = vld [vmem:[#allocation147_spill] sm:$0xff]  ;;  %v4181_v24 = vsel %vm2945_vm1, %v14464_v56, %v14463_v54 }
 0x437   : > { %v12783_v8 = vpop.permute.xlu2 %5203 }
 0x43d   : > { %8496 = vset.pattern.permute.xlu2 %v8791_v10 }
 0x43e   : > { %8495 = vset.pattern.permute.xlu1 %v8810_v17  ;;  %v5179_v32 = vpop.permute.xlu1 %5178  ;;  %3936 = vrot.lane.b32.xlu2 %v3569_v1, %s8675_s30  ;;  %v4067_v1 = vsel %vm2945_vm1, %v14460_v45, %v14459_v11 }
 0x43f   : > { %v6038_v30 = vmul.f32 %v5179_v32, %v4174_v19  ;;  %v4379_v33 = vpop.permute.xlu0 %4378  ;;  %v14461_v19 = vld [vmem:[#allocation200_spill] sm:$0xff] }
 0x440   : > { %v5910_v47 = vmul.f32 %v4379_v33, %v4046_v40  ;;  %v14466_v40 = vld [vmem:[#allocation181_spill] sm:$0xff] }
 0x441   : > { %v7907_v28 = vpack.c.bf16 %v6039_v38, %v6038_v30  ;;  %v14462_v38 = vld [vmem:[#allocation211_spill] sm:$0xff] }
 0x442   : > { %v7587_v42 = vpack.c.bf16 %v5911_v5, %v5910_v47  ;;  %v6045_v5 = vmul.f32 %v12646_v39, %v4181_v24  ;;  %v14469_v24 = vld [vmem:[#allocation193_spill] sm:$0xff] }
 0x443   : > { %8263 = vst [vmem:[%s9366_s7 + $0x230] sm:$0xff] %v7907_v28  }
 0x444   : > { %8199 = vst [vmem:[%s9366_s7 + $0x30] sm:$0xff] %v7587_v42  }
 0x446   : > { %5290 = vperm.xlu1 %8495, %v14451_v6   ;;  %v3869_v52 = vpop.permute.xlu1 %3868  ;;  %5296 = vperm.xlu2 %8496, %v14451_v6   ;;  %v14467_v6 = vld [vmem:[#allocation149_spill] sm:$0xff] }
 0x447   : > { %v4088_v43 = vsel %vm2945_vm1, %v12290_v51, %v3869_v52  ;;  %v4089_v16 = vsel %vm2945_vm1, %v12316_v44, %v3869_v52  ;;  %v5216_v28 = vpop.permute.xlu2 %5215  ;;  %v4180_v51 = vsel %vm2945_vm1, %v14465_v60, %v14463_v54  ;;  %v4066_v44 = vsel %vm2945_vm1, %v14466_v40, %v14459_v11  ;;  %v14470_v60 = vld [vmem:[#allocation142_spill] sm:$0xff] }
 0x448   : > { %v5952_v32 = vmul.f32 %v14461_v19, %v4088_v43  ;;  %v5953_v30 = vmul.f32 %v14462_v38, %v4089_v16  ;;  %v5931_v33 = vmul.f32 %v14467_v6, %v4067_v1  ;;  %v4504_v13 = vpop.permute.xlu0 %4503  ;;  %v6044_v42 = vmul.f32 %v5216_v28, %v4180_v51  ;;  %v14471_v51 = vld [vmem:[#allocation39_spill] sm:$0xff]  ;;  %v14473_v6 = vld [vmem:[#allocation170_spill] sm:$0xff] }
 0x449   : > { %v5930_v45 = vmul.f32 %v4504_v13, %v4066_v44  ;;  %v4087_v11 = vsel %vm2945_vm1, %v12253_v26, %v3869_v52  ;;  %v4086_v39 = vsel %vm2945_vm1, %v12250_v29, %v3869_v52  ;;  %v4176_v28 = vsel %vm2945_vm1, %v14469_v24, %v14452_v34  ;;  %v14472_v29 = vld [vmem:[#allocation159_spill] sm:$0xff] }
 0x44a   : > { %v7692_v47 = vpack.c.bf16 %v5953_v30, %v5952_v32  ;;  %v7922_v43 = vpack.c.bf16 %v6045_v5, %v6044_v42  ;;  %v14468_v32 = vld [vmem:[#allocation205_spill] sm:$0xff]  ;;  %v4177_v26 = vsel %vm2945_vm1, %v14471_v51, %v14452_v34  ;;  %v6040_v52 = vmul.f32 %v14472_v29, %v4176_v28  ;;  %v14475_v42 = vld [vmem:[#allocation24_spill] sm:$0xff] }
 0x44b   : > { %v7637_v16 = vpack.c.bf16 %v5931_v33, %v5930_v45  ;;  %v5951_v38 = vmul.f32 %v14468_v32, %v4087_v11  ;;  %v14474_v33 = vld [vmem:[#allocation25_spill] sm:$0xff]  ;;  %v4106_v45 = vsel %vm2945_vm1, %v14475_v42, %v14473_v6  ;;  %v14476_v34 = vld [vmem:[#allocation268_spill] sm:$0xff]  ;;  %v14483_v42 = vld [vmem:[#allocation223_spill] sm:$0xff] }
 0x44c   : > { %8220 = vst [vmem:[%s9366_s7 + $0xd8] sm:$0xff] %v7692_v47   ;;  %v4107_v13 = vsel %vm2945_vm1, %v14474_v33, %v14473_v6  ;;  %v14477_v32 = vld [vmem:[#allocation8_spill] sm:$0xff]  ;;  %v14481_v6 = vld [vmem:[#allocation61_spill] sm:$0xff] }
 0x44d   : > { %8266 = vst [vmem:[%s9366_s7 + $0x248] sm:$0xff] %v7922_v43  }
 0x44e   : > { %8497 = vset.pattern.permute.xlu1 %v8755_v2  ;;  %v12816_v19 = vpop.permute.xlu1 %3964  ;;  %8209 = vst [vmem:[%s9366_s7 + $0x80] sm:$0xff] %v7637_v16   ;;  %8498 = vset.pattern.permute.xlu2 %v8762_v4  ;;  %v5971_v16 = vmul.f32 %v14476_v34, %v4107_v13  ;;  %v14482_v13 = vld [vmem:[#allocation221_spill] sm:$0xff] }
 0x450   : > { %v4629_v1 = vpop.permute.xlu0 %4628 }
 0x451   : > { %v5950_v30 = vmul.f32 %v4629_v1, %v4086_v39 }
 0x453   : > { %v7687_v56 = vpack.c.bf16 %v5951_v38, %v5950_v30  ;;  %v14478_v38 = vld [vmem:[#allocation107_spill] sm:$0xff] }
 0x454   : > { %v4126_v30 = vsel %vm2945_vm1, %v14478_v38, %v14477_v32 }
 0x455   : > { %8219 = vst [vmem:[%s9366_s7 + $0xd0] sm:$0xff] %v7687_v56   ;;  %v14479_v56 = vld [vmem:[#allocation26_spill] sm:$0xff] }
 0x456   : > { %5303 = vperm.xlu1 %8497, %v14470_v60   ;;  %v5197_v40 = vpop.permute.xlu1 %5196  ;;  %5309 = vperm.xlu2 %8498, %v14470_v60   ;;  %v4127_v24 = vsel %vm2945_vm1, %v14479_v56, %v14477_v32  ;;  %v14487_v56 = vld [vmem:[#allocation215_spill] sm:$0xff] }
 0x457   : > { %v6041_v44 = vmul.f32 %v5197_v40, %v4177_v26  ;;  %v5235_v47 = vpop.permute.xlu2 %5234 }
 0x458   : > { %v4754_v43 = vpop.permute.xlu0 %4753 }
 0x459   : > { %v7912_v5 = vpack.c.bf16 %v6041_v44, %v6040_v52  ;;  %v5970_v11 = vmul.f32 %v4754_v43, %v4106_v45  ;;  %v14480_v52 = vld [vmem:[#allocation208_spill] sm:$0xff] }
 0x45b   : > { %8264 = vst [vmem:[%s9366_s7 + $0x238] sm:$0xff] %v7912_v5   ;;  %v7737_v39 = vpack.c.bf16 %v5971_v16, %v5970_v11 }
 0x45d   : > { %8229 = vst [vmem:[%s9366_s7 + $0x120] sm:$0xff] %v7737_v39   ;;  %v14486_v39 = vld [vmem:[#allocation57_spill] sm:$0xff] }
 0x45e   : > { %8499 = vset.pattern.permute.xlu1 %v8791_v10  ;;  %8500 = vset.pattern.permute.xlu2 %v8755_v2 }
 0x45f   : > { %v3871_v1 = vpop.permute.xlu2 %3870 }
 0x460   : > { %v4879_v28 = vpop.permute.xlu0 %4878  ;;  %v4090_v51 = vsel %vm2945_vm1, %v12442_v35, %v3871_v1  ;;  %v4091_v26 = vsel %vm2945_vm1, %v12445_v36, %v3871_v1  ;;  %v4092_v40 = vsel %vm2945_vm1, %v12489_v37, %v3871_v1  ;;  %v4093_v29 = vsel %vm2945_vm1, %v12507_v27, %v3871_v1  ;;  %v14484_v35 = vld [vmem:[#allocation114_spill] sm:$0xff]  ;;  %v14485_v37 = vld [vmem:[#allocation56_spill] sm:$0xff] }
 0x461   : > { %v5954_v44 = vmul.f32 %v14480_v52, %v4090_v51  ;;  %v5955_v33 = vmul.f32 %v14481_v6, %v4091_v26  ;;  %v5956_v5 = vmul.f32 %v14482_v13, %v4092_v40  ;;  %v5957_v45 = vmul.f32 %v14483_v42, %v4093_v29  ;;  %v14489_v51 = vld [vmem:[#allocation226_spill] sm:$0xff] }
 0x462   : > { %v5991_v43 = vmul.f32 %v14484_v35, %v4127_v24  ;;  %v5990_v36 = vmul.f32 %v4879_v28, %v4126_v30  ;;  %v4178_v11 = vsel %vm2945_vm1, %v14485_v37, %v14463_v54  ;;  %v4179_v1 = vsel %vm2945_vm1, %v14486_v39, %v14463_v54  ;;  %v14488_v28 = vld [vmem:[#allocation241_spill] sm:$0xff]  ;;  %v14490_v40 = vld [vmem:[#allocation230_spill] sm:$0xff] }
 0x463   : > { %v7697_v34 = vpack.c.bf16 %v5955_v33, %v5954_v44  ;;  %v7702_v16 = vpack.c.bf16 %v5957_v45, %v5956_v5  ;;  %v6042_v38 = vmul.f32 %v12783_v8, %v4178_v11  ;;  %v4147_v24 = vsel %vm2945_vm1, %v14487_v56, %v12692_v18  ;;  %v14491_v44 = vld [vmem:[#allocation19_spill] sm:$0xff]  ;;  %v14492_v33 = vld [vmem:[#allocation18_spill] sm:$0xff]  ;;  %v14497_v56 = vld [vmem:[#allocation257_spill] sm:$0xff] }
 0x464   : > { %v7787_v32 = vpack.c.bf16 %v5991_v43, %v5990_v36  ;;  %v4146_v26 = vsel %vm2945_vm1, %v14489_v51, %v12692_v18  ;;  %v6011_v29 = vmul.f32 %v14490_v40, %v4147_v24  ;;  %v4167_v6 = vsel %vm2945_vm1, %v14491_v44, %v14445_v31  ;;  %v14493_v35 = vld [vmem:[#allocation150_spill] sm:$0xff]  ;;  %v14494_v43 = vld [vmem:[#allocation251_spill] sm:$0xff]  ;;  %v14498_v40 = vld [vmem:[#allocation261_spill] sm:$0xff] }
 0x465   : > { %8221 = vst [vmem:[%s9366_s7 + $0xe0] sm:$0xff] %v7697_v34   ;;  %v4166_v18 = vsel %vm2945_vm1, %v14492_v33, %v14445_v31  ;;  %v6031_v5 = vmul.f32 %v12668_v23, %v4167_v6  ;;  %v4183_v36 = vsel %vm2945_vm1, %v14494_v43, %v14493_v35  ;;  %v14495_v34 = vld [vmem:[#allocation249_spill] sm:$0xff]  ;;  %v4184_v24 = vsel %vm2945_vm1, %v14497_v56, %v14493_v35  ;;  %v14500_v44 = vld [vmem:[#allocation126_spill] sm:$0xff]  ;;  %v14501_v33 = vld [vmem:[#allocation179_spill] sm:$0xff] }
 0x466   : > { %5321 = vperm.xlu1 %8499, %v14470_v60   ;;  %v5210_v27 = vpop.permute.xlu1 %5209  ;;  %8222 = vst [vmem:[%s9366_s7 + $0xe8] sm:$0xff] %v7702_v16   ;;  %5328 = vperm.xlu2 %8500, %v14488_v28   ;;  %v4182_v16 = vsel %vm2945_vm1, %v14495_v34, %v14493_v35  ;;  %v6047_v11 = vmul.f32 %v5235_v47, %v4183_v36  ;;  %v14496_v47 = vld [vmem:[#allocation259_spill] sm:$0xff]  ;;  %v14504_v36 = vld [vmem:[#allocation102_spill] sm:$0xff] }
 0x467   : > { %v6043_v30 = vmul.f32 %v5210_v27, %v4179_v1  ;;  %8239 = vst [vmem:[%s9366_s7 + $0x170] sm:$0xff] %v7787_v32   ;;  %v12903_v31 = vpop.permute.xlu2 %3966  ;;  %v12912_v32 = vld [vmem:[%s8774_s14 + $0x28] sm:$0xff]  ;;  %v4190_v6 = vsel %vm2945_vm1, %v14500_v44, %v14498_v40  ;;  %v14505_v56 = vld [vmem:[#allocation235_spill] sm:$0xff] }
 0x468   : > { %v5004_v54 = vpop.permute.xlu0 %5003 }
 0x469   : > { %v7917_v60 = vpack.c.bf16 %v6043_v30, %v6042_v38  ;;  %v6010_v52 = vmul.f32 %v5004_v54, %v4146_v26  ;;  %v5348_v38 = vperm.slane %v12912_v32, 2  ;;  %v4185_v30 = vsel %vm2945_vm1, %v14496_v47, %v14493_v35  ;;  %v14503_v35 = vld [vmem:[#allocation87_spill] sm:$0xff] }
 0x46b   : > { %8265 = vst [vmem:[%s9366_s7 + $0x240] sm:$0xff] %v7917_v60   ;;  %v7837_v8 = vpack.c.bf16 %v6011_v29, %v6010_v52  ;;  %v14499_v29 = vld [vmem:[#allocation131_spill] sm:$0xff] }
 0x46c   : > { %v4191_v52 = vsel %vm2945_vm1, %v14499_v29, %v14498_v40 }
 0x46d   : > { %8249 = vst [vmem:[%s9366_s7 + $0x1c0] sm:$0xff] %v7837_v8  }
 0x46e   : > { %8501 = vset.pattern.permute.xlu1 %v8762_v4  ;;  %8502 = vset.pattern.permute.xlu2 %v8810_v17 }
 0x46f   : > { %v5247_v1 = vpop.permute.xlu2 %5246 }
 0x470   : > { %v5129_v13 = vpop.permute.xlu0 %5128  ;;  %v6049_v60 = vmul.f32 %v5247_v1, %v4185_v30 }
 0x471   : > { %v6030_v42 = vmul.f32 %v5129_v13, %v4166_v18  ;;  %v6055_v18 = vmul.f32 %v14501_v33, %v4191_v52 }
 0x473   : > { %v7887_v45 = vpack.c.bf16 %v6031_v5, %v6030_v42 }
 0x475   : > { %8259 = vst [vmem:[%s9366_s7 + $0x210] sm:$0xff] %v7887_v45   ;;  %v14502_v45 = vld [vmem:[#allocation65_spill] sm:$0xff] }
 0x476   : > { %5334 = vperm.xlu1 %8501, %v14488_v28   ;;  %v5229_v37 = vpop.permute.xlu1 %5228  ;;  %5340 = vperm.xlu2 %8502, %v14488_v28   ;;  %v4186_v43 = vsel %vm2945_vm1, %v14503_v35, %v14502_v45  ;;  %v4187_v34 = vsel %vm2945_vm1, %v14504_v36, %v14502_v45 }
 0x477   : > { %v6046_v27 = vmul.f32 %v5229_v37, %v4182_v16 }
 0x478   : > { %v5254_v42 = vpop.permute.xlu0 %5253 }
 0x479   : > { %v7927_v23 = vpack.c.bf16 %v6047_v11, %v6046_v27  ;;  %v6050_v37 = vmul.f32 %v5254_v42, %v4186_v43  ;;  %v14511_v42 = vld [vmem:[#allocation133_spill] sm:$0xff] }
 0x47b   : > { %8267 = vst [vmem:[%s9366_s7 + $0x250] sm:$0xff] %v7927_v23  }
 0x47e   : > { %8503 = vset.pattern.permute.xlu1 %v8755_v2  ;;  %8504 = vset.pattern.permute.xlu2 %v8762_v4 }
 0x47f   : > { %v12908_v39 = vpop.permute.xlu1 %3934  ;;  %v5266_v26 = vpop.permute.xlu2 %5265 }
 0x486   : > { %5353 = vperm.xlu1 %8503, %v5348_v38   ;;  %5359 = vperm.xlu2 %8504, %v5348_v38  }
 0x487   : > { %v5241_v28 = vpop.permute.xlu1 %5240 }
 0x488   : > { %v6048_v51 = vmul.f32 %v5241_v28, %v4184_v24 }
 0x48a   : > { %v7932_v54 = vpack.c.bf16 %v6049_v60, %v6048_v51  ;;  %v14506_v60 = vld [vmem:[#allocation244_spill] sm:$0xff] }
 0x48c   : > { %8268 = vst [vmem:[%s9366_s7 + $0x258] sm:$0xff] %v7932_v54  }
 0x48e   : > { %8505 = vset.pattern.permute.xlu1 %v8810_v17  ;;  %8506 = vset.pattern.permute.xlu2 %v8791_v10 }
 0x48f   : > { %v5279_v8 = vpop.permute.xlu2 %5278 }
 0x490   : > { %v6054_v13 = vmul.f32 %v5279_v8, %v4190_v6 }
 0x492   : > { %v7947_v5 = vpack.c.bf16 %v6055_v18, %v6054_v13  ;;  %v14509_v18 = vld [vmem:[#allocation139_spill] sm:$0xff] }
 0x493   : > { %v4193_v13 = vsel %vm2945_vm1, %v14509_v18, %v14498_v40  ;;  %v14522_v18 = vld [vmem:[#allocation165_spill] sm:$0xff] }
 0x494   : > { %8271 = vst [vmem:[%s9366_s7 + $0x270] sm:$0xff] %v7947_v5   ;;  %v14510_v5 = vld [vmem:[#allocation130_spill] sm:$0xff] }
 0x496   : > { %5365 = vperm.xlu1 %8505, %v5348_v38   ;;  %5371 = vperm.xlu2 %8506, %v5348_v38  }
 0x497   : > { %v5260_v16 = vpop.permute.xlu1 %5259 }
 0x498   : > { %v6051_v11 = vmul.f32 %v5260_v16, %v4187_v34  ;;  %v12963_v6 = vpop.permute.xlu2 %3936  ;;  %v14512_v34 = vld [vmem:[#allocation14_spill] sm:$0xff] }
 0x499   : > { %v14513_v16 = vld [vmem:[#allocation162_spill] sm:$0xff] }
 0x49a   : > { %v7937_v27 = vpack.c.bf16 %v6051_v11, %v6050_v37  ;;  %v4195_v37 = vsel %vm2945_vm1, %v14513_v16, %v14512_v34  ;;  %v14526_v16 = vld [vmem:[#allocation209_spill] sm:$0xff] }
 0x49c   : > { %8269 = vst [vmem:[%s9366_s7 + $0x260] sm:$0xff] %v7937_v27  }
 0x49e   : > { %8507 = vset.pattern.permute.xlu1 %v8762_v4  ;;  %8508 = vset.pattern.permute.xlu2 %v8810_v17 }
 0x4a0   : > { %v3905_v23 = vpop.permute.xlu1 %3904  ;;  %v5297_v33 = vpop.permute.xlu2 %5296 }
 0x4a1   : > { %v4158_v1 = vsel %vm2945_vm1, %v12626_v15, %v3905_v23  ;;  %v4159_v47 = vsel %vm2945_vm1, %v12630_v12, %v3905_v23  ;;  %v4160_v30 = vsel %vm2945_vm1, %v12651_v9, %v3905_v23  ;;  %v4161_v38 = vsel %vm2945_vm1, %v12661_v20, %v3905_v23  ;;  %v14507_v12 = vld [vmem:[#allocation174_spill] sm:$0xff]  ;;  %v14508_v20 = vld [vmem:[#allocation100_spill] sm:$0xff] }
 0x4a2   : > { %v6022_v24 = vmul.f32 %v14505_v56, %v4158_v1  ;;  %v6023_v28 = vmul.f32 %v12523_v3, %v4159_v47  ;;  %v6024_v51 = vmul.f32 %v14506_v60, %v4160_v30  ;;  %v6025_v54 = vmul.f32 %v12619_v41, %v4161_v38  ;;  %v14515_v38 = vld [vmem:[#allocation136_spill] sm:$0xff] }
 0x4a3   : > { %v4188_v9 = vsel %vm2945_vm1, %v14507_v12, %v14502_v45  ;;  %v4189_v3 = vsel %vm2945_vm1, %v14508_v20, %v14502_v45  ;;  %v4192_v45 = vsel %vm2945_vm1, %v14511_v42, %v14498_v40  ;;  %v6057_v35 = vmul.f32 %v5297_v33, %v4193_v13  ;;  %v14514_v40 = vld [vmem:[#allocation135_spill] sm:$0xff]  ;;  %v14516_v56 = vld [vmem:[#allocation164_spill] sm:$0xff] }
 0x4a4   : > { %v7867_v29 = vpack.c.bf16 %v6023_v28, %v6022_v24  ;;  %v7872_v15 = vpack.c.bf16 %v6025_v54, %v6024_v51  ;;  %v6052_v8 = vmul.f32 %v5266_v26, %v4188_v9  ;;  %v4194_v11 = vsel %vm2945_vm1, %v14514_v40, %v14512_v34  ;;  %v14517_v28 = vld [vmem:[#allocation66_spill] sm:$0xff]  ;;  %v14518_v12 = vld [vmem:[#allocation184_spill] sm:$0xff]  ;;  %v14519_v9 = vld [vmem:[#allocation191_spill] sm:$0xff] }
 0x4a5   : > { %v4201_v24 = vsel %vm2945_vm1, %v14516_v56, %v14515_v38  ;;  %v4200_v60 = vsel %vm2945_vm1, %v14517_v28, %v14515_v38  ;;  %v4196_v20 = vsel %vm2945_vm1, %v14519_v9, %v14512_v34  ;;  %v4198_v13 = vsel %vm2945_vm1, %v14522_v18, %v14515_v38  ;;  %v14528_v56 = vld [vmem:[#allocation218_spill] sm:$0xff]  ;;  %v14533_v18 = vld [vmem:[#allocation231_spill] sm:$0xff] }
 0x4a6   : > { %8255 = vst [vmem:[%s9366_s7 + $0x1f0] sm:$0xff] %v7867_v29   ;;  %5384 = vperm.xlu1 %8507, %v12658_v22   ;;  %5390 = vperm.xlu2 %8508, %v12658_v22   ;;  %v6065_v54 = vmul.f32 %v12677_v46, %v4201_v24 }
 0x4a7   : > { %8256 = vst [vmem:[%s9366_s7 + $0x1f8] sm:$0xff] %v7872_v15  }
 0x4a8   : > { %v5272_v52 = vpop.permute.xlu1 %5271 }
 0x4a9   : > { %v6053_v41 = vmul.f32 %v5272_v52, %v4189_v3  ;;  %v14520_v3 = vld [vmem:[#allocation195_spill] sm:$0xff] }
 0x4aa   : > { %v4197_v52 = vsel %vm2945_vm1, %v14520_v3, %v14512_v34  ;;  %v14525_v34 = vld [vmem:[#allocation108_spill] sm:$0xff] }
 0x4ab   : > { %v7942_v44 = vpack.c.bf16 %v6053_v41, %v6052_v8  ;;  %v14521_v41 = vld [vmem:[#allocation69_spill] sm:$0xff]  ;;  %v4205_v24 = vsel %vm2945_vm1, %v14528_v56, %v14525_v34 }
 0x4ad   : > { %8270 = vst [vmem:[%s9366_s7 + $0x268] sm:$0xff] %v7942_v44   ;;  %v6060_v44 = vmul.f32 %v14521_v41, %v4196_v20  ;;  %v14531_v20 = vld [vmem:[#allocation242_spill] sm:$0xff]  ;;  %v14532_v41 = vld [vmem:[#allocation239_spill] sm:$0xff] }
 0x4ae   : > { %8509 = vset.pattern.permute.xlu1 %v8791_v10  ;;  %8510 = vset.pattern.permute.xlu2 %v8755_v2  ;;  %v4210_v3 = vsel %vm2945_vm1, %v14531_v20, %v12690_v61 }
 0x4b6   : > { %5396 = vperm.xlu1 %8509, %v12658_v22   ;;  %5403 = vperm.xlu2 %8510, %v14510_v5   ;;  %v5310_v22 = vpop.permute.xlu2 %5309 }
 0x4b7   : > { %v6059_v23 = vmul.f32 %v5310_v22, %v4195_v37  ;;  %v4203_v37 = vsel %vm2945_vm1, %v14526_v16, %v14525_v34 }
 0x4b8   : > { %v5291_v26 = vpop.permute.xlu1 %5290 }
 0x4b9   : > { %v6056_v43 = vmul.f32 %v5291_v26, %v4192_v45  ;;  %v14524_v26 = vld [vmem:[#allocation161_spill] sm:$0xff] }
 0x4ba   : > { %v4199_v42 = vsel %vm2945_vm1, %v14524_v26, %v14515_v38  ;;  %v5473_v38 = vperm.slane %v12912_v32, 7  ;;  %v14530_v32 = vld [vmem:[#allocation246_spill] sm:$0xff] }
 0x4bb   : > { %v7952_v36 = vpack.c.bf16 %v6057_v35, %v6056_v43  ;;  %v4211_v9 = vsel %vm2945_vm1, %v14530_v32, %v12690_v61 }
 0x4bd   : > { %8272 = vst [vmem:[%s9366_s7 + $0x278] sm:$0xff] %v7952_v36  }
 0x4be   : > { %8511 = vset.pattern.permute.xlu1 %v8810_v17  ;;  %8512 = vset.pattern.permute.xlu2 %v8791_v10 }
 0x4c0   : > { %v5329_v47 = vpop.permute.xlu2 %5328 }
 0x4c1   : > { %v6062_v35 = vmul.f32 %v5329_v47, %v4198_v13  ;;  %v4206_v13 = vsel %vm2945_vm1, %v14533_v18, %v12593_v0 }
 0x4c6   : > { %5415 = vperm.xlu1 %8511, %v14510_v5   ;;  %5421 = vperm.xlu2 %8512, %v14510_v5   ;;  %v14523_v5 = vld [vmem:[#allocation10_spill] sm:$0xff] }
 0x4c8   : > { %v5304_v27 = vpop.permute.xlu1 %5303 }
 0x4c9   : > { %v6058_v1 = vmul.f32 %v5304_v27, %v4194_v11  ;;  %v14527_v11 = vld [vmem:[#allocation206_spill] sm:$0xff] }
 0x4ca   : > { %v4202_v27 = vsel %vm2945_vm1, %v14527_v11, %v14525_v34 }
 0x4cb   : > { %v7957_v30 = vpack.c.bf16 %v6059_v23, %v6058_v1 }
 0x4cd   : > { %8273 = vst [vmem:[%s9366_s7 + $0x280] sm:$0xff] %v7957_v30  }
 0x4ce   : > { %8513 = vset.pattern.permute.xlu1 %v8755_v2  ;;  %8514 = vset.pattern.permute.xlu2 %v8762_v4 }
 0x4d0   : > { %v5341_v51 = vpop.permute.xlu2 %5340 }
 0x4d1   : > { %v6064_v29 = vmul.f32 %v5341_v51, %v4200_v60  ;;  %v14529_v60 = vld [vmem:[#allocation214_spill] sm:$0xff] }
 0x4d2   : > { %v4204_v51 = vsel %vm2945_vm1, %v14529_v60, %v14525_v34  ;;  %v14536_v34 = vld [vmem:[#allocation46_spill] sm:$0xff] }
 0x4d3   : > { %v7972_v15 = vpack.c.bf16 %v6065_v54, %v6064_v29  ;;  %v4209_v16 = vsel %vm2945_vm1, %v14536_v34, %v12593_v0  ;;  %v14547_v34 = vld [vmem:[#allocation256_spill] sm:$0xff] }
 0x4d5   : > { %8276 = vst [vmem:[%s9366_s7 + $0x298] sm:$0xff] %v7972_v15  }
 0x4d6   : > { %5428 = vperm.xlu1 %8513, %v14518_v12   ;;  %5434 = vperm.xlu2 %8514, %v14518_v12  }
 0x4d8   : > { %v5322_v8 = vpop.permute.xlu1 %5321 }
 0x4d9   : > { %v6061_v46 = vmul.f32 %v5322_v8, %v4197_v52 }
 0x4db   : > { %v7962_v33 = vpack.c.bf16 %v6061_v46, %v6060_v44  ;;  %v6075_v44 = vmul.f32 %v14532_v41, %v4211_v9  ;;  %v4220_v41 = vsel %vm2945_vm1, %v12551_v14, %v12908_v39 }
 0x4dd   : > { %8274 = vst [vmem:[%s9366_s7 + $0x288] sm:$0xff] %v7962_v33   ;;  %v5379_v33 = vpop.permute.xlu0 %5378 }
 0x4de   : > { %8515 = vset.pattern.permute.xlu1 %v8791_v10  ;;  %8516 = vset.pattern.permute.xlu2 %v8755_v2 }
 0x4e0   : > { %v5360_v22 = vpop.permute.xlu2 %5359 }
 0x4e1   : > { %v6067_v23 = vmul.f32 %v5360_v22, %v4203_v37 }
 0x4e6   : > { %5446 = vperm.xlu1 %8515, %v14518_v12   ;;  %5453 = vperm.xlu2 %8516, %v14523_v5  }
 0x4e8   : > { %v5335_v45 = vpop.permute.xlu1 %5334 }
 0x4e9   : > { %v6063_v43 = vmul.f32 %v5335_v45, %v4199_v42  ;;  %v6070_v45 = vmul.f32 %v5379_v33, %v4206_v13  ;;  %v13100_v33 = vld [vmem:[%s8774_s14 + $0x38] sm:$0xff] }
 0x4ea   : > { %v13103_v18 = vperm.slane %v13100_v33, 7 }
 0x4eb   : > { %v7967_v36 = vpack.c.bf16 %v6063_v43, %v6062_v35 }
 0x4ec   : > { %5878 = vperm.xlu0 %8569, %v13103_v18  }
 0x4ed   : > { %8275 = vst [vmem:[%s9366_s7 + $0x290] sm:$0xff] %v7967_v36   ;;  %v14535_v36 = vld [vmem:[#allocation121_spill] sm:$0xff] }
 0x4ee   : > { %8517 = vset.pattern.permute.xlu1 %v8762_v4  ;;  %8518 = vset.pattern.permute.xlu2 %v8810_v17  ;;  %v4208_v22 = vsel %vm2945_vm1, %v14535_v36, %v12593_v0 }
 0x4f0   : > { %v5372_v30 = vpop.permute.xlu2 %5371 }
 0x4f1   : > { %v6069_v54 = vmul.f32 %v5372_v30, %v4205_v24  ;;  %v14538_v30 = vld [vmem:[#allocation140_spill] sm:$0xff] }
 0x4f4   : > { %8577 = vset.pattern.permute.xlu0 %v8791_v10 }
 0x4f6   : > { %5459 = vperm.xlu1 %8517, %v14523_v5   ;;  %5465 = vperm.xlu2 %8518, %v14523_v5   ;;  %v14534_v5 = vld [vmem:[#allocation232_spill] sm:$0xff] }
 0x4f7   : > { %v4207_v26 = vsel %vm2945_vm1, %v14534_v5, %v12593_v0  ;;  %v14539_v0 = vld [vmem:[#allocation236_spill] sm:$0xff]  ;;  %v14543_v5 = vld [vmem:[#allocation175_spill] sm:$0xff] }
 0x4f8   : > { %v5354_v40 = vpop.permute.xlu1 %5353 }
 0x4f9   : > { %v6066_v1 = vmul.f32 %v5354_v40, %v4202_v27 }
 0x4fb   : > { %v7977_v47 = vpack.c.bf16 %v6067_v23, %v6066_v1  ;;  %v14537_v1 = vld [vmem:[#allocation49_spill] sm:$0xff] }
 0x4fd   : > { %8277 = vst [vmem:[%s9366_s7 + $0x2a0] sm:$0xff] %v7977_v47   ;;  %v4213_v47 = vsel %vm2945_vm1, %v14537_v1, %v12690_v61 }
 0x4fe   : > { %8519 = vset.pattern.permute.xlu1 %v8755_v2  ;;  %8520 = vset.pattern.permute.xlu2 %v8762_v4 }
 0x500   : > { %v5391_v15 = vpop.permute.xlu2 %5390 }
 0x501   : > { %v6072_v40 = vmul.f32 %v5391_v15, %v4208_v22  ;;  %v14542_v15 = vld [vmem:[#allocation32_spill] sm:$0xff]  ;;  %v4218_v22 = vsel %vm2945_vm1, %v12517_v50, %v12908_v39  ;;  %v4223_v50 = vsel %vm2945_vm1, %v12688_v21, %v12963_v6  ;;  %v4225_v21 = vsel %vm2945_vm1, %v12719_v53, %v12963_v6 }
 0x506   : > { %5478 = vperm.xlu1 %8519, %v5473_v38   ;;  %5484 = vperm.xlu2 %8520, %v5473_v38  }
 0x508   : > { %v5366_v28 = vpop.permute.xlu1 %5365 }
 0x509   : > { %v6068_v29 = vmul.f32 %v5366_v28, %v4204_v51  ;;  %v14540_v51 = vld [vmem:[#allocation185_spill] sm:$0xff] }
 0x50b   : > { %v7982_v12 = vpack.c.bf16 %v6069_v54, %v6068_v29  ;;  %v14541_v54 = vld [vmem:[#allocation95_spill] sm:$0xff] }
 0x50c   : > { %v4215_v29 = vsel %vm2945_vm1, %v14541_v54, %v14540_v51 }
 0x50d   : > { %8278 = vst [vmem:[%s9366_s7 + $0x2a8] sm:$0xff] %v7982_v12   ;;  %v4214_v12 = vsel %vm2945_vm1, %v14542_v15, %v14540_v51  ;;  %v14550_v15 = vld [vmem:[#allocation104_spill] sm:$0xff] }
 0x50e   : > { %8521 = vset.pattern.permute.xlu1 %v8810_v17  ;;  %8522 = vset.pattern.permute.xlu2 %v8791_v10 }
 0x510   : > { %v5404_v52 = vpop.permute.xlu2 %5403 }
 0x511   : > { %v6074_v8 = vmul.f32 %v5404_v52, %v4210_v3  ;;  %v4221_v52 = vsel %vm2945_vm1, %v12565_v7, %v12908_v39  ;;  %v4216_v7 = vsel %vm2945_vm1, %v14543_v5, %v14540_v51 }
 0x513   : > { %v7997_v46 = vpack.c.bf16 %v6075_v44, %v6074_v8 }
 0x515   : > { %8281 = vst [vmem:[%s9366_s7 + $0x2c0] sm:$0xff] %v7997_v46   ;;  %v6085_v46 = vmul.f32 %v12710_v25, %v4221_v52  ;;  %v14545_v25 = vld [vmem:[#allocation266_spill] sm:$0xff]  ;;  %v5504_v52 = vpop.permute.xlu0 %5503 }
 0x516   : > { %5490 = vperm.xlu1 %8521, %v5473_v38   ;;  %5496 = vperm.xlu2 %8522, %v5473_v38   ;;  %v4212_v38 = vsel %vm2945_vm1, %v14539_v0, %v12690_v61 }
 0x518   : > { %v5385_v42 = vpop.permute.xlu1 %5384 }
 0x519   : > { %v6071_v35 = vmul.f32 %v5385_v42, %v4207_v26  ;;  %v14544_v26 = vld [vmem:[#allocation38_spill] sm:$0xff]  ;;  %v4217_v42 = vsel %vm2945_vm1, %v14545_v25, %v14540_v51  ;;  %v14556_v25 = vld [vmem:[#allocation13_spill] sm:$0xff] }
 0x51b   : > { %v7987_v43 = vpack.c.bf16 %v6071_v35, %v6070_v45  ;;  %v14546_v45 = vld [vmem:[#allocation6_spill] sm:$0xff] }
 0x51c   : > { %v6080_v35 = vmul.f32 %v14546_v45, %v4216_v7 }
 0x51d   : > { %8279 = vst [vmem:[%s9366_s7 + $0x2b0] sm:$0xff] %v7987_v43  }
 0x51e   : > { %8523 = vset.pattern.permute.xlu1 %v8762_v4  ;;  %8524 = vset.pattern.permute.xlu2 %v8810_v17 }
 0x520   : > { %v5422_v23 = vpop.permute.xlu2 %5421 }
 0x521   : > { %v6077_v24 = vmul.f32 %v5422_v23, %v4213_v47 }
 0x526   : > { %5509 = vperm.xlu1 %8523, %v12680_v49   ;;  %5515 = vperm.xlu2 %8524, %v12680_v49  }
 0x528   : > { %v5397_v37 = vpop.permute.xlu1 %5396 }
 0x529   : > { %v6073_v11 = vmul.f32 %v5397_v37, %v4209_v16  ;;  %v14548_v16 = vld [vmem:[#allocation70_spill] sm:$0xff] }
 0x52a   : > { %v4219_v37 = vsel %vm2945_vm1, %v14548_v16, %v12908_v39  ;;  %v4222_v39 = vsel %vm2945_vm1, %v12685_v63, %v12963_v6  ;;  %v4224_v63 = vsel %vm2945_vm1, %v12708_v48, %v12963_v6 }
 0x52b   : > { %v7992_v27 = vpack.c.bf16 %v6073_v11, %v6072_v40 }
 0x52d   : > { %8280 = vst [vmem:[%s9366_s7 + $0x2b8] sm:$0xff] %v7992_v27  }
 0x52e   : > { %8525 = vset.pattern.permute.xlu1 %v8791_v10  ;;  %8526 = vset.pattern.permute.xlu2 %v8755_v2 }
 0x536   : > { %5521 = vperm.xlu1 %8525, %v12680_v49   ;;  %5528 = vperm.xlu2 %8526, %v14538_v30   ;;  %v5435_v49 = vpop.permute.xlu2 %5434 }
 0x537   : > { %v6079_v32 = vmul.f32 %v5435_v49, %v4215_v29 }
 0x538   : > { %v5416_v56 = vpop.permute.xlu1 %5415 }
 0x539   : > { %v6076_v28 = vmul.f32 %v5416_v56, %v4212_v38 }
 0x53b   : > { %v8002_v60 = vpack.c.bf16 %v6077_v24, %v6076_v28  ;;  %v8610_v24 = vld [vmem:[%s8774_s14 + $0x30] sm:$0xff]  ;;  %s7553_s14 = sshll.u32 %s8723_s19, 10  ;;  %s6667_s19 = scalar_lea.sflag [#allocation3], %s207_s5 }
 0x53c   : > { %v5598_v28 = vperm.slane %v8610_v24, 4  ;;  %s6679_s9 = scalar_lea.hbm %s13489_s4, %s7553_s14 }
 0x53d   : > { %8282 = vst [vmem:[%s9366_s7 + $0x2c8] sm:$0xff] %v8002_v60   ;;  %s6682_s12 = sshll.u32 %s6679_s9, 4  ;;  %s6683_s12 = int_to_ptr.hbm [resolvable:$true] %s6682_s12 }
 0x53e   : > { %8527 = vset.pattern.permute.xlu1 %v8810_v17  ;;  %8528 = vset.pattern.permute.xlu2 %v8791_v10  ;;  %s8625_s13 = sshra.s32 %s6683_s12, 4  ;;  %s8626_s13 = int_to_ptr.hbm [resolvable:$true] %s8625_s13 }
 0x53f   : > { %s8627_s20 = scalar_lea.hbm %s8626_s13, 1024  ;;  %p8632_p1 = scmp.lt.s32.totalorder %s8626_s13, %s13489_s4 }
 0x540   : > { %v5454_v20 = vpop.permute.xlu2 %5453  ;;  %p8628_p12 = scmp.ne.s32.totalorder %s8626_s13, %s8627_s20  ;;  %p8633_p2 = scmp.lt.s32.totalorder %s8631_s23, %s8627_s20 }
 0x541   : > { %v6082_v11 = vmul.f32 %v5454_v20, %v4218_v22 }
 0x542   : > { %p8629_p13 = pnand %p8628_p12, %p8740_p5  ;;  %p8634_p3 = por %p8633_p2, %p8632_p1 }
 0x544   : > { %p8630_p0 = pneg %p8629_p13 }
 0x546   : > { %5540 = vperm.xlu1 %8527, %v14538_v30   ;;  %5546 = vperm.xlu2 %8528, %v14538_v30   ;;  %p8635_p4 = pnand %p8634_p3, %p8630_p0 }
 0x548   : > { %v5429_v61 = vpop.permute.xlu1 %5428 }
 0x549   : > { %v6078_v9 = vmul.f32 %v5429_v61, %v4214_v12  ;;  %v14549_v61 = vld [vmem:[#allocation238_spill] sm:$0xff]  ;;  %v14551_v12 = vld [vmem:[#allocation103_spill] sm:$0xff] }
 0x54a   : > { %v4231_v53 = vsel %vm2945_vm1, %v14550_v15, %v14549_v61  ;;  %v4230_v48 = vsel %vm2945_vm1, %v14551_v12, %v14549_v61  ;;  %v14566_v15 = vld [vmem:[#allocation58_spill] sm:$0xff] }
 0x54b   : > { %v8007_v3 = vpack.c.bf16 %v6079_v32, %v6078_v9  ;;  %v14552_v32 = vld [vmem:[#allocation196_spill] sm:$0xff] }
 0x54c   : > { %v6095_v9 = vmul.f32 %v14552_v32, %v4231_v53  ;;  %v14567_v32 = vld [vmem:[#allocation182_spill] sm:$0xff] }
 0x54d   : > { %8283 = vst [vmem:[%s9366_s7 + $0x2d0] sm:$0xff] %v8007_v3  }
 0x54e   : > { %8529 = vset.pattern.permute.xlu1 %v8755_v2  ;;  %8530 = vset.pattern.permute.xlu2 %v8762_v4 }
 0x550   : > { %v5466_v8 = vpop.permute.xlu2 %5465 }
 0x551   : > { %v6084_v44 = vmul.f32 %v5466_v8, %v4220_v41  ;;  %v14553_v8 = vld [vmem:[#allocation71_spill] sm:$0xff] }
 0x552   : > { %v14554_v41 = vld [vmem:[#allocation11_spill] sm:$0xff] }
 0x553   : > { %v8022_v13 = vpack.c.bf16 %v6085_v46, %v6084_v44  ;;  %v4226_v44 = vsel %vm2945_vm1, %v14554_v41, %v14553_v8  ;;  %v14570_v41 = vld [vmem:[#allocation9_spill] sm:$0xff] }
 0x554   : > { %v6090_v7 = vmul.f32 %v5504_v52, %v4226_v44 }
 0x555   : > { %8286 = vst [vmem:[%s9366_s7 + $0x2e8] sm:$0xff] %v8022_v13   ;;  %v14555_v13 = vld [vmem:[#allocation12_spill] sm:$0xff] }
 0x556   : > { %5553 = vperm.xlu1 %8529, %v14544_v26   ;;  %5559 = vperm.xlu2 %8530, %v14544_v26   ;;  %v4227_v5 = vsel %vm2945_vm1, %v14555_v13, %v14553_v8  ;;  %v14571_v13 = vld [vmem:[#allocation52_spill] sm:$0xff] }
 0x558   : > { %v5447_v14 = vpop.permute.xlu1 %5446 }
 0x559   : > { %v6081_v43 = vmul.f32 %v5447_v14, %v4217_v42  ;;  %v4228_v42 = vsel %vm2945_vm1, %v14556_v25, %v14553_v8 }
 0x55b   : > { %v8012_v36 = vpack.c.bf16 %v6081_v43, %v6080_v35  ;;  %v14557_v35 = vld [vmem:[#allocation15_spill] sm:$0xff] }
 0x55c   : > { %v4229_v43 = vsel %vm2945_vm1, %v14557_v35, %v14553_v8 }
 0x55d   : > { %8284 = vst [vmem:[%s9366_s7 + $0x2d8] sm:$0xff] %v8012_v36  }
 0x55e   : > { %8531 = vset.pattern.permute.xlu1 %v8791_v10  ;;  %8532 = vset.pattern.permute.xlu2 %v8755_v2 }
 0x560   : > { %v5485_v1 = vpop.permute.xlu2 %5484 }
 0x561   : > { %v6087_v30 = vmul.f32 %v5485_v1, %v4223_v50 }
 0x566   : > { %5571 = vperm.xlu1 %8531, %v14544_v26   ;;  %5578 = vperm.xlu2 %8532, %v14547_v34  }
 0x568   : > { %v5460_v40 = vpop.permute.xlu1 %5459 }
 0x569   : > { %v6083_v27 = vmul.f32 %v5460_v40, %v4219_v37  ;;  %v14558_v37 = vld [vmem:[#allocation111_spill] sm:$0xff] }
 0x56a   : > { %v4233_v40 = vsel %vm2945_vm1, %v14558_v37, %v14549_v61 }
 0x56b   : > { %v8017_v23 = vpack.c.bf16 %v6083_v27, %v6082_v11  ;;  %v14559_v11 = vld [vmem:[#allocation176_spill] sm:$0xff]  ;;  %v14560_v27 = vld [vmem:[#allocation110_spill] sm:$0xff] }
 0x56d   : > { %8285 = vst [vmem:[%s9366_s7 + $0x2e0] sm:$0xff] %v8017_v23   ;;  %v4232_v23 = vsel %vm2945_vm1, %v14560_v27, %v14549_v61 }
 0x56e   : > { %8533 = vset.pattern.permute.xlu1 %v8762_v4  ;;  %8534 = vset.pattern.permute.xlu2 %v8810_v17 }
 0x570   : > { %v5497_v56 = vpop.permute.xlu2 %5496 }
 0x571   : > { %v6089_v49 = vmul.f32 %v5497_v56, %v4225_v21  ;;  %v14563_v56 = vld [vmem:[#allocation144_spill] sm:$0xff] }
 0x576   : > { %5584 = vperm.xlu1 %8533, %v14547_v34   ;;  %5590 = vperm.xlu2 %8534, %v14547_v34  }
 0x578   : > { %v5479_v47 = vpop.permute.xlu1 %5478 }
 0x579   : > { %v6086_v0 = vmul.f32 %v5479_v47, %v4222_v39 }
 0x57b   : > { %v8027_v38 = vpack.c.bf16 %v6087_v30, %v6086_v0  ;;  %v14561_v30 = vld [vmem:[#allocation85_spill] sm:$0xff] }
 0x57c   : > { %v14562_v0 = vld [vmem:[#allocation145_spill] sm:$0xff]  ;;  %v4234_v24 = vsel %vm2945_vm1, %v14563_v56, %v14561_v30 }
 0x57d   : > { %8287 = vst [vmem:[%s9366_s7 + $0x2f0] sm:$0xff] %v8027_v38   ;;  %v4235_v38 = vsel %vm2945_vm1, %v14562_v0, %v14561_v30 }
 0x57e   : > { %8535 = vset.pattern.permute.xlu1 %v8755_v2  ;;  %8536 = vset.pattern.permute.xlu2 %v8762_v4 }
 0x580   : > { %v5516_v54 = vpop.permute.xlu2 %5515 }
 0x581   : > { %v6092_v36 = vmul.f32 %v5516_v54, %v4228_v42  ;;  %v14565_v54 = vld [vmem:[#allocation60_spill] sm:$0xff] }
 0x586   : > { %5603 = vperm.xlu1 %8535, %v5598_v28   ;;  %5609 = vperm.xlu2 %8536, %v5598_v28  }
 0x588   : > { %v5491_v60 = vpop.permute.xlu1 %5490 }
 0x589   : > { %v6088_v51 = vmul.f32 %v5491_v60, %v4224_v63 }
 0x58b   : > { %v8032_v29 = vpack.c.bf16 %v6089_v49, %v6088_v51  ;;  %v14564_v51 = vld [vmem:[#allocation41_spill] sm:$0xff] }
 0x58c   : > { %v4240_v53 = vsel %vm2945_vm1, %v14566_v15, %v14564_v51 }
 0x58d   : > { %8288 = vst [vmem:[%s9366_s7 + $0x2f8] sm:$0xff] %v8032_v29   ;;  %v4241_v29 = vsel %vm2945_vm1, %v14565_v54, %v14564_v51 }
 0x58e   : > { %8537 = vset.pattern.permute.xlu1 %v8810_v17  ;;  %8538 = vset.pattern.permute.xlu2 %v8791_v10  ;;  %v6105_v12 = vmul.f32 %v12737_v58, %v4241_v29  ;;  %v14582_v29 = vld [vmem:[#allocation210_spill] sm:$0xff] }
 0x590   : > { %v5529_v6 = vpop.permute.xlu2 %5528 }
 0x591   : > { %v6094_v20 = vmul.f32 %v5529_v6, %v4230_v48 }
 0x593   : > { %v8047_v3 = vpack.c.bf16 %v6095_v9, %v6094_v20  ;;  %v14568_v9 = vld [vmem:[#allocation151_spill] sm:$0xff] }
 0x594   : > { %v4236_v20 = vsel %vm2945_vm1, %v14568_v9, %v14561_v30  ;;  %v14585_v9 = vld [vmem:[#allocation255_spill] sm:$0xff] }
 0x595   : > { %8291 = vst [vmem:[%s9366_s7 + $0x310] sm:$0xff] %v8047_v3   ;;  %v14569_v3 = vld [vmem:[#allocation155_spill] sm:$0xff]  ;;  %v6100_v44 = vmul.f32 %v14570_v41, %v4236_v20 }
 0x596   : > { %5615 = vperm.xlu1 %8537, %v5598_v28   ;;  %5621 = vperm.xlu2 %8538, %v5598_v28   ;;  %v4237_v52 = vsel %vm2945_vm1, %v14569_v3, %v14561_v30 }
 0x598   : > { %v5510_v46 = vpop.permute.xlu1 %5509 }
 0x599   : > { %v6091_v26 = vmul.f32 %v5510_v46, %v4227_v5  ;;  %v4238_v5 = vsel %vm2945_vm1, %v14571_v13, %v14564_v51 }
 0x59b   : > { %v8037_v14 = vpack.c.bf16 %v6091_v26, %v6090_v7  ;;  %v14572_v7 = vld [vmem:[#allocation224_spill] sm:$0xff] }
 0x59d   : > { %8289 = vst [vmem:[%s9366_s7 + $0x300] sm:$0xff] %v8037_v14   ;;  %v14573_v14 = vld [vmem:[#allocation54_spill] sm:$0xff] }
 0x59e   : > { %8539 = vset.pattern.permute.xlu1 %v8762_v4  ;;  %8540 = vset.pattern.permute.xlu2 %v8810_v17  ;;  %v4239_v25 = vsel %vm2945_vm1, %v14573_v14, %v14564_v51  ;;  %v14581_v51 = vld [vmem:[#allocation122_spill] sm:$0xff] }
 0x5a0   : > { %v5547_v16 = vpop.permute.xlu2 %5546 }
 0x5a1   : > { %v6097_v50 = vmul.f32 %v5547_v16, %v4233_v40  ;;  %v14576_v16 = vld [vmem:[#allocation220_spill] sm:$0xff] }
 0x5a6   : > { %5634 = vperm.xlu1 %8539, %v12713_v62   ;;  %5640 = vperm.xlu2 %8540, %v12713_v62  }
 0x5a8   : > { %v5522_v45 = vpop.permute.xlu1 %5521 }
 0x5a9   : > { %v6093_v22 = vmul.f32 %v5522_v45, %v4229_v43 }
 0x5ab   : > { %v8042_v34 = vpack.c.bf16 %v6093_v22, %v6092_v36  ;;  %v14574_v36 = vld [vmem:[#allocation117_spill] sm:$0xff] }
 0x5ac   : > { %v14575_v22 = vld [vmem:[#allocation225_spill] sm:$0xff]  ;;  %v4242_v37 = vsel %vm2945_vm1, %v14576_v16, %v14574_v36 }
 0x5ad   : > { %8290 = vst [vmem:[%s9366_s7 + $0x308] sm:$0xff] %v8042_v34   ;;  %v4243_v34 = vsel %vm2945_vm1, %v14575_v22, %v14574_v36 }
 0x5ae   : > { %8541 = vset.pattern.permute.xlu1 %v8791_v10  ;;  %8542 = vset.pattern.permute.xlu2 %v8755_v2 }
 0x5b6   : > { %5646 = vperm.xlu1 %8541, %v12713_v62   ;;  %5653 = vperm.xlu2 %8542, %v14559_v11   ;;  %v5560_v62 = vpop.permute.xlu2 %5559 }
 0x5b7   : > { %v6099_v21 = vmul.f32 %v5560_v62, %v4235_v38  ;;  %v14578_v62 = vld [vmem:[#allocation229_spill] sm:$0xff] }
 0x5b8   : > { %v5541_v1 = vpop.permute.xlu1 %5540  ;;  %v4244_v30 = vsel %vm2945_vm1, %v14578_v62, %v14574_v36 }
 0x5b9   : > { %v6096_v39 = vmul.f32 %v5541_v1, %v4232_v23 }
 0x5bb   : > { %v8052_v47 = vpack.c.bf16 %v6097_v50, %v6096_v39  ;;  %v5723_v50 = vperm.slane %v13100_v33, 1  ;;  %v14577_v39 = vld [vmem:[#allocation233_spill] sm:$0xff] }
 0x5bd   : > { %8292 = vst [vmem:[%s9366_s7 + $0x318] sm:$0xff] %v8052_v47   ;;  %v4245_v47 = vsel %vm2945_vm1, %v14577_v39, %v14574_v36  ;;  %v14590_v36 = vld [vmem:[#allocation128_spill] sm:$0xff] }
 0x5be   : > { %8543 = vset.pattern.permute.xlu1 %v8810_v17  ;;  %8544 = vset.pattern.permute.xlu2 %v8791_v10 }
 0x5c0   : > { %v5579_v60 = vpop.permute.xlu2 %5578 }
 0x5c1   : > { %v6102_v42 = vmul.f32 %v5579_v60, %v4238_v5 }
 0x5c6   : > { %5665 = vperm.xlu1 %8543, %v14559_v11   ;;  %5671 = vperm.xlu2 %8544, %v14559_v11  }
 0x5c8   : > { %v5554_v28 = vpop.permute.xlu1 %5553 }
 0x5c9   : > { %v6098_v63 = vmul.f32 %v5554_v28, %v4234_v24 }
 0x5cb   : > { %v8057_v49 = vpack.c.bf16 %v6099_v21, %v6098_v63  ;;  %v14579_v21 = vld [vmem:[#allocation250_spill] sm:$0xff]  ;;  %v14580_v63 = vld [vmem:[#allocation123_spill] sm:$0xff] }
 0x5cc   : > { %v4251_v60 = vsel %vm2945_vm1, %v14580_v63, %v14579_v21  ;;  %v4250_v54 = vsel %vm2945_vm1, %v14581_v51, %v14579_v21  ;;  %v4252_v22 = vsel %vm2945_vm1, %v14590_v36, %v14579_v21  ;;  %v14597_v51 = vld [vmem:[#allocation198_spill] sm:$0xff]  ;;  %v5848_v36 = vperm.slane %v13100_v33, 6  ;;  %v14609_v33 = vld [vmem:[#allocation217_spill] sm:$0xff] }
 0x5cd   : > { %8293 = vst [vmem:[%s9366_s7 + $0x320] sm:$0xff] %v8057_v49  }
 0x5ce   : > { %8545 = vset.pattern.permute.xlu1 %v8755_v2  ;;  %8546 = vset.pattern.permute.xlu2 %v8762_v4 }
 0x5d0   : > { %v5591_v61 = vpop.permute.xlu2 %5590 }
 0x5d1   : > { %v6104_v48 = vmul.f32 %v5591_v61, %v4240_v53  ;;  %v6115_v61 = vmul.f32 %v14582_v29, %v4251_v60 }
 0x5d3   : > { %v8072_v6 = vpack.c.bf16 %v6105_v12, %v6104_v48  ;;  %v5629_v12 = vpop.permute.xlu0 %5628  ;;  %v14583_v48 = vld [vmem:[#allocation43_spill] sm:$0xff] }
 0x5d4   : > { %v4247_v20 = vsel %vm2945_vm1, %v14585_v9, %v14583_v48 }
 0x5d5   : > { %8296 = vst [vmem:[%s9366_s7 + $0x338] sm:$0xff] %v8072_v6   ;;  %v14584_v6 = vld [vmem:[#allocation252_spill] sm:$0xff] }
 0x5d6   : > { %5678 = vperm.xlu1 %8545, %v14567_v32   ;;  %5684 = vperm.xlu2 %8546, %v14567_v32  }
 0x5d8   : > { %v5572_v8 = vpop.permute.xlu1 %5571 }
 0x5d9   : > { %v6101_v58 = vmul.f32 %v5572_v8, %v4237_v52 }
 0x5db   : > { %v8062_v46 = vpack.c.bf16 %v6101_v58, %v6100_v44  ;;  %v14586_v44 = vld [vmem:[#allocation89_spill] sm:$0xff] }
 0x5dc   : > { %v4248_v58 = vsel %vm2945_vm1, %v14586_v44, %v14583_v48 }
 0x5dd   : > { %8294 = vst [vmem:[%s9366_s7 + $0x328] sm:$0xff] %v8062_v46   ;;  %v14587_v46 = vld [vmem:[#allocation260_spill] sm:$0xff] }
 0x5de   : > { %8547 = vset.pattern.permute.xlu1 %v8791_v10  ;;  %8548 = vset.pattern.permute.xlu2 %v8755_v2  ;;  %v4249_v13 = vsel %vm2945_vm1, %v14587_v46, %v14583_v48 }
 0x5e0   : > { %v5610_v43 = vpop.permute.xlu2 %5609 }
 0x5e1   : > { %v6107_v11 = vmul.f32 %v5610_v43, %v4243_v34 }
 0x5e6   : > { %5696 = vperm.xlu1 %8547, %v14567_v32   ;;  %5703 = vperm.xlu2 %8548, %v14572_v7   ;;  %v4246_v32 = vsel %vm2945_vm1, %v14584_v6, %v14583_v48 }
 0x5e7   : > { %v6110_v52 = vmul.f32 %v5629_v12, %v4246_v32  ;;  %v14600_v12 = vld [vmem:[#allocation222_spill] sm:$0xff]  ;;  %v14601_v32 = vld [vmem:[#allocation125_spill] sm:$0xff] }
 0x5e8   : > { %v5585_v26 = vpop.permute.xlu1 %5584 }
 0x5e9   : > { %v6103_v45 = vmul.f32 %v5585_v26, %v4239_v25 }
 0x5eb   : > { %v8067_v35 = vpack.c.bf16 %v6103_v45, %v6102_v42  ;;  %v14588_v42 = vld [vmem:[#allocation132_spill] sm:$0xff] }
 0x5ec   : > { %v4253_v45 = vsel %vm2945_vm1, %v14588_v42, %v14579_v21 }
 0x5ed   : > { %8295 = vst [vmem:[%s9366_s7 + $0x330] sm:$0xff] %v8067_v35   ;;  %v14589_v35 = vld [vmem:[#allocation120_spill] sm:$0xff] }
 0x5ee   : > { %8549 = vset.pattern.permute.xlu1 %v8762_v4  ;;  %8550 = vset.pattern.permute.xlu2 %v8810_v17 }
 0x5f0   : > { %v5622_v1 = vpop.permute.xlu2 %5621 }
 0x5f1   : > { %v6109_v38 = vmul.f32 %v5622_v1, %v4245_v47 }
 0x5f6   : > { %5709 = vperm.xlu1 %8549, %v14572_v7   ;;  %5715 = vperm.xlu2 %8550, %v14572_v7  }
 0x5f8   : > { %v5604_v40 = vpop.permute.xlu1 %5603 }
 0x5f9   : > { %v6106_v27 = vmul.f32 %v5604_v40, %v4242_v37  ;;  %v14591_v40 = vld [vmem:[#allocation156_spill] sm:$0xff] }
 0x5fb   : > { %v8077_v23 = vpack.c.bf16 %v6107_v11, %v6106_v27  ;;  %v14592_v11 = vld [vmem:[#allocation113_spill] sm:$0xff] }
 0x5fc   : > { %v4255_v27 = vsel %vm2945_vm1, %v14592_v11, %v14591_v40 }
 0x5fd   : > { %8297 = vst [vmem:[%s9366_s7 + $0x340] sm:$0xff] %v8077_v23   ;;  %v14593_v23 = vld [vmem:[#allocation112_spill] sm:$0xff] }
 0x5fe   : > { %8551 = vset.pattern.permute.xlu1 %v8755_v2  ;;  %8552 = vset.pattern.permute.xlu2 %v8762_v4  ;;  %v4254_v1 = vsel %vm2945_vm1, %v14593_v23, %v14591_v40  ;;  %v14610_v23 = vld [vmem:[#allocation129_spill] sm:$0xff] }
 0x600   : > { %v5641_v24 = vpop.permute.xlu2 %5640 }
 0x601   : > { %v6112_v7 = vmul.f32 %v5641_v24, %v4248_v58  ;;  %v14596_v24 = vld [vmem:[#allocation187_spill] sm:$0xff] }
 0x606   : > { %5728 = vperm.xlu1 %8551, %v5723_v50   ;;  %5734 = vperm.xlu2 %8552, %v5723_v50  }
 0x608   : > { %v5616_v0 = vpop.permute.xlu1 %5615 }
 0x609   : > { %v6108_v56 = vmul.f32 %v5616_v0, %v4244_v30  ;;  %v14594_v0 = vld [vmem:[#allocation53_spill] sm:$0xff] }
 0x60a   : > { %v4258_v9 = vsel %vm2945_vm1, %v14601_v32, %v14594_v0 }
 0x60b   : > { %v8082_v28 = vpack.c.bf16 %v6109_v38, %v6108_v56  ;;  %v14595_v38 = vld [vmem:[#allocation138_spill] sm:$0xff] }
 0x60c   : > { %v4261_v56 = vsel %vm2945_vm1, %v14595_v38, %v14594_v0 }
 0x60d   : > { %8298 = vst [vmem:[%s9366_s7 + $0x348] sm:$0xff] %v8082_v28   ;;  %v4260_v28 = vsel %vm2945_vm1, %v14596_v24, %v14594_v0  ;;  %v6125_v63 = vmul.f32 %v12750_v55, %v4261_v56  ;;  %v5754_v56 = vpop.permute.xlu0 %5753  ;;  %v14613_v24 = vld [vmem:[#allocation243_spill] sm:$0xff] }
 0x60e   : > { %8553 = vset.pattern.permute.xlu1 %v8810_v17  ;;  %8554 = vset.pattern.permute.xlu2 %v8791_v10 }
 0x610   : > { %v5654_v49 = vpop.permute.xlu2 %5653 }
 0x611   : > { %v6114_v15 = vmul.f32 %v5654_v49, %v4250_v54  ;;  %v14598_v54 = vld [vmem:[#allocation91_spill] sm:$0xff] }
 0x612   : > { %v4256_v29 = vsel %vm2945_vm1, %v14598_v54, %v14591_v40 }
 0x613   : > { %v8097_v53 = vpack.c.bf16 %v6115_v61, %v6114_v15  ;;  %v14599_v61 = vld [vmem:[#allocation42_spill] sm:$0xff]  ;;  %v6120_v48 = vmul.f32 %v14600_v12, %v4256_v29 }
 0x614   : > { %v4257_v15 = vsel %vm2945_vm1, %v14599_v61, %v14591_v40  ;;  %v14616_v61 = vld [vmem:[#allocation119_spill] sm:$0xff] }
 0x615   : > { %8301 = vst [vmem:[%s9366_s7 + $0x360] sm:$0xff] %v8097_v53  }
 0x616   : > { %5740 = vperm.xlu1 %8553, %v5723_v50   ;;  %5746 = vperm.xlu2 %8554, %v5723_v50  }
 0x618   : > { %v5635_v3 = vpop.permute.xlu1 %5634 }
 0x619   : > { %v6111_v8 = vmul.f32 %v5635_v3, %v4247_v20  ;;  %v14602_v20 = vld [vmem:[#allocation240_spill] sm:$0xff]  ;;  %v14603_v3 = vld [vmem:[#allocation134_spill] sm:$0xff] }
 0x61b   : > { %v8087_v41 = vpack.c.bf16 %v6111_v8, %v6110_v52  ;;  %v4259_v52 = vsel %vm2945_vm1, %v14603_v3, %v14594_v0 }
 0x61d   : > { %8299 = vst [vmem:[%s9366_s7 + $0x350] sm:$0xff] %v8087_v41  }
 0x61e   : > { %8555 = vset.pattern.permute.xlu1 %v8762_v4  ;;  %8556 = vset.pattern.permute.xlu2 %v8810_v17 }
 0x620   : > { %v5672_v25 = vpop.permute.xlu2 %5671 }
 0x621   : > { %v6117_v34 = vmul.f32 %v5672_v25, %v4253_v45 }
 0x626   : > { %5759 = vperm.xlu1 %8555, %v12734_v59   ;;  %5765 = vperm.xlu2 %8556, %v12734_v59  }
 0x628   : > { %v5647_v5 = vpop.permute.xlu1 %5646 }
 0x629   : > { %v6113_v26 = vmul.f32 %v5647_v5, %v4249_v13  ;;  %v14604_v13 = vld [vmem:[#allocation40_spill] sm:$0xff]  ;;  %v14605_v5 = vld [vmem:[#allocation203_spill] sm:$0xff] }
 0x62b   : > { %v8092_v14 = vpack.c.bf16 %v6113_v26, %v6112_v7  ;;  %v4263_v7 = vsel %vm2945_vm1, %v14605_v5, %v14604_v13  ;;  %v14622_v5 = vld [vmem:[#allocation94_spill] sm:$0xff] }
 0x62d   : > { %8300 = vst [vmem:[%s9366_s7 + $0x358] sm:$0xff] %v8092_v14   ;;  %v14606_v14 = vld [vmem:[#allocation202_spill] sm:$0xff] }
 0x62e   : > { %8557 = vset.pattern.permute.xlu1 %v8791_v10  ;;  %8558 = vset.pattern.permute.xlu2 %v8755_v2  ;;  %v4262_v25 = vsel %vm2945_vm1, %v14606_v14, %v14604_v13 }
 0x636   : > { %5771 = vperm.xlu1 %8557, %v12734_v59   ;;  %5778 = vperm.xlu2 %8558, %v14589_v35   ;;  %v5685_v59 = vpop.permute.xlu2 %5684 }
 0x637   : > { %v6119_v39 = vmul.f32 %v5685_v59, %v4255_v27 }
 0x638   : > { %v5666_v43 = vpop.permute.xlu1 %5665 }
 0x639   : > { %v6116_v16 = vmul.f32 %v5666_v43, %v4252_v22  ;;  %v14607_v22 = vld [vmem:[#allocation212_spill] sm:$0xff] }
 0x63b   : > { %v8102_v37 = vpack.c.bf16 %v6117_v34, %v6116_v16  ;;  %v4265_v34 = vsel %vm2945_vm1, %v14607_v22, %v14604_v13 }
 0x63d   : > { %8302 = vst [vmem:[%s9366_s7 + $0x368] sm:$0xff] %v8102_v37   ;;  %v14608_v37 = vld [vmem:[#allocation207_spill] sm:$0xff] }
 0x63e   : > { %8560 = vset.pattern.permute.xlu1 %v8810_v17  ;;  %8561 = vset.pattern.permute.xlu2 %v8791_v10  ;;  %v4264_v59 = vsel %vm2945_vm1, %v14608_v37, %v14604_v13 }
 0x640   : > { %v5704_v62 = vpop.permute.xlu2 %5703 }
 0x641   : > { %v6122_v41 = vmul.f32 %v5704_v62, %v4258_v9 }
 0x646   : > { %5790 = vperm.xlu1 %8560, %v14589_v35   ;;  %5796 = vperm.xlu2 %8561, %v14589_v35  }
 0x648   : > { %v5679_v50 = vpop.permute.xlu1 %5678 }
 0x649   : > { %v6118_v47 = vmul.f32 %v5679_v50, %v4254_v1  ;;  %v4271_v1 = vsel %vm2945_vm1, %v14610_v23, %v14609_v33  ;;  %v14611_v50 = vld [vmem:[#allocation237_spill] sm:$0xff] }
 0x64b   : > { %v8107_v30 = vpack.c.bf16 %v6119_v39, %v6118_v47  ;;  %v4270_v39 = vsel %vm2945_vm1, %v14611_v50, %v14609_v33 }
 0x64d   : > { %8303 = vst [vmem:[%s9366_s7 + $0x370] sm:$0xff] %v8107_v30   ;;  %v14612_v30 = vld [vmem:[#allocation219_spill] sm:$0xff] }
 0x64e   : > { %8562 = vset.pattern.permute.xlu1 %v8755_v2  ;;  %8563 = vset.pattern.permute.xlu2 %v8762_v4  ;;  %v6135_v0 = vmul.f32 %v14612_v30, %v4271_v1 }
 0x650   : > { %v5716_v21 = vpop.permute.xlu2 %5715 }
 0x651   : > { %v6124_v60 = vmul.f32 %v5716_v21, %v4260_v28  ;;  %v14614_v28 = vld [vmem:[#allocation171_spill] sm:$0xff] }
 0x652   : > { %v4266_v21 = vsel %vm2945_vm1, %v14614_v28, %v14613_v24  ;;  %v14630_v28 = vld [vmem:[#allocation228_spill] sm:$0xff] }
 0x653   : > { %v8122_v49 = vpack.c.bf16 %v6125_v63, %v6124_v60  ;;  %v14615_v63 = vld [vmem:[#allocation37_spill] sm:$0xff] }
 0x654   : > { %v4267_v60 = vsel %vm2945_vm1, %v14615_v63, %v14613_v24  ;;  %v14631_v63 = vld [vmem:[#allocation234_spill] sm:$0xff] }
 0x655   : > { %8306 = vst [vmem:[%s9366_s7 + $0x388] sm:$0xff] %v8122_v49  }
 0x656   : > { %5803 = vperm.xlu1 %8562, %v14597_v51   ;;  %5809 = vperm.xlu2 %8563, %v14597_v51  }
 0x658   : > { %v5697_v53 = vpop.permute.xlu1 %5696 }
 0x659   : > { %v6121_v55 = vmul.f32 %v5697_v53, %v4257_v15  ;;  %v4268_v15 = vsel %vm2945_vm1, %v14616_v61, %v14613_v24  ;;  %v14617_v53 = vld [vmem:[#allocation82_spill] sm:$0xff]  ;;  %v14632_v61 = vld [vmem:[#allocation227_spill] sm:$0xff] }
 0x65a   : > { %v4269_v12 = vsel %vm2945_vm1, %v14617_v53, %v14613_v24  ;;  %v14633_v53 = vld [vmem:[#allocation81_spill] sm:$0xff] }
 0x65b   : > { %v8112_v6 = vpack.c.bf16 %v6121_v55, %v6120_v48 }
 0x65d   : > { %8304 = vst [vmem:[%s9366_s7 + $0x378] sm:$0xff] %v8112_v6  }
 0x65e   : > { %8565 = vset.pattern.permute.xlu1 %v8791_v10  ;;  %8566 = vset.pattern.permute.xlu2 %v8755_v2 }
 0x660   : > { %v5735_v46 = vpop.permute.xlu2 %5734 }
 0x661   : > { %v6127_v42 = vmul.f32 %v5735_v46, %v4263_v7  ;;  %v14621_v46 = vld [vmem:[#allocation148_spill] sm:$0xff] }
 0x666   : > { %5821 = vperm.xlu1 %8565, %v14597_v51   ;;  %5828 = vperm.xlu2 %8566, %v14602_v20   ;;  %v6130_v51 = vmul.f32 %v5754_v56, %v4266_v21  ;;  %v4283_v21 = vsel %vm2945_vm1, %v14630_v28, %v12903_v31 }
 0x668   : > { %v5710_v8 = vpop.permute.xlu1 %5709 }
 0x669   : > { %v6123_v44 = vmul.f32 %v5710_v8, %v4259_v52 }
 0x66b   : > { %v8117_v58 = vpack.c.bf16 %v6123_v44, %v6122_v41 }
 0x66d   : > { %8305 = vst [vmem:[%s9366_s7 + $0x380] sm:$0xff] %v8117_v58  }
 0x66e   : > { %8567 = vset.pattern.permute.xlu1 %v8762_v4  ;;  %8568 = vset.pattern.permute.xlu2 %v8810_v17 }
 0x670   : > { %v5747_v43 = vpop.permute.xlu2 %5746 }
 0x671   : > { %v6129_v40 = vmul.f32 %v5747_v43, %v4265_v34 }
 0x676   : > { %5834 = vperm.xlu1 %8567, %v14602_v20   ;;  %5840 = vperm.xlu2 %8568, %v14602_v20   ;;  %v14619_v20 = vld [vmem:[#allocation127_spill] sm:$0xff] }
 0x677   : > { %v4272_v3 = vsel %vm2945_vm1, %v14619_v20, %v14609_v33  ;;  %v5879_v20 = vpop.permute.xlu0 %5878 }
 0x678   : > { %v5729_v26 = vpop.permute.xlu1 %5728 }
 0x679   : > { %v6126_v45 = vmul.f32 %v5729_v26, %v4262_v25 }
 0x67b   : > { %v8127_v35 = vpack.c.bf16 %v6127_v42, %v6126_v45  ;;  %v14623_v45 = vld [vmem:[#allocation45_spill] sm:$0xff] }
 0x67d   : > { %8307 = vst [vmem:[%s9366_s7 + $0x390] sm:$0xff] %v8127_v35   ;;  %v4281_v35 = vsel %vm2945_vm1, %v14623_v45, %v12816_v19 }
 0x67e   : > { %8570 = vset.pattern.permute.xlu1 %v8755_v2  ;;  %8571 = vset.pattern.permute.xlu2 %v8762_v4 }
 0x680   : > { %v5766_v2 = vpop.permute.xlu2 %5765 }
 0x681   : > { %v6132_v55 = vmul.f32 %v5766_v2, %v4268_v15  ;;  %v14626_v2 = vld [vmem:[#allocation109_spill] sm:$0xff]  ;;  %v4285_v15 = vsel %vm2945_vm1, %v14632_v61, %v12903_v31 }
 0x686   : > { %5853 = vperm.xlu1 %8570, %v5848_v36   ;;  %5859 = vperm.xlu2 %8571, %v5848_v36  }
 0x688   : > { %v5741_v16 = vpop.permute.xlu1 %5740 }
 0x689   : > { %v6128_v11 = vmul.f32 %v5741_v16, %v4264_v59  ;;  %v6145_v16 = vmul.f32 %v12768_v57, %v4281_v35  ;;  %v14625_v59 = vld [vmem:[#allocation157_spill] sm:$0xff]  ;;  %v14628_v57 = vld [vmem:[#allocation254_spill] sm:$0xff] }
 0x68b   : > { %v8132_v27 = vpack.c.bf16 %v6129_v40, %v6128_v11 }
 0x68d   : > { %8308 = vst [vmem:[%s9366_s7 + $0x398] sm:$0xff] %v8132_v27  }
 0x68e   : > { %8572 = vset.pattern.permute.xlu1 %v8810_v17  ;;  %8573 = vset.pattern.permute.xlu2 %v8791_v10 }
 0x690   : > { %v5779_v47 = vpop.permute.xlu2 %5778 }
 0x691   : > { %v6134_v62 = vmul.f32 %v5779_v47, %v4270_v39  ;;  %v4278_v39 = vsel %vm2945_vm1, %v14628_v57, %v12816_v19  ;;  %v14629_v47 = vld [vmem:[#allocation50_spill] sm:$0xff] }
 0x693   : > { %v8147_v38 = vpack.c.bf16 %v6135_v0, %v6134_v62  ;;  %v4279_v62 = vsel %vm2945_vm1, %v14629_v47, %v12816_v19 }
 0x695   : > { %8311 = vst [vmem:[%s9366_s7 + $0x3b0] sm:$0xff] %v8147_v38  }
 0x696   : > { %5865 = vperm.xlu1 %8572, %v5848_v36   ;;  %5871 = vperm.xlu2 %8573, %v5848_v36   ;;  %v14624_v36 = vld [vmem:[#allocation118_spill] sm:$0xff] }
 0x697   : > { %v4280_v22 = vsel %vm2945_vm1, %v14624_v36, %v12816_v19 }
 0x698   : > { %v5760_v49 = vpop.permute.xlu1 %5759 }
 0x699   : > { %v6131_v54 = vmul.f32 %v5760_v49, %v4267_v60  ;;  %v4282_v60 = vsel %vm2945_vm1, %v14631_v63, %v12903_v31 }
 0x69b   : > { %v8137_v29 = vpack.c.bf16 %v6131_v54, %v6130_v51 }
 0x69d   : > { %8309 = vst [vmem:[%s9366_s7 + $0x3a0] sm:$0xff] %v8137_v29  }
 0x69e   : > { %8574 = vset.pattern.permute.xlu1 %v8762_v4  ;;  %8575 = vset.pattern.permute.xlu2 %v8810_v17  ;;  %v14618_v17 = vld [vmem:[#allocation213_spill] sm:$0xff] }
 0x69f   : > { %v4273_v9 = vsel %vm2945_vm1, %v14618_v17, %v14609_v33  ;;  %v14627_v33 = vld [vmem:[#allocation143_spill] sm:$0xff] }
 0x6a0   : > { %v5797_v4 = vpop.permute.xlu2 %5796  ;;  %v14635_v17 = vld [vmem:[#allocation51_spill] sm:$0xff] }
 0x6a1   : > { %v6137_v8 = vmul.f32 %v5797_v4, %v4273_v9  ;;  %v14634_v4 = vld [vmem:[#allocation245_spill] sm:$0xff] }
 0x6a2   : > { %v4286_v9 = vsel %vm2945_vm1, %v14635_v17, %v14634_v4 }
 0x6a6   : > { %5884 = vperm.xlu1 %8574, %v13103_v18   ;;  %5890 = vperm.xlu2 %8575, %v13103_v18  }
 0x6a8   : > { %v5772_v48 = vpop.permute.xlu1 %5771 }
 0x6a9   : > { %v6133_v6 = vmul.f32 %v5772_v48, %v4269_v12  ;;  %v4284_v12 = vsel %vm2945_vm1, %v14633_v53, %v12903_v31 }
 0x6ab   : > { %v8142_v32 = vpack.c.bf16 %v6133_v6, %v6132_v55 }
 0x6ad   : > { %8310 = vst [vmem:[%s9366_s7 + $0x3a8] sm:$0xff] %v8142_v32  }
 0x6ae   : > { %8576 = vset.pattern.permute.xlu1 %v8791_v10  ;;  %v14620_v10 = vld [vmem:[#allocation172_spill] sm:$0xff] }
 0x6af   : > { %v4274_v7 = vsel %vm2945_vm1, %v14622_v5, %v14620_v10  ;;  %v4276_v40 = vsel %vm2945_vm1, %v14625_v59, %v14620_v10  ;;  %v4277_v27 = vsel %vm2945_vm1, %v14626_v2, %v14620_v10 }
 0x6b0   : > { %v5810_v58 = vpop.permute.xlu2 %5809  ;;  %v6140_v23 = vmul.f32 %v14627_v33, %v4276_v40 }
 0x6b6   : > { %5896 = vperm.xlu1 %8576, %v13103_v18   ;;  %v4275_v18 = vsel %vm2945_vm1, %v14621_v46, %v14620_v10  ;;  %v14637_v10 = vld [vmem:[#allocation137_spill] sm:$0xff] }
 0x6b7   : > { %v6139_v26 = vmul.f32 %v5810_v58, %v4275_v18  ;;  %v4288_v46 = vsel %vm2945_vm1, %v14637_v10, %v14634_v4 }
 0x6b8   : > { %v5791_v52 = vpop.permute.xlu1 %5790 }
 0x6b9   : > { %v6136_v41 = vmul.f32 %v5791_v52, %v4272_v3  ;;  %v14636_v52 = vld [vmem:[#allocation216_spill] sm:$0xff] }
 0x6bb   : > { %v8152_v44 = vpack.c.bf16 %v6137_v8, %v6136_v41  ;;  %v4287_v8 = vsel %vm2945_vm1, %v14636_v52, %v14634_v4  ;;  %v6150_v41 = vmul.f32 %v5879_v20, %v4286_v9 }
 0x6bd   : > { %8312 = vst [vmem:[%s9366_s7 + $0x3b8] sm:$0xff] %v8152_v44  }
 0x6c0   : > { %v5829_v25 = vpop.permute.xlu2 %5828 }
 0x6c1   : > { %v6142_v0 = vmul.f32 %v5829_v25, %v4278_v39 }
 0x6c8   : > { %v5804_v13 = vpop.permute.xlu1 %5803 }
 0x6c9   : > { %v6138_v14 = vmul.f32 %v5804_v13, %v4274_v7  ;;  %v14638_v13 = vld [vmem:[#allocation48_spill] sm:$0xff] }
 0x6ca   : > { %v4289_v5 = vsel %vm2945_vm1, %v14638_v13, %v14634_v4 }
 0x6cb   : > { %v8157_v42 = vpack.c.bf16 %v6139_v26, %v6138_v14 }
 0x6cd   : > { %8313 = vst [vmem:[%s9366_s7 + $0x3c0] sm:$0xff] %v8157_v42  }
 0x6d0   : > { %v5841_v43 = vpop.permute.xlu2 %5840 }
 0x6d1   : > { %v6144_v34 = vmul.f32 %v5841_v43, %v4280_v22 }
 0x6d3   : > { %v8172_v37 = vpack.c.bf16 %v6145_v16, %v6144_v34 }
 0x6d5   : > { %8316 = vst [vmem:[%s9366_s7 + $0x3d8] sm:$0xff] %v8172_v37  }
 0x6d8   : > { %v5822_v11 = vpop.permute.xlu1 %5821 }
 0x6d9   : > { %v6141_v1 = vmul.f32 %v5822_v11, %v4277_v27 }
 0x6db   : > { %v8162_v50 = vpack.c.bf16 %v6141_v1, %v6140_v23 }
 0x6dd   : > { %8314 = vst [vmem:[%s9366_s7 + $0x3c8] sm:$0xff] %v8162_v50  }
 0x6e0   : > { %v5860_v24 = vpop.permute.xlu2 %5859 }
 0x6e1   : > { %v6147_v51 = vmul.f32 %v5860_v24, %v4283_v21 }
 0x6e8   : > { %v5835_v30 = vpop.permute.xlu1 %5834 }
 0x6e9   : > { %v6143_v38 = vmul.f32 %v5835_v30, %v4279_v62 }
 0x6eb   : > { %v8167_v56 = vpack.c.bf16 %v6143_v38, %v6142_v0 }
 0x6ed   : > { %8315 = vst [vmem:[%s9366_s7 + $0x3d0] sm:$0xff] %v8167_v56  }
 0x6f0   : > { %v5872_v19 = vpop.permute.xlu2 %5871 }
 0x6f1   : > { %v6149_v55 = vmul.f32 %v5872_v19, %v4285_v15 }
 0x6f8   : > { %v5854_v49 = vpop.permute.xlu1 %5853 }
 0x6f9   : > { %v6146_v54 = vmul.f32 %v5854_v49, %v4282_v60 }
 0x6fb   : > { %v8177_v29 = vpack.c.bf16 %v6147_v51, %v6146_v54 }
 0x6fd   : > { %8317 = vst [vmem:[%s9366_s7 + $0x3e0] sm:$0xff] %v8177_v29  }
 0x700   : > { %v5891_v58 = vpop.permute.xlu2 %5890 }
 0x701   : > { %v6152_v7 = vmul.f32 %v5891_v58, %v4288_v46 }
 0x708   : > { %v5866_v48 = vpop.permute.xlu1 %5865 }
 0x709   : > { %v6148_v6 = vmul.f32 %v5866_v48, %v4284_v12 }
 0x70b   : > { %v8182_v32 = vpack.c.bf16 %v6149_v55, %v6148_v6 }
 0x70d   : > { %8318 = vst [vmem:[%s9366_s7 + $0x3e8] sm:$0xff] %v8182_v32  }
 0x718   : > { %v5885_v3 = vpop.permute.xlu1 %5884 }
 0x719   : > { %v6151_v44 = vmul.f32 %v5885_v3, %v4287_v8 }
 0x71b   : > { %v8187_v31 = vpack.c.bf16 %v6151_v44, %v6150_v41 }
 0x71d   : > { %8319 = vst [vmem:[%s9366_s7 + $0x3f0] sm:$0xff] %v8187_v31  }
 0x728   : > { %v5897_v18 = vpop.permute.xlu1 %5896 }
 0x729   : > { %v6153_v26 = vmul.f32 %v5897_v18, %v4289_v5 }
 0x72b   : > { %v8192_v14 = vpack.c.bf16 %v6153_v26, %v6152_v7 }
 0x72d   : > { %8320 = vst [vmem:[%s9366_s7 + $0x3f8] sm:$0xff] %v8192_v14  }
 0x72e   : > { %8638 = shalt.err (!%p8635_p4)
}
 0x72f   : > { %s8676_s5 = smov 4  }
 0x730   : > { %8327 = dma.vmem_to_hbm [thread:$0]  (%p8740_p5), %s6681_s11, 16384, %s6683_s12, %s6667_s19, %s8675_s30, %s8675_s30, %s8676_s5  }
 0x731 PF: > { %p8333_p7 = scmp.ge.s32.totalorder %s8673_s18, 2  ;;  %s6697_s7 = sand.u32 1, %s8661_s15  }
 0x732   : > { %s6698_s29 = scalar_lea.sflag [#allocation3], %s6697_s7 }
 0x733   : > { %p8330_p8 = pnand %p8333_p7, %p8744_p6 }
 0x735   : > { %p8331_p9 = pneg %p8330_p8 }
 0x737   : > { %8656 = dma.done.wait (%p8331_p9), %s6698_s29, 16384  }
 0x738   : > { %8658 = vsyncadd (%p8331_p9), %s6698_s29, 4294950912  ;;  %p14_p10 = scmp.ge.s32.totalorder %s8727_s21, 10   ;;  %s14639_s15 = smov %s8665_s16 }
 0x739   : > { %s14640_s16 = smov %s8669_s17  ;;  %s14641_s17 = smov %s8738_s24 }
 0x73a   : > { %s14642_s18 = smov %s8727_s21  ;;  %16 = sbr.rel (!%p14_p10) target bundleno = 3 (0x3), region = 74 }
 0x73f   :  { %6704 = vsyncpa [#allocation3], 1 }
 0x740   :  { %6706 = vsyncpa [#allocation3 + $0x1], 1 }

</bundles_post_ra>
